<compile_context>
chip_gen: v5e
topology: v5e:2x2
jax: 0.10.0
libtpu: 0.0.40
codegen_flags: <defaults>
</compile_context>

<pallas_src>
import jax
import jax.numpy as jnp
from jax import lax
from jax.experimental import pallas as pl
from jax.experimental.pallas import tpu as pltpu


_VMEM = pl.BlockSpec(memory_space=pltpu.MemorySpace.VMEM)


# ----------------------------------------------------------------------------
# Fused kernel factory (num_layers / shapes are static at trace time)
# ----------------------------------------------------------------------------
def _make_fused_kernel(num_layers, T, B, E, Hp, K):
    G = 4 * Hp

    def kernel(*refs):
        pos = 0
        len_ref = refs[pos]; pos += 1            # (B, 1) int32
        x_ref = refs[pos]; pos += 1              # (T, B, E) bf16
        layer_refs = []
        for _ in range(num_layers):              # 10 weight refs per layer
            layer_refs.append(refs[pos:pos + 10]); pos += 10
        wtag_f_ref, wtag_b_ref, btag_ref = refs[pos:pos + 3]; pos += 3
        out_ref = refs[pos]; pos += 1            # (T*B, K) f32
        af0, af1, ab0, ab1, xw_f_ref, xw_b_ref = refs[pos:pos + 6]
        acts_f = (af0, af1)                      # ping-pong layer activations
        acts_b = (ab0, ab1)

        len_vec = len_ref[...]                   # (B, 1) int32, hoisted

        def project(parts, wih_ref, b_ref):
            # Hoisted x-projection over ALL timesteps: one large MXU matmul per
            # input part (bf16 operands, f32 accumulation); bias folded once so
            # the time loop has no per-step bias broadcast.
            wih = wih_ref[...]                   # (sum_d, 4*Hp) bf16
            acc = None
            r = 0
            for p in parts:
                d = p.shape[1]
                term = jnp.dot(p.astype(jnp.bfloat16), wih[r:r + d, :],
                               preferred_element_type=jnp.float32)
                acc = term if acc is None else acc + term
                r += d
            return acc + b_ref[...]              # (T*B, 4*Hp) f32

        def cell(gates, h, c, m):
            # PyTorch gate order (i, f, g, o); all elementwise math in f32.
            i = jax.nn.sigmoid(gates[:, 0 * Hp:1 * Hp])
            f = jax.nn.sigmoid(gates[:, 1 * Hp:2 * Hp])
            g = jnp.tanh(gates[:, 2 * Hp:3 * Hp])
            o = jax.nn.sigmoid(gates[:, 3 * Hp:4 * Hp])
            c_new = f * c + i * g
            h_new = o * jnp.tanh(c_new)
            # pack_padded_sequence semantics: frozen state + zero output past
            # each sequence length (select, not float blend -> NaN-safe).
            return (jnp.where(m, h_new, h),
                    jnp.where(m, c_new, c),
                    jnp.where(m, h_new, 0.0))

        parts = [x_ref[...].reshape(T * B, E)]   # current layer input (flat rows)
        for l in range(num_layers):
            (wihf, whhf, bf, h0f, c0f,
             wihb, whhb, bb, h0b, c0b) = layer_refs[l]
            of_ref = acts_f[l % 2]
            ob_ref = acts_b[l % 2]

            xw_f_ref[...] = project(parts, wihf, bf).reshape(T, B, G)
            xw_b_ref[...] = project(parts, wihb, bb).reshape(T, B, G)

            whh_f = whhf[...]                    # (Hp, 4*Hp) bf16, hoisted
            whh_b = whhb[...]

            def step(t, carry):
                h_f, c_f, h_b, c_b = carry
                tb = T - 1 - t                   # in-kernel time reversal
                m_f = t < len_vec                # (B, 1) bool
                m_b = tb < len_vec

                g_f = xw_f_ref[t] + jnp.dot(h_f.astype(jnp.bfloat16), whh_f,
                                            preferred_element_type=jnp.float32)
                g_b = xw_b_ref[tb] + jnp.dot(h_b.astype(jnp.bfloat16), whh_b,
                                             preferred_element_type=jnp.float32)

                h_f, c_f, y_f = cell(g_f, h_f, c_f, m_f)
                h_b, c_b, y_b = cell(g_b, h_b, c_b, m_b)
                of_ref[t] = y_f
                ob_ref[tb] = y_b
                return h_f, c_f, h_b, c_b

            lax.fori_loop(0, T, step,
                          (h0f[...], c0f[...], h0b[...], c0b[...]),
                          unroll=True)

            parts = [of_ref[...].reshape(T * B, Hp),
                     ob_ref[...].reshape(T * B, Hp)]

        # hidden_to_tag + log_softmax, fused.  Rows are (t, b)-ordered; the
        # row-wise softmax is order-invariant, so the concat of the two
        # directions is replaced by two dots against the split tag weights.
        feat_f, feat_b = parts
        logits = (jnp.dot(feat_f.astype(jnp.bfloat16), wtag_f_ref[...],
                          preferred_element_type=jnp.float32)
                  + jnp.dot(feat_b.astype(jnp.bfloat16), wtag_b_ref[...],
                            preferred_element_type=jnp.float32)
                  + btag_ref[...])
        mx = jnp.max(logits, axis=-1, keepdims=True)
        z = logits - mx
        lse = jnp.log(jnp.sum(jnp.exp(z), axis=-1, keepdims=True))
        out_ref[...] = (z - lse).astype(out_ref.dtype)

    return kernel


def _cost_estimate(num_layers, T, B, E, Hp, K):
    G = 4 * Hp
    flops = 0
    transcendentals = 0
    bytes_accessed = T * B * E * 2 + B * 4 + T * B * K * 4
    in_dim = E
    for _ in range(num_layers):
        flops += 2 * (2 * T * B * in_dim * G          # hoisted x @ W_ih
                      + 2 * T * B * Hp * G            # recurrent h @ W_hh
                      + 12 * T * B * Hp)              # gate elementwise
        transcendentals += 2 * T * B * 5 * Hp         # 3 sigmoid + 2 tanh / dir
        bytes_accessed += 2 * (in_dim * G * 2 + Hp * G * 2
                               + G * 4 + 2 * B * Hp * 4)
        in_dim = 2 * Hp
    flops += 2 * T * B * 2 * Hp * K + 5 * T * B * K   # tag head + log_softmax
    transcendentals += T * B * (K + 1)
    bytes_accessed += 2 * Hp * K * 2 + K * 4
    return pl.CostEstimate(flops=flops, transcendentals=transcendentals,
                           bytes_accessed=bytes_accessed)


# ----------------------------------------------------------------------------
# Wrapper (the whole forward is one pallas_call)
# ----------------------------------------------------------------------------
def bilstm_alt_forward(params, X, X_lengths):
    """X: (B, T, E) batch_first (like the PyTorch module); lengths: (B,)."""
    B, T, E = X.shape
    L = params['num_layers']
    K = params['tagset_size']
    Hp = params['layers'][0]['h0_f'].shape[1]

    x = jnp.transpose(X, (1, 0, 2)).astype(jnp.bfloat16)        # (T, B, E)
    len2d = X_lengths.astype(jnp.int32).reshape(B, 1)

    args = [len2d, x]
    for l in range(L):
        p = params['layers'][l]
        args += [p['wih_f'].astype(jnp.bfloat16),
                 p['whh_f'].astype(jnp.bfloat16),
                 p['b_f'], p['h0_f'], p['c0_f'],
                 p['wih_b'].astype(jnp.bfloat16),
                 p['whh_b'].astype(jnp.bfloat16),
                 p['b_b'], p['h0_b'], p['c0_b']]
    w_tag = params['w_tag']
    args += [w_tag[:Hp].astype(jnp.bfloat16),       # acts on forward half
             w_tag[Hp:].astype(jnp.bfloat16),       # acts on backward half
             params['b_tag']]

    kernel = _make_fused_kernel(L, T, B, E, Hp, K)
    logp = pl.pallas_call(
        kernel,
        out_shape=jax.ShapeDtypeStruct((T * B, K), jnp.float32),
        in_specs=[_VMEM] * len(args),
        out_specs=_VMEM,
        scratch_shapes=[pltpu.VMEM((T, B, Hp), jnp.float32),      # act fwd, slot 0
                        pltpu.VMEM((T, B, Hp), jnp.float32),      # act fwd, slot 1
                        pltpu.VMEM((T, B, Hp), jnp.float32),      # act bwd, slot 0
                        pltpu.VMEM((T, B, Hp), jnp.float32),      # act bwd, slot 1
                        pltpu.VMEM((T, B, 4 * Hp), jnp.float32),  # hoisted xW fwd
                        pltpu.VMEM((T, B, 4 * Hp), jnp.float32)], # hoisted xW bwd
        compiler_params=pltpu.CompilerParams(vmem_limit_bytes=32 * 1024 * 1024),
        cost_estimate=_cost_estimate(L, T, B, E, Hp, K),
    )(*args)

    # Kernel rows are (t, b)-ordered; only this final reorder of the small
    # (T*B, K) output is needed to match X.view(B, T, tagset_size).
    return jnp.transpose(logp.reshape(T, B, K), (1, 0, 2))


# ----------------------------------------------------------------------------
# Deterministic parameter init (shapes follow nn.LSTM / nn.Linear in __init__)
# ----------------------------------------------------------------------------
def init_params(key, embedding_dim, hidden_dim, num_layers, tagset_size, batch):
    Hp = hidden_dim // 2

    def w(k, shape):
        return jax.random.normal(k, shape, jnp.float32) * 0.1

    layers = []
    for l in range(num_layers):
        in_dim = embedding_dim if l == 0 else hidden_dim
        ks = jax.random.split(jax.random.fold_in(key, l), 10)
        layers.append(dict(
            wih_f=w(ks[0], (in_dim, 4 * Hp)), whh_f=w(ks[1], (Hp, 4 * Hp)),
            b_f=w(ks[2], (1, 4 * Hp)),
            h0_f=w(ks[3], (batch, Hp)), c0_f=w(ks[4], (batch, Hp)),
            wih_b=w(ks[5], (in_dim, 4 * Hp)), whh_b=w(ks[6], (Hp, 4 * Hp)),
            b_b=w(ks[7], (1, 4 * Hp)),
            h0_b=w(ks[8], (batch, Hp)), c0_b=w(ks[9], (batch, Hp)),
        ))
    kw, kb = jax.random.split(jax.random.fold_in(key, 12345))
    return dict(
        num_layers=num_layers,
        tagset_size=tagset_size,
        layers=layers,
        w_tag=w(kw, (hidden_dim, tagset_size)),
        b_tag=w(kb, (1, tagset_size)),
    )


# ----------------------------------------------------------------------------
if __name__ == "__main__":
    key = jax.random.PRNGKey(0)
    B, T, E = 4, 8, 16               # batch, seq_len, embedding_dim
    hidden_dim, num_layers = 32, 2   # hp_dict['hidden_dim'], hp_dict['num_layers']
    tagset_size = 5                  # len(tag_to_ix)

    kx, kp = jax.random.split(key)
    X = jax.random.normal(kx, (B, T, E), jnp.float32)
    # pack_padded_sequence requires sorted-descending lengths by default
    X_lengths = jnp.array([8, 6, 5, 3], dtype=jnp.int32)

    params = init_params(kp, E, hidden_dim, num_layers, tagset_size, B)

    y_hat = bilstm_alt_forward(params, X, X_lengths)
    jax.block_until_ready(y_hat)
    assert y_hat.shape == (B, T, tagset_size)
    assert bool(jnp.all(jnp.isfinite(y_hat)))
    print("KERNEL_OK")
</pallas_src>

<mosaic_0001>
module attributes {stable_mosaic.version = 11 : i64} {
  func.func @kernel(%arg0: memref<4x1xi32, #tpu.memory_space<vmem>>, %arg1: memref<8x4x16xbf16, #tpu.memory_space<vmem>>, %arg2: memref<16x64xbf16, #tpu.memory_space<vmem>>, %arg3: memref<16x64xbf16, #tpu.memory_space<vmem>>, %arg4: memref<1x64xf32, #tpu.memory_space<vmem>>, %arg5: memref<4x16xf32, #tpu.memory_space<vmem>>, %arg6: memref<4x16xf32, #tpu.memory_space<vmem>>, %arg7: memref<16x64xbf16, #tpu.memory_space<vmem>>, %arg8: memref<16x64xbf16, #tpu.memory_space<vmem>>, %arg9: memref<1x64xf32, #tpu.memory_space<vmem>>, %arg10: memref<4x16xf32, #tpu.memory_space<vmem>>, %arg11: memref<4x16xf32, #tpu.memory_space<vmem>>, %arg12: memref<32x64xbf16, #tpu.memory_space<vmem>>, %arg13: memref<16x64xbf16, #tpu.memory_space<vmem>>, %arg14: memref<1x64xf32, #tpu.memory_space<vmem>>, %arg15: memref<4x16xf32, #tpu.memory_space<vmem>>, %arg16: memref<4x16xf32, #tpu.memory_space<vmem>>, %arg17: memref<32x64xbf16, #tpu.memory_space<vmem>>, %arg18: memref<16x64xbf16, #tpu.memory_space<vmem>>, %arg19: memref<1x64xf32, #tpu.memory_space<vmem>>, %arg20: memref<4x16xf32, #tpu.memory_space<vmem>>, %arg21: memref<4x16xf32, #tpu.memory_space<vmem>>, %arg22: memref<16x5xbf16, #tpu.memory_space<vmem>>, %arg23: memref<16x5xbf16, #tpu.memory_space<vmem>>, %arg24: memref<1x5xf32, #tpu.memory_space<vmem>>, %arg25: memref<32x5xf32, #tpu.memory_space<vmem>>, %arg26: memref<8x4x16xf32, #tpu.memory_space<vmem>>, %arg27: memref<8x4x16xf32, #tpu.memory_space<vmem>>, %arg28: memref<8x4x16xf32, #tpu.memory_space<vmem>>, %arg29: memref<8x4x16xf32, #tpu.memory_space<vmem>>, %arg30: memref<8x4x64xf32, #tpu.memory_space<vmem>>, %arg31: memref<8x4x64xf32, #tpu.memory_space<vmem>>) attributes {dimension_semantics = [], scalar_prefetch = 0 : i64, scratch_operands = 6 : i64, tpu.core_type = #tpu.core_type<tc>} {
    %c0 = arith.constant 0 : index
    %c0_0 = arith.constant 0 : index
    %0 = vector.load %arg0[%c0, %c0_0] : memref<4x1xi32, #tpu.memory_space<vmem>>, vector<4x1xi32>
    %c0_1 = arith.constant 0 : index
    %c0_2 = arith.constant 0 : index
    %c0_3 = arith.constant 0 : index
    %1 = vector.load %arg1[%c0_1, %c0_2, %c0_3] : memref<8x4x16xbf16, #tpu.memory_space<vmem>>, vector<8x4x16xbf16>
    %2 = vector.shape_cast %1 : vector<8x4x16xbf16> to vector<32x16xbf16>
    %c0_4 = arith.constant 0 : index
    %c0_5 = arith.constant 0 : index
    %3 = vector.load %arg2[%c0_4, %c0_5] : memref<16x64xbf16, #tpu.memory_space<vmem>>, vector<16x64xbf16>
    %cst = arith.constant dense<0.000000e+00> : vector<32x64xf32>
    %4 = tpu.matmul %2, %3, %cst {dimension_numbers = #tpu.dot_dimension_numbers<[1], [0], [0], [1], [0, 0, 1, 1], [], []>} : vector<32x16xbf16>, vector<16x64xbf16>, vector<32x64xf32> -> vector<32x64xf32>
    %c0_6 = arith.constant 0 : index
    %c0_7 = arith.constant 0 : index
    %5 = vector.load %arg4[%c0_6, %c0_7] : memref<1x64xf32, #tpu.memory_space<vmem>>, vector<1x64xf32>
    %6 = vector.broadcast %5 : vector<1x64xf32> to vector<32x64xf32>
    %7 = arith.addf %4, %6 : vector<32x64xf32>
    %8 = vector.shape_cast %7 : vector<32x64xf32> to vector<8x4x64xf32>
    %c0_8 = arith.constant 0 : index
    %c0_9 = arith.constant 0 : index
    %c0_10 = arith.constant 0 : index
    %9 = vector.load %arg30[%c0_8, %c0_9, %c0_10] : memref<8x4x64xf32, #tpu.memory_space<vmem>>, vector<8x4x64xf32>
    tpu.vector_store %arg30[%c0_8, %c0_9, %c0_10], %8 {strides = array<i32>} : memref<8x4x64xf32, #tpu.memory_space<vmem>>, vector<8x4x64xf32>,
    %c0_11 = arith.constant 0 : index
    %c0_12 = arith.constant 0 : index
    %10 = vector.load %arg7[%c0_11, %c0_12] : memref<16x64xbf16, #tpu.memory_space<vmem>>, vector<16x64xbf16>
    %cst_13 = arith.constant dense<0.000000e+00> : vector<32x64xf32>
    %11 = tpu.matmul %2, %10, %cst_13 {dimension_numbers = #tpu.dot_dimension_numbers<[1], [0], [0], [1], [0, 0, 1, 1], [], []>} : vector<32x16xbf16>, vector<16x64xbf16>, vector<32x64xf32> -> vector<32x64xf32>
    %c0_14 = arith.constant 0 : index
    %c0_15 = arith.constant 0 : index
    %12 = vector.load %arg9[%c0_14, %c0_15] : memref<1x64xf32, #tpu.memory_space<vmem>>, vector<1x64xf32>
    %13 = vector.broadcast %12 : vector<1x64xf32> to vector<32x64xf32>
    %14 = arith.addf %11, %13 : vector<32x64xf32>
    %15 = vector.shape_cast %14 : vector<32x64xf32> to vector<8x4x64xf32>
    %c0_16 = arith.constant 0 : index
    %c0_17 = arith.constant 0 : index
    %c0_18 = arith.constant 0 : index
    %16 = vector.load %arg31[%c0_16, %c0_17, %c0_18] : memref<8x4x64xf32, #tpu.memory_space<vmem>>, vector<8x4x64xf32>
    tpu.vector_store %arg31[%c0_16, %c0_17, %c0_18], %15 {strides = array<i32>} : memref<8x4x64xf32, #tpu.memory_space<vmem>>, vector<8x4x64xf32>,
    %c0_19 = arith.constant 0 : index
    %c0_20 = arith.constant 0 : index
    %17 = vector.load %arg3[%c0_19, %c0_20] : memref<16x64xbf16, #tpu.memory_space<vmem>>, vector<16x64xbf16>
    %c0_21 = arith.constant 0 : index
    %c0_22 = arith.constant 0 : index
    %18 = vector.load %arg8[%c0_21, %c0_22] : memref<16x64xbf16, #tpu.memory_space<vmem>>, vector<16x64xbf16>
    %c0_23 = arith.constant 0 : index
    %c0_24 = arith.constant 0 : index
    %19 = vector.load %arg5[%c0_23, %c0_24] : memref<4x16xf32, #tpu.memory_space<vmem>>, vector<4x16xf32>
    %c0_25 = arith.constant 0 : index
    %c0_26 = arith.constant 0 : index
    %20 = vector.load %arg6[%c0_25, %c0_26] : memref<4x16xf32, #tpu.memory_space<vmem>>, vector<4x16xf32>
    %c0_27 = arith.constant 0 : index
    %c0_28 = arith.constant 0 : index
    %21 = vector.load %arg10[%c0_27, %c0_28] : memref<4x16xf32, #tpu.memory_space<vmem>>, vector<4x16xf32>
    %c0_29 = arith.constant 0 : index
    %c0_30 = arith.constant 0 : index
    %22 = vector.load %arg11[%c0_29, %c0_30] : memref<4x16xf32, #tpu.memory_space<vmem>>, vector<4x16xf32>
    %c0_i32 = arith.constant 0 : i32
    %c7_i32 = arith.constant 7 : i32
    %23 = arith.subi %c7_i32, %c0_i32 : i32
    %24 = vector.broadcast %c0_i32 : i32 to vector<4x1xi32>
    %25 = arith.cmpi slt, %24, %0 : vector<4x1xi32>
    %26 = vector.broadcast %23 : i32 to vector<4x1xi32>
    %27 = arith.cmpi slt, %26, %0 : vector<4x1xi32>
    %28 = arith.index_cast %c0_i32 : i32 to index
    %c0_31 = arith.constant 0 : index
    %c0_32 = arith.constant 0 : index
    %29 = vector.load %arg30[%28, %c0_31, %c0_32] : memref<8x4x64xf32, #tpu.memory_space<vmem>>, vector<1x4x64xf32>
    %30 = vector.shape_cast %29 : vector<1x4x64xf32> to vector<4x64xf32>
    %31 = arith.truncf %19 : vector<4x16xf32> to vector<4x16xbf16>
    %cst_33 = arith.constant dense<0.000000e+00> : vector<4x64xf32>
    %32 = tpu.matmul %31, %17, %cst_33 {dimension_numbers = #tpu.dot_dimension_numbers<[1], [0], [0], [1], [0, 0, 1, 1], [], []>} : vector<4x16xbf16>, vector<16x64xbf16>, vector<4x64xf32> -> vector<4x64xf32>
    %33 = arith.addf %30, %32 : vector<4x64xf32>
    %34 = arith.index_cast %23 : i32 to index
    %c0_34 = arith.constant 0 : index
    %c0_35 = arith.constant 0 : index
    %35 = vector.load %arg31[%34, %c0_34, %c0_35] : memref<8x4x64xf32, #tpu.memory_space<vmem>>, vector<1x4x64xf32>
    %36 = vector.shape_cast %35 : vector<1x4x64xf32> to vector<4x64xf32>
    %37 = arith.truncf %21 : vector<4x16xf32> to vector<4x16xbf16>
    %cst_36 = arith.constant dense<0.000000e+00> : vector<4x64xf32>
    %38 = tpu.matmul %37, %18, %cst_36 {dimension_numbers = #tpu.dot_dimension_numbers<[1], [0], [0], [1], [0, 0, 1, 1], [], []>} : vector<4x16xbf16>, vector<16x64xbf16>, vector<4x64xf32> -> vector<4x64xf32>
    %39 = arith.addf %36, %38 : vector<4x64xf32>
    %40 = vector.extract_strided_slice %33 {offsets = [0, 0], sizes = [4, 16], strides = [1, 1]} : vector<4x64xf32> to vector<4x16xf32>
    %41 = arith.negf %40 : vector<4x16xf32>
    %42 = math.exp %41 : vector<4x16xf32>
    %cst_37 = arith.constant 1.000000e+00 : f32
    %43 = vector.broadcast %cst_37 : f32 to vector<4x16xf32>
    %44 = arith.addf %43, %42 : vector<4x16xf32>
    %45 = arith.divf %43, %44 : vector<4x16xf32>
    %46 = vector.extract_strided_slice %33 {offsets = [0, 16], sizes = [4, 16], strides = [1, 1]} : vector<4x64xf32> to vector<4x16xf32>
    %47 = arith.negf %46 : vector<4x16xf32>
    %48 = math.exp %47 : vector<4x16xf32>
    %cst_38 = arith.constant 1.000000e+00 : f32
    %49 = vector.broadcast %cst_38 : f32 to vector<4x16xf32>
    %50 = arith.addf %49, %48 : vector<4x16xf32>
    %51 = arith.divf %49, %50 : vector<4x16xf32>
    %52 = vector.extract_strided_slice %33 {offsets = [0, 32], sizes = [4, 16], strides = [1, 1]} : vector<4x64xf32> to vector<4x16xf32>
    %53 = math.tanh %52 : vector<4x16xf32>
    %54 = vector.extract_strided_slice %33 {offsets = [0, 48], sizes = [4, 16], strides = [1, 1]} : vector<4x64xf32> to vector<4x16xf32>
    %55 = arith.negf %54 : vector<4x16xf32>
    %56 = math.exp %55 : vector<4x16xf32>
    %cst_39 = arith.constant 1.000000e+00 : f32
    %57 = vector.broadcast %cst_39 : f32 to vector<4x16xf32>
    %58 = arith.addf %57, %56 : vector<4x16xf32>
    %59 = arith.divf %57, %58 : vector<4x16xf32>
    %60 = arith.mulf %51, %20 : vector<4x16xf32>
    %61 = arith.mulf %45, %53 : vector<4x16xf32>
    %62 = arith.addf %60, %61 : vector<4x16xf32>
    %63 = math.tanh %62 : vector<4x16xf32>
    %64 = arith.mulf %59, %63 : vector<4x16xf32>
    %65 = vector.shape_cast %25 : vector<4x1xi1> to vector<4x1xi1>
    %66 = vector.broadcast %65 : vector<4x1xi1> to vector<4x16xi1>
    %67 = arith.select %66, %64, %19 : vector<4x16xi1>, vector<4x16xf32>
    %68 = vector.shape_cast %25 : vector<4x1xi1> to vector<4x1xi1>
    %69 = vector.broadcast %68 : vector<4x1xi1> to vector<4x16xi1>
    %70 = arith.select %69, %62, %20 : vector<4x16xi1>, vector<4x16xf32>
    %cst_40 = arith.constant 0.000000e+00 : f32
    %71 = vector.shape_cast %25 : vector<4x1xi1> to vector<4x1xi1>
    %72 = vector.broadcast %71 : vector<4x1xi1> to vector<4x16xi1>
    %73 = vector.broadcast %cst_40 : f32 to vector<4x16xf32>
    %74 = arith.select %72, %64, %73 : vector<4x16xi1>, vector<4x16xf32>
    %75 = vector.extract_strided_slice %39 {offsets = [0, 0], sizes = [4, 16], strides = [1, 1]} : vector<4x64xf32> to vector<4x16xf32>
    %76 = arith.negf %75 : vector<4x16xf32>
    %77 = math.exp %76 : vector<4x16xf32>
    %cst_41 = arith.constant 1.000000e+00 : f32
    %78 = vector.broadcast %cst_41 : f32 to vector<4x16xf32>
    %79 = arith.addf %78, %77 : vector<4x16xf32>
    %80 = arith.divf %78, %79 : vector<4x16xf32>
    %81 = vector.extract_strided_slice %39 {offsets = [0, 16], sizes = [4, 16], strides = [1, 1]} : vector<4x64xf32> to vector<4x16xf32>
    %82 = arith.negf %81 : vector<4x16xf32>
    %83 = math.exp %82 : vector<4x16xf32>
    %cst_42 = arith.constant 1.000000e+00 : f32
    %84 = vector.broadcast %cst_42 : f32 to vector<4x16xf32>
    %85 = arith.addf %84, %83 : vector<4x16xf32>
    %86 = arith.divf %84, %85 : vector<4x16xf32>
    %87 = vector.extract_strided_slice %39 {offsets = [0, 32], sizes = [4, 16], strides = [1, 1]} : vector<4x64xf32> to vector<4x16xf32>
    %88 = math.tanh %87 : vector<4x16xf32>
    %89 = vector.extract_strided_slice %39 {offsets = [0, 48], sizes = [4, 16], strides = [1, 1]} : vector<4x64xf32> to vector<4x16xf32>
    %90 = arith.negf %89 : vector<4x16xf32>
    %91 = math.exp %90 : vector<4x16xf32>
    %cst_43 = arith.constant 1.000000e+00 : f32
    %92 = vector.broadcast %cst_43 : f32 to vector<4x16xf32>
    %93 = arith.addf %92, %91 : vector<4x16xf32>
    %94 = arith.divf %92, %93 : vector<4x16xf32>
    %95 = arith.mulf %86, %22 : vector<4x16xf32>
    %96 = arith.mulf %80, %88 : vector<4x16xf32>
    %97 = arith.addf %95, %96 : vector<4x16xf32>
    %98 = math.tanh %97 : vector<4x16xf32>
    %99 = arith.mulf %94, %98 : vector<4x16xf32>
    %100 = vector.shape_cast %27 : vector<4x1xi1> to vector<4x1xi1>
    %101 = vector.broadcast %100 : vector<4x1xi1> to vector<4x16xi1>
    %102 = arith.select %101, %99, %21 : vector<4x16xi1>, vector<4x16xf32>
    %103 = vector.shape_cast %27 : vector<4x1xi1> to vector<4x1xi1>
    %104 = vector.broadcast %103 : vector<4x1xi1> to vector<4x16xi1>
    %105 = arith.select %104, %97, %22 : vector<4x16xi1>, vector<4x16xf32>
    %cst_44 = arith.constant 0.000000e+00 : f32
    %106 = vector.shape_cast %27 : vector<4x1xi1> to vector<4x1xi1>
    %107 = vector.broadcast %106 : vector<4x1xi1> to vector<4x16xi1>
    %108 = vector.broadcast %cst_44 : f32 to vector<4x16xf32>
    %109 = arith.select %107, %99, %108 : vector<4x16xi1>, vector<4x16xf32>
    %110 = arith.index_cast %c0_i32 : i32 to index
    %c0_45 = arith.constant 0 : index
    %c0_46 = arith.constant 0 : index
    %111 = vector.load %arg26[%110, %c0_45, %c0_46] : memref<8x4x16xf32, #tpu.memory_space<vmem>>, vector<1x4x16xf32>
    %112 = vector.shape_cast %111 : vector<1x4x16xf32> to vector<4x16xf32>
    %113 = vector.shape_cast %74 : vector<4x16xf32> to vector<1x4x16xf32>
    tpu.vector_store %arg26[%110, %c0_45, %c0_46], %113 {strides = array<i32>} : memref<8x4x16xf32, #tpu.memory_space<vmem>>, vector<1x4x16xf32>,
    %114 = arith.index_cast %23 : i32 to index
    %c0_47 = arith.constant 0 : index
    %c0_48 = arith.constant 0 : index
    %115 = vector.load %arg28[%114, %c0_47, %c0_48] : memref<8x4x16xf32, #tpu.memory_space<vmem>>, vector<1x4x16xf32>
    %116 = vector.shape_cast %115 : vector<1x4x16xf32> to vector<4x16xf32>
    %117 = vector.shape_cast %109 : vector<4x16xf32> to vector<1x4x16xf32>
    tpu.vector_store %arg28[%114, %c0_47, %c0_48], %117 {strides = array<i32>} : memref<8x4x16xf32, #tpu.memory_space<vmem>>, vector<1x4x16xf32>,
    %c1_i32 = arith.constant 1 : i32
    %c7_i32_49 = arith.constant 7 : i32
    %118 = arith.subi %c7_i32_49, %c1_i32 : i32
    %119 = vector.broadcast %c1_i32 : i32 to vector<4x1xi32>
    %120 = arith.cmpi slt, %119, %0 : vector<4x1xi32>
    %121 = vector.broadcast %118 : i32 to vector<4x1xi32>
    %122 = arith.cmpi slt, %121, %0 : vector<4x1xi32>
    %123 = arith.index_cast %c1_i32 : i32 to index
    %c0_50 = arith.constant 0 : index
    %c0_51 = arith.constant 0 : index
    %124 = vector.load %arg30[%123, %c0_50, %c0_51] : memref<8x4x64xf32, #tpu.memory_space<vmem>>, vector<1x4x64xf32>
    %125 = vector.shape_cast %124 : vector<1x4x64xf32> to vector<4x64xf32>
    %126 = arith.truncf %67 : vector<4x16xf32> to vector<4x16xbf16>
    %cst_52 = arith.constant dense<0.000000e+00> : vector<4x64xf32>
    %127 = tpu.matmul %126, %17, %cst_52 {dimension_numbers = #tpu.dot_dimension_numbers<[1], [0], [0], [1], [0, 0, 1, 1], [], []>} : vector<4x16xbf16>, vector<16x64xbf16>, vector<4x64xf32> -> vector<4x64xf32>
    %128 = arith.addf %125, %127 : vector<4x64xf32>
    %129 = arith.index_cast %118 : i32 to index
    %c0_53 = arith.constant 0 : index
    %c0_54 = arith.constant 0 : index
    %130 = vector.load %arg31[%129, %c0_53, %c0_54] : memref<8x4x64xf32, #tpu.memory_space<vmem>>, vector<1x4x64xf32>
    %131 = vector.shape_cast %130 : vector<1x4x64xf32> to vector<4x64xf32>
    %132 = arith.truncf %102 : vector<4x16xf32> to vector<4x16xbf16>
    %cst_55 = arith.constant dense<0.000000e+00> : vector<4x64xf32>
    %133 = tpu.matmul %132, %18, %cst_55 {dimension_numbers = #tpu.dot_dimension_numbers<[1], [0], [0], [1], [0, 0, 1, 1], [], []>} : vector<4x16xbf16>, vector<16x64xbf16>, vector<4x64xf32> -> vector<4x64xf32>
    %134 = arith.addf %131, %133 : vector<4x64xf32>
    %135 = vector.extract_strided_slice %128 {offsets = [0, 0], sizes = [4, 16], strides = [1, 1]} : vector<4x64xf32> to vector<4x16xf32>
    %136 = arith.negf %135 : vector<4x16xf32>
    %137 = math.exp %136 : vector<4x16xf32>
    %cst_56 = arith.constant 1.000000e+00 : f32
    %138 = vector.broadcast %cst_56 : f32 to vector<4x16xf32>
    %139 = arith.addf %138, %137 : vector<4x16xf32>
    %140 = arith.divf %138, %139 : vector<4x16xf32>
    %141 = vector.extract_strided_slice %128 {offsets = [0, 16], sizes = [4, 16], strides = [1, 1]} : vector<4x64xf32> to vector<4x16xf32>
    %142 = arith.negf %141 : vector<4x16xf32>
    %143 = math.exp %142 : vector<4x16xf32>
    %cst_57 = arith.constant 1.000000e+00 : f32
    %144 = vector.broadcast %cst_57 : f32 to vector<4x16xf32>
    %145 = arith.addf %144, %143 : vector<4x16xf32>
    %146 = arith.divf %144, %145 : vector<4x16xf32>
    %147 = vector.extract_strided_slice %128 {offsets = [0, 32], sizes = [4, 16], strides = [1, 1]} : vector<4x64xf32> to vector<4x16xf32>
    %148 = math.tanh %147 : vector<4x16xf32>
    %149 = vector.extract_strided_slice %128 {offsets = [0, 48], sizes = [4, 16], strides = [1, 1]} : vector<4x64xf32> to vector<4x16xf32>
    %150 = arith.negf %149 : vector<4x16xf32>
    %151 = math.exp %150 : vector<4x16xf32>
    %cst_58 = arith.constant 1.000000e+00 : f32
    %152 = vector.broadcast %cst_58 : f32 to vector<4x16xf32>
    %153 = arith.addf %152, %151 : vector<4x16xf32>
    %154 = arith.divf %152, %153 : vector<4x16xf32>
    %155 = arith.mulf %146, %70 : vector<4x16xf32>
    %156 = arith.mulf %140, %148 : vector<4x16xf32>
    %157 = arith.addf %155, %156 : vector<4x16xf32>
    %158 = math.tanh %157 : vector<4x16xf32>
    %159 = arith.mulf %154, %158 : vector<4x16xf32>
    %160 = vector.shape_cast %120 : vector<4x1xi1> to vector<4x1xi1>
    %161 = vector.broadcast %160 : vector<4x1xi1> to vector<4x16xi1>
    %162 = arith.select %161, %159, %67 : vector<4x16xi1>, vector<4x16xf32>
    %163 = vector.shape_cast %120 : vector<4x1xi1> to vector<4x1xi1>
    %164 = vector.broadcast %163 : vector<4x1xi1> to vector<4x16xi1>
    %165 = arith.select %164, %157, %70 : vector<4x16xi1>, vector<4x16xf32>
    %cst_59 = arith.constant 0.000000e+00 : f32
    %166 = vector.shape_cast %120 : vector<4x1xi1> to vector<4x1xi1>
    %167 = vector.broadcast %166 : vector<4x1xi1> to vector<4x16xi1>
    %168 = vector.broadcast %cst_59 : f32 to vector<4x16xf32>
    %169 = arith.select %167, %159, %168 : vector<4x16xi1>, vector<4x16xf32>
    %170 = vector.extract_strided_slice %134 {offsets = [0, 0], sizes = [4, 16], strides = [1, 1]} : vector<4x64xf32> to vector<4x16xf32>
    %171 = arith.negf %170 : vector<4x16xf32>
    %172 = math.exp %171 : vector<4x16xf32>
    %cst_60 = arith.constant 1.000000e+00 : f32
    %173 = vector.broadcast %cst_60 : f32 to vector<4x16xf32>
    %174 = arith.addf %173, %172 : vector<4x16xf32>
    %175 = arith.divf %173, %174 : vector<4x16xf32>
    %176 = vector.extract_strided_slice %134 {offsets = [0, 16], sizes = [4, 16], strides = [1, 1]} : vector<4x64xf32> to vector<4x16xf32>
    %177 = arith.negf %176 : vector<4x16xf32>
    %178 = math.exp %177 : vector<4x16xf32>
    %cst_61 = arith.constant 1.000000e+00 : f32
    %179 = vector.broadcast %cst_61 : f32 to vector<4x16xf32>
    %180 = arith.addf %179, %178 : vector<4x16xf32>
    %181 = arith.divf %179, %180 : vector<4x16xf32>
    %182 = vector.extract_strided_slice %134 {offsets = [0, 32], sizes = [4, 16], strides = [1, 1]} : vector<4x64xf32> to vector<4x16xf32>
    %183 = math.tanh %182 : vector<4x16xf32>
    %184 = vector.extract_strided_slice %134 {offsets = [0, 48], sizes = [4, 16], strides = [1, 1]} : vector<4x64xf32> to vector<4x16xf32>
    %185 = arith.negf %184 : vector<4x16xf32>
    %186 = math.exp %185 : vector<4x16xf32>
    %cst_62 = arith.constant 1.000000e+00 : f32
    %187 = vector.broadcast %cst_62 : f32 to vector<4x16xf32>
    %188 = arith.addf %187, %186 : vector<4x16xf32>
    %189 = arith.divf %187, %188 : vector<4x16xf32>
    %190 = arith.mulf %181, %105 : vector<4x16xf32>
    %191 = arith.mulf %175, %183 : vector<4x16xf32>
    %192 = arith.addf %190, %191 : vector<4x16xf32>
    %193 = math.tanh %192 : vector<4x16xf32>
    %194 = arith.mulf %189, %193 : vector<4x16xf32>
    %195 = vector.shape_cast %122 : vector<4x1xi1> to vector<4x1xi1>
    %196 = vector.broadcast %195 : vector<4x1xi1> to vector<4x16xi1>
    %197 = arith.select %196, %194, %102 : vector<4x16xi1>, vector<4x16xf32>
    %198 = vector.shape_cast %122 : vector<4x1xi1> to vector<4x1xi1>
    %199 = vector.broadcast %198 : vector<4x1xi1> to vector<4x16xi1>
    %200 = arith.select %199, %192, %105 : vector<4x16xi1>, vector<4x16xf32>
    %cst_63 = arith.constant 0.000000e+00 : f32
    %201 = vector.shape_cast %122 : vector<4x1xi1> to vector<4x1xi1>
    %202 = vector.broadcast %201 : vector<4x1xi1> to vector<4x16xi1>
    %203 = vector.broadcast %cst_63 : f32 to vector<4x16xf32>
    %204 = arith.select %202, %194, %203 : vector<4x16xi1>, vector<4x16xf32>
    %205 = arith.index_cast %c1_i32 : i32 to index
    %c0_64 = arith.constant 0 : index
    %c0_65 = arith.constant 0 : index
    %206 = vector.load %arg26[%205, %c0_64, %c0_65] : memref<8x4x16xf32, #tpu.memory_space<vmem>>, vector<1x4x16xf32>
    %207 = vector.shape_cast %206 : vector<1x4x16xf32> to vector<4x16xf32>
    %208 = vector.shape_cast %169 : vector<4x16xf32> to vector<1x4x16xf32>
    tpu.vector_store %arg26[%205, %c0_64, %c0_65], %208 {strides = array<i32>} : memref<8x4x16xf32, #tpu.memory_space<vmem>>, vector<1x4x16xf32>,
    %209 = arith.index_cast %118 : i32 to index
    %c0_66 = arith.constant 0 : index
    %c0_67 = arith.constant 0 : index
    %210 = vector.load %arg28[%209, %c0_66, %c0_67] : memref<8x4x16xf32, #tpu.memory_space<vmem>>, vector<1x4x16xf32>
    %211 = vector.shape_cast %210 : vector<1x4x16xf32> to vector<4x16xf32>
    %212 = vector.shape_cast %204 : vector<4x16xf32> to vector<1x4x16xf32>
    tpu.vector_store %arg28[%209, %c0_66, %c0_67], %212 {strides = array<i32>} : memref<8x4x16xf32, #tpu.memory_space<vmem>>, vector<1x4x16xf32>,
    %c2_i32 = arith.constant 2 : i32
    %c7_i32_68 = arith.constant 7 : i32
    %213 = arith.subi %c7_i32_68, %c2_i32 : i32
    %214 = vector.broadcast %c2_i32 : i32 to vector<4x1xi32>
    %215 = arith.cmpi slt, %214, %0 : vector<4x1xi32>
    %216 = vector.broadcast %213 : i32 to vector<4x1xi32>
    %217 = arith.cmpi slt, %216, %0 : vector<4x1xi32>
    %218 = arith.index_cast %c2_i32 : i32 to index
    %c0_69 = arith.constant 0 : index
    %c0_70 = arith.constant 0 : index
    %219 = vector.load %arg30[%218, %c0_69, %c0_70] : memref<8x4x64xf32, #tpu.memory_space<vmem>>, vector<1x4x64xf32>
    %220 = vector.shape_cast %219 : vector<1x4x64xf32> to vector<4x64xf32>
    %221 = arith.truncf %162 : vector<4x16xf32> to vector<4x16xbf16>
    %cst_71 = arith.constant dense<0.000000e+00> : vector<4x64xf32>
    %222 = tpu.matmul %221, %17, %cst_71 {dimension_numbers = #tpu.dot_dimension_numbers<[1], [0], [0], [1], [0, 0, 1, 1], [], []>} : vector<4x16xbf16>, vector<16x64xbf16>, vector<4x64xf32> -> vector<4x64xf32>
    %223 = arith.addf %220, %222 : vector<4x64xf32>
    %224 = arith.index_cast %213 : i32 to index
    %c0_72 = arith.constant 0 : index
    %c0_73 = arith.constant 0 : index
    %225 = vector.load %arg31[%224, %c0_72, %c0_73] : memref<8x4x64xf32, #tpu.memory_space<vmem>>, vector<1x4x64xf32>
    %226 = vector.shape_cast %225 : vector<1x4x64xf32> to vector<4x64xf32>
    %227 = arith.truncf %197 : vector<4x16xf32> to vector<4x16xbf16>
    %cst_74 = arith.constant dense<0.000000e+00> : vector<4x64xf32>
    %228 = tpu.matmul %227, %18, %cst_74 {dimension_numbers = #tpu.dot_dimension_numbers<[1], [0], [0], [1], [0, 0, 1, 1], [], []>} : vector<4x16xbf16>, vector<16x64xbf16>, vector<4x64xf32> -> vector<4x64xf32>
    %229 = arith.addf %226, %228 : vector<4x64xf32>
    %230 = vector.extract_strided_slice %223 {offsets = [0, 0], sizes = [4, 16], strides = [1, 1]} : vector<4x64xf32> to vector<4x16xf32>
    %231 = arith.negf %230 : vector<4x16xf32>
    %232 = math.exp %231 : vector<4x16xf32>
    %cst_75 = arith.constant 1.000000e+00 : f32
    %233 = vector.broadcast %cst_75 : f32 to vector<4x16xf32>
    %234 = arith.addf %233, %232 : vector<4x16xf32>
    %235 = arith.divf %233, %234 : vector<4x16xf32>
    %236 = vector.extract_strided_slice %223 {offsets = [0, 16], sizes = [4, 16], strides = [1, 1]} : vector<4x64xf32> to vector<4x16xf32>
    %237 = arith.negf %236 : vector<4x16xf32>
    %238 = math.exp %237 : vector<4x16xf32>
    %cst_76 = arith.constant 1.000000e+00 : f32
    %239 = vector.broadcast %cst_76 : f32 to vector<4x16xf32>
    %240 = arith.addf %239, %238 : vector<4x16xf32>
    %241 = arith.divf %239, %240 : vector<4x16xf32>
    %242 = vector.extract_strided_slice %223 {offsets = [0, 32], sizes = [4, 16], strides = [1, 1]} : vector<4x64xf32> to vector<4x16xf32>
    %243 = math.tanh %242 : vector<4x16xf32>
    %244 = vector.extract_strided_slice %223 {offsets = [0, 48], sizes = [4, 16], strides = [1, 1]} : vector<4x64xf32> to vector<4x16xf32>
    %245 = arith.negf %244 : vector<4x16xf32>
    %246 = math.exp %245 : vector<4x16xf32>
    %cst_77 = arith.constant 1.000000e+00 : f32
    %247 = vector.broadcast %cst_77 : f32 to vector<4x16xf32>
    %248 = arith.addf %247, %246 : vector<4x16xf32>
    %249 = arith.divf %247, %248 : vector<4x16xf32>
    %250 = arith.mulf %241, %165 : vector<4x16xf32>
    %251 = arith.mulf %235, %243 : vector<4x16xf32>
    %252 = arith.addf %250, %251 : vector<4x16xf32>
    %253 = math.tanh %252 : vector<4x16xf32>
    %254 = arith.mulf %249, %253 : vector<4x16xf32>
    %255 = vector.shape_cast %215 : vector<4x1xi1> to vector<4x1xi1>
    %256 = vector.broadcast %255 : vector<4x1xi1> to vector<4x16xi1>
    %257 = arith.select %256, %254, %162 : vector<4x16xi1>, vector<4x16xf32>
    %258 = vector.shape_cast %215 : vector<4x1xi1> to vector<4x1xi1>
    %259 = vector.broadcast %258 : vector<4x1xi1> to vector<4x16xi1>
    %260 = arith.select %259, %252, %165 : vector<4x16xi1>, vector<4x16xf32>
    %cst_78 = arith.constant 0.000000e+00 : f32
    %261 = vector.shape_cast %215 : vector<4x1xi1> to vector<4x1xi1>
    %262 = vector.broadcast %261 : vector<4x1xi1> to vector<4x16xi1>
    %263 = vector.broadcast %cst_78 : f32 to vector<4x16xf32>
    %264 = arith.select %262, %254, %263 : vector<4x16xi1>, vector<4x16xf32>
    %265 = vector.extract_strided_slice %229 {offsets = [0, 0], sizes = [4, 16], strides = [1, 1]} : vector<4x64xf32> to vector<4x16xf32>
    %266 = arith.negf %265 : vector<4x16xf32>
    %267 = math.exp %266 : vector<4x16xf32>
    %cst_79 = arith.constant 1.000000e+00 : f32
    %268 = vector.broadcast %cst_79 : f32 to vector<4x16xf32>
    %269 = arith.addf %268, %267 : vector<4x16xf32>
    %270 = arith.divf %268, %269 : vector<4x16xf32>
    %271 = vector.extract_strided_slice %229 {offsets = [0, 16], sizes = [4, 16], strides = [1, 1]} : vector<4x64xf32> to vector<4x16xf32>
    %272 = arith.negf %271 : vector<4x16xf32>
    %273 = math.exp %272 : vector<4x16xf32>
    %cst_80 = arith.constant 1.000000e+00 : f32
    %274 = vector.broadcast %cst_80 : f32 to vector<4x16xf32>
    %275 = arith.addf %274, %273 : vector<4x16xf32>
    %276 = arith.divf %274, %275 : vector<4x16xf32>
    %277 = vector.extract_strided_slice %229 {offsets = [0, 32], sizes = [4, 16], strides = [1, 1]} : vector<4x64xf32> to vector<4x16xf32>
    %278 = math.tanh %277 : vector<4x16xf32>
    %279 = vector.extract_strided_slice %229 {offsets = [0, 48], sizes = [4, 16], strides = [1, 1]} : vector<4x64xf32> to vector<4x16xf32>
    %280 = arith.negf %279 : vector<4x16xf32>
    %281 = math.exp %280 : vector<4x16xf32>
    %cst_81 = arith.constant 1.000000e+00 : f32
    %282 = vector.broadcast %cst_81 : f32 to vector<4x16xf32>
    %283 = arith.addf %282, %281 : vector<4x16xf32>
    %284 = arith.divf %282, %283 : vector<4x16xf32>
    %285 = arith.mulf %276, %200 : vector<4x16xf32>
    %286 = arith.mulf %270, %278 : vector<4x16xf32>
    %287 = arith.addf %285, %286 : vector<4x16xf32>
    %288 = math.tanh %287 : vector<4x16xf32>
    %289 = arith.mulf %284, %288 : vector<4x16xf32>
    %290 = vector.shape_cast %217 : vector<4x1xi1> to vector<4x1xi1>
    %291 = vector.broadcast %290 : vector<4x1xi1> to vector<4x16xi1>
    %292 = arith.select %291, %289, %197 : vector<4x16xi1>, vector<4x16xf32>
    %293 = vector.shape_cast %217 : vector<4x1xi1> to vector<4x1xi1>
    %294 = vector.broadcast %293 : vector<4x1xi1> to vector<4x16xi1>
    %295 = arith.select %294, %287, %200 : vector<4x16xi1>, vector<4x16xf32>
    %cst_82 = arith.constant 0.000000e+00 : f32
    %296 = vector.shape_cast %217 : vector<4x1xi1> to vector<4x1xi1>
    %297 = vector.broadcast %296 : vector<4x1xi1> to vector<4x16xi1>
    %298 = vector.broadcast %cst_82 : f32 to vector<4x16xf32>
    %299 = arith.select %297, %289, %298 : vector<4x16xi1>, vector<4x16xf32>
    %300 = arith.index_cast %c2_i32 : i32 to index
    %c0_83 = arith.constant 0 : index
    %c0_84 = arith.constant 0 : index
    %301 = vector.load %arg26[%300, %c0_83, %c0_84] : memref<8x4x16xf32, #tpu.memory_space<vmem>>, vector<1x4x16xf32>
    %302 = vector.shape_cast %301 : vector<1x4x16xf32> to vector<4x16xf32>
    %303 = vector.shape_cast %264 : vector<4x16xf32> to vector<1x4x16xf32>
    tpu.vector_store %arg26[%300, %c0_83, %c0_84], %303 {strides = array<i32>} : memref<8x4x16xf32, #tpu.memory_space<vmem>>, vector<1x4x16xf32>,
    %304 = arith.index_cast %213 : i32 to index
    %c0_85 = arith.constant 0 : index
    %c0_86 = arith.constant 0 : index
    %305 = vector.load %arg28[%304, %c0_85, %c0_86] : memref<8x4x16xf32, #tpu.memory_space<vmem>>, vector<1x4x16xf32>
    %306 = vector.shape_cast %305 : vector<1x4x16xf32> to vector<4x16xf32>
    %307 = vector.shape_cast %299 : vector<4x16xf32> to vector<1x4x16xf32>
    tpu.vector_store %arg28[%304, %c0_85, %c0_86], %307 {strides = array<i32>} : memref<8x4x16xf32, #tpu.memory_space<vmem>>, vector<1x4x16xf32>,
    %c3_i32 = arith.constant 3 : i32
    %c7_i32_87 = arith.constant 7 : i32
    %308 = arith.subi %c7_i32_87, %c3_i32 : i32
    %309 = vector.broadcast %c3_i32 : i32 to vector<4x1xi32>
    %310 = arith.cmpi slt, %309, %0 : vector<4x1xi32>
    %311 = vector.broadcast %308 : i32 to vector<4x1xi32>
    %312 = arith.cmpi slt, %311, %0 : vector<4x1xi32>
    %313 = arith.index_cast %c3_i32 : i32 to index
    %c0_88 = arith.constant 0 : index
    %c0_89 = arith.constant 0 : index
    %314 = vector.load %arg30[%313, %c0_88, %c0_89] : memref<8x4x64xf32, #tpu.memory_space<vmem>>, vector<1x4x64xf32>
    %315 = vector.shape_cast %314 : vector<1x4x64xf32> to vector<4x64xf32>
    %316 = arith.truncf %257 : vector<4x16xf32> to vector<4x16xbf16>
    %cst_90 = arith.constant dense<0.000000e+00> : vector<4x64xf32>
    %317 = tpu.matmul %316, %17, %cst_90 {dimension_numbers = #tpu.dot_dimension_numbers<[1], [0], [0], [1], [0, 0, 1, 1], [], []>} : vector<4x16xbf16>, vector<16x64xbf16>, vector<4x64xf32> -> vector<4x64xf32>
    %318 = arith.addf %315, %317 : vector<4x64xf32>
    %319 = arith.index_cast %308 : i32 to index
    %c0_91 = arith.constant 0 : index
    %c0_92 = arith.constant 0 : index
    %320 = vector.load %arg31[%319, %c0_91, %c0_92] : memref<8x4x64xf32, #tpu.memory_space<vmem>>, vector<1x4x64xf32>
    %321 = vector.shape_cast %320 : vector<1x4x64xf32> to vector<4x64xf32>
    %322 = arith.truncf %292 : vector<4x16xf32> to vector<4x16xbf16>
    %cst_93 = arith.constant dense<0.000000e+00> : vector<4x64xf32>
    %323 = tpu.matmul %322, %18, %cst_93 {dimension_numbers = #tpu.dot_dimension_numbers<[1], [0], [0], [1], [0, 0, 1, 1], [], []>} : vector<4x16xbf16>, vector<16x64xbf16>, vector<4x64xf32> -> vector<4x64xf32>
    %324 = arith.addf %321, %323 : vector<4x64xf32>
    %325 = vector.extract_strided_slice %318 {offsets = [0, 0], sizes = [4, 16], strides = [1, 1]} : vector<4x64xf32> to vector<4x16xf32>
    %326 = arith.negf %325 : vector<4x16xf32>
    %327 = math.exp %326 : vector<4x16xf32>
    %cst_94 = arith.constant 1.000000e+00 : f32
    %328 = vector.broadcast %cst_94 : f32 to vector<4x16xf32>
    %329 = arith.addf %328, %327 : vector<4x16xf32>
    %330 = arith.divf %328, %329 : vector<4x16xf32>
    %331 = vector.extract_strided_slice %318 {offsets = [0, 16], sizes = [4, 16], strides = [1, 1]} : vector<4x64xf32> to vector<4x16xf32>
    %332 = arith.negf %331 : vector<4x16xf32>
    %333 = math.exp %332 : vector<4x16xf32>
    %cst_95 = arith.constant 1.000000e+00 : f32
    %334 = vector.broadcast %cst_95 : f32 to vector<4x16xf32>
    %335 = arith.addf %334, %333 : vector<4x16xf32>
    %336 = arith.divf %334, %335 : vector<4x16xf32>
    %337 = vector.extract_strided_slice %318 {offsets = [0, 32], sizes = [4, 16], strides = [1, 1]} : vector<4x64xf32> to vector<4x16xf32>
    %338 = math.tanh %337 : vector<4x16xf32>
    %339 = vector.extract_strided_slice %318 {offsets = [0, 48], sizes = [4, 16], strides = [1, 1]} : vector<4x64xf32> to vector<4x16xf32>
    %340 = arith.negf %339 : vector<4x16xf32>
    %341 = math.exp %340 : vector<4x16xf32>
    %cst_96 = arith.constant 1.000000e+00 : f32
    %342 = vector.broadcast %cst_96 : f32 to vector<4x16xf32>
    %343 = arith.addf %342, %341 : vector<4x16xf32>
    %344 = arith.divf %342, %343 : vector<4x16xf32>
    %345 = arith.mulf %336, %260 : vector<4x16xf32>
    %346 = arith.mulf %330, %338 : vector<4x16xf32>
    %347 = arith.addf %345, %346 : vector<4x16xf32>
    %348 = math.tanh %347 : vector<4x16xf32>
    %349 = arith.mulf %344, %348 : vector<4x16xf32>
    %350 = vector.shape_cast %310 : vector<4x1xi1> to vector<4x1xi1>
    %351 = vector.broadcast %350 : vector<4x1xi1> to vector<4x16xi1>
    %352 = arith.select %351, %349, %257 : vector<4x16xi1>, vector<4x16xf32>
    %353 = vector.shape_cast %310 : vector<4x1xi1> to vector<4x1xi1>
    %354 = vector.broadcast %353 : vector<4x1xi1> to vector<4x16xi1>
    %355 = arith.select %354, %347, %260 : vector<4x16xi1>, vector<4x16xf32>
    %cst_97 = arith.constant 0.000000e+00 : f32
    %356 = vector.shape_cast %310 : vector<4x1xi1> to vector<4x1xi1>
    %357 = vector.broadcast %356 : vector<4x1xi1> to vector<4x16xi1>
    %358 = vector.broadcast %cst_97 : f32 to vector<4x16xf32>
    %359 = arith.select %357, %349, %358 : vector<4x16xi1>, vector<4x16xf32>
    %360 = vector.extract_strided_slice %324 {offsets = [0, 0], sizes = [4, 16], strides = [1, 1]} : vector<4x64xf32> to vector<4x16xf32>
    %361 = arith.negf %360 : vector<4x16xf32>
    %362 = math.exp %361 : vector<4x16xf32>
    %cst_98 = arith.constant 1.000000e+00 : f32
    %363 = vector.broadcast %cst_98 : f32 to vector<4x16xf32>
    %364 = arith.addf %363, %362 : vector<4x16xf32>
    %365 = arith.divf %363, %364 : vector<4x16xf32>
    %366 = vector.extract_strided_slice %324 {offsets = [0, 16], sizes = [4, 16], strides = [1, 1]} : vector<4x64xf32> to vector<4x16xf32>
    %367 = arith.negf %366 : vector<4x16xf32>
    %368 = math.exp %367 : vector<4x16xf32>
    %cst_99 = arith.constant 1.000000e+00 : f32
    %369 = vector.broadcast %cst_99 : f32 to vector<4x16xf32>
    %370 = arith.addf %369, %368 : vector<4x16xf32>
    %371 = arith.divf %369, %370 : vector<4x16xf32>
    %372 = vector.extract_strided_slice %324 {offsets = [0, 32], sizes = [4, 16], strides = [1, 1]} : vector<4x64xf32> to vector<4x16xf32>
    %373 = math.tanh %372 : vector<4x16xf32>
    %374 = vector.extract_strided_slice %324 {offsets = [0, 48], sizes = [4, 16], strides = [1, 1]} : vector<4x64xf32> to vector<4x16xf32>
    %375 = arith.negf %374 : vector<4x16xf32>
    %376 = math.exp %375 : vector<4x16xf32>
    %cst_100 = arith.constant 1.000000e+00 : f32
    %377 = vector.broadcast %cst_100 : f32 to vector<4x16xf32>
    %378 = arith.addf %377, %376 : vector<4x16xf32>
    %379 = arith.divf %377, %378 : vector<4x16xf32>
    %380 = arith.mulf %371, %295 : vector<4x16xf32>
    %381 = arith.mulf %365, %373 : vector<4x16xf32>
    %382 = arith.addf %380, %381 : vector<4x16xf32>
    %383 = math.tanh %382 : vector<4x16xf32>
    %384 = arith.mulf %379, %383 : vector<4x16xf32>
    %385 = vector.shape_cast %312 : vector<4x1xi1> to vector<4x1xi1>
    %386 = vector.broadcast %385 : vector<4x1xi1> to vector<4x16xi1>
    %387 = arith.select %386, %384, %292 : vector<4x16xi1>, vector<4x16xf32>
    %388 = vector.shape_cast %312 : vector<4x1xi1> to vector<4x1xi1>
    %389 = vector.broadcast %388 : vector<4x1xi1> to vector<4x16xi1>
    %390 = arith.select %389, %382, %295 : vector<4x16xi1>, vector<4x16xf32>
    %cst_101 = arith.constant 0.000000e+00 : f32
    %391 = vector.shape_cast %312 : vector<4x1xi1> to vector<4x1xi1>
    %392 = vector.broadcast %391 : vector<4x1xi1> to vector<4x16xi1>
    %393 = vector.broadcast %cst_101 : f32 to vector<4x16xf32>
    %394 = arith.select %392, %384, %393 : vector<4x16xi1>, vector<4x16xf32>
    %395 = arith.index_cast %c3_i32 : i32 to index
    %c0_102 = arith.constant 0 : index
    %c0_103 = arith.constant 0 : index
    %396 = vector.load %arg26[%395, %c0_102, %c0_103] : memref<8x4x16xf32, #tpu.memory_space<vmem>>, vector<1x4x16xf32>
    %397 = vector.shape_cast %396 : vector<1x4x16xf32> to vector<4x16xf32>
    %398 = vector.shape_cast %359 : vector<4x16xf32> to vector<1x4x16xf32>
    tpu.vector_store %arg26[%395, %c0_102, %c0_103], %398 {strides = array<i32>} : memref<8x4x16xf32, #tpu.memory_space<vmem>>, vector<1x4x16xf32>,
    %399 = arith.index_cast %308 : i32 to index
    %c0_104 = arith.constant 0 : index
    %c0_105 = arith.constant 0 : index
    %400 = vector.load %arg28[%399, %c0_104, %c0_105] : memref<8x4x16xf32, #tpu.memory_space<vmem>>, vector<1x4x16xf32>
    %401 = vector.shape_cast %400 : vector<1x4x16xf32> to vector<4x16xf32>
    %402 = vector.shape_cast %394 : vector<4x16xf32> to vector<1x4x16xf32>
    tpu.vector_store %arg28[%399, %c0_104, %c0_105], %402 {strides = array<i32>} : memref<8x4x16xf32, #tpu.memory_space<vmem>>, vector<1x4x16xf32>,
    %c4_i32 = arith.constant 4 : i32
    %c7_i32_106 = arith.constant 7 : i32
    %403 = arith.subi %c7_i32_106, %c4_i32 : i32
    %404 = vector.broadcast %c4_i32 : i32 to vector<4x1xi32>
    %405 = arith.cmpi slt, %404, %0 : vector<4x1xi32>
    %406 = vector.broadcast %403 : i32 to vector<4x1xi32>
    %407 = arith.cmpi slt, %406, %0 : vector<4x1xi32>
    %408 = arith.index_cast %c4_i32 : i32 to index
    %c0_107 = arith.constant 0 : index
    %c0_108 = arith.constant 0 : index
    %409 = vector.load %arg30[%408, %c0_107, %c0_108] : memref<8x4x64xf32, #tpu.memory_space<vmem>>, vector<1x4x64xf32>
    %410 = vector.shape_cast %409 : vector<1x4x64xf32> to vector<4x64xf32>
    %411 = arith.truncf %352 : vector<4x16xf32> to vector<4x16xbf16>
    %cst_109 = arith.constant dense<0.000000e+00> : vector<4x64xf32>
    %412 = tpu.matmul %411, %17, %cst_109 {dimension_numbers = #tpu.dot_dimension_numbers<[1], [0], [0], [1], [0, 0, 1, 1], [], []>} : vector<4x16xbf16>, vector<16x64xbf16>, vector<4x64xf32> -> vector<4x64xf32>
    %413 = arith.addf %410, %412 : vector<4x64xf32>
    %414 = arith.index_cast %403 : i32 to index
    %c0_110 = arith.constant 0 : index
    %c0_111 = arith.constant 0 : index
    %415 = vector.load %arg31[%414, %c0_110, %c0_111] : memref<8x4x64xf32, #tpu.memory_space<vmem>>, vector<1x4x64xf32>
    %416 = vector.shape_cast %415 : vector<1x4x64xf32> to vector<4x64xf32>
    %417 = arith.truncf %387 : vector<4x16xf32> to vector<4x16xbf16>
    %cst_112 = arith.constant dense<0.000000e+00> : vector<4x64xf32>
    %418 = tpu.matmul %417, %18, %cst_112 {dimension_numbers = #tpu.dot_dimension_numbers<[1], [0], [0], [1], [0, 0, 1, 1], [], []>} : vector<4x16xbf16>, vector<16x64xbf16>, vector<4x64xf32> -> vector<4x64xf32>
    %419 = arith.addf %416, %418 : vector<4x64xf32>
    %420 = vector.extract_strided_slice %413 {offsets = [0, 0], sizes = [4, 16], strides = [1, 1]} : vector<4x64xf32> to vector<4x16xf32>
    %421 = arith.negf %420 : vector<4x16xf32>
    %422 = math.exp %421 : vector<4x16xf32>
    %cst_113 = arith.constant 1.000000e+00 : f32
    %423 = vector.broadcast %cst_113 : f32 to vector<4x16xf32>
    %424 = arith.addf %423, %422 : vector<4x16xf32>
    %425 = arith.divf %423, %424 : vector<4x16xf32>
    %426 = vector.extract_strided_slice %413 {offsets = [0, 16], sizes = [4, 16], strides = [1, 1]} : vector<4x64xf32> to vector<4x16xf32>
    %427 = arith.negf %426 : vector<4x16xf32>
    %428 = math.exp %427 : vector<4x16xf32>
    %cst_114 = arith.constant 1.000000e+00 : f32
    %429 = vector.broadcast %cst_114 : f32 to vector<4x16xf32>
    %430 = arith.addf %429, %428 : vector<4x16xf32>
    %431 = arith.divf %429, %430 : vector<4x16xf32>
    %432 = vector.extract_strided_slice %413 {offsets = [0, 32], sizes = [4, 16], strides = [1, 1]} : vector<4x64xf32> to vector<4x16xf32>
    %433 = math.tanh %432 : vector<4x16xf32>
    %434 = vector.extract_strided_slice %413 {offsets = [0, 48], sizes = [4, 16], strides = [1, 1]} : vector<4x64xf32> to vector<4x16xf32>
    %435 = arith.negf %434 : vector<4x16xf32>
    %436 = math.exp %435 : vector<4x16xf32>
    %cst_115 = arith.constant 1.000000e+00 : f32
    %437 = vector.broadcast %cst_115 : f32 to vector<4x16xf32>
    %438 = arith.addf %437, %436 : vector<4x16xf32>
    %439 = arith.divf %437, %438 : vector<4x16xf32>
    %440 = arith.mulf %431, %355 : vector<4x16xf32>
    %441 = arith.mulf %425, %433 : vector<4x16xf32>
    %442 = arith.addf %440, %441 : vector<4x16xf32>
    %443 = math.tanh %442 : vector<4x16xf32>
    %444 = arith.mulf %439, %443 : vector<4x16xf32>
    %445 = vector.shape_cast %405 : vector<4x1xi1> to vector<4x1xi1>
    %446 = vector.broadcast %445 : vector<4x1xi1> to vector<4x16xi1>
    %447 = arith.select %446, %444, %352 : vector<4x16xi1>, vector<4x16xf32>
    %448 = vector.shape_cast %405 : vector<4x1xi1> to vector<4x1xi1>
    %449 = vector.broadcast %448 : vector<4x1xi1> to vector<4x16xi1>
    %450 = arith.select %449, %442, %355 : vector<4x16xi1>, vector<4x16xf32>
    %cst_116 = arith.constant 0.000000e+00 : f32
    %451 = vector.shape_cast %405 : vector<4x1xi1> to vector<4x1xi1>
    %452 = vector.broadcast %451 : vector<4x1xi1> to vector<4x16xi1>
    %453 = vector.broadcast %cst_116 : f32 to vector<4x16xf32>
    %454 = arith.select %452, %444, %453 : vector<4x16xi1>, vector<4x16xf32>
    %455 = vector.extract_strided_slice %419 {offsets = [0, 0], sizes = [4, 16], strides = [1, 1]} : vector<4x64xf32> to vector<4x16xf32>
    %456 = arith.negf %455 : vector<4x16xf32>
    %457 = math.exp %456 : vector<4x16xf32>
    %cst_117 = arith.constant 1.000000e+00 : f32
    %458 = vector.broadcast %cst_117 : f32 to vector<4x16xf32>
    %459 = arith.addf %458, %457 : vector<4x16xf32>
    %460 = arith.divf %458, %459 : vector<4x16xf32>
    %461 = vector.extract_strided_slice %419 {offsets = [0, 16], sizes = [4, 16], strides = [1, 1]} : vector<4x64xf32> to vector<4x16xf32>
    %462 = arith.negf %461 : vector<4x16xf32>
    %463 = math.exp %462 : vector<4x16xf32>
    %cst_118 = arith.constant 1.000000e+00 : f32
    %464 = vector.broadcast %cst_118 : f32 to vector<4x16xf32>
    %465 = arith.addf %464, %463 : vector<4x16xf32>
    %466 = arith.divf %464, %465 : vector<4x16xf32>
    %467 = vector.extract_strided_slice %419 {offsets = [0, 32], sizes = [4, 16], strides = [1, 1]} : vector<4x64xf32> to vector<4x16xf32>
    %468 = math.tanh %467 : vector<4x16xf32>
    %469 = vector.extract_strided_slice %419 {offsets = [0, 48], sizes = [4, 16], strides = [1, 1]} : vector<4x64xf32> to vector<4x16xf32>
    %470 = arith.negf %469 : vector<4x16xf32>
    %471 = math.exp %470 : vector<4x16xf32>
    %cst_119 = arith.constant 1.000000e+00 : f32
    %472 = vector.broadcast %cst_119 : f32 to vector<4x16xf32>
    %473 = arith.addf %472, %471 : vector<4x16xf32>
    %474 = arith.divf %472, %473 : vector<4x16xf32>
    %475 = arith.mulf %466, %390 : vector<4x16xf32>
    %476 = arith.mulf %460, %468 : vector<4x16xf32>
    %477 = arith.addf %475, %476 : vector<4x16xf32>
    %478 = math.tanh %477 : vector<4x16xf32>
    %479 = arith.mulf %474, %478 : vector<4x16xf32>
    %480 = vector.shape_cast %407 : vector<4x1xi1> to vector<4x1xi1>
    %481 = vector.broadcast %480 : vector<4x1xi1> to vector<4x16xi1>
    %482 = arith.select %481, %479, %387 : vector<4x16xi1>, vector<4x16xf32>
    %483 = vector.shape_cast %407 : vector<4x1xi1> to vector<4x1xi1>
    %484 = vector.broadcast %483 : vector<4x1xi1> to vector<4x16xi1>
    %485 = arith.select %484, %477, %390 : vector<4x16xi1>, vector<4x16xf32>
    %cst_120 = arith.constant 0.000000e+00 : f32
    %486 = vector.shape_cast %407 : vector<4x1xi1> to vector<4x1xi1>
    %487 = vector.broadcast %486 : vector<4x1xi1> to vector<4x16xi1>
    %488 = vector.broadcast %cst_120 : f32 to vector<4x16xf32>
    %489 = arith.select %487, %479, %488 : vector<4x16xi1>, vector<4x16xf32>
    %490 = arith.index_cast %c4_i32 : i32 to index
    %c0_121 = arith.constant 0 : index
    %c0_122 = arith.constant 0 : index
    %491 = vector.load %arg26[%490, %c0_121, %c0_122] : memref<8x4x16xf32, #tpu.memory_space<vmem>>, vector<1x4x16xf32>
    %492 = vector.shape_cast %491 : vector<1x4x16xf32> to vector<4x16xf32>
    %493 = vector.shape_cast %454 : vector<4x16xf32> to vector<1x4x16xf32>
    tpu.vector_store %arg26[%490, %c0_121, %c0_122], %493 {strides = array<i32>} : memref<8x4x16xf32, #tpu.memory_space<vmem>>, vector<1x4x16xf32>,
    %494 = arith.index_cast %403 : i32 to index
    %c0_123 = arith.constant 0 : index
    %c0_124 = arith.constant 0 : index
    %495 = vector.load %arg28[%494, %c0_123, %c0_124] : memref<8x4x16xf32, #tpu.memory_space<vmem>>, vector<1x4x16xf32>
    %496 = vector.shape_cast %495 : vector<1x4x16xf32> to vector<4x16xf32>
    %497 = vector.shape_cast %489 : vector<4x16xf32> to vector<1x4x16xf32>
    tpu.vector_store %arg28[%494, %c0_123, %c0_124], %497 {strides = array<i32>} : memref<8x4x16xf32, #tpu.memory_space<vmem>>, vector<1x4x16xf32>,
    %c5_i32 = arith.constant 5 : i32
    %c7_i32_125 = arith.constant 7 : i32
    %498 = arith.subi %c7_i32_125, %c5_i32 : i32
    %499 = vector.broadcast %c5_i32 : i32 to vector<4x1xi32>
    %500 = arith.cmpi slt, %499, %0 : vector<4x1xi32>
    %501 = vector.broadcast %498 : i32 to vector<4x1xi32>
    %502 = arith.cmpi slt, %501, %0 : vector<4x1xi32>
    %503 = arith.index_cast %c5_i32 : i32 to index
    %c0_126 = arith.constant 0 : index
    %c0_127 = arith.constant 0 : index
    %504 = vector.load %arg30[%503, %c0_126, %c0_127] : memref<8x4x64xf32, #tpu.memory_space<vmem>>, vector<1x4x64xf32>
    %505 = vector.shape_cast %504 : vector<1x4x64xf32> to vector<4x64xf32>
    %506 = arith.truncf %447 : vector<4x16xf32> to vector<4x16xbf16>
    %cst_128 = arith.constant dense<0.000000e+00> : vector<4x64xf32>
    %507 = tpu.matmul %506, %17, %cst_128 {dimension_numbers = #tpu.dot_dimension_numbers<[1], [0], [0], [1], [0, 0, 1, 1], [], []>} : vector<4x16xbf16>, vector<16x64xbf16>, vector<4x64xf32> -> vector<4x64xf32>
    %508 = arith.addf %505, %507 : vector<4x64xf32>
    %509 = arith.index_cast %498 : i32 to index
    %c0_129 = arith.constant 0 : index
    %c0_130 = arith.constant 0 : index
    %510 = vector.load %arg31[%509, %c0_129, %c0_130] : memref<8x4x64xf32, #tpu.memory_space<vmem>>, vector<1x4x64xf32>
    %511 = vector.shape_cast %510 : vector<1x4x64xf32> to vector<4x64xf32>
    %512 = arith.truncf %482 : vector<4x16xf32> to vector<4x16xbf16>
    %cst_131 = arith.constant dense<0.000000e+00> : vector<4x64xf32>
    %513 = tpu.matmul %512, %18, %cst_131 {dimension_numbers = #tpu.dot_dimension_numbers<[1], [0], [0], [1], [0, 0, 1, 1], [], []>} : vector<4x16xbf16>, vector<16x64xbf16>, vector<4x64xf32> -> vector<4x64xf32>
    %514 = arith.addf %511, %513 : vector<4x64xf32>
    %515 = vector.extract_strided_slice %508 {offsets = [0, 0], sizes = [4, 16], strides = [1, 1]} : vector<4x64xf32> to vector<4x16xf32>
    %516 = arith.negf %515 : vector<4x16xf32>
    %517 = math.exp %516 : vector<4x16xf32>
    %cst_132 = arith.constant 1.000000e+00 : f32
    %518 = vector.broadcast %cst_132 : f32 to vector<4x16xf32>
    %519 = arith.addf %518, %517 : vector<4x16xf32>
    %520 = arith.divf %518, %519 : vector<4x16xf32>
    %521 = vector.extract_strided_slice %508 {offsets = [0, 16], sizes = [4, 16], strides = [1, 1]} : vector<4x64xf32> to vector<4x16xf32>
    %522 = arith.negf %521 : vector<4x16xf32>
    %523 = math.exp %522 : vector<4x16xf32>
    %cst_133 = arith.constant 1.000000e+00 : f32
    %524 = vector.broadcast %cst_133 : f32 to vector<4x16xf32>
    %525 = arith.addf %524, %523 : vector<4x16xf32>
    %526 = arith.divf %524, %525 : vector<4x16xf32>
    %527 = vector.extract_strided_slice %508 {offsets = [0, 32], sizes = [4, 16], strides = [1, 1]} : vector<4x64xf32> to vector<4x16xf32>
    %528 = math.tanh %527 : vector<4x16xf32>
    %529 = vector.extract_strided_slice %508 {offsets = [0, 48], sizes = [4, 16], strides = [1, 1]} : vector<4x64xf32> to vector<4x16xf32>
    %530 = arith.negf %529 : vector<4x16xf32>
    %531 = math.exp %530 : vector<4x16xf32>
    %cst_134 = arith.constant 1.000000e+00 : f32
    %532 = vector.broadcast %cst_134 : f32 to vector<4x16xf32>
    %533 = arith.addf %532, %531 : vector<4x16xf32>
    %534 = arith.divf %532, %533 : vector<4x16xf32>
    %535 = arith.mulf %526, %450 : vector<4x16xf32>
    %536 = arith.mulf %520, %528 : vector<4x16xf32>
    %537 = arith.addf %535, %536 : vector<4x16xf32>
    %538 = math.tanh %537 : vector<4x16xf32>
    %539 = arith.mulf %534, %538 : vector<4x16xf32>
    %540 = vector.shape_cast %500 : vector<4x1xi1> to vector<4x1xi1>
    %541 = vector.broadcast %540 : vector<4x1xi1> to vector<4x16xi1>
    %542 = arith.select %541, %539, %447 : vector<4x16xi1>, vector<4x16xf32>
    %543 = vector.shape_cast %500 : vector<4x1xi1> to vector<4x1xi1>
    %544 = vector.broadcast %543 : vector<4x1xi1> to vector<4x16xi1>
    %545 = arith.select %544, %537, %450 : vector<4x16xi1>, vector<4x16xf32>
    %cst_135 = arith.constant 0.000000e+00 : f32
    %546 = vector.shape_cast %500 : vector<4x1xi1> to vector<4x1xi1>
    %547 = vector.broadcast %546 : vector<4x1xi1> to vector<4x16xi1>
    %548 = vector.broadcast %cst_135 : f32 to vector<4x16xf32>
    %549 = arith.select %547, %539, %548 : vector<4x16xi1>, vector<4x16xf32>
    %550 = vector.extract_strided_slice %514 {offsets = [0, 0], sizes = [4, 16], strides = [1, 1]} : vector<4x64xf32> to vector<4x16xf32>
    %551 = arith.negf %550 : vector<4x16xf32>
    %552 = math.exp %551 : vector<4x16xf32>
    %cst_136 = arith.constant 1.000000e+00 : f32
    %553 = vector.broadcast %cst_136 : f32 to vector<4x16xf32>
    %554 = arith.addf %553, %552 : vector<4x16xf32>
    %555 = arith.divf %553, %554 : vector<4x16xf32>
    %556 = vector.extract_strided_slice %514 {offsets = [0, 16], sizes = [4, 16], strides = [1, 1]} : vector<4x64xf32> to vector<4x16xf32>
    %557 = arith.negf %556 : vector<4x16xf32>
    %558 = math.exp %557 : vector<4x16xf32>
    %cst_137 = arith.constant 1.000000e+00 : f32
    %559 = vector.broadcast %cst_137 : f32 to vector<4x16xf32>
    %560 = arith.addf %559, %558 : vector<4x16xf32>
    %561 = arith.divf %559, %560 : vector<4x16xf32>
    %562 = vector.extract_strided_slice %514 {offsets = [0, 32], sizes = [4, 16], strides = [1, 1]} : vector<4x64xf32> to vector<4x16xf32>
    %563 = math.tanh %562 : vector<4x16xf32>
    %564 = vector.extract_strided_slice %514 {offsets = [0, 48], sizes = [4, 16], strides = [1, 1]} : vector<4x64xf32> to vector<4x16xf32>
    %565 = arith.negf %564 : vector<4x16xf32>
    %566 = math.exp %565 : vector<4x16xf32>
    %cst_138 = arith.constant 1.000000e+00 : f32
    %567 = vector.broadcast %cst_138 : f32 to vector<4x16xf32>
    %568 = arith.addf %567, %566 : vector<4x16xf32>
    %569 = arith.divf %567, %568 : vector<4x16xf32>
    %570 = arith.mulf %561, %485 : vector<4x16xf32>
    %571 = arith.mulf %555, %563 : vector<4x16xf32>
    %572 = arith.addf %570, %571 : vector<4x16xf32>
    %573 = math.tanh %572 : vector<4x16xf32>
    %574 = arith.mulf %569, %573 : vector<4x16xf32>
    %575 = vector.shape_cast %502 : vector<4x1xi1> to vector<4x1xi1>
    %576 = vector.broadcast %575 : vector<4x1xi1> to vector<4x16xi1>
    %577 = arith.select %576, %574, %482 : vector<4x16xi1>, vector<4x16xf32>
    %578 = vector.shape_cast %502 : vector<4x1xi1> to vector<4x1xi1>
    %579 = vector.broadcast %578 : vector<4x1xi1> to vector<4x16xi1>
    %580 = arith.select %579, %572, %485 : vector<4x16xi1>, vector<4x16xf32>
    %cst_139 = arith.constant 0.000000e+00 : f32
    %581 = vector.shape_cast %502 : vector<4x1xi1> to vector<4x1xi1>
    %582 = vector.broadcast %581 : vector<4x1xi1> to vector<4x16xi1>
    %583 = vector.broadcast %cst_139 : f32 to vector<4x16xf32>
    %584 = arith.select %582, %574, %583 : vector<4x16xi1>, vector<4x16xf32>
    %585 = arith.index_cast %c5_i32 : i32 to index
    %c0_140 = arith.constant 0 : index
    %c0_141 = arith.constant 0 : index
    %586 = vector.load %arg26[%585, %c0_140, %c0_141] : memref<8x4x16xf32, #tpu.memory_space<vmem>>, vector<1x4x16xf32>
    %587 = vector.shape_cast %586 : vector<1x4x16xf32> to vector<4x16xf32>
    %588 = vector.shape_cast %549 : vector<4x16xf32> to vector<1x4x16xf32>
    tpu.vector_store %arg26[%585, %c0_140, %c0_141], %588 {strides = array<i32>} : memref<8x4x16xf32, #tpu.memory_space<vmem>>, vector<1x4x16xf32>,
    %589 = arith.index_cast %498 : i32 to index
    %c0_142 = arith.constant 0 : index
    %c0_143 = arith.constant 0 : index
    %590 = vector.load %arg28[%589, %c0_142, %c0_143] : memref<8x4x16xf32, #tpu.memory_space<vmem>>, vector<1x4x16xf32>
    %591 = vector.shape_cast %590 : vector<1x4x16xf32> to vector<4x16xf32>
    %592 = vector.shape_cast %584 : vector<4x16xf32> to vector<1x4x16xf32>
    tpu.vector_store %arg28[%589, %c0_142, %c0_143], %592 {strides = array<i32>} : memref<8x4x16xf32, #tpu.memory_space<vmem>>, vector<1x4x16xf32>,
    %c6_i32 = arith.constant 6 : i32
    %c7_i32_144 = arith.constant 7 : i32
    %593 = arith.subi %c7_i32_144, %c6_i32 : i32
    %594 = vector.broadcast %c6_i32 : i32 to vector<4x1xi32>
    %595 = arith.cmpi slt, %594, %0 : vector<4x1xi32>
    %596 = vector.broadcast %593 : i32 to vector<4x1xi32>
    %597 = arith.cmpi slt, %596, %0 : vector<4x1xi32>
    %598 = arith.index_cast %c6_i32 : i32 to index
    %c0_145 = arith.constant 0 : index
    %c0_146 = arith.constant 0 : index
    %599 = vector.load %arg30[%598, %c0_145, %c0_146] : memref<8x4x64xf32, #tpu.memory_space<vmem>>, vector<1x4x64xf32>
    %600 = vector.shape_cast %599 : vector<1x4x64xf32> to vector<4x64xf32>
    %601 = arith.truncf %542 : vector<4x16xf32> to vector<4x16xbf16>
    %cst_147 = arith.constant dense<0.000000e+00> : vector<4x64xf32>
    %602 = tpu.matmul %601, %17, %cst_147 {dimension_numbers = #tpu.dot_dimension_numbers<[1], [0], [0], [1], [0, 0, 1, 1], [], []>} : vector<4x16xbf16>, vector<16x64xbf16>, vector<4x64xf32> -> vector<4x64xf32>
    %603 = arith.addf %600, %602 : vector<4x64xf32>
    %604 = arith.index_cast %593 : i32 to index
    %c0_148 = arith.constant 0 : index
    %c0_149 = arith.constant 0 : index
    %605 = vector.load %arg31[%604, %c0_148, %c0_149] : memref<8x4x64xf32, #tpu.memory_space<vmem>>, vector<1x4x64xf32>
    %606 = vector.shape_cast %605 : vector<1x4x64xf32> to vector<4x64xf32>
    %607 = arith.truncf %577 : vector<4x16xf32> to vector<4x16xbf16>
    %cst_150 = arith.constant dense<0.000000e+00> : vector<4x64xf32>
    %608 = tpu.matmul %607, %18, %cst_150 {dimension_numbers = #tpu.dot_dimension_numbers<[1], [0], [0], [1], [0, 0, 1, 1], [], []>} : vector<4x16xbf16>, vector<16x64xbf16>, vector<4x64xf32> -> vector<4x64xf32>
    %609 = arith.addf %606, %608 : vector<4x64xf32>
    %610 = vector.extract_strided_slice %603 {offsets = [0, 0], sizes = [4, 16], strides = [1, 1]} : vector<4x64xf32> to vector<4x16xf32>
    %611 = arith.negf %610 : vector<4x16xf32>
    %612 = math.exp %611 : vector<4x16xf32>
    %cst_151 = arith.constant 1.000000e+00 : f32
    %613 = vector.broadcast %cst_151 : f32 to vector<4x16xf32>
    %614 = arith.addf %613, %612 : vector<4x16xf32>
    %615 = arith.divf %613, %614 : vector<4x16xf32>
    %616 = vector.extract_strided_slice %603 {offsets = [0, 16], sizes = [4, 16], strides = [1, 1]} : vector<4x64xf32> to vector<4x16xf32>
    %617 = arith.negf %616 : vector<4x16xf32>
    %618 = math.exp %617 : vector<4x16xf32>
    %cst_152 = arith.constant 1.000000e+00 : f32
    %619 = vector.broadcast %cst_152 : f32 to vector<4x16xf32>
    %620 = arith.addf %619, %618 : vector<4x16xf32>
    %621 = arith.divf %619, %620 : vector<4x16xf32>
    %622 = vector.extract_strided_slice %603 {offsets = [0, 32], sizes = [4, 16], strides = [1, 1]} : vector<4x64xf32> to vector<4x16xf32>
    %623 = math.tanh %622 : vector<4x16xf32>
    %624 = vector.extract_strided_slice %603 {offsets = [0, 48], sizes = [4, 16], strides = [1, 1]} : vector<4x64xf32> to vector<4x16xf32>
    %625 = arith.negf %624 : vector<4x16xf32>
    %626 = math.exp %625 : vector<4x16xf32>
    %cst_153 = arith.constant 1.000000e+00 : f32
    %627 = vector.broadcast %cst_153 : f32 to vector<4x16xf32>
    %628 = arith.addf %627, %626 : vector<4x16xf32>
    %629 = arith.divf %627, %628 : vector<4x16xf32>
    %630 = arith.mulf %621, %545 : vector<4x16xf32>
    %631 = arith.mulf %615, %623 : vector<4x16xf32>
    %632 = arith.addf %630, %631 : vector<4x16xf32>
    %633 = math.tanh %632 : vector<4x16xf32>
    %634 = arith.mulf %629, %633 : vector<4x16xf32>
    %635 = vector.shape_cast %595 : vector<4x1xi1> to vector<4x1xi1>
    %636 = vector.broadcast %635 : vector<4x1xi1> to vector<4x16xi1>
    %637 = arith.select %636, %634, %542 : vector<4x16xi1>, vector<4x16xf32>
    %638 = vector.shape_cast %595 : vector<4x1xi1> to vector<4x1xi1>
    %639 = vector.broadcast %638 : vector<4x1xi1> to vector<4x16xi1>
    %640 = arith.select %639, %632, %545 : vector<4x16xi1>, vector<4x16xf32>
    %cst_154 = arith.constant 0.000000e+00 : f32
    %641 = vector.shape_cast %595 : vector<4x1xi1> to vector<4x1xi1>
    %642 = vector.broadcast %641 : vector<4x1xi1> to vector<4x16xi1>
    %643 = vector.broadcast %cst_154 : f32 to vector<4x16xf32>
    %644 = arith.select %642, %634, %643 : vector<4x16xi1>, vector<4x16xf32>
    %645 = vector.extract_strided_slice %609 {offsets = [0, 0], sizes = [4, 16], strides = [1, 1]} : vector<4x64xf32> to vector<4x16xf32>
    %646 = arith.negf %645 : vector<4x16xf32>
    %647 = math.exp %646 : vector<4x16xf32>
    %cst_155 = arith.constant 1.000000e+00 : f32
    %648 = vector.broadcast %cst_155 : f32 to vector<4x16xf32>
    %649 = arith.addf %648, %647 : vector<4x16xf32>
    %650 = arith.divf %648, %649 : vector<4x16xf32>
    %651 = vector.extract_strided_slice %609 {offsets = [0, 16], sizes = [4, 16], strides = [1, 1]} : vector<4x64xf32> to vector<4x16xf32>
    %652 = arith.negf %651 : vector<4x16xf32>
    %653 = math.exp %652 : vector<4x16xf32>
    %cst_156 = arith.constant 1.000000e+00 : f32
    %654 = vector.broadcast %cst_156 : f32 to vector<4x16xf32>
    %655 = arith.addf %654, %653 : vector<4x16xf32>
    %656 = arith.divf %654, %655 : vector<4x16xf32>
    %657 = vector.extract_strided_slice %609 {offsets = [0, 32], sizes = [4, 16], strides = [1, 1]} : vector<4x64xf32> to vector<4x16xf32>
    %658 = math.tanh %657 : vector<4x16xf32>
    %659 = vector.extract_strided_slice %609 {offsets = [0, 48], sizes = [4, 16], strides = [1, 1]} : vector<4x64xf32> to vector<4x16xf32>
    %660 = arith.negf %659 : vector<4x16xf32>
    %661 = math.exp %660 : vector<4x16xf32>
    %cst_157 = arith.constant 1.000000e+00 : f32
    %662 = vector.broadcast %cst_157 : f32 to vector<4x16xf32>
    %663 = arith.addf %662, %661 : vector<4x16xf32>
    %664 = arith.divf %662, %663 : vector<4x16xf32>
    %665 = arith.mulf %656, %580 : vector<4x16xf32>
    %666 = arith.mulf %650, %658 : vector<4x16xf32>
    %667 = arith.addf %665, %666 : vector<4x16xf32>
    %668 = math.tanh %667 : vector<4x16xf32>
    %669 = arith.mulf %664, %668 : vector<4x16xf32>
    %670 = vector.shape_cast %597 : vector<4x1xi1> to vector<4x1xi1>
    %671 = vector.broadcast %670 : vector<4x1xi1> to vector<4x16xi1>
    %672 = arith.select %671, %669, %577 : vector<4x16xi1>, vector<4x16xf32>
    %673 = vector.shape_cast %597 : vector<4x1xi1> to vector<4x1xi1>
    %674 = vector.broadcast %673 : vector<4x1xi1> to vector<4x16xi1>
    %675 = arith.select %674, %667, %580 : vector<4x16xi1>, vector<4x16xf32>
    %cst_158 = arith.constant 0.000000e+00 : f32
    %676 = vector.shape_cast %597 : vector<4x1xi1> to vector<4x1xi1>
    %677 = vector.broadcast %676 : vector<4x1xi1> to vector<4x16xi1>
    %678 = vector.broadcast %cst_158 : f32 to vector<4x16xf32>
    %679 = arith.select %677, %669, %678 : vector<4x16xi1>, vector<4x16xf32>
    %680 = arith.index_cast %c6_i32 : i32 to index
    %c0_159 = arith.constant 0 : index
    %c0_160 = arith.constant 0 : index
    %681 = vector.load %arg26[%680, %c0_159, %c0_160] : memref<8x4x16xf32, #tpu.memory_space<vmem>>, vector<1x4x16xf32>
    %682 = vector.shape_cast %681 : vector<1x4x16xf32> to vector<4x16xf32>
    %683 = vector.shape_cast %644 : vector<4x16xf32> to vector<1x4x16xf32>
    tpu.vector_store %arg26[%680, %c0_159, %c0_160], %683 {strides = array<i32>} : memref<8x4x16xf32, #tpu.memory_space<vmem>>, vector<1x4x16xf32>,
    %684 = arith.index_cast %593 : i32 to index
    %c0_161 = arith.constant 0 : index
    %c0_162 = arith.constant 0 : index
    %685 = vector.load %arg28[%684, %c0_161, %c0_162] : memref<8x4x16xf32, #tpu.memory_space<vmem>>, vector<1x4x16xf32>
    %686 = vector.shape_cast %685 : vector<1x4x16xf32> to vector<4x16xf32>
    %687 = vector.shape_cast %679 : vector<4x16xf32> to vector<1x4x16xf32>
    tpu.vector_store %arg28[%684, %c0_161, %c0_162], %687 {strides = array<i32>} : memref<8x4x16xf32, #tpu.memory_space<vmem>>, vector<1x4x16xf32>,
    %c7_i32_163 = arith.constant 7 : i32
    %c7_i32_164 = arith.constant 7 : i32
    %688 = arith.subi %c7_i32_164, %c7_i32_163 : i32
    %689 = vector.broadcast %c7_i32_163 : i32 to vector<4x1xi32>
    %690 = arith.cmpi slt, %689, %0 : vector<4x1xi32>
    %691 = vector.broadcast %688 : i32 to vector<4x1xi32>
    %692 = arith.cmpi slt, %691, %0 : vector<4x1xi32>
    %693 = arith.index_cast %c7_i32_163 : i32 to index
    %c0_165 = arith.constant 0 : index
    %c0_166 = arith.constant 0 : index
    %694 = vector.load %arg30[%693, %c0_165, %c0_166] : memref<8x4x64xf32, #tpu.memory_space<vmem>>, vector<1x4x64xf32>
    %695 = vector.shape_cast %694 : vector<1x4x64xf32> to vector<4x64xf32>
    %696 = arith.truncf %637 : vector<4x16xf32> to vector<4x16xbf16>
    %cst_167 = arith.constant dense<0.000000e+00> : vector<4x64xf32>
    %697 = tpu.matmul %696, %17, %cst_167 {dimension_numbers = #tpu.dot_dimension_numbers<[1], [0], [0], [1], [0, 0, 1, 1], [], []>} : vector<4x16xbf16>, vector<16x64xbf16>, vector<4x64xf32> -> vector<4x64xf32>
    %698 = arith.addf %695, %697 : vector<4x64xf32>
    %699 = arith.index_cast %688 : i32 to index
    %c0_168 = arith.constant 0 : index
    %c0_169 = arith.constant 0 : index
    %700 = vector.load %arg31[%699, %c0_168, %c0_169] : memref<8x4x64xf32, #tpu.memory_space<vmem>>, vector<1x4x64xf32>
    %701 = vector.shape_cast %700 : vector<1x4x64xf32> to vector<4x64xf32>
    %702 = arith.truncf %672 : vector<4x16xf32> to vector<4x16xbf16>
    %cst_170 = arith.constant dense<0.000000e+00> : vector<4x64xf32>
    %703 = tpu.matmul %702, %18, %cst_170 {dimension_numbers = #tpu.dot_dimension_numbers<[1], [0], [0], [1], [0, 0, 1, 1], [], []>} : vector<4x16xbf16>, vector<16x64xbf16>, vector<4x64xf32> -> vector<4x64xf32>
    %704 = arith.addf %701, %703 : vector<4x64xf32>
    %705 = vector.extract_strided_slice %698 {offsets = [0, 0], sizes = [4, 16], strides = [1, 1]} : vector<4x64xf32> to vector<4x16xf32>
    %706 = arith.negf %705 : vector<4x16xf32>
    %707 = math.exp %706 : vector<4x16xf32>
    %cst_171 = arith.constant 1.000000e+00 : f32
    %708 = vector.broadcast %cst_171 : f32 to vector<4x16xf32>
    %709 = arith.addf %708, %707 : vector<4x16xf32>
    %710 = arith.divf %708, %709 : vector<4x16xf32>
    %711 = vector.extract_strided_slice %698 {offsets = [0, 16], sizes = [4, 16], strides = [1, 1]} : vector<4x64xf32> to vector<4x16xf32>
    %712 = arith.negf %711 : vector<4x16xf32>
    %713 = math.exp %712 : vector<4x16xf32>
    %cst_172 = arith.constant 1.000000e+00 : f32
    %714 = vector.broadcast %cst_172 : f32 to vector<4x16xf32>
    %715 = arith.addf %714, %713 : vector<4x16xf32>
    %716 = arith.divf %714, %715 : vector<4x16xf32>
    %717 = vector.extract_strided_slice %698 {offsets = [0, 32], sizes = [4, 16], strides = [1, 1]} : vector<4x64xf32> to vector<4x16xf32>
    %718 = math.tanh %717 : vector<4x16xf32>
    %719 = vector.extract_strided_slice %698 {offsets = [0, 48], sizes = [4, 16], strides = [1, 1]} : vector<4x64xf32> to vector<4x16xf32>
    %720 = arith.negf %719 : vector<4x16xf32>
    %721 = math.exp %720 : vector<4x16xf32>
    %cst_173 = arith.constant 1.000000e+00 : f32
    %722 = vector.broadcast %cst_173 : f32 to vector<4x16xf32>
    %723 = arith.addf %722, %721 : vector<4x16xf32>
    %724 = arith.divf %722, %723 : vector<4x16xf32>
    %725 = arith.mulf %716, %640 : vector<4x16xf32>
    %726 = arith.mulf %710, %718 : vector<4x16xf32>
    %727 = arith.addf %725, %726 : vector<4x16xf32>
    %728 = math.tanh %727 : vector<4x16xf32>
    %729 = arith.mulf %724, %728 : vector<4x16xf32>
    %730 = vector.shape_cast %690 : vector<4x1xi1> to vector<4x1xi1>
    %731 = vector.broadcast %730 : vector<4x1xi1> to vector<4x16xi1>
    %732 = arith.select %731, %729, %637 : vector<4x16xi1>, vector<4x16xf32>
    %733 = vector.shape_cast %690 : vector<4x1xi1> to vector<4x1xi1>
    %734 = vector.broadcast %733 : vector<4x1xi1> to vector<4x16xi1>
    %735 = arith.select %734, %727, %640 : vector<4x16xi1>, vector<4x16xf32>
    %cst_174 = arith.constant 0.000000e+00 : f32
    %736 = vector.shape_cast %690 : vector<4x1xi1> to vector<4x1xi1>
    %737 = vector.broadcast %736 : vector<4x1xi1> to vector<4x16xi1>
    %738 = vector.broadcast %cst_174 : f32 to vector<4x16xf32>
    %739 = arith.select %737, %729, %738 : vector<4x16xi1>, vector<4x16xf32>
    %740 = vector.extract_strided_slice %704 {offsets = [0, 0], sizes = [4, 16], strides = [1, 1]} : vector<4x64xf32> to vector<4x16xf32>
    %741 = arith.negf %740 : vector<4x16xf32>
    %742 = math.exp %741 : vector<4x16xf32>
    %cst_175 = arith.constant 1.000000e+00 : f32
    %743 = vector.broadcast %cst_175 : f32 to vector<4x16xf32>
    %744 = arith.addf %743, %742 : vector<4x16xf32>
    %745 = arith.divf %743, %744 : vector<4x16xf32>
    %746 = vector.extract_strided_slice %704 {offsets = [0, 16], sizes = [4, 16], strides = [1, 1]} : vector<4x64xf32> to vector<4x16xf32>
    %747 = arith.negf %746 : vector<4x16xf32>
    %748 = math.exp %747 : vector<4x16xf32>
    %cst_176 = arith.constant 1.000000e+00 : f32
    %749 = vector.broadcast %cst_176 : f32 to vector<4x16xf32>
    %750 = arith.addf %749, %748 : vector<4x16xf32>
    %751 = arith.divf %749, %750 : vector<4x16xf32>
    %752 = vector.extract_strided_slice %704 {offsets = [0, 32], sizes = [4, 16], strides = [1, 1]} : vector<4x64xf32> to vector<4x16xf32>
    %753 = math.tanh %752 : vector<4x16xf32>
    %754 = vector.extract_strided_slice %704 {offsets = [0, 48], sizes = [4, 16], strides = [1, 1]} : vector<4x64xf32> to vector<4x16xf32>
    %755 = arith.negf %754 : vector<4x16xf32>
    %756 = math.exp %755 : vector<4x16xf32>
    %cst_177 = arith.constant 1.000000e+00 : f32
    %757 = vector.broadcast %cst_177 : f32 to vector<4x16xf32>
    %758 = arith.addf %757, %756 : vector<4x16xf32>
    %759 = arith.divf %757, %758 : vector<4x16xf32>
    %760 = arith.mulf %751, %675 : vector<4x16xf32>
    %761 = arith.mulf %745, %753 : vector<4x16xf32>
    %762 = arith.addf %760, %761 : vector<4x16xf32>
    %763 = math.tanh %762 : vector<4x16xf32>
    %764 = arith.mulf %759, %763 : vector<4x16xf32>
    %765 = vector.shape_cast %692 : vector<4x1xi1> to vector<4x1xi1>
    %766 = vector.broadcast %765 : vector<4x1xi1> to vector<4x16xi1>
    %767 = arith.select %766, %764, %672 : vector<4x16xi1>, vector<4x16xf32>
    %768 = vector.shape_cast %692 : vector<4x1xi1> to vector<4x1xi1>
    %769 = vector.broadcast %768 : vector<4x1xi1> to vector<4x16xi1>
    %770 = arith.select %769, %762, %675 : vector<4x16xi1>, vector<4x16xf32>
    %cst_178 = arith.constant 0.000000e+00 : f32
    %771 = vector.shape_cast %692 : vector<4x1xi1> to vector<4x1xi1>
    %772 = vector.broadcast %771 : vector<4x1xi1> to vector<4x16xi1>
    %773 = vector.broadcast %cst_178 : f32 to vector<4x16xf32>
    %774 = arith.select %772, %764, %773 : vector<4x16xi1>, vector<4x16xf32>
    %775 = arith.index_cast %c7_i32_163 : i32 to index
    %c0_179 = arith.constant 0 : index
    %c0_180 = arith.constant 0 : index
    %776 = vector.load %arg26[%775, %c0_179, %c0_180] : memref<8x4x16xf32, #tpu.memory_space<vmem>>, vector<1x4x16xf32>
    %777 = vector.shape_cast %776 : vector<1x4x16xf32> to vector<4x16xf32>
    %778 = vector.shape_cast %739 : vector<4x16xf32> to vector<1x4x16xf32>
    tpu.vector_store %arg26[%775, %c0_179, %c0_180], %778 {strides = array<i32>} : memref<8x4x16xf32, #tpu.memory_space<vmem>>, vector<1x4x16xf32>,
    %779 = arith.index_cast %688 : i32 to index
    %c0_181 = arith.constant 0 : index
    %c0_182 = arith.constant 0 : index
    %780 = vector.load %arg28[%779, %c0_181, %c0_182] : memref<8x4x16xf32, #tpu.memory_space<vmem>>, vector<1x4x16xf32>
    %781 = vector.shape_cast %780 : vector<1x4x16xf32> to vector<4x16xf32>
    %782 = vector.shape_cast %774 : vector<4x16xf32> to vector<1x4x16xf32>
    tpu.vector_store %arg28[%779, %c0_181, %c0_182], %782 {strides = array<i32>} : memref<8x4x16xf32, #tpu.memory_space<vmem>>, vector<1x4x16xf32>,
    %c8_i32 = arith.constant 8 : i32
    %c0_183 = arith.constant 0 : index
    %c0_184 = arith.constant 0 : index
    %c0_185 = arith.constant 0 : index
    %783 = vector.load %arg26[%c0_183, %c0_184, %c0_185] : memref<8x4x16xf32, #tpu.memory_space<vmem>>, vector<8x4x16xf32>
    %784 = vector.shape_cast %783 : vector<8x4x16xf32> to vector<32x16xf32>
    %c0_186 = arith.constant 0 : index
    %c0_187 = arith.constant 0 : index
    %c0_188 = arith.constant 0 : index
    %785 = vector.load %arg28[%c0_186, %c0_187, %c0_188] : memref<8x4x16xf32, #tpu.memory_space<vmem>>, vector<8x4x16xf32>
    %786 = vector.shape_cast %785 : vector<8x4x16xf32> to vector<32x16xf32>
    %c0_189 = arith.constant 0 : index
    %c0_190 = arith.constant 0 : index
    %787 = vector.load %arg12[%c0_189, %c0_190] : memref<32x64xbf16, #tpu.memory_space<vmem>>, vector<32x64xbf16>
    %788 = arith.truncf %784 : vector<32x16xf32> to vector<32x16xbf16>
    %789 = vector.extract_strided_slice %787 {offsets = [0, 0], sizes = [16, 64], strides = [1, 1]} : vector<32x64xbf16> to vector<16x64xbf16>
    %cst_191 = arith.constant dense<0.000000e+00> : vector<32x64xf32>
    %790 = tpu.matmul %788, %789, %cst_191 {dimension_numbers = #tpu.dot_dimension_numbers<[1], [0], [0], [1], [0, 0, 1, 1], [], []>} : vector<32x16xbf16>, vector<16x64xbf16>, vector<32x64xf32> -> vector<32x64xf32>
    %791 = arith.truncf %786 : vector<32x16xf32> to vector<32x16xbf16>
    %792 = vector.extract_strided_slice %787 {offsets = [16, 0], sizes = [16, 64], strides = [1, 1]} : vector<32x64xbf16> to vector<16x64xbf16>
    %cst_192 = arith.constant dense<0.000000e+00> : vector<32x64xf32>
    %793 = tpu.matmul %791, %792, %cst_192 {dimension_numbers = #tpu.dot_dimension_numbers<[1], [0], [0], [1], [0, 0, 1, 1], [], []>} : vector<32x16xbf16>, vector<16x64xbf16>, vector<32x64xf32> -> vector<32x64xf32>
    %794 = arith.addf %790, %793 : vector<32x64xf32>
    %c0_193 = arith.constant 0 : index
    %c0_194 = arith.constant 0 : index
    %795 = vector.load %arg14[%c0_193, %c0_194] : memref<1x64xf32, #tpu.memory_space<vmem>>, vector<1x64xf32>
    %796 = vector.broadcast %795 : vector<1x64xf32> to vector<32x64xf32>
    %797 = arith.addf %794, %796 : vector<32x64xf32>
    %798 = vector.shape_cast %797 : vector<32x64xf32> to vector<8x4x64xf32>
    %c0_195 = arith.constant 0 : index
    %c0_196 = arith.constant 0 : index
    %c0_197 = arith.constant 0 : index
    %799 = vector.load %arg30[%c0_195, %c0_196, %c0_197] : memref<8x4x64xf32, #tpu.memory_space<vmem>>, vector<8x4x64xf32>
    tpu.vector_store %arg30[%c0_195, %c0_196, %c0_197], %798 {strides = array<i32>} : memref<8x4x64xf32, #tpu.memory_space<vmem>>, vector<8x4x64xf32>,
    %c0_198 = arith.constant 0 : index
    %c0_199 = arith.constant 0 : index
    %800 = vector.load %arg17[%c0_198, %c0_199] : memref<32x64xbf16, #tpu.memory_space<vmem>>, vector<32x64xbf16>
    %801 = arith.truncf %784 : vector<32x16xf32> to vector<32x16xbf16>
    %802 = vector.extract_strided_slice %800 {offsets = [0, 0], sizes = [16, 64], strides = [1, 1]} : vector<32x64xbf16> to vector<16x64xbf16>
    %cst_200 = arith.constant dense<0.000000e+00> : vector<32x64xf32>
    %803 = tpu.matmul %801, %802, %cst_200 {dimension_numbers = #tpu.dot_dimension_numbers<[1], [0], [0], [1], [0, 0, 1, 1], [], []>} : vector<32x16xbf16>, vector<16x64xbf16>, vector<32x64xf32> -> vector<32x64xf32>
    %804 = arith.truncf %786 : vector<32x16xf32> to vector<32x16xbf16>
    %805 = vector.extract_strided_slice %800 {offsets = [16, 0], sizes = [16, 64], strides = [1, 1]} : vector<32x64xbf16> to vector<16x64xbf16>
    %cst_201 = arith.constant dense<0.000000e+00> : vector<32x64xf32>
    %806 = tpu.matmul %804, %805, %cst_201 {dimension_numbers = #tpu.dot_dimension_numbers<[1], [0], [0], [1], [0, 0, 1, 1], [], []>} : vector<32x16xbf16>, vector<16x64xbf16>, vector<32x64xf32> -> vector<32x64xf32>
    %807 = arith.addf %803, %806 : vector<32x64xf32>
    %c0_202 = arith.constant 0 : index
    %c0_203 = arith.constant 0 : index
    %808 = vector.load %arg19[%c0_202, %c0_203] : memref<1x64xf32, #tpu.memory_space<vmem>>, vector<1x64xf32>
    %809 = vector.broadcast %808 : vector<1x64xf32> to vector<32x64xf32>
    %810 = arith.addf %807, %809 : vector<32x64xf32>
    %811 = vector.shape_cast %810 : vector<32x64xf32> to vector<8x4x64xf32>
    %c0_204 = arith.constant 0 : index
    %c0_205 = arith.constant 0 : index
    %c0_206 = arith.constant 0 : index
    %812 = vector.load %arg31[%c0_204, %c0_205, %c0_206] : memref<8x4x64xf32, #tpu.memory_space<vmem>>, vector<8x4x64xf32>
    tpu.vector_store %arg31[%c0_204, %c0_205, %c0_206], %811 {strides = array<i32>} : memref<8x4x64xf32, #tpu.memory_space<vmem>>, vector<8x4x64xf32>,
    %c0_207 = arith.constant 0 : index
    %c0_208 = arith.constant 0 : index
    %813 = vector.load %arg13[%c0_207, %c0_208] : memref<16x64xbf16, #tpu.memory_space<vmem>>, vector<16x64xbf16>
    %c0_209 = arith.constant 0 : index
    %c0_210 = arith.constant 0 : index
    %814 = vector.load %arg18[%c0_209, %c0_210] : memref<16x64xbf16, #tpu.memory_space<vmem>>, vector<16x64xbf16>
    %c0_211 = arith.constant 0 : index
    %c0_212 = arith.constant 0 : index
    %815 = vector.load %arg15[%c0_211, %c0_212] : memref<4x16xf32, #tpu.memory_space<vmem>>, vector<4x16xf32>
    %c0_213 = arith.constant 0 : index
    %c0_214 = arith.constant 0 : index
    %816 = vector.load %arg16[%c0_213, %c0_214] : memref<4x16xf32, #tpu.memory_space<vmem>>, vector<4x16xf32>
    %c0_215 = arith.constant 0 : index
    %c0_216 = arith.constant 0 : index
    %817 = vector.load %arg20[%c0_215, %c0_216] : memref<4x16xf32, #tpu.memory_space<vmem>>, vector<4x16xf32>
    %c0_217 = arith.constant 0 : index
    %c0_218 = arith.constant 0 : index
    %818 = vector.load %arg21[%c0_217, %c0_218] : memref<4x16xf32, #tpu.memory_space<vmem>>, vector<4x16xf32>
    %c0_i32_219 = arith.constant 0 : i32
    %c7_i32_220 = arith.constant 7 : i32
    %819 = arith.subi %c7_i32_220, %c0_i32_219 : i32
    %820 = vector.broadcast %c0_i32_219 : i32 to vector<4x1xi32>
    %821 = arith.cmpi slt, %820, %0 : vector<4x1xi32>
    %822 = vector.broadcast %819 : i32 to vector<4x1xi32>
    %823 = arith.cmpi slt, %822, %0 : vector<4x1xi32>
    %824 = arith.index_cast %c0_i32_219 : i32 to index
    %c0_221 = arith.constant 0 : index
    %c0_222 = arith.constant 0 : index
    %825 = vector.load %arg30[%824, %c0_221, %c0_222] : memref<8x4x64xf32, #tpu.memory_space<vmem>>, vector<1x4x64xf32>
    %826 = vector.shape_cast %825 : vector<1x4x64xf32> to vector<4x64xf32>
    %827 = arith.truncf %815 : vector<4x16xf32> to vector<4x16xbf16>
    %cst_223 = arith.constant dense<0.000000e+00> : vector<4x64xf32>
    %828 = tpu.matmul %827, %813, %cst_223 {dimension_numbers = #tpu.dot_dimension_numbers<[1], [0], [0], [1], [0, 0, 1, 1], [], []>} : vector<4x16xbf16>, vector<16x64xbf16>, vector<4x64xf32> -> vector<4x64xf32>
    %829 = arith.addf %826, %828 : vector<4x64xf32>
    %830 = arith.index_cast %819 : i32 to index
    %c0_224 = arith.constant 0 : index
    %c0_225 = arith.constant 0 : index
    %831 = vector.load %arg31[%830, %c0_224, %c0_225] : memref<8x4x64xf32, #tpu.memory_space<vmem>>, vector<1x4x64xf32>
    %832 = vector.shape_cast %831 : vector<1x4x64xf32> to vector<4x64xf32>
    %833 = arith.truncf %817 : vector<4x16xf32> to vector<4x16xbf16>
    %cst_226 = arith.constant dense<0.000000e+00> : vector<4x64xf32>
    %834 = tpu.matmul %833, %814, %cst_226 {dimension_numbers = #tpu.dot_dimension_numbers<[1], [0], [0], [1], [0, 0, 1, 1], [], []>} : vector<4x16xbf16>, vector<16x64xbf16>, vector<4x64xf32> -> vector<4x64xf32>
    %835 = arith.addf %832, %834 : vector<4x64xf32>
    %836 = vector.extract_strided_slice %829 {offsets = [0, 0], sizes = [4, 16], strides = [1, 1]} : vector<4x64xf32> to vector<4x16xf32>
    %837 = arith.negf %836 : vector<4x16xf32>
    %838 = math.exp %837 : vector<4x16xf32>
    %cst_227 = arith.constant 1.000000e+00 : f32
    %839 = vector.broadcast %cst_227 : f32 to vector<4x16xf32>
    %840 = arith.addf %839, %838 : vector<4x16xf32>
    %841 = arith.divf %839, %840 : vector<4x16xf32>
    %842 = vector.extract_strided_slice %829 {offsets = [0, 16], sizes = [4, 16], strides = [1, 1]} : vector<4x64xf32> to vector<4x16xf32>
    %843 = arith.negf %842 : vector<4x16xf32>
    %844 = math.exp %843 : vector<4x16xf32>
    %cst_228 = arith.constant 1.000000e+00 : f32
    %845 = vector.broadcast %cst_228 : f32 to vector<4x16xf32>
    %846 = arith.addf %845, %844 : vector<4x16xf32>
    %847 = arith.divf %845, %846 : vector<4x16xf32>
    %848 = vector.extract_strided_slice %829 {offsets = [0, 32], sizes = [4, 16], strides = [1, 1]} : vector<4x64xf32> to vector<4x16xf32>
    %849 = math.tanh %848 : vector<4x16xf32>
    %850 = vector.extract_strided_slice %829 {offsets = [0, 48], sizes = [4, 16], strides = [1, 1]} : vector<4x64xf32> to vector<4x16xf32>
    %851 = arith.negf %850 : vector<4x16xf32>
    %852 = math.exp %851 : vector<4x16xf32>
    %cst_229 = arith.constant 1.000000e+00 : f32
    %853 = vector.broadcast %cst_229 : f32 to vector<4x16xf32>
    %854 = arith.addf %853, %852 : vector<4x16xf32>
    %855 = arith.divf %853, %854 : vector<4x16xf32>
    %856 = arith.mulf %847, %816 : vector<4x16xf32>
    %857 = arith.mulf %841, %849 : vector<4x16xf32>
    %858 = arith.addf %856, %857 : vector<4x16xf32>
    %859 = math.tanh %858 : vector<4x16xf32>
    %860 = arith.mulf %855, %859 : vector<4x16xf32>
    %861 = vector.shape_cast %821 : vector<4x1xi1> to vector<4x1xi1>
    %862 = vector.broadcast %861 : vector<4x1xi1> to vector<4x16xi1>
    %863 = arith.select %862, %860, %815 : vector<4x16xi1>, vector<4x16xf32>
    %864 = vector.shape_cast %821 : vector<4x1xi1> to vector<4x1xi1>
    %865 = vector.broadcast %864 : vector<4x1xi1> to vector<4x16xi1>
    %866 = arith.select %865, %858, %816 : vector<4x16xi1>, vector<4x16xf32>
    %cst_230 = arith.constant 0.000000e+00 : f32
    %867 = vector.shape_cast %821 : vector<4x1xi1> to vector<4x1xi1>
    %868 = vector.broadcast %867 : vector<4x1xi1> to vector<4x16xi1>
    %869 = vector.broadcast %cst_230 : f32 to vector<4x16xf32>
    %870 = arith.select %868, %860, %869 : vector<4x16xi1>, vector<4x16xf32>
    %871 = vector.extract_strided_slice %835 {offsets = [0, 0], sizes = [4, 16], strides = [1, 1]} : vector<4x64xf32> to vector<4x16xf32>
    %872 = arith.negf %871 : vector<4x16xf32>
    %873 = math.exp %872 : vector<4x16xf32>
    %cst_231 = arith.constant 1.000000e+00 : f32
    %874 = vector.broadcast %cst_231 : f32 to vector<4x16xf32>
    %875 = arith.addf %874, %873 : vector<4x16xf32>
    %876 = arith.divf %874, %875 : vector<4x16xf32>
    %877 = vector.extract_strided_slice %835 {offsets = [0, 16], sizes = [4, 16], strides = [1, 1]} : vector<4x64xf32> to vector<4x16xf32>
    %878 = arith.negf %877 : vector<4x16xf32>
    %879 = math.exp %878 : vector<4x16xf32>
    %cst_232 = arith.constant 1.000000e+00 : f32
    %880 = vector.broadcast %cst_232 : f32 to vector<4x16xf32>
    %881 = arith.addf %880, %879 : vector<4x16xf32>
    %882 = arith.divf %880, %881 : vector<4x16xf32>
    %883 = vector.extract_strided_slice %835 {offsets = [0, 32], sizes = [4, 16], strides = [1, 1]} : vector<4x64xf32> to vector<4x16xf32>
    %884 = math.tanh %883 : vector<4x16xf32>
    %885 = vector.extract_strided_slice %835 {offsets = [0, 48], sizes = [4, 16], strides = [1, 1]} : vector<4x64xf32> to vector<4x16xf32>
    %886 = arith.negf %885 : vector<4x16xf32>
    %887 = math.exp %886 : vector<4x16xf32>
    %cst_233 = arith.constant 1.000000e+00 : f32
    %888 = vector.broadcast %cst_233 : f32 to vector<4x16xf32>
    %889 = arith.addf %888, %887 : vector<4x16xf32>
    %890 = arith.divf %888, %889 : vector<4x16xf32>
    %891 = arith.mulf %882, %818 : vector<4x16xf32>
    %892 = arith.mulf %876, %884 : vector<4x16xf32>
    %893 = arith.addf %891, %892 : vector<4x16xf32>
    %894 = math.tanh %893 : vector<4x16xf32>
    %895 = arith.mulf %890, %894 : vector<4x16xf32>
    %896 = vector.shape_cast %823 : vector<4x1xi1> to vector<4x1xi1>
    %897 = vector.broadcast %896 : vector<4x1xi1> to vector<4x16xi1>
    %898 = arith.select %897, %895, %817 : vector<4x16xi1>, vector<4x16xf32>
    %899 = vector.shape_cast %823 : vector<4x1xi1> to vector<4x1xi1>
    %900 = vector.broadcast %899 : vector<4x1xi1> to vector<4x16xi1>
    %901 = arith.select %900, %893, %818 : vector<4x16xi1>, vector<4x16xf32>
    %cst_234 = arith.constant 0.000000e+00 : f32
    %902 = vector.shape_cast %823 : vector<4x1xi1> to vector<4x1xi1>
    %903 = vector.broadcast %902 : vector<4x1xi1> to vector<4x16xi1>
    %904 = vector.broadcast %cst_234 : f32 to vector<4x16xf32>
    %905 = arith.select %903, %895, %904 : vector<4x16xi1>, vector<4x16xf32>
    %906 = arith.index_cast %c0_i32_219 : i32 to index
    %c0_235 = arith.constant 0 : index
    %c0_236 = arith.constant 0 : index
    %907 = vector.load %arg27[%906, %c0_235, %c0_236] : memref<8x4x16xf32, #tpu.memory_space<vmem>>, vector<1x4x16xf32>
    %908 = vector.shape_cast %907 : vector<1x4x16xf32> to vector<4x16xf32>
    %909 = vector.shape_cast %870 : vector<4x16xf32> to vector<1x4x16xf32>
    tpu.vector_store %arg27[%906, %c0_235, %c0_236], %909 {strides = array<i32>} : memref<8x4x16xf32, #tpu.memory_space<vmem>>, vector<1x4x16xf32>,
    %910 = arith.index_cast %819 : i32 to index
    %c0_237 = arith.constant 0 : index
    %c0_238 = arith.constant 0 : index
    %911 = vector.load %arg29[%910, %c0_237, %c0_238] : memref<8x4x16xf32, #tpu.memory_space<vmem>>, vector<1x4x16xf32>
    %912 = vector.shape_cast %911 : vector<1x4x16xf32> to vector<4x16xf32>
    %913 = vector.shape_cast %905 : vector<4x16xf32> to vector<1x4x16xf32>
    tpu.vector_store %arg29[%910, %c0_237, %c0_238], %913 {strides = array<i32>} : memref<8x4x16xf32, #tpu.memory_space<vmem>>, vector<1x4x16xf32>,
    %c1_i32_239 = arith.constant 1 : i32
    %c7_i32_240 = arith.constant 7 : i32
    %914 = arith.subi %c7_i32_240, %c1_i32_239 : i32
    %915 = vector.broadcast %c1_i32_239 : i32 to vector<4x1xi32>
    %916 = arith.cmpi slt, %915, %0 : vector<4x1xi32>
    %917 = vector.broadcast %914 : i32 to vector<4x1xi32>
    %918 = arith.cmpi slt, %917, %0 : vector<4x1xi32>
    %919 = arith.index_cast %c1_i32_239 : i32 to index
    %c0_241 = arith.constant 0 : index
    %c0_242 = arith.constant 0 : index
    %920 = vector.load %arg30[%919, %c0_241, %c0_242] : memref<8x4x64xf32, #tpu.memory_space<vmem>>, vector<1x4x64xf32>
    %921 = vector.shape_cast %920 : vector<1x4x64xf32> to vector<4x64xf32>
    %922 = arith.truncf %863 : vector<4x16xf32> to vector<4x16xbf16>
    %cst_243 = arith.constant dense<0.000000e+00> : vector<4x64xf32>
    %923 = tpu.matmul %922, %813, %cst_243 {dimension_numbers = #tpu.dot_dimension_numbers<[1], [0], [0], [1], [0, 0, 1, 1], [], []>} : vector<4x16xbf16>, vector<16x64xbf16>, vector<4x64xf32> -> vector<4x64xf32>
    %924 = arith.addf %921, %923 : vector<4x64xf32>
    %925 = arith.index_cast %914 : i32 to index
    %c0_244 = arith.constant 0 : index
    %c0_245 = arith.constant 0 : index
    %926 = vector.load %arg31[%925, %c0_244, %c0_245] : memref<8x4x64xf32, #tpu.memory_space<vmem>>, vector<1x4x64xf32>
    %927 = vector.shape_cast %926 : vector<1x4x64xf32> to vector<4x64xf32>
    %928 = arith.truncf %898 : vector<4x16xf32> to vector<4x16xbf16>
    %cst_246 = arith.constant dense<0.000000e+00> : vector<4x64xf32>
    %929 = tpu.matmul %928, %814, %cst_246 {dimension_numbers = #tpu.dot_dimension_numbers<[1], [0], [0], [1], [0, 0, 1, 1], [], []>} : vector<4x16xbf16>, vector<16x64xbf16>, vector<4x64xf32> -> vector<4x64xf32>
    %930 = arith.addf %927, %929 : vector<4x64xf32>
    %931 = vector.extract_strided_slice %924 {offsets = [0, 0], sizes = [4, 16], strides = [1, 1]} : vector<4x64xf32> to vector<4x16xf32>
    %932 = arith.negf %931 : vector<4x16xf32>
    %933 = math.exp %932 : vector<4x16xf32>
    %cst_247 = arith.constant 1.000000e+00 : f32
    %934 = vector.broadcast %cst_247 : f32 to vector<4x16xf32>
    %935 = arith.addf %934, %933 : vector<4x16xf32>
    %936 = arith.divf %934, %935 : vector<4x16xf32>
    %937 = vector.extract_strided_slice %924 {offsets = [0, 16], sizes = [4, 16], strides = [1, 1]} : vector<4x64xf32> to vector<4x16xf32>
    %938 = arith.negf %937 : vector<4x16xf32>
    %939 = math.exp %938 : vector<4x16xf32>
    %cst_248 = arith.constant 1.000000e+00 : f32
    %940 = vector.broadcast %cst_248 : f32 to vector<4x16xf32>
    %941 = arith.addf %940, %939 : vector<4x16xf32>
    %942 = arith.divf %940, %941 : vector<4x16xf32>
    %943 = vector.extract_strided_slice %924 {offsets = [0, 32], sizes = [4, 16], strides = [1, 1]} : vector<4x64xf32> to vector<4x16xf32>
    %944 = math.tanh %943 : vector<4x16xf32>
    %945 = vector.extract_strided_slice %924 {offsets = [0, 48], sizes = [4, 16], strides = [1, 1]} : vector<4x64xf32> to vector<4x16xf32>
    %946 = arith.negf %945 : vector<4x16xf32>
    %947 = math.exp %946 : vector<4x16xf32>
    %cst_249 = arith.constant 1.000000e+00 : f32
    %948 = vector.broadcast %cst_249 : f32 to vector<4x16xf32>
    %949 = arith.addf %948, %947 : vector<4x16xf32>
    %950 = arith.divf %948, %949 : vector<4x16xf32>
    %951 = arith.mulf %942, %866 : vector<4x16xf32>
    %952 = arith.mulf %936, %944 : vector<4x16xf32>
    %953 = arith.addf %951, %952 : vector<4x16xf32>
    %954 = math.tanh %953 : vector<4x16xf32>
    %955 = arith.mulf %950, %954 : vector<4x16xf32>
    %956 = vector.shape_cast %916 : vector<4x1xi1> to vector<4x1xi1>
    %957 = vector.broadcast %956 : vector<4x1xi1> to vector<4x16xi1>
    %958 = arith.select %957, %955, %863 : vector<4x16xi1>, vector<4x16xf32>
    %959 = vector.shape_cast %916 : vector<4x1xi1> to vector<4x1xi1>
    %960 = vector.broadcast %959 : vector<4x1xi1> to vector<4x16xi1>
    %961 = arith.select %960, %953, %866 : vector<4x16xi1>, vector<4x16xf32>
    %cst_250 = arith.constant 0.000000e+00 : f32
    %962 = vector.shape_cast %916 : vector<4x1xi1> to vector<4x1xi1>
    %963 = vector.broadcast %962 : vector<4x1xi1> to vector<4x16xi1>
    %964 = vector.broadcast %cst_250 : f32 to vector<4x16xf32>
    %965 = arith.select %963, %955, %964 : vector<4x16xi1>, vector<4x16xf32>
    %966 = vector.extract_strided_slice %930 {offsets = [0, 0], sizes = [4, 16], strides = [1, 1]} : vector<4x64xf32> to vector<4x16xf32>
    %967 = arith.negf %966 : vector<4x16xf32>
    %968 = math.exp %967 : vector<4x16xf32>
    %cst_251 = arith.constant 1.000000e+00 : f32
    %969 = vector.broadcast %cst_251 : f32 to vector<4x16xf32>
    %970 = arith.addf %969, %968 : vector<4x16xf32>
    %971 = arith.divf %969, %970 : vector<4x16xf32>
    %972 = vector.extract_strided_slice %930 {offsets = [0, 16], sizes = [4, 16], strides = [1, 1]} : vector<4x64xf32> to vector<4x16xf32>
    %973 = arith.negf %972 : vector<4x16xf32>
    %974 = math.exp %973 : vector<4x16xf32>
    %cst_252 = arith.constant 1.000000e+00 : f32
    %975 = vector.broadcast %cst_252 : f32 to vector<4x16xf32>
    %976 = arith.addf %975, %974 : vector<4x16xf32>
    %977 = arith.divf %975, %976 : vector<4x16xf32>
    %978 = vector.extract_strided_slice %930 {offsets = [0, 32], sizes = [4, 16], strides = [1, 1]} : vector<4x64xf32> to vector<4x16xf32>
    %979 = math.tanh %978 : vector<4x16xf32>
    %980 = vector.extract_strided_slice %930 {offsets = [0, 48], sizes = [4, 16], strides = [1, 1]} : vector<4x64xf32> to vector<4x16xf32>
    %981 = arith.negf %980 : vector<4x16xf32>
    %982 = math.exp %981 : vector<4x16xf32>
    %cst_253 = arith.constant 1.000000e+00 : f32
    %983 = vector.broadcast %cst_253 : f32 to vector<4x16xf32>
    %984 = arith.addf %983, %982 : vector<4x16xf32>
    %985 = arith.divf %983, %984 : vector<4x16xf32>
    %986 = arith.mulf %977, %901 : vector<4x16xf32>
    %987 = arith.mulf %971, %979 : vector<4x16xf32>
    %988 = arith.addf %986, %987 : vector<4x16xf32>
    %989 = math.tanh %988 : vector<4x16xf32>
    %990 = arith.mulf %985, %989 : vector<4x16xf32>
    %991 = vector.shape_cast %918 : vector<4x1xi1> to vector<4x1xi1>
    %992 = vector.broadcast %991 : vector<4x1xi1> to vector<4x16xi1>
    %993 = arith.select %992, %990, %898 : vector<4x16xi1>, vector<4x16xf32>
    %994 = vector.shape_cast %918 : vector<4x1xi1> to vector<4x1xi1>
    %995 = vector.broadcast %994 : vector<4x1xi1> to vector<4x16xi1>
    %996 = arith.select %995, %988, %901 : vector<4x16xi1>, vector<4x16xf32>
    %cst_254 = arith.constant 0.000000e+00 : f32
    %997 = vector.shape_cast %918 : vector<4x1xi1> to vector<4x1xi1>
    %998 = vector.broadcast %997 : vector<4x1xi1> to vector<4x16xi1>
    %999 = vector.broadcast %cst_254 : f32 to vector<4x16xf32>
    %1000 = arith.select %998, %990, %999 : vector<4x16xi1>, vector<4x16xf32>
    %1001 = arith.index_cast %c1_i32_239 : i32 to index
    %c0_255 = arith.constant 0 : index
    %c0_256 = arith.constant 0 : index
    %1002 = vector.load %arg27[%1001, %c0_255, %c0_256] : memref<8x4x16xf32, #tpu.memory_space<vmem>>, vector<1x4x16xf32>
    %1003 = vector.shape_cast %1002 : vector<1x4x16xf32> to vector<4x16xf32>
    %1004 = vector.shape_cast %965 : vector<4x16xf32> to vector<1x4x16xf32>
    tpu.vector_store %arg27[%1001, %c0_255, %c0_256], %1004 {strides = array<i32>} : memref<8x4x16xf32, #tpu.memory_space<vmem>>, vector<1x4x16xf32>,
    %1005 = arith.index_cast %914 : i32 to index
    %c0_257 = arith.constant 0 : index
    %c0_258 = arith.constant 0 : index
    %1006 = vector.load %arg29[%1005, %c0_257, %c0_258] : memref<8x4x16xf32, #tpu.memory_space<vmem>>, vector<1x4x16xf32>
    %1007 = vector.shape_cast %1006 : vector<1x4x16xf32> to vector<4x16xf32>
    %1008 = vector.shape_cast %1000 : vector<4x16xf32> to vector<1x4x16xf32>
    tpu.vector_store %arg29[%1005, %c0_257, %c0_258], %1008 {strides = array<i32>} : memref<8x4x16xf32, #tpu.memory_space<vmem>>, vector<1x4x16xf32>,
    %c2_i32_259 = arith.constant 2 : i32
    %c7_i32_260 = arith.constant 7 : i32
    %1009 = arith.subi %c7_i32_260, %c2_i32_259 : i32
    %1010 = vector.broadcast %c2_i32_259 : i32 to vector<4x1xi32>
    %1011 = arith.cmpi slt, %1010, %0 : vector<4x1xi32>
    %1012 = vector.broadcast %1009 : i32 to vector<4x1xi32>
    %1013 = arith.cmpi slt, %1012, %0 : vector<4x1xi32>
    %1014 = arith.index_cast %c2_i32_259 : i32 to index
    %c0_261 = arith.constant 0 : index
    %c0_262 = arith.constant 0 : index
    %1015 = vector.load %arg30[%1014, %c0_261, %c0_262] : memref<8x4x64xf32, #tpu.memory_space<vmem>>, vector<1x4x64xf32>
    %1016 = vector.shape_cast %1015 : vector<1x4x64xf32> to vector<4x64xf32>
    %1017 = arith.truncf %958 : vector<4x16xf32> to vector<4x16xbf16>
    %cst_263 = arith.constant dense<0.000000e+00> : vector<4x64xf32>
    %1018 = tpu.matmul %1017, %813, %cst_263 {dimension_numbers = #tpu.dot_dimension_numbers<[1], [0], [0], [1], [0, 0, 1, 1], [], []>} : vector<4x16xbf16>, vector<16x64xbf16>, vector<4x64xf32> -> vector<4x64xf32>
    %1019 = arith.addf %1016, %1018 : vector<4x64xf32>
    %1020 = arith.index_cast %1009 : i32 to index
    %c0_264 = arith.constant 0 : index
    %c0_265 = arith.constant 0 : index
    %1021 = vector.load %arg31[%1020, %c0_264, %c0_265] : memref<8x4x64xf32, #tpu.memory_space<vmem>>, vector<1x4x64xf32>
    %1022 = vector.shape_cast %1021 : vector<1x4x64xf32> to vector<4x64xf32>
    %1023 = arith.truncf %993 : vector<4x16xf32> to vector<4x16xbf16>
    %cst_266 = arith.constant dense<0.000000e+00> : vector<4x64xf32>
    %1024 = tpu.matmul %1023, %814, %cst_266 {dimension_numbers = #tpu.dot_dimension_numbers<[1], [0], [0], [1], [0, 0, 1, 1], [], []>} : vector<4x16xbf16>, vector<16x64xbf16>, vector<4x64xf32> -> vector<4x64xf32>
    %1025 = arith.addf %1022, %1024 : vector<4x64xf32>
    %1026 = vector.extract_strided_slice %1019 {offsets = [0, 0], sizes = [4, 16], strides = [1, 1]} : vector<4x64xf32> to vector<4x16xf32>
    %1027 = arith.negf %1026 : vector<4x16xf32>
    %1028 = math.exp %1027 : vector<4x16xf32>
    %cst_267 = arith.constant 1.000000e+00 : f32
    %1029 = vector.broadcast %cst_267 : f32 to vector<4x16xf32>
    %1030 = arith.addf %1029, %1028 : vector<4x16xf32>
    %1031 = arith.divf %1029, %1030 : vector<4x16xf32>
    %1032 = vector.extract_strided_slice %1019 {offsets = [0, 16], sizes = [4, 16], strides = [1, 1]} : vector<4x64xf32> to vector<4x16xf32>
    %1033 = arith.negf %1032 : vector<4x16xf32>
    %1034 = math.exp %1033 : vector<4x16xf32>
    %cst_268 = arith.constant 1.000000e+00 : f32
    %1035 = vector.broadcast %cst_268 : f32 to vector<4x16xf32>
    %1036 = arith.addf %1035, %1034 : vector<4x16xf32>
    %1037 = arith.divf %1035, %1036 : vector<4x16xf32>
    %1038 = vector.extract_strided_slice %1019 {offsets = [0, 32], sizes = [4, 16], strides = [1, 1]} : vector<4x64xf32> to vector<4x16xf32>
    %1039 = math.tanh %1038 : vector<4x16xf32>
    %1040 = vector.extract_strided_slice %1019 {offsets = [0, 48], sizes = [4, 16], strides = [1, 1]} : vector<4x64xf32> to vector<4x16xf32>
    %1041 = arith.negf %1040 : vector<4x16xf32>
    %1042 = math.exp %1041 : vector<4x16xf32>
    %cst_269 = arith.constant 1.000000e+00 : f32
    %1043 = vector.broadcast %cst_269 : f32 to vector<4x16xf32>
    %1044 = arith.addf %1043, %1042 : vector<4x16xf32>
    %1045 = arith.divf %1043, %1044 : vector<4x16xf32>
    %1046 = arith.mulf %1037, %961 : vector<4x16xf32>
    %1047 = arith.mulf %1031, %1039 : vector<4x16xf32>
    %1048 = arith.addf %1046, %1047 : vector<4x16xf32>
    %1049 = math.tanh %1048 : vector<4x16xf32>
    %1050 = arith.mulf %1045, %1049 : vector<4x16xf32>
    %1051 = vector.shape_cast %1011 : vector<4x1xi1> to vector<4x1xi1>
    %1052 = vector.broadcast %1051 : vector<4x1xi1> to vector<4x16xi1>
    %1053 = arith.select %1052, %1050, %958 : vector<4x16xi1>, vector<4x16xf32>
    %1054 = vector.shape_cast %1011 : vector<4x1xi1> to vector<4x1xi1>
    %1055 = vector.broadcast %1054 : vector<4x1xi1> to vector<4x16xi1>
    %1056 = arith.select %1055, %1048, %961 : vector<4x16xi1>, vector<4x16xf32>
    %cst_270 = arith.constant 0.000000e+00 : f32
    %1057 = vector.shape_cast %1011 : vector<4x1xi1> to vector<4x1xi1>
    %1058 = vector.broadcast %1057 : vector<4x1xi1> to vector<4x16xi1>
    %1059 = vector.broadcast %cst_270 : f32 to vector<4x16xf32>
    %1060 = arith.select %1058, %1050, %1059 : vector<4x16xi1>, vector<4x16xf32>
    %1061 = vector.extract_strided_slice %1025 {offsets = [0, 0], sizes = [4, 16], strides = [1, 1]} : vector<4x64xf32> to vector<4x16xf32>
    %1062 = arith.negf %1061 : vector<4x16xf32>
    %1063 = math.exp %1062 : vector<4x16xf32>
    %cst_271 = arith.constant 1.000000e+00 : f32
    %1064 = vector.broadcast %cst_271 : f32 to vector<4x16xf32>
    %1065 = arith.addf %1064, %1063 : vector<4x16xf32>
    %1066 = arith.divf %1064, %1065 : vector<4x16xf32>
    %1067 = vector.extract_strided_slice %1025 {offsets = [0, 16], sizes = [4, 16], strides = [1, 1]} : vector<4x64xf32> to vector<4x16xf32>
    %1068 = arith.negf %1067 : vector<4x16xf32>
    %1069 = math.exp %1068 : vector<4x16xf32>
    %cst_272 = arith.constant 1.000000e+00 : f32
    %1070 = vector.broadcast %cst_272 : f32 to vector<4x16xf32>
    %1071 = arith.addf %1070, %1069 : vector<4x16xf32>
    %1072 = arith.divf %1070, %1071 : vector<4x16xf32>
    %1073 = vector.extract_strided_slice %1025 {offsets = [0, 32], sizes = [4, 16], strides = [1, 1]} : vector<4x64xf32> to vector<4x16xf32>
    %1074 = math.tanh %1073 : vector<4x16xf32>
    %1075 = vector.extract_strided_slice %1025 {offsets = [0, 48], sizes = [4, 16], strides = [1, 1]} : vector<4x64xf32> to vector<4x16xf32>
    %1076 = arith.negf %1075 : vector<4x16xf32>
    %1077 = math.exp %1076 : vector<4x16xf32>
    %cst_273 = arith.constant 1.000000e+00 : f32
    %1078 = vector.broadcast %cst_273 : f32 to vector<4x16xf32>
    %1079 = arith.addf %1078, %1077 : vector<4x16xf32>
    %1080 = arith.divf %1078, %1079 : vector<4x16xf32>
    %1081 = arith.mulf %1072, %996 : vector<4x16xf32>
    %1082 = arith.mulf %1066, %1074 : vector<4x16xf32>
    %1083 = arith.addf %1081, %1082 : vector<4x16xf32>
    %1084 = math.tanh %1083 : vector<4x16xf32>
    %1085 = arith.mulf %1080, %1084 : vector<4x16xf32>
    %1086 = vector.shape_cast %1013 : vector<4x1xi1> to vector<4x1xi1>
    %1087 = vector.broadcast %1086 : vector<4x1xi1> to vector<4x16xi1>
    %1088 = arith.select %1087, %1085, %993 : vector<4x16xi1>, vector<4x16xf32>
    %1089 = vector.shape_cast %1013 : vector<4x1xi1> to vector<4x1xi1>
    %1090 = vector.broadcast %1089 : vector<4x1xi1> to vector<4x16xi1>
    %1091 = arith.select %1090, %1083, %996 : vector<4x16xi1>, vector<4x16xf32>
    %cst_274 = arith.constant 0.000000e+00 : f32
    %1092 = vector.shape_cast %1013 : vector<4x1xi1> to vector<4x1xi1>
    %1093 = vector.broadcast %1092 : vector<4x1xi1> to vector<4x16xi1>
    %1094 = vector.broadcast %cst_274 : f32 to vector<4x16xf32>
    %1095 = arith.select %1093, %1085, %1094 : vector<4x16xi1>, vector<4x16xf32>
    %1096 = arith.index_cast %c2_i32_259 : i32 to index
    %c0_275 = arith.constant 0 : index
    %c0_276 = arith.constant 0 : index
    %1097 = vector.load %arg27[%1096, %c0_275, %c0_276] : memref<8x4x16xf32, #tpu.memory_space<vmem>>, vector<1x4x16xf32>
    %1098 = vector.shape_cast %1097 : vector<1x4x16xf32> to vector<4x16xf32>
    %1099 = vector.shape_cast %1060 : vector<4x16xf32> to vector<1x4x16xf32>
    tpu.vector_store %arg27[%1096, %c0_275, %c0_276], %1099 {strides = array<i32>} : memref<8x4x16xf32, #tpu.memory_space<vmem>>, vector<1x4x16xf32>,
    %1100 = arith.index_cast %1009 : i32 to index
    %c0_277 = arith.constant 0 : index
    %c0_278 = arith.constant 0 : index
    %1101 = vector.load %arg29[%1100, %c0_277, %c0_278] : memref<8x4x16xf32, #tpu.memory_space<vmem>>, vector<1x4x16xf32>
    %1102 = vector.shape_cast %1101 : vector<1x4x16xf32> to vector<4x16xf32>
    %1103 = vector.shape_cast %1095 : vector<4x16xf32> to vector<1x4x16xf32>
    tpu.vector_store %arg29[%1100, %c0_277, %c0_278], %1103 {strides = array<i32>} : memref<8x4x16xf32, #tpu.memory_space<vmem>>, vector<1x4x16xf32>,
    %c3_i32_279 = arith.constant 3 : i32
    %c7_i32_280 = arith.constant 7 : i32
    %1104 = arith.subi %c7_i32_280, %c3_i32_279 : i32
    %1105 = vector.broadcast %c3_i32_279 : i32 to vector<4x1xi32>
    %1106 = arith.cmpi slt, %1105, %0 : vector<4x1xi32>
    %1107 = vector.broadcast %1104 : i32 to vector<4x1xi32>
    %1108 = arith.cmpi slt, %1107, %0 : vector<4x1xi32>
    %1109 = arith.index_cast %c3_i32_279 : i32 to index
    %c0_281 = arith.constant 0 : index
    %c0_282 = arith.constant 0 : index
    %1110 = vector.load %arg30[%1109, %c0_281, %c0_282] : memref<8x4x64xf32, #tpu.memory_space<vmem>>, vector<1x4x64xf32>
    %1111 = vector.shape_cast %1110 : vector<1x4x64xf32> to vector<4x64xf32>
    %1112 = arith.truncf %1053 : vector<4x16xf32> to vector<4x16xbf16>
    %cst_283 = arith.constant dense<0.000000e+00> : vector<4x64xf32>
    %1113 = tpu.matmul %1112, %813, %cst_283 {dimension_numbers = #tpu.dot_dimension_numbers<[1], [0], [0], [1], [0, 0, 1, 1], [], []>} : vector<4x16xbf16>, vector<16x64xbf16>, vector<4x64xf32> -> vector<4x64xf32>
    %1114 = arith.addf %1111, %1113 : vector<4x64xf32>
    %1115 = arith.index_cast %1104 : i32 to index
    %c0_284 = arith.constant 0 : index
    %c0_285 = arith.constant 0 : index
    %1116 = vector.load %arg31[%1115, %c0_284, %c0_285] : memref<8x4x64xf32, #tpu.memory_space<vmem>>, vector<1x4x64xf32>
    %1117 = vector.shape_cast %1116 : vector<1x4x64xf32> to vector<4x64xf32>
    %1118 = arith.truncf %1088 : vector<4x16xf32> to vector<4x16xbf16>
    %cst_286 = arith.constant dense<0.000000e+00> : vector<4x64xf32>
    %1119 = tpu.matmul %1118, %814, %cst_286 {dimension_numbers = #tpu.dot_dimension_numbers<[1], [0], [0], [1], [0, 0, 1, 1], [], []>} : vector<4x16xbf16>, vector<16x64xbf16>, vector<4x64xf32> -> vector<4x64xf32>
    %1120 = arith.addf %1117, %1119 : vector<4x64xf32>
    %1121 = vector.extract_strided_slice %1114 {offsets = [0, 0], sizes = [4, 16], strides = [1, 1]} : vector<4x64xf32> to vector<4x16xf32>
    %1122 = arith.negf %1121 : vector<4x16xf32>
    %1123 = math.exp %1122 : vector<4x16xf32>
    %cst_287 = arith.constant 1.000000e+00 : f32
    %1124 = vector.broadcast %cst_287 : f32 to vector<4x16xf32>
    %1125 = arith.addf %1124, %1123 : vector<4x16xf32>
    %1126 = arith.divf %1124, %1125 : vector<4x16xf32>
    %1127 = vector.extract_strided_slice %1114 {offsets = [0, 16], sizes = [4, 16], strides = [1, 1]} : vector<4x64xf32> to vector<4x16xf32>
    %1128 = arith.negf %1127 : vector<4x16xf32>
    %1129 = math.exp %1128 : vector<4x16xf32>
    %cst_288 = arith.constant 1.000000e+00 : f32
    %1130 = vector.broadcast %cst_288 : f32 to vector<4x16xf32>
    %1131 = arith.addf %1130, %1129 : vector<4x16xf32>
    %1132 = arith.divf %1130, %1131 : vector<4x16xf32>
    %1133 = vector.extract_strided_slice %1114 {offsets = [0, 32], sizes = [4, 16], strides = [1, 1]} : vector<4x64xf32> to vector<4x16xf32>
    %1134 = math.tanh %1133 : vector<4x16xf32>
    %1135 = vector.extract_strided_slice %1114 {offsets = [0, 48], sizes = [4, 16], strides = [1, 1]} : vector<4x64xf32> to vector<4x16xf32>
    %1136 = arith.negf %1135 : vector<4x16xf32>
    %1137 = math.exp %1136 : vector<4x16xf32>
    %cst_289 = arith.constant 1.000000e+00 : f32
    %1138 = vector.broadcast %cst_289 : f32 to vector<4x16xf32>
    %1139 = arith.addf %1138, %1137 : vector<4x16xf32>
    %1140 = arith.divf %1138, %1139 : vector<4x16xf32>
    %1141 = arith.mulf %1132, %1056 : vector<4x16xf32>
    %1142 = arith.mulf %1126, %1134 : vector<4x16xf32>
    %1143 = arith.addf %1141, %1142 : vector<4x16xf32>
    %1144 = math.tanh %1143 : vector<4x16xf32>
    %1145 = arith.mulf %1140, %1144 : vector<4x16xf32>
    %1146 = vector.shape_cast %1106 : vector<4x1xi1> to vector<4x1xi1>
    %1147 = vector.broadcast %1146 : vector<4x1xi1> to vector<4x16xi1>
    %1148 = arith.select %1147, %1145, %1053 : vector<4x16xi1>, vector<4x16xf32>
    %1149 = vector.shape_cast %1106 : vector<4x1xi1> to vector<4x1xi1>
    %1150 = vector.broadcast %1149 : vector<4x1xi1> to vector<4x16xi1>
    %1151 = arith.select %1150, %1143, %1056 : vector<4x16xi1>, vector<4x16xf32>
    %cst_290 = arith.constant 0.000000e+00 : f32
    %1152 = vector.shape_cast %1106 : vector<4x1xi1> to vector<4x1xi1>
    %1153 = vector.broadcast %1152 : vector<4x1xi1> to vector<4x16xi1>
    %1154 = vector.broadcast %cst_290 : f32 to vector<4x16xf32>
    %1155 = arith.select %1153, %1145, %1154 : vector<4x16xi1>, vector<4x16xf32>
    %1156 = vector.extract_strided_slice %1120 {offsets = [0, 0], sizes = [4, 16], strides = [1, 1]} : vector<4x64xf32> to vector<4x16xf32>
    %1157 = arith.negf %1156 : vector<4x16xf32>
    %1158 = math.exp %1157 : vector<4x16xf32>
    %cst_291 = arith.constant 1.000000e+00 : f32
    %1159 = vector.broadcast %cst_291 : f32 to vector<4x16xf32>
    %1160 = arith.addf %1159, %1158 : vector<4x16xf32>
    %1161 = arith.divf %1159, %1160 : vector<4x16xf32>
    %1162 = vector.extract_strided_slice %1120 {offsets = [0, 16], sizes = [4, 16], strides = [1, 1]} : vector<4x64xf32> to vector<4x16xf32>
    %1163 = arith.negf %1162 : vector<4x16xf32>
    %1164 = math.exp %1163 : vector<4x16xf32>
    %cst_292 = arith.constant 1.000000e+00 : f32
    %1165 = vector.broadcast %cst_292 : f32 to vector<4x16xf32>
    %1166 = arith.addf %1165, %1164 : vector<4x16xf32>
    %1167 = arith.divf %1165, %1166 : vector<4x16xf32>
    %1168 = vector.extract_strided_slice %1120 {offsets = [0, 32], sizes = [4, 16], strides = [1, 1]} : vector<4x64xf32> to vector<4x16xf32>
    %1169 = math.tanh %1168 : vector<4x16xf32>
    %1170 = vector.extract_strided_slice %1120 {offsets = [0, 48], sizes = [4, 16], strides = [1, 1]} : vector<4x64xf32> to vector<4x16xf32>
    %1171 = arith.negf %1170 : vector<4x16xf32>
    %1172 = math.exp %1171 : vector<4x16xf32>
    %cst_293 = arith.constant 1.000000e+00 : f32
    %1173 = vector.broadcast %cst_293 : f32 to vector<4x16xf32>
    %1174 = arith.addf %1173, %1172 : vector<4x16xf32>
    %1175 = arith.divf %1173, %1174 : vector<4x16xf32>
    %1176 = arith.mulf %1167, %1091 : vector<4x16xf32>
    %1177 = arith.mulf %1161, %1169 : vector<4x16xf32>
    %1178 = arith.addf %1176, %1177 : vector<4x16xf32>
    %1179 = math.tanh %1178 : vector<4x16xf32>
    %1180 = arith.mulf %1175, %1179 : vector<4x16xf32>
    %1181 = vector.shape_cast %1108 : vector<4x1xi1> to vector<4x1xi1>
    %1182 = vector.broadcast %1181 : vector<4x1xi1> to vector<4x16xi1>
    %1183 = arith.select %1182, %1180, %1088 : vector<4x16xi1>, vector<4x16xf32>
    %1184 = vector.shape_cast %1108 : vector<4x1xi1> to vector<4x1xi1>
    %1185 = vector.broadcast %1184 : vector<4x1xi1> to vector<4x16xi1>
    %1186 = arith.select %1185, %1178, %1091 : vector<4x16xi1>, vector<4x16xf32>
    %cst_294 = arith.constant 0.000000e+00 : f32
    %1187 = vector.shape_cast %1108 : vector<4x1xi1> to vector<4x1xi1>
    %1188 = vector.broadcast %1187 : vector<4x1xi1> to vector<4x16xi1>
    %1189 = vector.broadcast %cst_294 : f32 to vector<4x16xf32>
    %1190 = arith.select %1188, %1180, %1189 : vector<4x16xi1>, vector<4x16xf32>
    %1191 = arith.index_cast %c3_i32_279 : i32 to index
    %c0_295 = arith.constant 0 : index
    %c0_296 = arith.constant 0 : index
    %1192 = vector.load %arg27[%1191, %c0_295, %c0_296] : memref<8x4x16xf32, #tpu.memory_space<vmem>>, vector<1x4x16xf32>
    %1193 = vector.shape_cast %1192 : vector<1x4x16xf32> to vector<4x16xf32>
    %1194 = vector.shape_cast %1155 : vector<4x16xf32> to vector<1x4x16xf32>
    tpu.vector_store %arg27[%1191, %c0_295, %c0_296], %1194 {strides = array<i32>} : memref<8x4x16xf32, #tpu.memory_space<vmem>>, vector<1x4x16xf32>,
    %1195 = arith.index_cast %1104 : i32 to index
    %c0_297 = arith.constant 0 : index
    %c0_298 = arith.constant 0 : index
    %1196 = vector.load %arg29[%1195, %c0_297, %c0_298] : memref<8x4x16xf32, #tpu.memory_space<vmem>>, vector<1x4x16xf32>
    %1197 = vector.shape_cast %1196 : vector<1x4x16xf32> to vector<4x16xf32>
    %1198 = vector.shape_cast %1190 : vector<4x16xf32> to vector<1x4x16xf32>
    tpu.vector_store %arg29[%1195, %c0_297, %c0_298], %1198 {strides = array<i32>} : memref<8x4x16xf32, #tpu.memory_space<vmem>>, vector<1x4x16xf32>,
    %c4_i32_299 = arith.constant 4 : i32
    %c7_i32_300 = arith.constant 7 : i32
    %1199 = arith.subi %c7_i32_300, %c4_i32_299 : i32
    %1200 = vector.broadcast %c4_i32_299 : i32 to vector<4x1xi32>
    %1201 = arith.cmpi slt, %1200, %0 : vector<4x1xi32>
    %1202 = vector.broadcast %1199 : i32 to vector<4x1xi32>
    %1203 = arith.cmpi slt, %1202, %0 : vector<4x1xi32>
    %1204 = arith.index_cast %c4_i32_299 : i32 to index
    %c0_301 = arith.constant 0 : index
    %c0_302 = arith.constant 0 : index
    %1205 = vector.load %arg30[%1204, %c0_301, %c0_302] : memref<8x4x64xf32, #tpu.memory_space<vmem>>, vector<1x4x64xf32>
    %1206 = vector.shape_cast %1205 : vector<1x4x64xf32> to vector<4x64xf32>
    %1207 = arith.truncf %1148 : vector<4x16xf32> to vector<4x16xbf16>
    %cst_303 = arith.constant dense<0.000000e+00> : vector<4x64xf32>
    %1208 = tpu.matmul %1207, %813, %cst_303 {dimension_numbers = #tpu.dot_dimension_numbers<[1], [0], [0], [1], [0, 0, 1, 1], [], []>} : vector<4x16xbf16>, vector<16x64xbf16>, vector<4x64xf32> -> vector<4x64xf32>
    %1209 = arith.addf %1206, %1208 : vector<4x64xf32>
    %1210 = arith.index_cast %1199 : i32 to index
    %c0_304 = arith.constant 0 : index
    %c0_305 = arith.constant 0 : index
    %1211 = vector.load %arg31[%1210, %c0_304, %c0_305] : memref<8x4x64xf32, #tpu.memory_space<vmem>>, vector<1x4x64xf32>
    %1212 = vector.shape_cast %1211 : vector<1x4x64xf32> to vector<4x64xf32>
    %1213 = arith.truncf %1183 : vector<4x16xf32> to vector<4x16xbf16>
    %cst_306 = arith.constant dense<0.000000e+00> : vector<4x64xf32>
    %1214 = tpu.matmul %1213, %814, %cst_306 {dimension_numbers = #tpu.dot_dimension_numbers<[1], [0], [0], [1], [0, 0, 1, 1], [], []>} : vector<4x16xbf16>, vector<16x64xbf16>, vector<4x64xf32> -> vector<4x64xf32>
    %1215 = arith.addf %1212, %1214 : vector<4x64xf32>
    %1216 = vector.extract_strided_slice %1209 {offsets = [0, 0], sizes = [4, 16], strides = [1, 1]} : vector<4x64xf32> to vector<4x16xf32>
    %1217 = arith.negf %1216 : vector<4x16xf32>
    %1218 = math.exp %1217 : vector<4x16xf32>
    %cst_307 = arith.constant 1.000000e+00 : f32
    %1219 = vector.broadcast %cst_307 : f32 to vector<4x16xf32>
    %1220 = arith.addf %1219, %1218 : vector<4x16xf32>
    %1221 = arith.divf %1219, %1220 : vector<4x16xf32>
    %1222 = vector.extract_strided_slice %1209 {offsets = [0, 16], sizes = [4, 16], strides = [1, 1]} : vector<4x64xf32> to vector<4x16xf32>
    %1223 = arith.negf %1222 : vector<4x16xf32>
    %1224 = math.exp %1223 : vector<4x16xf32>
    %cst_308 = arith.constant 1.000000e+00 : f32
    %1225 = vector.broadcast %cst_308 : f32 to vector<4x16xf32>
    %1226 = arith.addf %1225, %1224 : vector<4x16xf32>
    %1227 = arith.divf %1225, %1226 : vector<4x16xf32>
    %1228 = vector.extract_strided_slice %1209 {offsets = [0, 32], sizes = [4, 16], strides = [1, 1]} : vector<4x64xf32> to vector<4x16xf32>
    %1229 = math.tanh %1228 : vector<4x16xf32>
    %1230 = vector.extract_strided_slice %1209 {offsets = [0, 48], sizes = [4, 16], strides = [1, 1]} : vector<4x64xf32> to vector<4x16xf32>
    %1231 = arith.negf %1230 : vector<4x16xf32>
    %1232 = math.exp %1231 : vector<4x16xf32>
    %cst_309 = arith.constant 1.000000e+00 : f32
    %1233 = vector.broadcast %cst_309 : f32 to vector<4x16xf32>
    %1234 = arith.addf %1233, %1232 : vector<4x16xf32>
    %1235 = arith.divf %1233, %1234 : vector<4x16xf32>
    %1236 = arith.mulf %1227, %1151 : vector<4x16xf32>
    %1237 = arith.mulf %1221, %1229 : vector<4x16xf32>
    %1238 = arith.addf %1236, %1237 : vector<4x16xf32>
    %1239 = math.tanh %1238 : vector<4x16xf32>
    %1240 = arith.mulf %1235, %1239 : vector<4x16xf32>
    %1241 = vector.shape_cast %1201 : vector<4x1xi1> to vector<4x1xi1>
    %1242 = vector.broadcast %1241 : vector<4x1xi1> to vector<4x16xi1>
    %1243 = arith.select %1242, %1240, %1148 : vector<4x16xi1>, vector<4x16xf32>
    %1244 = vector.shape_cast %1201 : vector<4x1xi1> to vector<4x1xi1>
    %1245 = vector.broadcast %1244 : vector<4x1xi1> to vector<4x16xi1>
    %1246 = arith.select %1245, %1238, %1151 : vector<4x16xi1>, vector<4x16xf32>
    %cst_310 = arith.constant 0.000000e+00 : f32
    %1247 = vector.shape_cast %1201 : vector<4x1xi1> to vector<4x1xi1>
    %1248 = vector.broadcast %1247 : vector<4x1xi1> to vector<4x16xi1>
    %1249 = vector.broadcast %cst_310 : f32 to vector<4x16xf32>
    %1250 = arith.select %1248, %1240, %1249 : vector<4x16xi1>, vector<4x16xf32>
    %1251 = vector.extract_strided_slice %1215 {offsets = [0, 0], sizes = [4, 16], strides = [1, 1]} : vector<4x64xf32> to vector<4x16xf32>
    %1252 = arith.negf %1251 : vector<4x16xf32>
    %1253 = math.exp %1252 : vector<4x16xf32>
    %cst_311 = arith.constant 1.000000e+00 : f32
    %1254 = vector.broadcast %cst_311 : f32 to vector<4x16xf32>
    %1255 = arith.addf %1254, %1253 : vector<4x16xf32>
    %1256 = arith.divf %1254, %1255 : vector<4x16xf32>
    %1257 = vector.extract_strided_slice %1215 {offsets = [0, 16], sizes = [4, 16], strides = [1, 1]} : vector<4x64xf32> to vector<4x16xf32>
    %1258 = arith.negf %1257 : vector<4x16xf32>
    %1259 = math.exp %1258 : vector<4x16xf32>
    %cst_312 = arith.constant 1.000000e+00 : f32
    %1260 = vector.broadcast %cst_312 : f32 to vector<4x16xf32>
    %1261 = arith.addf %1260, %1259 : vector<4x16xf32>
    %1262 = arith.divf %1260, %1261 : vector<4x16xf32>
    %1263 = vector.extract_strided_slice %1215 {offsets = [0, 32], sizes = [4, 16], strides = [1, 1]} : vector<4x64xf32> to vector<4x16xf32>
    %1264 = math.tanh %1263 : vector<4x16xf32>
    %1265 = vector.extract_strided_slice %1215 {offsets = [0, 48], sizes = [4, 16], strides = [1, 1]} : vector<4x64xf32> to vector<4x16xf32>
    %1266 = arith.negf %1265 : vector<4x16xf32>
    %1267 = math.exp %1266 : vector<4x16xf32>
    %cst_313 = arith.constant 1.000000e+00 : f32
    %1268 = vector.broadcast %cst_313 : f32 to vector<4x16xf32>
    %1269 = arith.addf %1268, %1267 : vector<4x16xf32>
    %1270 = arith.divf %1268, %1269 : vector<4x16xf32>
    %1271 = arith.mulf %1262, %1186 : vector<4x16xf32>
    %1272 = arith.mulf %1256, %1264 : vector<4x16xf32>
    %1273 = arith.addf %1271, %1272 : vector<4x16xf32>
    %1274 = math.tanh %1273 : vector<4x16xf32>
    %1275 = arith.mulf %1270, %1274 : vector<4x16xf32>
    %1276 = vector.shape_cast %1203 : vector<4x1xi1> to vector<4x1xi1>
    %1277 = vector.broadcast %1276 : vector<4x1xi1> to vector<4x16xi1>
    %1278 = arith.select %1277, %1275, %1183 : vector<4x16xi1>, vector<4x16xf32>
    %1279 = vector.shape_cast %1203 : vector<4x1xi1> to vector<4x1xi1>
    %1280 = vector.broadcast %1279 : vector<4x1xi1> to vector<4x16xi1>
    %1281 = arith.select %1280, %1273, %1186 : vector<4x16xi1>, vector<4x16xf32>
    %cst_314 = arith.constant 0.000000e+00 : f32
    %1282 = vector.shape_cast %1203 : vector<4x1xi1> to vector<4x1xi1>
    %1283 = vector.broadcast %1282 : vector<4x1xi1> to vector<4x16xi1>
    %1284 = vector.broadcast %cst_314 : f32 to vector<4x16xf32>
    %1285 = arith.select %1283, %1275, %1284 : vector<4x16xi1>, vector<4x16xf32>
    %1286 = arith.index_cast %c4_i32_299 : i32 to index
    %c0_315 = arith.constant 0 : index
    %c0_316 = arith.constant 0 : index
    %1287 = vector.load %arg27[%1286, %c0_315, %c0_316] : memref<8x4x16xf32, #tpu.memory_space<vmem>>, vector<1x4x16xf32>
    %1288 = vector.shape_cast %1287 : vector<1x4x16xf32> to vector<4x16xf32>
    %1289 = vector.shape_cast %1250 : vector<4x16xf32> to vector<1x4x16xf32>
    tpu.vector_store %arg27[%1286, %c0_315, %c0_316], %1289 {strides = array<i32>} : memref<8x4x16xf32, #tpu.memory_space<vmem>>, vector<1x4x16xf32>,
    %1290 = arith.index_cast %1199 : i32 to index
    %c0_317 = arith.constant 0 : index
    %c0_318 = arith.constant 0 : index
    %1291 = vector.load %arg29[%1290, %c0_317, %c0_318] : memref<8x4x16xf32, #tpu.memory_space<vmem>>, vector<1x4x16xf32>
    %1292 = vector.shape_cast %1291 : vector<1x4x16xf32> to vector<4x16xf32>
    %1293 = vector.shape_cast %1285 : vector<4x16xf32> to vector<1x4x16xf32>
    tpu.vector_store %arg29[%1290, %c0_317, %c0_318], %1293 {strides = array<i32>} : memref<8x4x16xf32, #tpu.memory_space<vmem>>, vector<1x4x16xf32>,
    %c5_i32_319 = arith.constant 5 : i32
    %c7_i32_320 = arith.constant 7 : i32
    %1294 = arith.subi %c7_i32_320, %c5_i32_319 : i32
    %1295 = vector.broadcast %c5_i32_319 : i32 to vector<4x1xi32>
    %1296 = arith.cmpi slt, %1295, %0 : vector<4x1xi32>
    %1297 = vector.broadcast %1294 : i32 to vector<4x1xi32>
    %1298 = arith.cmpi slt, %1297, %0 : vector<4x1xi32>
    %1299 = arith.index_cast %c5_i32_319 : i32 to index
    %c0_321 = arith.constant 0 : index
    %c0_322 = arith.constant 0 : index
    %1300 = vector.load %arg30[%1299, %c0_321, %c0_322] : memref<8x4x64xf32, #tpu.memory_space<vmem>>, vector<1x4x64xf32>
    %1301 = vector.shape_cast %1300 : vector<1x4x64xf32> to vector<4x64xf32>
    %1302 = arith.truncf %1243 : vector<4x16xf32> to vector<4x16xbf16>
    %cst_323 = arith.constant dense<0.000000e+00> : vector<4x64xf32>
    %1303 = tpu.matmul %1302, %813, %cst_323 {dimension_numbers = #tpu.dot_dimension_numbers<[1], [0], [0], [1], [0, 0, 1, 1], [], []>} : vector<4x16xbf16>, vector<16x64xbf16>, vector<4x64xf32> -> vector<4x64xf32>
    %1304 = arith.addf %1301, %1303 : vector<4x64xf32>
    %1305 = arith.index_cast %1294 : i32 to index
    %c0_324 = arith.constant 0 : index
    %c0_325 = arith.constant 0 : index
    %1306 = vector.load %arg31[%1305, %c0_324, %c0_325] : memref<8x4x64xf32, #tpu.memory_space<vmem>>, vector<1x4x64xf32>
    %1307 = vector.shape_cast %1306 : vector<1x4x64xf32> to vector<4x64xf32>
    %1308 = arith.truncf %1278 : vector<4x16xf32> to vector<4x16xbf16>
    %cst_326 = arith.constant dense<0.000000e+00> : vector<4x64xf32>
    %1309 = tpu.matmul %1308, %814, %cst_326 {dimension_numbers = #tpu.dot_dimension_numbers<[1], [0], [0], [1], [0, 0, 1, 1], [], []>} : vector<4x16xbf16>, vector<16x64xbf16>, vector<4x64xf32> -> vector<4x64xf32>
    %1310 = arith.addf %1307, %1309 : vector<4x64xf32>
    %1311 = vector.extract_strided_slice %1304 {offsets = [0, 0], sizes = [4, 16], strides = [1, 1]} : vector<4x64xf32> to vector<4x16xf32>
    %1312 = arith.negf %1311 : vector<4x16xf32>
    %1313 = math.exp %1312 : vector<4x16xf32>
    %cst_327 = arith.constant 1.000000e+00 : f32
    %1314 = vector.broadcast %cst_327 : f32 to vector<4x16xf32>
    %1315 = arith.addf %1314, %1313 : vector<4x16xf32>
    %1316 = arith.divf %1314, %1315 : vector<4x16xf32>
    %1317 = vector.extract_strided_slice %1304 {offsets = [0, 16], sizes = [4, 16], strides = [1, 1]} : vector<4x64xf32> to vector<4x16xf32>
    %1318 = arith.negf %1317 : vector<4x16xf32>
    %1319 = math.exp %1318 : vector<4x16xf32>
    %cst_328 = arith.constant 1.000000e+00 : f32
    %1320 = vector.broadcast %cst_328 : f32 to vector<4x16xf32>
    %1321 = arith.addf %1320, %1319 : vector<4x16xf32>
    %1322 = arith.divf %1320, %1321 : vector<4x16xf32>
    %1323 = vector.extract_strided_slice %1304 {offsets = [0, 32], sizes = [4, 16], strides = [1, 1]} : vector<4x64xf32> to vector<4x16xf32>
    %1324 = math.tanh %1323 : vector<4x16xf32>
    %1325 = vector.extract_strided_slice %1304 {offsets = [0, 48], sizes = [4, 16], strides = [1, 1]} : vector<4x64xf32> to vector<4x16xf32>
    %1326 = arith.negf %1325 : vector<4x16xf32>
    %1327 = math.exp %1326 : vector<4x16xf32>
    %cst_329 = arith.constant 1.000000e+00 : f32
    %1328 = vector.broadcast %cst_329 : f32 to vector<4x16xf32>
    %1329 = arith.addf %1328, %1327 : vector<4x16xf32>
    %1330 = arith.divf %1328, %1329 : vector<4x16xf32>
    %1331 = arith.mulf %1322, %1246 : vector<4x16xf32>
    %1332 = arith.mulf %1316, %1324 : vector<4x16xf32>
    %1333 = arith.addf %1331, %1332 : vector<4x16xf32>
    %1334 = math.tanh %1333 : vector<4x16xf32>
    %1335 = arith.mulf %1330, %1334 : vector<4x16xf32>
    %1336 = vector.shape_cast %1296 : vector<4x1xi1> to vector<4x1xi1>
    %1337 = vector.broadcast %1336 : vector<4x1xi1> to vector<4x16xi1>
    %1338 = arith.select %1337, %1335, %1243 : vector<4x16xi1>, vector<4x16xf32>
    %1339 = vector.shape_cast %1296 : vector<4x1xi1> to vector<4x1xi1>
    %1340 = vector.broadcast %1339 : vector<4x1xi1> to vector<4x16xi1>
    %1341 = arith.select %1340, %1333, %1246 : vector<4x16xi1>, vector<4x16xf32>
    %cst_330 = arith.constant 0.000000e+00 : f32
    %1342 = vector.shape_cast %1296 : vector<4x1xi1> to vector<4x1xi1>
    %1343 = vector.broadcast %1342 : vector<4x1xi1> to vector<4x16xi1>
    %1344 = vector.broadcast %cst_330 : f32 to vector<4x16xf32>
    %1345 = arith.select %1343, %1335, %1344 : vector<4x16xi1>, vector<4x16xf32>
    %1346 = vector.extract_strided_slice %1310 {offsets = [0, 0], sizes = [4, 16], strides = [1, 1]} : vector<4x64xf32> to vector<4x16xf32>
    %1347 = arith.negf %1346 : vector<4x16xf32>
    %1348 = math.exp %1347 : vector<4x16xf32>
    %cst_331 = arith.constant 1.000000e+00 : f32
    %1349 = vector.broadcast %cst_331 : f32 to vector<4x16xf32>
    %1350 = arith.addf %1349, %1348 : vector<4x16xf32>
    %1351 = arith.divf %1349, %1350 : vector<4x16xf32>
    %1352 = vector.extract_strided_slice %1310 {offsets = [0, 16], sizes = [4, 16], strides = [1, 1]} : vector<4x64xf32> to vector<4x16xf32>
    %1353 = arith.negf %1352 : vector<4x16xf32>
    %1354 = math.exp %1353 : vector<4x16xf32>
    %cst_332 = arith.constant 1.000000e+00 : f32
    %1355 = vector.broadcast %cst_332 : f32 to vector<4x16xf32>
    %1356 = arith.addf %1355, %1354 : vector<4x16xf32>
    %1357 = arith.divf %1355, %1356 : vector<4x16xf32>
    %1358 = vector.extract_strided_slice %1310 {offsets = [0, 32], sizes = [4, 16], strides = [1, 1]} : vector<4x64xf32> to vector<4x16xf32>
    %1359 = math.tanh %1358 : vector<4x16xf32>
    %1360 = vector.extract_strided_slice %1310 {offsets = [0, 48], sizes = [4, 16], strides = [1, 1]} : vector<4x64xf32> to vector<4x16xf32>
    %1361 = arith.negf %1360 : vector<4x16xf32>
    %1362 = math.exp %1361 : vector<4x16xf32>
    %cst_333 = arith.constant 1.000000e+00 : f32
    %1363 = vector.broadcast %cst_333 : f32 to vector<4x16xf32>
    %1364 = arith.addf %1363, %1362 : vector<4x16xf32>
    %1365 = arith.divf %1363, %1364 : vector<4x16xf32>
    %1366 = arith.mulf %1357, %1281 : vector<4x16xf32>
    %1367 = arith.mulf %1351, %1359 : vector<4x16xf32>
    %1368 = arith.addf %1366, %1367 : vector<4x16xf32>
    %1369 = math.tanh %1368 : vector<4x16xf32>
    %1370 = arith.mulf %1365, %1369 : vector<4x16xf32>
    %1371 = vector.shape_cast %1298 : vector<4x1xi1> to vector<4x1xi1>
    %1372 = vector.broadcast %1371 : vector<4x1xi1> to vector<4x16xi1>
    %1373 = arith.select %1372, %1370, %1278 : vector<4x16xi1>, vector<4x16xf32>
    %1374 = vector.shape_cast %1298 : vector<4x1xi1> to vector<4x1xi1>
    %1375 = vector.broadcast %1374 : vector<4x1xi1> to vector<4x16xi1>
    %1376 = arith.select %1375, %1368, %1281 : vector<4x16xi1>, vector<4x16xf32>
    %cst_334 = arith.constant 0.000000e+00 : f32
    %1377 = vector.shape_cast %1298 : vector<4x1xi1> to vector<4x1xi1>
    %1378 = vector.broadcast %1377 : vector<4x1xi1> to vector<4x16xi1>
    %1379 = vector.broadcast %cst_334 : f32 to vector<4x16xf32>
    %1380 = arith.select %1378, %1370, %1379 : vector<4x16xi1>, vector<4x16xf32>
    %1381 = arith.index_cast %c5_i32_319 : i32 to index
    %c0_335 = arith.constant 0 : index
    %c0_336 = arith.constant 0 : index
    %1382 = vector.load %arg27[%1381, %c0_335, %c0_336] : memref<8x4x16xf32, #tpu.memory_space<vmem>>, vector<1x4x16xf32>
    %1383 = vector.shape_cast %1382 : vector<1x4x16xf32> to vector<4x16xf32>
    %1384 = vector.shape_cast %1345 : vector<4x16xf32> to vector<1x4x16xf32>
    tpu.vector_store %arg27[%1381, %c0_335, %c0_336], %1384 {strides = array<i32>} : memref<8x4x16xf32, #tpu.memory_space<vmem>>, vector<1x4x16xf32>,
    %1385 = arith.index_cast %1294 : i32 to index
    %c0_337 = arith.constant 0 : index
    %c0_338 = arith.constant 0 : index
    %1386 = vector.load %arg29[%1385, %c0_337, %c0_338] : memref<8x4x16xf32, #tpu.memory_space<vmem>>, vector<1x4x16xf32>
    %1387 = vector.shape_cast %1386 : vector<1x4x16xf32> to vector<4x16xf32>
    %1388 = vector.shape_cast %1380 : vector<4x16xf32> to vector<1x4x16xf32>
    tpu.vector_store %arg29[%1385, %c0_337, %c0_338], %1388 {strides = array<i32>} : memref<8x4x16xf32, #tpu.memory_space<vmem>>, vector<1x4x16xf32>,
    %c6_i32_339 = arith.constant 6 : i32
    %c7_i32_340 = arith.constant 7 : i32
    %1389 = arith.subi %c7_i32_340, %c6_i32_339 : i32
    %1390 = vector.broadcast %c6_i32_339 : i32 to vector<4x1xi32>
    %1391 = arith.cmpi slt, %1390, %0 : vector<4x1xi32>
    %1392 = vector.broadcast %1389 : i32 to vector<4x1xi32>
    %1393 = arith.cmpi slt, %1392, %0 : vector<4x1xi32>
    %1394 = arith.index_cast %c6_i32_339 : i32 to index
    %c0_341 = arith.constant 0 : index
    %c0_342 = arith.constant 0 : index
    %1395 = vector.load %arg30[%1394, %c0_341, %c0_342] : memref<8x4x64xf32, #tpu.memory_space<vmem>>, vector<1x4x64xf32>
    %1396 = vector.shape_cast %1395 : vector<1x4x64xf32> to vector<4x64xf32>
    %1397 = arith.truncf %1338 : vector<4x16xf32> to vector<4x16xbf16>
    %cst_343 = arith.constant dense<0.000000e+00> : vector<4x64xf32>
    %1398 = tpu.matmul %1397, %813, %cst_343 {dimension_numbers = #tpu.dot_dimension_numbers<[1], [0], [0], [1], [0, 0, 1, 1], [], []>} : vector<4x16xbf16>, vector<16x64xbf16>, vector<4x64xf32> -> vector<4x64xf32>
    %1399 = arith.addf %1396, %1398 : vector<4x64xf32>
    %1400 = arith.index_cast %1389 : i32 to index
    %c0_344 = arith.constant 0 : index
    %c0_345 = arith.constant 0 : index
    %1401 = vector.load %arg31[%1400, %c0_344, %c0_345] : memref<8x4x64xf32, #tpu.memory_space<vmem>>, vector<1x4x64xf32>
    %1402 = vector.shape_cast %1401 : vector<1x4x64xf32> to vector<4x64xf32>
    %1403 = arith.truncf %1373 : vector<4x16xf32> to vector<4x16xbf16>
    %cst_346 = arith.constant dense<0.000000e+00> : vector<4x64xf32>
    %1404 = tpu.matmul %1403, %814, %cst_346 {dimension_numbers = #tpu.dot_dimension_numbers<[1], [0], [0], [1], [0, 0, 1, 1], [], []>} : vector<4x16xbf16>, vector<16x64xbf16>, vector<4x64xf32> -> vector<4x64xf32>
    %1405 = arith.addf %1402, %1404 : vector<4x64xf32>
    %1406 = vector.extract_strided_slice %1399 {offsets = [0, 0], sizes = [4, 16], strides = [1, 1]} : vector<4x64xf32> to vector<4x16xf32>
    %1407 = arith.negf %1406 : vector<4x16xf32>
    %1408 = math.exp %1407 : vector<4x16xf32>
    %cst_347 = arith.constant 1.000000e+00 : f32
    %1409 = vector.broadcast %cst_347 : f32 to vector<4x16xf32>
    %1410 = arith.addf %1409, %1408 : vector<4x16xf32>
    %1411 = arith.divf %1409, %1410 : vector<4x16xf32>
    %1412 = vector.extract_strided_slice %1399 {offsets = [0, 16], sizes = [4, 16], strides = [1, 1]} : vector<4x64xf32> to vector<4x16xf32>
    %1413 = arith.negf %1412 : vector<4x16xf32>
    %1414 = math.exp %1413 : vector<4x16xf32>
    %cst_348 = arith.constant 1.000000e+00 : f32
    %1415 = vector.broadcast %cst_348 : f32 to vector<4x16xf32>
    %1416 = arith.addf %1415, %1414 : vector<4x16xf32>
    %1417 = arith.divf %1415, %1416 : vector<4x16xf32>
    %1418 = vector.extract_strided_slice %1399 {offsets = [0, 32], sizes = [4, 16], strides = [1, 1]} : vector<4x64xf32> to vector<4x16xf32>
    %1419 = math.tanh %1418 : vector<4x16xf32>
    %1420 = vector.extract_strided_slice %1399 {offsets = [0, 48], sizes = [4, 16], strides = [1, 1]} : vector<4x64xf32> to vector<4x16xf32>
    %1421 = arith.negf %1420 : vector<4x16xf32>
    %1422 = math.exp %1421 : vector<4x16xf32>
    %cst_349 = arith.constant 1.000000e+00 : f32
    %1423 = vector.broadcast %cst_349 : f32 to vector<4x16xf32>
    %1424 = arith.addf %1423, %1422 : vector<4x16xf32>
    %1425 = arith.divf %1423, %1424 : vector<4x16xf32>
    %1426 = arith.mulf %1417, %1341 : vector<4x16xf32>
    %1427 = arith.mulf %1411, %1419 : vector<4x16xf32>
    %1428 = arith.addf %1426, %1427 : vector<4x16xf32>
    %1429 = math.tanh %1428 : vector<4x16xf32>
    %1430 = arith.mulf %1425, %1429 : vector<4x16xf32>
    %1431 = vector.shape_cast %1391 : vector<4x1xi1> to vector<4x1xi1>
    %1432 = vector.broadcast %1431 : vector<4x1xi1> to vector<4x16xi1>
    %1433 = arith.select %1432, %1430, %1338 : vector<4x16xi1>, vector<4x16xf32>
    %1434 = vector.shape_cast %1391 : vector<4x1xi1> to vector<4x1xi1>
    %1435 = vector.broadcast %1434 : vector<4x1xi1> to vector<4x16xi1>
    %1436 = arith.select %1435, %1428, %1341 : vector<4x16xi1>, vector<4x16xf32>
    %cst_350 = arith.constant 0.000000e+00 : f32
    %1437 = vector.shape_cast %1391 : vector<4x1xi1> to vector<4x1xi1>
    %1438 = vector.broadcast %1437 : vector<4x1xi1> to vector<4x16xi1>
    %1439 = vector.broadcast %cst_350 : f32 to vector<4x16xf32>
    %1440 = arith.select %1438, %1430, %1439 : vector<4x16xi1>, vector<4x16xf32>
    %1441 = vector.extract_strided_slice %1405 {offsets = [0, 0], sizes = [4, 16], strides = [1, 1]} : vector<4x64xf32> to vector<4x16xf32>
    %1442 = arith.negf %1441 : vector<4x16xf32>
    %1443 = math.exp %1442 : vector<4x16xf32>
    %cst_351 = arith.constant 1.000000e+00 : f32
    %1444 = vector.broadcast %cst_351 : f32 to vector<4x16xf32>
    %1445 = arith.addf %1444, %1443 : vector<4x16xf32>
    %1446 = arith.divf %1444, %1445 : vector<4x16xf32>
    %1447 = vector.extract_strided_slice %1405 {offsets = [0, 16], sizes = [4, 16], strides = [1, 1]} : vector<4x64xf32> to vector<4x16xf32>
    %1448 = arith.negf %1447 : vector<4x16xf32>
    %1449 = math.exp %1448 : vector<4x16xf32>
    %cst_352 = arith.constant 1.000000e+00 : f32
    %1450 = vector.broadcast %cst_352 : f32 to vector<4x16xf32>
    %1451 = arith.addf %1450, %1449 : vector<4x16xf32>
    %1452 = arith.divf %1450, %1451 : vector<4x16xf32>
    %1453 = vector.extract_strided_slice %1405 {offsets = [0, 32], sizes = [4, 16], strides = [1, 1]} : vector<4x64xf32> to vector<4x16xf32>
    %1454 = math.tanh %1453 : vector<4x16xf32>
    %1455 = vector.extract_strided_slice %1405 {offsets = [0, 48], sizes = [4, 16], strides = [1, 1]} : vector<4x64xf32> to vector<4x16xf32>
    %1456 = arith.negf %1455 : vector<4x16xf32>
    %1457 = math.exp %1456 : vector<4x16xf32>
    %cst_353 = arith.constant 1.000000e+00 : f32
    %1458 = vector.broadcast %cst_353 : f32 to vector<4x16xf32>
    %1459 = arith.addf %1458, %1457 : vector<4x16xf32>
    %1460 = arith.divf %1458, %1459 : vector<4x16xf32>
    %1461 = arith.mulf %1452, %1376 : vector<4x16xf32>
    %1462 = arith.mulf %1446, %1454 : vector<4x16xf32>
    %1463 = arith.addf %1461, %1462 : vector<4x16xf32>
    %1464 = math.tanh %1463 : vector<4x16xf32>
    %1465 = arith.mulf %1460, %1464 : vector<4x16xf32>
    %1466 = vector.shape_cast %1393 : vector<4x1xi1> to vector<4x1xi1>
    %1467 = vector.broadcast %1466 : vector<4x1xi1> to vector<4x16xi1>
    %1468 = arith.select %1467, %1465, %1373 : vector<4x16xi1>, vector<4x16xf32>
    %1469 = vector.shape_cast %1393 : vector<4x1xi1> to vector<4x1xi1>
    %1470 = vector.broadcast %1469 : vector<4x1xi1> to vector<4x16xi1>
    %1471 = arith.select %1470, %1463, %1376 : vector<4x16xi1>, vector<4x16xf32>
    %cst_354 = arith.constant 0.000000e+00 : f32
    %1472 = vector.shape_cast %1393 : vector<4x1xi1> to vector<4x1xi1>
    %1473 = vector.broadcast %1472 : vector<4x1xi1> to vector<4x16xi1>
    %1474 = vector.broadcast %cst_354 : f32 to vector<4x16xf32>
    %1475 = arith.select %1473, %1465, %1474 : vector<4x16xi1>, vector<4x16xf32>
    %1476 = arith.index_cast %c6_i32_339 : i32 to index
    %c0_355 = arith.constant 0 : index
    %c0_356 = arith.constant 0 : index
    %1477 = vector.load %arg27[%1476, %c0_355, %c0_356] : memref<8x4x16xf32, #tpu.memory_space<vmem>>, vector<1x4x16xf32>
    %1478 = vector.shape_cast %1477 : vector<1x4x16xf32> to vector<4x16xf32>
    %1479 = vector.shape_cast %1440 : vector<4x16xf32> to vector<1x4x16xf32>
    tpu.vector_store %arg27[%1476, %c0_355, %c0_356], %1479 {strides = array<i32>} : memref<8x4x16xf32, #tpu.memory_space<vmem>>, vector<1x4x16xf32>,
    %1480 = arith.index_cast %1389 : i32 to index
    %c0_357 = arith.constant 0 : index
    %c0_358 = arith.constant 0 : index
    %1481 = vector.load %arg29[%1480, %c0_357, %c0_358] : memref<8x4x16xf32, #tpu.memory_space<vmem>>, vector<1x4x16xf32>
    %1482 = vector.shape_cast %1481 : vector<1x4x16xf32> to vector<4x16xf32>
    %1483 = vector.shape_cast %1475 : vector<4x16xf32> to vector<1x4x16xf32>
    tpu.vector_store %arg29[%1480, %c0_357, %c0_358], %1483 {strides = array<i32>} : memref<8x4x16xf32, #tpu.memory_space<vmem>>, vector<1x4x16xf32>,
    %c7_i32_359 = arith.constant 7 : i32
    %c7_i32_360 = arith.constant 7 : i32
    %1484 = arith.subi %c7_i32_360, %c7_i32_359 : i32
    %1485 = vector.broadcast %c7_i32_359 : i32 to vector<4x1xi32>
    %1486 = arith.cmpi slt, %1485, %0 : vector<4x1xi32>
    %1487 = vector.broadcast %1484 : i32 to vector<4x1xi32>
    %1488 = arith.cmpi slt, %1487, %0 : vector<4x1xi32>
    %1489 = arith.index_cast %c7_i32_359 : i32 to index
    %c0_361 = arith.constant 0 : index
    %c0_362 = arith.constant 0 : index
    %1490 = vector.load %arg30[%1489, %c0_361, %c0_362] : memref<8x4x64xf32, #tpu.memory_space<vmem>>, vector<1x4x64xf32>
    %1491 = vector.shape_cast %1490 : vector<1x4x64xf32> to vector<4x64xf32>
    %1492 = arith.truncf %1433 : vector<4x16xf32> to vector<4x16xbf16>
    %cst_363 = arith.constant dense<0.000000e+00> : vector<4x64xf32>
    %1493 = tpu.matmul %1492, %813, %cst_363 {dimension_numbers = #tpu.dot_dimension_numbers<[1], [0], [0], [1], [0, 0, 1, 1], [], []>} : vector<4x16xbf16>, vector<16x64xbf16>, vector<4x64xf32> -> vector<4x64xf32>
    %1494 = arith.addf %1491, %1493 : vector<4x64xf32>
    %1495 = arith.index_cast %1484 : i32 to index
    %c0_364 = arith.constant 0 : index
    %c0_365 = arith.constant 0 : index
    %1496 = vector.load %arg31[%1495, %c0_364, %c0_365] : memref<8x4x64xf32, #tpu.memory_space<vmem>>, vector<1x4x64xf32>
    %1497 = vector.shape_cast %1496 : vector<1x4x64xf32> to vector<4x64xf32>
    %1498 = arith.truncf %1468 : vector<4x16xf32> to vector<4x16xbf16>
    %cst_366 = arith.constant dense<0.000000e+00> : vector<4x64xf32>
    %1499 = tpu.matmul %1498, %814, %cst_366 {dimension_numbers = #tpu.dot_dimension_numbers<[1], [0], [0], [1], [0, 0, 1, 1], [], []>} : vector<4x16xbf16>, vector<16x64xbf16>, vector<4x64xf32> -> vector<4x64xf32>
    %1500 = arith.addf %1497, %1499 : vector<4x64xf32>
    %1501 = vector.extract_strided_slice %1494 {offsets = [0, 0], sizes = [4, 16], strides = [1, 1]} : vector<4x64xf32> to vector<4x16xf32>
    %1502 = arith.negf %1501 : vector<4x16xf32>
    %1503 = math.exp %1502 : vector<4x16xf32>
    %cst_367 = arith.constant 1.000000e+00 : f32
    %1504 = vector.broadcast %cst_367 : f32 to vector<4x16xf32>
    %1505 = arith.addf %1504, %1503 : vector<4x16xf32>
    %1506 = arith.divf %1504, %1505 : vector<4x16xf32>
    %1507 = vector.extract_strided_slice %1494 {offsets = [0, 16], sizes = [4, 16], strides = [1, 1]} : vector<4x64xf32> to vector<4x16xf32>
    %1508 = arith.negf %1507 : vector<4x16xf32>
    %1509 = math.exp %1508 : vector<4x16xf32>
    %cst_368 = arith.constant 1.000000e+00 : f32
    %1510 = vector.broadcast %cst_368 : f32 to vector<4x16xf32>
    %1511 = arith.addf %1510, %1509 : vector<4x16xf32>
    %1512 = arith.divf %1510, %1511 : vector<4x16xf32>
    %1513 = vector.extract_strided_slice %1494 {offsets = [0, 32], sizes = [4, 16], strides = [1, 1]} : vector<4x64xf32> to vector<4x16xf32>
    %1514 = math.tanh %1513 : vector<4x16xf32>
    %1515 = vector.extract_strided_slice %1494 {offsets = [0, 48], sizes = [4, 16], strides = [1, 1]} : vector<4x64xf32> to vector<4x16xf32>
    %1516 = arith.negf %1515 : vector<4x16xf32>
    %1517 = math.exp %1516 : vector<4x16xf32>
    %cst_369 = arith.constant 1.000000e+00 : f32
    %1518 = vector.broadcast %cst_369 : f32 to vector<4x16xf32>
    %1519 = arith.addf %1518, %1517 : vector<4x16xf32>
    %1520 = arith.divf %1518, %1519 : vector<4x16xf32>
    %1521 = arith.mulf %1512, %1436 : vector<4x16xf32>
    %1522 = arith.mulf %1506, %1514 : vector<4x16xf32>
    %1523 = arith.addf %1521, %1522 : vector<4x16xf32>
    %1524 = math.tanh %1523 : vector<4x16xf32>
    %1525 = arith.mulf %1520, %1524 : vector<4x16xf32>
    %1526 = vector.shape_cast %1486 : vector<4x1xi1> to vector<4x1xi1>
    %1527 = vector.broadcast %1526 : vector<4x1xi1> to vector<4x16xi1>
    %1528 = arith.select %1527, %1525, %1433 : vector<4x16xi1>, vector<4x16xf32>
    %1529 = vector.shape_cast %1486 : vector<4x1xi1> to vector<4x1xi1>
    %1530 = vector.broadcast %1529 : vector<4x1xi1> to vector<4x16xi1>
    %1531 = arith.select %1530, %1523, %1436 : vector<4x16xi1>, vector<4x16xf32>
    %cst_370 = arith.constant 0.000000e+00 : f32
    %1532 = vector.shape_cast %1486 : vector<4x1xi1> to vector<4x1xi1>
    %1533 = vector.broadcast %1532 : vector<4x1xi1> to vector<4x16xi1>
    %1534 = vector.broadcast %cst_370 : f32 to vector<4x16xf32>
    %1535 = arith.select %1533, %1525, %1534 : vector<4x16xi1>, vector<4x16xf32>
    %1536 = vector.extract_strided_slice %1500 {offsets = [0, 0], sizes = [4, 16], strides = [1, 1]} : vector<4x64xf32> to vector<4x16xf32>
    %1537 = arith.negf %1536 : vector<4x16xf32>
    %1538 = math.exp %1537 : vector<4x16xf32>
    %cst_371 = arith.constant 1.000000e+00 : f32
    %1539 = vector.broadcast %cst_371 : f32 to vector<4x16xf32>
    %1540 = arith.addf %1539, %1538 : vector<4x16xf32>
    %1541 = arith.divf %1539, %1540 : vector<4x16xf32>
    %1542 = vector.extract_strided_slice %1500 {offsets = [0, 16], sizes = [4, 16], strides = [1, 1]} : vector<4x64xf32> to vector<4x16xf32>
    %1543 = arith.negf %1542 : vector<4x16xf32>
    %1544 = math.exp %1543 : vector<4x16xf32>
    %cst_372 = arith.constant 1.000000e+00 : f32
    %1545 = vector.broadcast %cst_372 : f32 to vector<4x16xf32>
    %1546 = arith.addf %1545, %1544 : vector<4x16xf32>
    %1547 = arith.divf %1545, %1546 : vector<4x16xf32>
    %1548 = vector.extract_strided_slice %1500 {offsets = [0, 32], sizes = [4, 16], strides = [1, 1]} : vector<4x64xf32> to vector<4x16xf32>
    %1549 = math.tanh %1548 : vector<4x16xf32>
    %1550 = vector.extract_strided_slice %1500 {offsets = [0, 48], sizes = [4, 16], strides = [1, 1]} : vector<4x64xf32> to vector<4x16xf32>
    %1551 = arith.negf %1550 : vector<4x16xf32>
    %1552 = math.exp %1551 : vector<4x16xf32>
    %cst_373 = arith.constant 1.000000e+00 : f32
    %1553 = vector.broadcast %cst_373 : f32 to vector<4x16xf32>
    %1554 = arith.addf %1553, %1552 : vector<4x16xf32>
    %1555 = arith.divf %1553, %1554 : vector<4x16xf32>
    %1556 = arith.mulf %1547, %1471 : vector<4x16xf32>
    %1557 = arith.mulf %1541, %1549 : vector<4x16xf32>
    %1558 = arith.addf %1556, %1557 : vector<4x16xf32>
    %1559 = math.tanh %1558 : vector<4x16xf32>
    %1560 = arith.mulf %1555, %1559 : vector<4x16xf32>
    %1561 = vector.shape_cast %1488 : vector<4x1xi1> to vector<4x1xi1>
    %1562 = vector.broadcast %1561 : vector<4x1xi1> to vector<4x16xi1>
    %1563 = arith.select %1562, %1560, %1468 : vector<4x16xi1>, vector<4x16xf32>
    %1564 = vector.shape_cast %1488 : vector<4x1xi1> to vector<4x1xi1>
    %1565 = vector.broadcast %1564 : vector<4x1xi1> to vector<4x16xi1>
    %1566 = arith.select %1565, %1558, %1471 : vector<4x16xi1>, vector<4x16xf32>
    %cst_374 = arith.constant 0.000000e+00 : f32
    %1567 = vector.shape_cast %1488 : vector<4x1xi1> to vector<4x1xi1>
    %1568 = vector.broadcast %1567 : vector<4x1xi1> to vector<4x16xi1>
    %1569 = vector.broadcast %cst_374 : f32 to vector<4x16xf32>
    %1570 = arith.select %1568, %1560, %1569 : vector<4x16xi1>, vector<4x16xf32>
    %1571 = arith.index_cast %c7_i32_359 : i32 to index
    %c0_375 = arith.constant 0 : index
    %c0_376 = arith.constant 0 : index
    %1572 = vector.load %arg27[%1571, %c0_375, %c0_376] : memref<8x4x16xf32, #tpu.memory_space<vmem>>, vector<1x4x16xf32>
    %1573 = vector.shape_cast %1572 : vector<1x4x16xf32> to vector<4x16xf32>
    %1574 = vector.shape_cast %1535 : vector<4x16xf32> to vector<1x4x16xf32>
    tpu.vector_store %arg27[%1571, %c0_375, %c0_376], %1574 {strides = array<i32>} : memref<8x4x16xf32, #tpu.memory_space<vmem>>, vector<1x4x16xf32>,
    %1575 = arith.index_cast %1484 : i32 to index
    %c0_377 = arith.constant 0 : index
    %c0_378 = arith.constant 0 : index
    %1576 = vector.load %arg29[%1575, %c0_377, %c0_378] : memref<8x4x16xf32, #tpu.memory_space<vmem>>, vector<1x4x16xf32>
    %1577 = vector.shape_cast %1576 : vector<1x4x16xf32> to vector<4x16xf32>
    %1578 = vector.shape_cast %1570 : vector<4x16xf32> to vector<1x4x16xf32>
    tpu.vector_store %arg29[%1575, %c0_377, %c0_378], %1578 {strides = array<i32>} : memref<8x4x16xf32, #tpu.memory_space<vmem>>, vector<1x4x16xf32>,
    %c8_i32_379 = arith.constant 8 : i32
    %c0_380 = arith.constant 0 : index
    %c0_381 = arith.constant 0 : index
    %c0_382 = arith.constant 0 : index
    %1579 = vector.load %arg27[%c0_380, %c0_381, %c0_382] : memref<8x4x16xf32, #tpu.memory_space<vmem>>, vector<8x4x16xf32>
    %1580 = vector.shape_cast %1579 : vector<8x4x16xf32> to vector<32x16xf32>
    %c0_383 = arith.constant 0 : index
    %c0_384 = arith.constant 0 : index
    %c0_385 = arith.constant 0 : index
    %1581 = vector.load %arg29[%c0_383, %c0_384, %c0_385] : memref<8x4x16xf32, #tpu.memory_space<vmem>>, vector<8x4x16xf32>
    %1582 = vector.shape_cast %1581 : vector<8x4x16xf32> to vector<32x16xf32>
    %1583 = arith.truncf %1580 : vector<32x16xf32> to vector<32x16xbf16>
    %c0_386 = arith.constant 0 : index
    %c0_387 = arith.constant 0 : index
    %1584 = vector.load %arg22[%c0_386, %c0_387] : memref<16x5xbf16, #tpu.memory_space<vmem>>, vector<16x5xbf16>
    %cst_388 = arith.constant dense<0.000000e+00> : vector<32x5xf32>
    %1585 = tpu.matmul %1583, %1584, %cst_388 {dimension_numbers = #tpu.dot_dimension_numbers<[1], [0], [0], [1], [0, 0, 1, 1], [], []>} : vector<32x16xbf16>, vector<16x5xbf16>, vector<32x5xf32> -> vector<32x5xf32>
    %1586 = arith.truncf %1582 : vector<32x16xf32> to vector<32x16xbf16>
    %c0_389 = arith.constant 0 : index
    %c0_390 = arith.constant 0 : index
    %1587 = vector.load %arg23[%c0_389, %c0_390] : memref<16x5xbf16, #tpu.memory_space<vmem>>, vector<16x5xbf16>
    %cst_391 = arith.constant dense<0.000000e+00> : vector<32x5xf32>
    %1588 = tpu.matmul %1586, %1587, %cst_391 {dimension_numbers = #tpu.dot_dimension_numbers<[1], [0], [0], [1], [0, 0, 1, 1], [], []>} : vector<32x16xbf16>, vector<16x5xbf16>, vector<32x5xf32> -> vector<32x5xf32>
    %1589 = arith.addf %1585, %1588 : vector<32x5xf32>
    %c0_392 = arith.constant 0 : index
    %c0_393 = arith.constant 0 : index
    %1590 = vector.load %arg24[%c0_392, %c0_393] : memref<1x5xf32, #tpu.memory_space<vmem>>, vector<1x5xf32>
    %1591 = vector.broadcast %1590 : vector<1x5xf32> to vector<32x5xf32>
    %1592 = arith.addf %1589, %1591 : vector<32x5xf32>
    %cst_394 = arith.constant dense<0xFF800000> : vector<32xf32>
    %1593 = vector.multi_reduction <maximumf>, %1592, %cst_394 [1] : vector<32x5xf32> to vector<32xf32>
    %1594 = vector.shape_cast %1593 : vector<32xf32> to vector<32x1xf32>
    %1595 = vector.broadcast %1594 : vector<32x1xf32> to vector<32x5xf32>
    %1596 = arith.subf %1592, %1595 : vector<32x5xf32>
    %1597 = math.exp %1596 : vector<32x5xf32>
    %cst_395 = arith.constant dense<0.000000e+00> : vector<32xf32>
    %1598 = vector.multi_reduction <add>, %1597, %cst_395 [1] : vector<32x5xf32> to vector<32xf32>
    %1599 = vector.shape_cast %1598 : vector<32xf32> to vector<32x1xf32>
    %1600 = math.log %1599 : vector<32x1xf32>
    %1601 = vector.broadcast %1600 : vector<32x1xf32> to vector<32x5xf32>
    %1602 = arith.subf %1596, %1601 : vector<32x5xf32>
    %c0_396 = arith.constant 0 : index
    %c0_397 = arith.constant 0 : index
    %1603 = vector.load %arg25[%c0_396, %c0_397] : memref<32x5xf32, #tpu.memory_space<vmem>>, vector<32x5xf32>
    tpu.vector_store %arg25[%c0_396, %c0_397], %1602 {strides = array<i32>} : memref<32x5xf32, #tpu.memory_space<vmem>>, vector<32x5xf32>,
    return
  }
}

</mosaic_0001>

<bundles_post_ra>
// kernel: tpu_custom_call.1
= control target key start
LH: loop header
LB: loop body
LE: loop exit
PB: predicated region body
PF: predicated region fallthrough
CT: control target
= control target key end

     0   :  { %s5504_s0 = inlined_call_operand.vmem [shape: s32[4,1], index: 0, kind: input, shape index: {}]   ;;  %s5505_s1 = inlined_call_operand.vmem [shape: bf16[8,4,16], index: 1, kind: input, shape index: {}]   ;;  %s5506_s2 = inlined_call_operand.hbm [shape: bf16[16,64], index: 2, kind: input, shape index: {}]   ;;  %s5507_s3 = inlined_call_operand.hbm [shape: bf16[16,64], index: 3, kind: input, shape index: {}]   ;;  %s5508_s4 = inlined_call_operand.hbm [shape: f32[1,64], index: 4, kind: input, shape index: {}]   ;;  %s5509_s5 = inlined_call_operand.hbm [shape: f32[4,16], index: 5, kind: input, shape index: {}]   ;;  %s5510_s6 = inlined_call_operand.hbm [shape: f32[4,16], index: 6, kind: input, shape index: {}]   ;;  %s5511_s7 = inlined_call_operand.hbm [shape: bf16[16,64], index: 7, kind: input, shape index: {}]   ;;  %s5512_s8 = inlined_call_operand.hbm [shape: bf16[16,64], index: 8, kind: input, shape index: {}]   ;;  %s5513_s9 = inlined_call_operand.hbm [shape: f32[1,64], index: 9, kind: input, shape index: {}]   ;;  %s5514_s10 = inlined_call_operand.hbm [shape: f32[4,16], index: 10, kind: input, shape index: {}]   ;;  %s5515_s11 = inlined_call_operand.hbm [shape: f32[4,16], index: 11, kind: input, shape index: {}]   ;;  %s5516_s12 = inlined_call_operand.vmem [shape: bf16[32,64], index: 12, kind: input, shape index: {}]   ;;  %s5517_s13 = inlined_call_operand.vmem [shape: bf16[16,64], index: 13, kind: input, shape index: {}]   ;;  %s5518_s14 = inlined_call_operand.hbm [shape: f32[1,64], index: 14, kind: input, shape index: {}]   ;;  %s5519_s15 = inlined_call_operand.hbm [shape: f32[4,16], index: 15, kind: input, shape index: {}]   ;;  %s5520_s16 = inlined_call_operand.hbm [shape: f32[4,16], index: 16, kind: input, shape index: {}]   ;;  %s5521_s17 = inlined_call_operand.hbm [shape: bf16[32,64], index: 17, kind: input, shape index: {}]   ;;  %s5522_s18 = inlined_call_operand.hbm [shape: bf16[16,64], index: 18, kind: input, shape index: {}]   ;;  %s5523_s19 = inlined_call_operand.hbm [shape: f32[1,64], index: 19, kind: input, shape index: {}]   ;;  %s5524_s20 = inlined_call_operand.hbm [shape: f32[4,16], index: 20, kind: input, shape index: {}]   ;;  %s5525_s21 = inlined_call_operand.hbm [shape: f32[4,16], index: 21, kind: input, shape index: {}]   ;;  %s5526_s22 = inlined_call_operand.vmem [shape: bf16[16,5], index: 22, kind: input, shape index: {}]   ;;  %s5527_s23 = inlined_call_operand.vmem [shape: bf16[16,5], index: 23, kind: input, shape index: {}]   ;;  %s5528_s24 = inlined_call_operand.vmem [shape: f32[1,5], index: 24, kind: input, shape index: {}]   ;;  %s5529_s25 = inlined_call_operand.vmem [shape: f32[32,5], index: 25, kind: output, shape index: {}]  }
   0x1   :  { %5535 = sst [smem:[#allocation46_spill]] %s5504_s0 }
   0x2   :  { %5536 = sst [smem:[#allocation47_spill]] %s5505_s1 }
   0x3   :  { %5537 = sst [smem:[#allocation48_spill]] %s5506_s2 }
   0x4   :  { %5538 = sst [smem:[#allocation49_spill]] %s5507_s3 }
   0x5   :  { %5539 = sst [smem:[#allocation50_spill]] %s5508_s4 }
   0x6   :  { %5540 = sst [smem:[#allocation51_spill]] %s5509_s5 }
   0x7   :  { %5541 = sst [smem:[#allocation52_spill]] %s5510_s6 }
   0x8   :  { %5542 = sst [smem:[#allocation53_spill]] %s5511_s7 }
   0x9   :  { %5543 = sst [smem:[#allocation54_spill]] %s5512_s8 }
   0xa   :  { %5544 = sst [smem:[#allocation55_spill]] %s5513_s9 }
   0xb   :  { %5545 = sst [smem:[#allocation56_spill]] %s5528_s24 }
   0xc   :  { %5546 = sst [smem:[#allocation57_spill]] %s5529_s25 }
   0xd   :  { %30 = vsyncpa [#allocation9], 0 }
   0xe   :  { %31 = vsyncpa [#allocation11], 0 }
   0xf   :  { %32 = vsyncpa [#allocation14], 0 }
  0x10   :  { %33 = vsyncpa [#allocation17], 0 }
  0x11   :  { %34 = vsyncpa [#allocation20], 0 }
  0x12   :  { %35 = vsyncpa [#allocation23], 0 }
  0x13   :  { %36 = vsyncpa [#allocation26], 0 }
  0x14   :  { %37 = vsyncpa [#allocation29], 0 }
  0x15   :  { %38 = vsyncpa [#allocation32], 0 }
  0x16   :  { %39 = vsyncpa [#allocation35], 0  ;;  %s5547_s6 = sld [smem:[#allocation49_spill]]  ;;  %s4168_s7 = smov [#allocation10]  }
  0x17   :  { %s63_s3 = sshll.u32 %s4168_s7, 4  ;;  %s5548_s8 = sld [smem:[#allocation51_spill]]  ;;  %s64_s3 = int_to_ptr.vmem [resolvable:$true] %s63_s3 }
  0x18   :  { %s4169_s4 = smov 64   ;;  %s4170_s28 = smov 4  }
  0x19   :  { %s4171_s9 = smov [#allocation13]   ;;  %s5549_s2 = sld [smem:[#allocation53_spill]] }
  0x1a   :  { %s88_s5 = sshll.u32 %s4171_s9, 4  ;;  %s5550_s26 = sld [smem:[#allocation55_spill]]  ;;  %s89_s5 = int_to_ptr.vmem [resolvable:$true] %s88_s5 }
  0x1b   :  { %s156_s29 = sshll.u32 %s5515_s11, 4  ;;  %s4176_s9 = smov [#allocation28]   ;;  %s157_s29 = int_to_ptr.hbm [resolvable:$true] %s156_s29 }
  0x1c   :  { %s61_s30 = sshll.u32 %s5547_s6, 4  ;;  %s4177_s0 = smov [#allocation31]   ;;  %s62_s30 = int_to_ptr.hbm [resolvable:$true] %s61_s30 }
  0x1d   :  { %s86_s27 = sshll.u32 %s5548_s8, 4  ;;  %s4172_s8 = smov [#allocation16]   ;;  %s87_s27 = int_to_ptr.hbm [resolvable:$true] %s86_s27 }
  0x1e   :  { %69 = dma.hbm_to_vmem [thread:$0]  %s62_s30, 128, %s64_s3, [#allocation11], %s4169_s4, %s4169_s4, %s4170_s28  }
  0x1f   :  { %s107_s6 = sshll.u32 %s5549_s2, 4  ;;  %s109_s24 = sshll.u32 %s4172_s8, 4  ;;  %s108_s6 = int_to_ptr.hbm [resolvable:$true] %s107_s6  ;;  %s110_s24 = int_to_ptr.vmem [resolvable:$true] %s109_s24 }
  0x20   :  { %91 = dma.hbm_to_vmem [thread:$0]  %s87_s27, 64, %s89_s5, [#allocation14]  }
  0x21   :  { %s134_s1 = sshll.u32 %s5550_s26, 4  ;;  %s4173_s30 = smov [#allocation19]   ;;  %s135_s1 = int_to_ptr.hbm [resolvable:$true] %s134_s1 }
  0x22   :  { %115 = dma.hbm_to_vmem [thread:$0]  %s108_s6, 128, %s110_s24, [#allocation17], %s4169_s4, %s4169_s4, %s4170_s28  }
  0x23   :  { %s136_s3 = sshll.u32 %s4173_s30, 4  ;;  %s182_s5 = sshll.u32 %s5519_s15, 4  ;;  %s137_s3 = int_to_ptr.vmem [resolvable:$true] %s136_s3  ;;  %s183_s5 = int_to_ptr.hbm [resolvable:$true] %s182_s5 }
  0x24   :  { %139 = dma.hbm_to_vmem [thread:$0]  %s135_s1, 16, %s137_s3, [#allocation20]  }
  0x25   :  { %s4174_s2 = smov [#allocation22]   ;;  %s4175_s26 = smov [#allocation25]  }
  0x26   :  { %s158_s7 = sshll.u32 %s4174_s2, 4  ;;  %s184_s24 = sshll.u32 %s4175_s26, 4  ;;  %s159_s7 = int_to_ptr.vmem [resolvable:$true] %s158_s7  ;;  %s185_s24 = int_to_ptr.vmem [resolvable:$true] %s184_s24 }
  0x27   :  { %161 = dma.hbm_to_vmem [thread:$0]  %s157_s29, 64, %s159_s7, [#allocation23]  }
  0x28   :  { %s203_s30 = sshll.u32 %s5521_s17, 4  ;;  %s230_s3 = sshll.u32 %s5523_s19, 4  ;;  %s204_s30 = int_to_ptr.hbm [resolvable:$true] %s203_s30  ;;  %s231_s3 = int_to_ptr.hbm [resolvable:$true] %s230_s3 }
  0x29   :  { %187 = dma.hbm_to_vmem [thread:$0]  %s183_s5, 64, %s185_s24, [#allocation26]  }
  0x2a   :  { %s205_s15 = sshll.u32 %s4176_s9, 4  ;;  %s232_s29 = sshll.u32 %s4177_s0, 4  ;;  %s206_s15 = int_to_ptr.vmem [resolvable:$true] %s205_s15  ;;  %s233_s29 = int_to_ptr.vmem [resolvable:$true] %s232_s29 }
  0x2b   :  { %211 = dma.hbm_to_vmem [thread:$0]  %s204_s30, 256, %s206_s15, [#allocation29], %s4169_s4, %s4169_s4, %s4170_s28  }
  0x2c   :  { %s5551_s17 = sld [smem:[#allocation48_spill]]  ;;  %s4178_s24 = smov [#allocation8]  }
  0x2d   :  { %235 = dma.hbm_to_vmem [thread:$0]  %s231_s3, 16, %s233_s29, [#allocation32]  }
  0x2e   :  { %s5552_s19 = sld [smem:[#allocation50_spill]]  ;;  %s50_s6 = sshll.u32 %s4178_s24, 4  ;;  %s51_s6 = int_to_ptr.vmem [resolvable:$true] %s50_s6 }
  0x2f   :  { %s4179_s8 = smov [#allocation12]   ;;  %s5553_s9 = sld [smem:[#allocation52_spill]] }
  0x30   :  { %s77_s30 = sshll.u32 %s4179_s8, 4  ;;  %s5554_s29 = sld [smem:[#allocation54_spill]]  ;;  %s78_s30 = int_to_ptr.vmem [resolvable:$true] %s77_s30 }
  0x31   :  { %s4180_s25 = smov [#allocation15]   ;;  %s4181_s5 = smov [#allocation18]  }
  0x32   :  { %s48_s2 = sshll.u32 %s5551_s17, 4  ;;  %s99_s17 = sshll.u32 %s4180_s25, 4  ;;  %s49_s2 = int_to_ptr.hbm [resolvable:$true] %s48_s2  ;;  %s100_s17 = int_to_ptr.vmem [resolvable:$true] %s99_s17 }
  0x33   :  { %56 = dma.hbm_to_vmem [thread:$0]  %s49_s2, 128, %s51_s6, [#allocation9], %s4169_s4, %s4169_s4, %s4170_s28  }
  0x34   :  { %s75_s26 = sshll.u32 %s5552_s19, 4  ;;  %s122_s2 = sshll.u32 %s4181_s5, 4  ;;  %s76_s26 = int_to_ptr.hbm [resolvable:$true] %s75_s26  ;;  %s123_s2 = int_to_ptr.vmem [resolvable:$true] %s122_s2 }
  0x35   :  { %s97_s15 = sshll.u32 %s5553_s9, 4  ;;  %s145_s24 = sshll.u32 %s5514_s10, 4  ;;  %s98_s15 = int_to_ptr.hbm [resolvable:$true] %s97_s15  ;;  %s146_s24 = int_to_ptr.hbm [resolvable:$true] %s145_s24 }
  0x36   :  { %80 = dma.hbm_to_vmem [thread:$0]  %s76_s26, 16, %s78_s30, [#allocation11]  }
  0x37   :  { %s120_s27 = sshll.u32 %s5554_s29, 4  ;;  %s171_s8 = sshll.u32 %s5518_s14, 4  ;;  %s121_s27 = int_to_ptr.hbm [resolvable:$true] %s120_s27  ;;  %s172_s8 = int_to_ptr.hbm [resolvable:$true] %s171_s8 }
  0x38   :  { %102 = dma.hbm_to_vmem [thread:$0]  %s98_s15, 64, %s100_s17, [#allocation14]  }
  0x39   :  { %128 = dma.hbm_to_vmem [thread:$0]  %s121_s27, 128, %s123_s2, [#allocation17], %s4169_s4, %s4169_s4, %s4170_s28  }
  0x3a   :  { %s4182_s30 = smov [#allocation21]   ;;  %s4183_s1 = smov [#allocation24]  }
  0x3b   :  { %s147_s11 = sshll.u32 %s4182_s30, 4  ;;  %s173_s9 = sshll.u32 %s4183_s1, 4  ;;  %s148_s11 = int_to_ptr.vmem [resolvable:$true] %s147_s11  ;;  %s174_s9 = int_to_ptr.vmem [resolvable:$true] %s173_s9 }
  0x3c   :  { %150 = dma.hbm_to_vmem [thread:$0]  %s146_s24, 64, %s148_s11, [#allocation20]  }
  0x3d   :  { %s193_s10 = sshll.u32 %s5520_s16, 4  ;;  %s216_s27 = sshll.u32 %s5522_s18, 4  ;;  %s194_s10 = int_to_ptr.hbm [resolvable:$true] %s193_s10  ;;  %s217_s27 = int_to_ptr.hbm [resolvable:$true] %s216_s27 }
  0x3e   :  { %176 = dma.hbm_to_vmem [thread:$0]  %s172_s8, 16, %s174_s9, [#allocation23]  }
  0x3f   :  { %s4184_s25 = smov [#allocation27]   ;;  %s4185_s17 = smov [#allocation30]  }
  0x40   :  { %s195_s14 = sshll.u32 %s4184_s25, 4  ;;  %s218_s5 = sshll.u32 %s4185_s17, 4  ;;  %s196_s14 = int_to_ptr.vmem [resolvable:$true] %s195_s14  ;;  %s219_s5 = int_to_ptr.vmem [resolvable:$true] %s218_s5 }
  0x41   :  { %198 = dma.hbm_to_vmem [thread:$0]  %s194_s10, 64, %s196_s14, [#allocation26]  }
  0x42   :  { %s241_s19 = sshll.u32 %s5524_s20, 4  ;;  %s252_s18 = sshll.u32 %s5525_s21, 4  ;;  %s242_s19 = int_to_ptr.hbm [resolvable:$true] %s241_s19  ;;  %s253_s18 = int_to_ptr.hbm [resolvable:$true] %s252_s18 }
  0x43   :  { %224 = dma.hbm_to_vmem [thread:$0]  %s217_s27, 128, %s219_s5, [#allocation29], %s4169_s4, %s4169_s4, %s4170_s28  }
  0x44   :  { %s4186_s26 = smov [#allocation33]   ;;  %s4187_s8 = smov [#allocation34]  }
  0x45   :  { %s243_s6 = sshll.u32 %s4186_s26, 4  ;;  %s254_s30 = sshll.u32 %s4187_s8, 4  ;;  %s244_s6 = int_to_ptr.vmem [resolvable:$true] %s243_s6  ;;  %s255_s30 = int_to_ptr.vmem [resolvable:$true] %s254_s30 }
  0x46   :  { %246 = dma.hbm_to_vmem [thread:$0]  %s242_s19, 64, %s244_s6, [#allocation32]  }
  0x47   :  { %257 = dma.hbm_to_vmem [thread:$0]  %s253_s18, 64, %s255_s30, [#allocation35]  }
  0x48   :  { %4148 = dma.done.wait [#allocation9], 128  }
  0x49   :  { %4149 = vsyncadd [#allocation9], 4294967168 }
  0x4a   :  { %4150 = dma.done.wait [#allocation11], 144  }
  0x4b   :  { %4151 = vsyncadd [#allocation11], 4294967152 }
  0x4c   :  { %4152 = dma.done.wait [#allocation14], 128  }
  0x4d   :  { %4153 = vsyncadd [#allocation14], 4294967168 }
  0x4e   :  { %4154 = dma.done.wait [#allocation17], 256  }
  0x4f   :  { %4155 = vsyncadd [#allocation17], 4294967040 }
  0x50   :  { %4156 = dma.done.wait [#allocation20], 80  }
  0x51   :  { %4157 = vsyncadd [#allocation20], 4294967216 }
  0x52   :  { %4158 = dma.done.wait [#allocation23], 80  }
  0x53   :  { %4159 = vsyncadd [#allocation23], 4294967216 }
  0x54   :  { %4160 = dma.done.wait [#allocation26], 128  }
  0x55   :  { %4161 = vsyncadd [#allocation26], 4294967168 }
  0x56   :  { %4162 = dma.done.wait [#allocation29], 384  }
  0x57   :  { %4163 = vsyncadd [#allocation29], 4294966912 }
  0x58   :  { %4164 = dma.done.wait [#allocation32], 80  }
  0x59   :  { %4165 = vsyncadd [#allocation32], 4294967216 }
  0x5a   :  { %4166 = dma.done.wait [#allocation35], 64  }
  0x5b   :  { %4167 = vsyncadd [#allocation35], 4294967232  ;;  %v3397_v0 = vld [vmem:[#allocation16] sm:$0xff]  ;;  %s5555_s4 = sld [smem:[#allocation47_spill]]  ;;  %v4408_v5 = vld [vmem:[#allocation18] sm:$0xff]  ;;  %s4188_s2 = smov 16  }
  0x5c   :  { %3409 = vmatpush.bf16.msra.mxu3 %v3397_v0  ;;  %v3396_v6 = vld [vmem:[#allocation8] sm:$0xff]  ;;  %468 = vmatpush.bf16.msra.mxu1 %v3397_v0  ;;  %v4424_v11 = vld [vmem:[#allocation10] sm:$0xff]  ;;  %v507_v12 = vld [vmem:[#allocation22] sm:$0xf]  ;;  %vm383_vm0 = vcmask 130048   ;;  %vm5532_vm1 = vcmask 519168  }
  0x5d   :  { %3408 = vmatpush.bf16.msra.mxu2 %v3396_v6  ;;  %395 = vmatpush.bf16.msra.mxu0 %v3396_v6  ;;  %v4433_v15 = vld [vmem:[#allocation13] sm:$0xf]  ;;  %v4441_v18 = vld [vmem:[#allocation21] sm:$0xf]  ;;  %v3440_v20 = vld [vmem:[#allocation12] ss:$0 sm:$0xff] }
  0x5e   :  { %635 = vrot.lane.b32.xlu1 %v507_v12, %s4188_s2  ;;  %v511_v17 = vpack.c.bf16 %v4433_v15, %v4433_v15  ;;  %v537_v19 = vpack.c.bf16 %v4441_v18, %v4441_v18  ;;  %v4450_v26 = vld [vmem:[#allocation19] ss:$0 sm:$0xff]  ;;  %v505_v40 = vld [vmem:[#allocation15] sm:$0xf]  ;;  %s4189_s7 = smov 96   ;;  %v4190_v58 = vmov 0  }
  0x5f   :  { %582 = vrot.lane.b32.xlu2 %v505_v40, %s4188_s2  ;;  %3436 = vset.pattern.permute.xlu1 %v4190_v58  ;;  %s5556_s24 = sld [smem:[#allocation46_spill]]  ;;  %s4191_s18 = smov 48  }
  0x60   :  { %554 = vmatpush.bf16.msrb.mxu3 %v4408_v5  ;;  %870 = vmatpush.bf16.msrb.mxu1 %v4408_v5  ;;  %s4192_s26 = smov 32   ;;  %s4193_s6 = smov 80  }
  0x61   :  { %v342_v1 = vld [vmem:[%s5555_s4 + $0x8] sm:$0x3]  ;;  %v343_v2 = vld [vmem:[%s5555_s4 + $0xa] sm:$0x3]  ;;  %v344_v3 = vld [vmem:[%s5555_s4 + $0xc] sm:$0x3]  ;;  %528 = vmatpush.bf16.msrb.mxu2 %v4424_v11  ;;  %847 = vmatpush.bf16.msrb.mxu0 %v4424_v11 }
  0x62   :  { %v345_v4 = vld [vmem:[%s5555_s4 + $0xe] sm:$0x3]  ;;  %365 = vst [vmem:[#allocation1 + $0x20] ss:$4 sm:$0xff] %v342_v1  ;;  %v338_v7 = vld [vmem:[%s5555_s4] sm:$0x3]  ;;  %3437 = vset.pattern.permute.xlu0 %v4190_v58  ;;  %3438 = vset.pattern.permute.xlu2 %v4190_v58 }
  0x63   :  { %368 = vst [vmem:[#allocation1 + $0x21] ss:$4 sm:$0xff] %v343_v2  ;;  %v339_v8 = vld [vmem:[%s5555_s4 + $0x2] sm:$0x3]  ;;  %v340_v9 = vld [vmem:[%s5555_s4 + $0x4] sm:$0x3] }
  0x64   :  { %371 = vst [vmem:[#allocation1 + $0x22] ss:$4 sm:$0xff] %v344_v3  ;;  %v341_v10 = vld [vmem:[%s5555_s4 + $0x6] sm:$0x3]  ;;  %s5594_s9 = sld [smem:[#allocation56_spill]] }
  0x65   :  { %374 = vst [vmem:[#allocation1 + $0x23] ss:$4 sm:$0xff] %v345_v4  ;;  %s5595_s10 = sld [smem:[#allocation57_spill]] }
  0x66   :  { %353 = vst [vmem:[#allocation1] ss:$4 sm:$0xff] %v338_v7 }
  0x67   :  { %356 = vst [vmem:[#allocation1 + $0x1] ss:$4 sm:$0xff] %v339_v8 }
  0x68   :  { %359 = vst [vmem:[#allocation1 + $0x2] ss:$4 sm:$0xff] %v340_v9 }
  0x69   :  { %362 = vst [vmem:[#allocation1 + $0x3] ss:$4 sm:$0xff] %v341_v10 }
  0x6c   :  { %v376_v13 = vld.sshfl [vmem:[#allocation1 + $0x20] sm:$0xff pattern:$0x73625140] }
  0x6d   :  { %442 = vst [vmem:[#allocation1 + $0x20] ss:$4 sm:$0xff] %v342_v1  ;;  %3273 = vmatmul.msk.bf16.vlgmr.msra.gmra.mxu2 %vm383_vm0, %v376_v13 }
  0x6e   :  { %444 = vst [vmem:[#allocation1 + $0x21] ss:$4 sm:$0xff] %v343_v2  ;;  %697 = vmatpush.bf16.msra.mxu2 %v4424_v11 }
  0x6f   :  { %446 = vst [vmem:[#allocation1 + $0x22] ss:$4 sm:$0xff] %v344_v3 }
  0x70   :  { %448 = vst [vmem:[#allocation1 + $0x23] ss:$4 sm:$0xff] %v345_v4  ;;  %v375_v14 = vld.sshfl [vmem:[#allocation1] sm:$0xff pattern:$0x73625140] }
  0x71   :  { %3272 = vmatmul.msk.bf16.vlgmr.msra.gmra.mxu0 %vm383_vm0, %v375_v14  ;;  %434 = vst [vmem:[#allocation1] ss:$4 sm:$0xff] %v338_v7 }
  0x72   :  { %436 = vst [vmem:[#allocation1 + $0x1] ss:$4 sm:$0xff] %v339_v8  ;;  %1145 = vmatpush.bf16.msra.mxu0 %v4424_v11 }
  0x73   :  { %438 = vst [vmem:[#allocation1 + $0x2] ss:$4 sm:$0xff] %v340_v9 }
  0x74   :  { %440 = vst [vmem:[#allocation1 + $0x3] ss:$4 sm:$0xff] %v341_v10 }
  0x77   :  { %v450_v16 = vld.sshfl [vmem:[#allocation1 + $0x20] sm:$0xff pattern:$0x73625140] }
  0x78   :  { %3279 = vmatmul.msk.bf16.vlgmr.msra.gmra.mxu3 %vm383_vm0, %v450_v16 }
  0x79   :  { %720 = vmatpush.bf16.msra.mxu3 %v4408_v5 }
  0x7d   :  { %3284 = vmatmul.msk.bf16.vlgmr.msrb.gmra.mxu2 %vm383_vm0, %v511_v17  ;;  %v4472_v17 = vld [vmem:[%s5556_s24] sm:$0xf] }
  0x7e   :  { %997 = vmatpush.bf16.msrb.mxu2 %v4424_v11  ;;  %vm509_vm10 = vcmp.gt.s32.totalorder %v4472_v17, 7  ;;  %vm508_vm11 = vcmp.gt.s32.totalorder %v4472_v17, 0 }
  0x88   :  { %3289 = vmatmul.msk.bf16.vlgmr.msrb.gmra.mxu3 %vm383_vm0, %v537_v19 }
  0x89   :  { %1020 = vmatpush.bf16.msrb.mxu3 %v4408_v5 }
  0xee   :  { %v397_v22 = vpop.f32.mrf.mxu0 }
  0xef   :  { %v398_v24 = vadd.f32 %v3440_v20, %v397_v22  ;;  %v655_v22 = vsel %vm509_vm10, 1, %v4190_v58 }
  0xf0   :  { %v402_v21 = vpop.f32.mrf.mxu2 }
  0xf1   :  { %v403_v23 = vadd.f32 %v3440_v20, %v402_v21  ;;  %420 = vst.msk [vmem:[#allocation6] sm:$0xf] %vm5532_vm1, %v398_v24  ;;  %v411_v30 = vrot.slane %v398_v24, 4  ;;  %v602_v24 = vsel %vm508_vm11, 1, %v4190_v58 }
  0xf3   :  { %v413_v25 = vrot.slane %v403_v23, 4  ;;  %424 = vst.msk [vmem:[#allocation6 + $0x10] sm:$0xf] %vm5532_vm1, %v403_v23 }
  0xf4   :  { %421 = vst.msk [vmem:[#allocation6 + $0x4] sm:$0xf] %vm5532_vm1, %v411_v30 }
  0xf5   :  { %425 = vst.msk [vmem:[#allocation6 + $0x14] sm:$0xf] %vm5532_vm1, %v413_v25  ;;  %v4484_v25 = vpop.permute.xlu1 %635 }
  0xf6   :  { %v399_v52 = vpop.f32.mrf.mxu0 }
  0xf7   :  { %v400_v53 = vadd.f32 %v3440_v20, %v399_v52 }
  0xf8   :  { %v404_v27 = vpop.f32.mrf.mxu2  ;;  %v510_v43 = vld [vmem:[#allocation6] sm:$0xf] }
  0xf9   :  { %v405_v31 = vadd.f32 %v3440_v20, %v404_v27  ;;  %v412_v55 = vrot.slane %v400_v53, 4  ;;  %422 = vst.msk [vmem:[#allocation6 + $0x8] sm:$0xf] %vm5532_vm1, %v400_v53  ;;  %v4486_v27 = vpop.permute.xlu2 %582 }
  0xfb   :  { %v475_v28 = vpop.f32.mrf.mxu3  ;;  %v414_v33 = vrot.slane %v405_v31, 4  ;;  %426 = vst.msk [vmem:[#allocation6 + $0x18] sm:$0xf] %vm5532_vm1, %v405_v31 }
  0xfc   :  { %v476_v29 = vadd.f32 %v4450_v26, %v475_v28  ;;  %423 = vst.msk [vmem:[#allocation6 + $0xc] sm:$0xf] %vm5532_vm1, %v412_v55 }
  0xfd   :  { %427 = vst.msk [vmem:[#allocation6 + $0x1c] sm:$0xf] %vm5532_vm1, %v414_v33 }
  0xfe   :  { %v486_v32 = vrot.slane %v476_v29, 4  ;;  %496 = vst.msk [vmem:[#allocation7 + $0x10] sm:$0xf] %vm5532_vm1, %v476_v29 }
 0x100   :  { %497 = vst.msk [vmem:[#allocation7 + $0x14] sm:$0xf] %vm5532_vm1, %v486_v32  ;;  %v530_v34 = vpop.f32.mrf.mxu2 }
 0x101   :  { %v534_v45 = vadd.f32 %v530_v34, %v510_v43 }
 0x103   :  { %v477_v35 = vpop.f32.mrf.mxu3  ;;  %v3290_v49 = vmul.f32 -1.442695, %v534_v45 }
 0x104   :  { %v478_v36 = vadd.f32 %v4450_v26, %v477_v35 }
 0x106   :  { %v487_v37 = vrot.slane %v478_v36, 4  ;;  %498 = vst.msk [vmem:[#allocation7 + $0x18] sm:$0xf] %vm5532_vm1, %v478_v36 }
 0x108   :  { %499 = vst.msk [vmem:[#allocation7 + $0x1c] sm:$0xf] %vm5532_vm1, %v487_v37  ;;  %v532_v38 = vpop.f32.mrf.mxu2 }
 0x10b   :  { %v556_v39 = vpop.f32.mrf.mxu3 }
 0x10f   :  { %v536_v41 = vld [vmem:[#allocation7 + $0x1c] sm:$0xf] }
 0x110   :  { %v560_v42 = vadd.f32 %v556_v39, %v536_v41 }
 0x112   :  { %3444 = vtanh.f32 %v560_v42  ;;  %v3291_v48 = vmul.f32 -1.442695, %v560_v42 }
 0x113   :  { %v558_v44 = vpop.f32.mrf.mxu3  ;;  %3446 = vtanh.f32 %v534_v45 }
 0x114   :  { %3448 = vpow2.f32 %v3291_v48  ;;  %v705_v48 = vld [vmem:[#allocation7 + $0x18] sm:$0xf] }
 0x115   :  { %3450 = vpow2.f32 %v3290_v49 }
 0x118   :  { %v3445_v46 = vpop.eup %3444 }
 0x119   :  { %640 = vrot.lane.b32.xlu0 %v3445_v46, %s4189_s7  ;;  %v3447_v47 = vpop.eup %3446 }
 0x11a   :  { %v3449_v50 = vpop.eup %3448 }
 0x11b   :  { %v617_v51 = vadd.f32 1.0, %v3449_v50  ;;  %v3451_v54 = vpop.eup %3450 }
 0x11c   :  { %v564_v56 = vadd.f32 1.0, %v3451_v54 }
 0x11d   :  { %3452 = vrcp.f32 %v617_v51  ;;  %v629_v2 = vand.u32 2147483648, %v617_v51  ;;  %vm623_vm3 = vweird.f32 %v617_v51  ;;  %v627_v3 = vand.u32 2147483647, %v617_v51 }
 0x11e   :  { %3454 = vrcp.f32 %v564_v56  ;;  %vm570_vm5 = vweird.f32 %v564_v56  ;;  %v576_v8 = vand.u32 2147483648, %v564_v56  ;;  %v574_v10 = vand.u32 2147483647, %v564_v56 }
 0x11f   :  { %v630_v7 = vor.u32 1.1754944e-38, %v629_v2  ;;  %vm628_vm7 = vcmp.eq.f32.partialorder %v627_v3, 8.507059e+37 }
 0x120   :  { %v577_v16 = vor.u32 1.1754944e-38, %v576_v8  ;;  %vm575_vm9 = vcmp.eq.f32.partialorder %v574_v10, 8.507059e+37 }
 0x121   :  { %587 = vrot.lane.b32.xlu0 %v3447_v47, %s4189_s7 }
 0x123   :  { %v3453_v57 = vpop.eup %3452 }
 0x124   :  { %v619_v59 = vmul.f32 %v3453_v57, %v617_v51  ;;  %v3455_v60 = vpop.eup %3454  ;;  %vm624_vm2 = vweird.f32 %v3453_v57  ;;  %v682_v51 = vld [vmem:[#allocation6 + $0x4] sm:$0xf] }
 0x125   :  { %v566_v62 = vmul.f32 %v3455_v60, %v564_v56  ;;  %vm625_vm4 = vmor %vm623_vm3, %vm624_vm2  ;;  %vm571_vm6 = vweird.f32 %v3455_v60 }
 0x126   :  { %v620_v61 = vsub.f32 1.0, %v619_v59  ;;  %vm572_vm8 = vmor %vm570_vm5, %vm571_vm6 }
 0x127   :  { %v567_v0 = vsub.f32 1.0, %v566_v62 }
 0x128   :  { %v621_v63 = vmul.f32 %v3453_v57, %v620_v61 }
 0x129   :  { %v568_v4 = vmul.f32 %v3455_v60, %v567_v0 }
 0x12a   :  { %v622_v1 = vadd.f32 %v3453_v57, %v621_v63 }
 0x12b   :  { %v569_v9 = vadd.f32 %v3455_v60, %v568_v4 }
 0x12c   :  { %v626_v6 = vsel %vm625_vm4, %v3453_v57, %v622_v1  ;;  %vm680_vm4 = vcmp.gt.s32.totalorder %v4472_v17, 6 }
 0x12d   :  { %v631_v12 = vsel %vm628_vm7, %v630_v7, %v626_v6  ;;  %v573_v19 = vsel %vm572_vm8, %v3455_v60, %v569_v9 }
 0x12e   :  { %v578_v20 = vsel %vm575_vm9, %v577_v16, %v573_v19  ;;  %v638_v28 = vmul.f32 %v4484_v25, %v631_v12  ;;  %v809_v16 = vsel %vm680_vm4, 1, %v4190_v58  ;;  %vm679_vm9 = vcmp.gt.s32.totalorder %v4472_v17, 1 }
 0x12f   :  { %v585_v32 = vmul.f32 %v4486_v27, %v578_v20 }
 0x18b   :  { %v641_v13 = vpop.permute.xlu0 %640 }
 0x18c   :  { %v643_v14 = vmul.f32 %v641_v13, %v631_v12 }
 0x18e   :  { %645 = vrot.lane.b32.xlu1 %v643_v14, %s4188_s2 }
 0x193   :  { %v588_v21 = vpop.permute.xlu0 %587 }
 0x194   :  { %v590_v23 = vmul.f32 %v588_v21, %v578_v20 }
 0x196   :  { %592 = vrot.lane.b32.xlu2 %v590_v23, %s4188_s2  ;;  %657 = vperm.xlu1 %3436, %v655_v22  }
 0x19e   :  { %604 = vperm.xlu1 %3436, %v602_v24   ;;  %661 = vrot.lane.b32.xlu2 %v4441_v18, %s4191_s18 }
 0x1a6   :  { %608 = vrot.lane.b32.xlu2 %v4433_v15, %s4191_s18 }
 0x1f0   :  { %v593_v31 = vpop.permute.xlu2 %592 }
 0x1f1   :  { %v4493_v33 = vadd.f32 %v593_v31, %v585_v32 }
 0x1f8   :  { %v662_v35 = vpop.permute.xlu2 %661 }
 0x200   :  { %v646_v29 = vpop.permute.xlu1 %645  ;;  %v609_v42 = vpop.permute.xlu2 %608 }
 0x201   :  { %v4489_v30 = vadd.f32 %v646_v29, %v638_v28 }
 0x203   :  { %3456 = vtanh.f32 %v4489_v30 }
 0x204   :  { %3458 = vtanh.f32 %v4493_v33 }
 0x208   :  { %v4498_v34 = vpop.permute.xlu1 %657 }
 0x209   :  { %v3457_v18 = vpop.eup %3456  ;;  %vm5533_vm12 = vcmp.eq.s32.totalorder %v4498_v34, 1 }
 0x20a   :  { %651 = vrot.lane.b32.xlu0 %v3457_v18, %s4192_s26  ;;  %v3459_v15 = vpop.eup %3458 }
 0x210   :  { %v4511_v40 = vpop.permute.xlu1 %604 }
 0x211   :  { %vm606_vm13 = vcmp.eq.s32.totalorder %v4511_v40, 1 }
 0x212   :  { %598 = vrot.lane.b32.xlu0 %v3459_v15, %s4192_s26 }
 0x27c   :  { %v652_v36 = vpop.permute.xlu0 %651 }
 0x27d   :  { %v4500_v37 = vmul.f32 %v652_v36, %v631_v12 }
 0x27f   :  { %v4506_v38 = vsel %vm5533_vm12, %v4500_v37, %v662_v35  ;;  %v4538_v35 = vsel %vm5533_vm12, %v4489_v30, %v4484_v25  ;;  %v764_v25 = vsel %vm679_vm9, 1, %v4190_v58  ;;  %vm829_vm9 = vcmp.gt.s32.totalorder %v4472_v17, 2 }
 0x280   :  { %v706_v39 = vpack.c.bf16 %v4506_v38, %v4506_v38 }
 0x282   :  { %708 = vrot.lane.b32.xlu0 %v706_v39, %s4193_s6 }
 0x284   :  { %v599_v41 = vpop.permute.xlu0 %598 }
 0x285   :  { %v4513_v43 = vmul.f32 %v599_v41, %v578_v20 }
 0x287   :  { %v4519_v44 = vsel %vm606_vm13, %v4513_v43, %v609_v42  ;;  %v4548_v42 = vsel %vm606_vm13, %v4493_v33, %v4486_v27  ;;  %v449_v27 = vld.sshfl [vmem:[#allocation1] sm:$0xff pattern:$0x73625140] }
 0x288   :  { %v683_v45 = vpack.c.bf16 %v4519_v44, %v4519_v44  ;;  %3278 = vmatmul.msk.bf16.vlgmr.msra.gmra.mxu1 %vm383_vm0, %v449_v27 }
 0x289   :  { %1168 = vmatpush.bf16.msra.mxu1 %v4408_v5 }
 0x28a   :  { %685 = vrot.lane.b32.xlu1 %v683_v45, %s4193_s6 }
 0x2f4   :  { %v709_v46 = vpop.permute.xlu0 %708 }
 0x2f5   :  { %3293 = vmatmul.msk.bf16.vlgmr.msra.gmra.mxu3 %vm383_vm0, %v709_v46 }
 0x2f6   :  { %1306 = vmatpush.bf16.msra.mxu3 %v4408_v5 }
 0x2fc   :  { %v686_v47 = vpop.permute.xlu1 %685 }
 0x2fd   :  { %3292 = vmatmul.msk.bf16.vlgmr.msra.gmra.mxu2 %vm383_vm0, %v686_v47 }
 0x2fe   :  { %1283 = vmatpush.bf16.msra.mxu2 %v4424_v11 }
 0x378   :  { %v722_v49 = vpop.f32.mrf.mxu3 }
 0x379   :  { %v726_v50 = vadd.f32 %v722_v49, %v705_v48 }
 0x37b   :  { %3460 = vtanh.f32 %v726_v50  ;;  %v3295_v59 = vmul.f32 -1.442695, %v726_v50 }
 0x380   :  { %v699_v52 = vpop.f32.mrf.mxu2  ;;  %v724_v53 = vpop.f32.mrf.mxu3 }
 0x381   :  { %v3461_v54 = vpop.eup %3460  ;;  %v703_v55 = vadd.f32 %v699_v52, %v682_v51 }
 0x382   :  { %794 = vrot.lane.b32.xlu2 %v3461_v54, %s4189_s7 }
 0x383   :  { %3462 = vtanh.f32 %v703_v55  ;;  %v3294_v1 = vmul.f32 -1.442695, %v703_v55 }
 0x384   :  { %3464 = vpow2.f32 %v3295_v59  ;;  %v470_v59 = vpop.f32.mrf.mxu1 }
 0x388   :  { %v701_v56 = vpop.f32.mrf.mxu2 }
 0x389   :  { %v3463_v57 = vpop.eup %3462 }
 0x38a   :  { %749 = vrot.lane.b32.xlu0 %v3463_v57, %s4189_s7  ;;  %v3465_v60 = vpop.eup %3464 }
 0x38b   :  { %v775_v61 = vadd.f32 1.0, %v3465_v60  ;;  %v471_v60 = vadd.f32 %v4450_v26, %v470_v59 }
 0x38d   :  { %3466 = vrcp.f32 %v775_v61  ;;  %v787_v4 = vand.u32 2147483648, %v775_v61  ;;  %vm781_vm15 = vweird.f32 %v775_v61  ;;  %v785_v6 = vand.u32 2147483647, %v775_v61  ;;  %492 = vst.msk [vmem:[#allocation7] sm:$0xf] %vm5532_vm1, %v471_v60 }
 0x38e   :  { %3468 = vpow2.f32 %v3294_v1  ;;  %v832_v1 = vld [vmem:[#allocation6 + $0x8] sm:$0xf] }
 0x38f   :  { %v788_v9 = vor.u32 1.1754944e-38, %v787_v4  ;;  %vm786_vm3 = vcmp.eq.f32.partialorder %v785_v6, 8.507059e+37 }
 0x393   :  { %v3467_v62 = vpop.eup %3466 }
 0x394   :  { %v777_v63 = vmul.f32 %v3467_v62, %v775_v61  ;;  %vm782_vm14 = vweird.f32 %v3467_v62  ;;  %v3469_v7 = vpop.eup %3468  ;;  %v484_v61 = vrot.slane %v471_v60, 4 }
 0x395   :  { %vm783_vm2 = vmor %vm781_vm15, %vm782_vm14  ;;  %v730_v10 = vadd.f32 1.0, %v3469_v7  ;;  %v855_v7 = vld [vmem:[#allocation7 + $0x14] sm:$0xf] }
 0x396   :  { %v778_v0 = vsub.f32 1.0, %v777_v63  ;;  %493 = vst.msk [vmem:[#allocation7 + $0x4] sm:$0xf] %vm5532_vm1, %v484_v61 }
 0x397   :  { %3470 = vrcp.f32 %v730_v10  ;;  %v742_v24 = vand.u32 2147483648, %v730_v10  ;;  %vm736_vm6 = vweird.f32 %v730_v10  ;;  %v740_v28 = vand.u32 2147483647, %v730_v10 }
 0x398   :  { %v779_v2 = vmul.f32 %v3467_v62, %v778_v0 }
 0x399   :  { %v743_v31 = vor.u32 1.1754944e-38, %v742_v24  ;;  %vm741_vm8 = vcmp.eq.f32.partialorder %v740_v28, 8.507059e+37 }
 0x39a   :  { %v780_v3 = vadd.f32 %v3467_v62, %v779_v2 }
 0x39c   :  { %v784_v8 = vsel %vm783_vm2, %v3467_v62, %v780_v3  ;;  %v472_v62 = vpop.f32.mrf.mxu1 }
 0x39d   :  { %v789_v13 = vsel %vm786_vm3, %v788_v9, %v784_v8  ;;  %v3471_v19 = vpop.eup %3470  ;;  %v473_v63 = vadd.f32 %v4450_v26, %v472_v62 }
 0x39e   :  { %v732_v20 = vmul.f32 %v3471_v19, %v730_v10  ;;  %vm737_vm5 = vweird.f32 %v3471_v19  ;;  %v792_v36 = vmul.f32 %v789_v13, %v4538_v35 }
 0x39f   :  { %vm738_vm7 = vmor %vm736_vm6, %vm737_vm5  ;;  %v485_v0 = vrot.slane %v473_v63, 4  ;;  %494 = vst.msk [vmem:[#allocation7 + $0x8] sm:$0xf] %vm5532_vm1, %v473_v63 }
 0x3a0   :  { %v733_v21 = vsub.f32 1.0, %v732_v20 }
 0x3a1   :  { %495 = vst.msk [vmem:[#allocation7 + $0xc] sm:$0xf] %vm5532_vm1, %v485_v0 }
 0x3a2   :  { %v734_v22 = vmul.f32 %v3471_v19, %v733_v21 }
 0x3a4   :  { %v735_v23 = vadd.f32 %v3471_v19, %v734_v22 }
 0x3a6   :  { %v739_v29 = vsel %vm738_vm7, %v3471_v19, %v735_v23 }
 0x3a7   :  { %v744_v18 = vsel %vm741_vm8, %v743_v31, %v739_v29  ;;  %vm830_vm8 = vcmp.gt.s32.totalorder %v4472_v17, 5 }
 0x3a8   :  { %v747_v45 = vmul.f32 %v744_v18, %v4548_v42  ;;  %v959_v60 = vsel %vm830_vm8, 1, %v4190_v58 }
 0x3dc   :  { %v795_v12 = vpop.permute.xlu2 %794 }
 0x3dd   :  { %v797_v14 = vmul.f32 %v795_v12, %v789_v13 }
 0x3df   :  { %799 = vrot.lane.b32.xlu1 %v797_v14, %s4188_s2 }
 0x3e7   :  { %811 = vperm.xlu1 %3436, %v809_v16  }
 0x3fc   :  { %v750_v32 = vpop.permute.xlu0 %749 }
 0x3fd   :  { %v752_v15 = vmul.f32 %v750_v32, %v744_v18 }
 0x3ff   :  { %754 = vrot.lane.b32.xlu2 %v752_v15, %s4188_s2 }
 0x451   :  { %v800_v39 = vpop.permute.xlu1 %799 }
 0x452   :  { %v4541_v41 = vadd.f32 %v800_v39, %v792_v36 }
 0x454   :  { %3472 = vtanh.f32 %v4541_v41 }
 0x459   :  { %v755_v46 = vpop.permute.xlu2 %754  ;;  %v4560_v33 = vpop.permute.xlu1 %811 }
 0x45a   :  { %v3473_v47 = vpop.eup %3472  ;;  %v4551_v48 = vadd.f32 %v755_v46, %v747_v45  ;;  %vm813_vm10 = vcmp.eq.s32.totalorder %v4560_v33, 1 }
 0x45b   :  { %805 = vrot.lane.b32.xlu0 %v3473_v47, %s4192_s26 }
 0x45c   :  { %3474 = vtanh.f32 %v4551_v48 }
 0x462   :  { %v3475_v30 = vpop.eup %3474 }
 0x463   :  { %760 = vrot.lane.b32.xlu2 %v3475_v30, %s4192_s26  ;;  %766 = vperm.xlu0 %3437, %v764_v25  }
 0x4bd   :  { %v761_v53 = vpop.permute.xlu2 %760 }
 0x4be   :  { %v4574_v54 = vmul.f32 %v761_v53, %v744_v18 }
 0x4cd   :  { %v806_v49 = vpop.permute.xlu0 %805 }
 0x4ce   :  { %v4562_v50 = vmul.f32 %v806_v49, %v789_v13 }
 0x4d0   :  { %v4569_v51 = vsel %vm813_vm10, %v4562_v50, %v4506_v38 }
 0x4d1   :  { %v856_v52 = vpack.c.bf16 %v4569_v51, %v4569_v51 }
 0x4d3   :  { %858 = vrot.lane.b32.xlu1 %v856_v52, %s4193_s6 }
 0x4d5   :  { %v4576_v55 = vpop.permute.xlu0 %766 }
 0x4d6   :  { %vm768_vm11 = vcmp.eq.s32.totalorder %v4576_v55, 1 }
 0x4d7   :  { %v4583_v56 = vsel %vm768_vm11, %v4574_v54, %v4519_v44  ;;  %v4608_v61 = vsel %vm768_vm11, %v4551_v48, %v4548_v42 }
 0x4d8   :  { %v833_v38 = vpack.c.bf16 %v4583_v56, %v4583_v56 }
 0x4da   :  { %835 = vrot.lane.b32.xlu2 %v833_v38, %s4193_s6 }
 0x534   :  { %v836_v57 = vpop.permute.xlu2 %835 }
 0x535   :  { %3296 = vmatmul.msk.bf16.vlgmr.msrb.gmra.mxu0 %vm383_vm0, %v836_v57 }
 0x536   :  { %1421 = vmatpush.bf16.msrb.mxu0 %v4424_v11 }
 0x545   :  { %v859_v44 = vpop.permute.xlu1 %858 }
 0x546   :  { %3297 = vmatmul.msk.bf16.vlgmr.msrb.gmra.mxu1 %vm383_vm0, %v859_v44 }
 0x547   :  { %1444 = vmatpush.bf16.msrb.mxu1 %v4408_v5 }
 0x5b2   :  { %v849_v2 = vpop.f32.mrf.mxu0 }
 0x5b3   :  { %v853_v3 = vadd.f32 %v849_v2, %v832_v1  ;;  %v4619_v1 = vsel %vm813_vm10, %v4541_v41, %v4538_v35 }
 0x5b5   :  { %3476 = vtanh.f32 %v853_v3  ;;  %v3298_v26 = vmul.f32 -1.442695, %v853_v3 }
 0x5ba   :  { %v851_v4 = vpop.f32.mrf.mxu0 }
 0x5bb   :  { %v3477_v6 = vpop.eup %3476  ;;  %v914_v4 = vsel %vm829_vm9, 1, %v4190_v58 }
 0x5bc   :  { %899 = vrot.lane.b32.xlu2 %v3477_v6, %s4189_s7 }
 0x5c3   :  { %v872_v8 = vpop.f32.mrf.mxu1 }
 0x5c4   :  { %v876_v9 = vadd.f32 %v872_v8, %v855_v7 }
 0x5c6   :  { %3478 = vtanh.f32 %v876_v9  ;;  %v3299_v28 = vmul.f32 -1.442695, %v876_v9 }
 0x5c7   :  { %3480 = vpow2.f32 %v3298_v26 }
 0x5cb   :  { %v874_v10 = vpop.f32.mrf.mxu1 }
 0x5cc   :  { %v3479_v12 = vpop.eup %3478 }
 0x5cd   :  { %944 = vrot.lane.b32.xlu1 %v3479_v12, %s4189_s7  ;;  %v3481_v13 = vpop.eup %3480 }
 0x5ce   :  { %v880_v14 = vadd.f32 1.0, %v3481_v13 }
 0x5d0   :  { %3482 = vrcp.f32 %v880_v14  ;;  %v892_v23 = vand.u32 2147483648, %v880_v14  ;;  %vm886_vm15 = vweird.f32 %v880_v14  ;;  %v890_v24 = vand.u32 2147483647, %v880_v14 }
 0x5d1   :  { %3484 = vpow2.f32 %v3299_v28 }
 0x5d2   :  { %v893_v31 = vor.u32 1.1754944e-38, %v892_v23  ;;  %vm891_vm3 = vcmp.eq.f32.partialorder %v890_v24, 8.507059e+37 }
 0x5d6   :  { %v3483_v16 = vpop.eup %3482 }
 0x5d7   :  { %v882_v19 = vmul.f32 %v3483_v16, %v880_v14  ;;  %vm887_vm14 = vweird.f32 %v3483_v16  ;;  %v3485_v36 = vpop.eup %3484 }
 0x5d8   :  { %vm888_vm2 = vmor %vm886_vm15, %vm887_vm14  ;;  %v925_v39 = vadd.f32 1.0, %v3485_v36 }
 0x5d9   :  { %v883_v20 = vsub.f32 1.0, %v882_v19 }
 0x5da   :  { %3486 = vrcp.f32 %v925_v39  ;;  %v937_v27 = vand.u32 2147483648, %v925_v39  ;;  %vm931_vm5 = vweird.f32 %v925_v39  ;;  %v935_v49 = vand.u32 2147483647, %v925_v39 }
 0x5db   :  { %v884_v21 = vmul.f32 %v3483_v16, %v883_v20 }
 0x5dc   :  { %v938_v53 = vor.u32 1.1754944e-38, %v937_v27  ;;  %vm936_vm7 = vcmp.eq.f32.partialorder %v935_v49, 8.507059e+37 }
 0x5dd   :  { %v885_v22 = vadd.f32 %v3483_v16, %v884_v21 }
 0x5df   :  { %v889_v29 = vsel %vm888_vm2, %v3483_v16, %v885_v22  ;;  %v1005_v16 = vld [vmem:[#allocation7 + $0x10] sm:$0xf] }
 0x5e0   :  { %v894_v18 = vsel %vm891_vm3, %v893_v31, %v889_v29  ;;  %v3487_v45 = vpop.eup %3486 }
 0x5e1   :  { %v927_v46 = vmul.f32 %v3487_v45, %v925_v39  ;;  %vm932_vm4 = vweird.f32 %v3487_v45  ;;  %v897_v44 = vmul.f32 %v894_v18, %v4608_v61 }
 0x5e2   :  { %vm933_vm6 = vmor %vm931_vm5, %vm932_vm4 }
 0x5e3   :  { %v928_v47 = vsub.f32 1.0, %v927_v46 }
 0x5e5   :  { %v929_v25 = vmul.f32 %v3487_v45, %v928_v47 }
 0x5e7   :  { %v930_v30 = vadd.f32 %v3487_v45, %v929_v25 }
 0x5e9   :  { %v934_v52 = vsel %vm933_vm6, %v3487_v45, %v930_v30  ;;  %vm980_vm6 = vcmp.gt.s32.totalorder %v4472_v17, 4 }
 0x5ea   :  { %v939_v57 = vsel %vm936_vm7, %v938_v53, %v934_v52 }
 0x5eb   :  { %v942_v2 = vmul.f32 %v939_v57, %v4619_v1 }
 0x616   :  { %v900_v32 = vpop.permute.xlu2 %899 }
 0x617   :  { %v902_v15 = vmul.f32 %v900_v32, %v894_v18 }
 0x619   :  { %904 = vrot.lane.b32.xlu1 %v902_v15, %s4188_s2 }
 0x63f   :  { %v945_v38 = vpop.permute.xlu1 %944 }
 0x640   :  { %v947_v59 = vmul.f32 %v945_v38, %v939_v57 }
 0x642   :  { %949 = vrot.lane.b32.xlu0 %v947_v59, %s4188_s2 }
 0x64a   :  { %961 = vperm.xlu0 %3437, %v959_v60  }
 0x68b   :  { %v905_v62 = vpop.permute.xlu1 %904 }
 0x68c   :  { %v4611_v63 = vadd.f32 %v905_v62, %v897_v44 }
 0x68e   :  { %3488 = vtanh.f32 %v4611_v63 }
 0x694   :  { %v3489_v0 = vpop.eup %3488 }
 0x695   :  { %910 = vrot.lane.b32.xlu1 %v3489_v0, %s4192_s26 }
 0x6b4   :  { %v950_v42 = vpop.permute.xlu0 %949 }
 0x6b5   :  { %v4622_v48 = vadd.f32 %v950_v42, %v942_v2 }
 0x6b7   :  { %3490 = vtanh.f32 %v4622_v48 }
 0x6bc   :  { %v4628_v6 = vpop.permute.xlu0 %961 }
 0x6bd   :  { %v3491_v3 = vpop.eup %3490  ;;  %vm963_vm14 = vcmp.eq.s32.totalorder %v4628_v6, 1 }
 0x6be   :  { %955 = vrot.lane.b32.xlu2 %v3491_v3, %s4192_s26 }
 0x6c6   :  { %916 = vperm.xlu2 %3438, %v914_v4  }
 0x707   :  { %v911_v9 = vpop.permute.xlu1 %910 }
 0x708   :  { %v4642_v10 = vmul.f32 %v911_v9, %v894_v18 }
 0x718   :  { %v956_v7 = vpop.permute.xlu2 %955 }
 0x719   :  { %v4630_v35 = vmul.f32 %v956_v7, %v939_v57  ;;  %v1109_v57 = vsel %vm980_vm6, 1, %v4190_v58 }
 0x71b   :  { %v4637_v41 = vsel %vm963_vm14, %v4630_v35, %v4569_v51 }
 0x71c   :  { %v1006_v8 = vpack.c.bf16 %v4637_v41, %v4637_v41 }
 0x71e   :  { %1008 = vrot.lane.b32.xlu0 %v1006_v8, %s4193_s6 }
 0x720   :  { %v4644_v12 = vpop.permute.xlu2 %916 }
 0x721   :  { %vm918_vm15 = vcmp.eq.s32.totalorder %v4644_v12, 1 }
 0x722   :  { %v4651_v26 = vsel %vm918_vm15, %v4642_v10, %v4583_v56  ;;  %v982_v56 = vld [vmem:[#allocation6 + $0xc] sm:$0xf] }
 0x723   :  { %v983_v51 = vpack.c.bf16 %v4651_v26, %v4651_v26 }
 0x725   :  { %985 = vrot.lane.b32.xlu1 %v983_v51, %s4193_s6  ;;  %v4670_v51 = vsel %vm963_vm14, %v4622_v48, %v4619_v1 }
 0x790   :  { %v1009_v13 = vpop.permute.xlu0 %1008 }
 0x791   :  { %3301 = vmatmul.msk.bf16.vlgmr.msrb.gmra.mxu3 %vm383_vm0, %v1009_v13 }
 0x792   :  { %1581 = vmatpush.bf16.msrb.mxu3 %v4408_v5 }
 0x797   :  { %v986_v14 = vpop.permute.xlu1 %985 }
 0x798   :  { %3300 = vmatmul.msk.bf16.vlgmr.msrb.gmra.mxu2 %vm383_vm0, %v986_v14 }
 0x799   :  { %1559 = vmatpush.bf16.msrb.mxu2 %v4424_v11 }
 0x814   :  { %v1022_v19 = vpop.f32.mrf.mxu3 }
 0x815   :  { %v1026_v20 = vadd.f32 %v1022_v19, %v1005_v16  ;;  %v4680_v19 = vsel %vm918_vm15, %v4611_v63, %v4608_v61 }
 0x817   :  { %3492 = vtanh.f32 %v1026_v20  ;;  %v3303_v5 = vmul.f32 -1.442695, %v1026_v20 }
 0x81b   :  { %v999_v21 = vpop.f32.mrf.mxu2 }
 0x81c   :  { %v1003_v22 = vadd.f32 %v999_v21, %v982_v56  ;;  %v1024_v23 = vpop.f32.mrf.mxu3 }
 0x81d   :  { %v3493_v24 = vpop.eup %3492 }
 0x81e   :  { %3494 = vtanh.f32 %v1003_v22  ;;  %1094 = vrot.lane.b32.xlu2 %v3493_v24, %s4189_s7  ;;  %v3302_v36 = vmul.f32 -1.442695, %v1003_v22 }
 0x81f   :  { %3496 = vpow2.f32 %v3303_v5 }
 0x823   :  { %v1001_v28 = vpop.f32.mrf.mxu2 }
 0x824   :  { %v3495_v29 = vpop.eup %3494 }
 0x825   :  { %1049 = vrot.lane.b32.xlu0 %v3495_v29, %s4189_s7  ;;  %v3497_v31 = vpop.eup %3496 }
 0x826   :  { %v1075_v11 = vadd.f32 1.0, %v3497_v31 }
 0x828   :  { %3498 = vrcp.f32 %v1075_v11  ;;  %v1087_v46 = vand.u32 2147483648, %v1075_v11  ;;  %vm1081_vm3 = vweird.f32 %v1075_v11  ;;  %v1085_v47 = vand.u32 2147483647, %v1075_v11 }
 0x829   :  { %3500 = vpow2.f32 %v3302_v36 }
 0x82a   :  { %v1088_v27 = vor.u32 1.1754944e-38, %v1087_v46  ;;  %vm1086_vm5 = vcmp.eq.f32.partialorder %v1085_v47, 8.507059e+37 }
 0x82e   :  { %v3499_v32 = vpop.eup %3498 }
 0x82f   :  { %v1077_v18 = vmul.f32 %v3499_v32, %v1075_v11  ;;  %vm1082_vm2 = vweird.f32 %v3499_v32  ;;  %v3501_v25 = vpop.eup %3500 }
 0x830   :  { %vm1083_vm4 = vmor %vm1081_vm3, %vm1082_vm2  ;;  %v1030_v49 = vadd.f32 1.0, %v3501_v25  ;;  %vm979_vm3 = vcmp.gt.s32.totalorder %v4472_v17, 3 }
 0x831   :  { %v1078_v15 = vsub.f32 1.0, %v1077_v18  ;;  %v1064_v48 = vsel %vm979_vm3, 1, %v4190_v58 }
 0x832   :  { %3502 = vrcp.f32 %v1030_v49  ;;  %v1042_v2 = vand.u32 2147483648, %v1030_v49  ;;  %vm1036_vm8 = vweird.f32 %v1030_v49  ;;  %v1040_v42 = vand.u32 2147483647, %v1030_v49 }
 0x833   :  { %v1079_v39 = vmul.f32 %v3499_v32, %v1078_v15 }
 0x834   :  { %v1043_v4 = vor.u32 1.1754944e-38, %v1042_v2  ;;  %vm1041_vm2 = vcmp.eq.f32.partialorder %v1040_v42, 8.507059e+37 }
 0x835   :  { %v1080_v45 = vadd.f32 %v3499_v32, %v1079_v39 }
 0x837   :  { %v1084_v30 = vsel %vm1083_vm4, %v3499_v32, %v1080_v45  ;;  %v1130_v32 = vld [vmem:[#allocation6 + $0x10] sm:$0xf] }
 0x838   :  { %v1089_v52 = vsel %vm1086_vm5, %v1088_v27, %v1084_v30  ;;  %v3503_v59 = vpop.eup %3502 }
 0x839   :  { %v1032_v60 = vmul.f32 %v3503_v59, %v1030_v49  ;;  %vm1037_vm7 = vweird.f32 %v3503_v59  ;;  %v1092_v13 = vmul.f32 %v1089_v52, %v4670_v51 }
 0x83a   :  { %vm1038_vm9 = vmor %vm1036_vm8, %vm1037_vm7 }
 0x83b   :  { %v1033_v44 = vsub.f32 1.0, %v1032_v60 }
 0x83d   :  { %v1034_v62 = vmul.f32 %v3503_v59, %v1033_v44 }
 0x83f   :  { %v1035_v0 = vadd.f32 %v3503_v59, %v1034_v62 }
 0x841   :  { %v1039_v3 = vsel %vm1038_vm9, %v3503_v59, %v1035_v0 }
 0x842   :  { %v1044_v8 = vsel %vm1041_vm2, %v1043_v4, %v1039_v3 }
 0x843   :  { %v1047_v20 = vmul.f32 %v1044_v8, %v4680_v19 }
 0x878   :  { %v1095_v53 = vpop.permute.xlu2 %1094 }
 0x879   :  { %v1097_v38 = vmul.f32 %v1095_v53, %v1089_v52 }
 0x87b   :  { %1099 = vrot.lane.b32.xlu1 %v1097_v38, %s4188_s2 }
 0x883   :  { %1111 = vperm.xlu1 %3436, %v1109_v57  }
 0x897   :  { %v1050_v7 = vpop.permute.xlu0 %1049 }
 0x898   :  { %v1052_v9 = vmul.f32 %v1050_v7, %v1044_v8 }
 0x89a   :  { %1054 = vrot.lane.b32.xlu2 %v1052_v9, %s4188_s2 }
 0x8ed   :  { %v1100_v14 = vpop.permute.xlu1 %1099 }
 0x8ee   :  { %v4673_v16 = vadd.f32 %v1100_v14, %v1092_v13 }
 0x8f0   :  { %3504 = vtanh.f32 %v4673_v16 }
 0x8f4   :  { %v1055_v56 = vpop.permute.xlu2 %1054 }
 0x8f5   :  { %v4683_v21 = vadd.f32 %v1055_v56, %v1047_v20  ;;  %v4690_v61 = vpop.permute.xlu1 %1111 }
 0x8f6   :  { %v3505_v1 = vpop.eup %3504  ;;  %vm1113_vm4 = vcmp.eq.s32.totalorder %v4690_v61, 1 }
 0x8f7   :  { %3506 = vtanh.f32 %v4683_v21  ;;  %1105 = vrot.lane.b32.xlu0 %v3505_v1, %s4192_s26 }
 0x8fd   :  { %v3507_v22 = vpop.eup %3506 }
 0x8fe   :  { %1060 = vrot.lane.b32.xlu2 %v3507_v22, %s4192_s26 }
 0x8ff   :  { %1066 = vperm.xlu0 %3437, %v1064_v48  }
 0x958   :  { %v1061_v17 = vpop.permute.xlu2 %1060 }
 0x959   :  { %v4704_v28 = vmul.f32 %v1061_v17, %v1044_v8 }
 0x969   :  { %v1106_v63 = vpop.permute.xlu0 %1105 }
 0x96a   :  { %v4692_v23 = vmul.f32 %v1106_v63, %v1089_v52 }
 0x96c   :  { %v4699_v24 = vsel %vm1113_vm4, %v4692_v23, %v4637_v41 }
 0x96d   :  { %v1154_v58 = vpack.c.bf16 %v4699_v24, %v4699_v24 }
 0x96f   :  { %1156 = vrot.lane.b32.xlu1 %v1154_v58, %s4193_s6 }
 0x971   :  { %v4706_v29 = vpop.permute.xlu0 %1066 }
 0x972   :  { %vm1068_vm5 = vcmp.eq.s32.totalorder %v4706_v29, 1 }
 0x973   :  { %v4713_v5 = vsel %vm1068_vm5, %v4704_v28, %v4651_v26  ;;  %v1153_v26 = vld [vmem:[#allocation7 + $0xc] sm:$0xf] }
 0x974   :  { %v1131_v41 = vpack.c.bf16 %v4713_v5, %v4713_v5 }
 0x976   :  { %1133 = vrot.lane.b32.xlu2 %v1131_v41, %s4193_s6 }
 0x9d0   :  { %v1134_v31 = vpop.permute.xlu2 %1133 }
 0x9d1   :  { %3304 = vmatmul.msk.bf16.vlgmr.msra.gmra.mxu0 %vm383_vm0, %v1134_v31  ;;  %v4728_v31 = vsel %vm1113_vm4, %v4673_v16, %v4670_v51 }
 0x9e1   :  { %v1157_v11 = vpop.permute.xlu1 %1156 }
 0x9e2   :  { %3305 = vmatmul.msk.bf16.vlgmr.msra.gmra.mxu1 %vm383_vm0, %v1157_v11 }
 0xa4e   :  { %v1147_v18 = vpop.f32.mrf.mxu0 }
 0xa4f   :  { %v1151_v15 = vadd.f32 %v1147_v18, %v1130_v32 }
 0xa51   :  { %3508 = vtanh.f32 %v1151_v15  ;;  %v3306_v30 = vmul.f32 -1.442695, %v1151_v15  ;;  %v4738_v15 = vsel %vm1068_vm5, %v4683_v21, %v4680_v19 }
 0xa56   :  { %v1149_v36 = vpop.f32.mrf.mxu0 }
 0xa57   :  { %v3509_v39 = vpop.eup %3508 }
 0xa58   :  { %1197 = vrot.lane.b32.xlu1 %v3509_v39, %s4189_s7 }
 0xa5f   :  { %v1170_v45 = vpop.f32.mrf.mxu1 }
 0xa60   :  { %v1174_v46 = vadd.f32 %v1170_v45, %v1153_v26 }
 0xa62   :  { %3510 = vtanh.f32 %v1174_v46  ;;  %v3307_v52 = vmul.f32 -1.442695, %v1174_v46 }
 0xa63   :  { %3512 = vpow2.f32 %v3306_v30 }
 0xa67   :  { %v1172_v47 = vpop.f32.mrf.mxu1 }
 0xa68   :  { %v3511_v25 = vpop.eup %3510 }
 0xa69   :  { %1237 = vrot.lane.b32.xlu0 %v3511_v25, %s4189_s7  ;;  %v3513_v27 = vpop.eup %3512 }
 0xa6a   :  { %v1178_v49 = vadd.f32 1.0, %v3513_v27 }
 0xa6c   :  { %3514 = vrcp.f32 %v1178_v49  ;;  %v1190_v0 = vand.u32 2147483648, %v1178_v49  ;;  %vm1184_vm7 = vweird.f32 %v1178_v49  ;;  %v1188_v42 = vand.u32 2147483647, %v1178_v49 }
 0xa6d   :  { %3516 = vpow2.f32 %v3307_v52  ;;  %v1268_v52 = vld [vmem:[#allocation6 + $0x14] sm:$0xf] }
 0xa6e   :  { %v1191_v4 = vor.u32 1.1754944e-38, %v1190_v0  ;;  %vm1189_vm9 = vcmp.eq.f32.partialorder %v1188_v42, 8.507059e+37 }
 0xa72   :  { %v3515_v53 = vpop.eup %3514 }
 0xa73   :  { %v1180_v38 = vmul.f32 %v3515_v53, %v1178_v49  ;;  %v3517_v57 = vpop.eup %3516  ;;  %vm1185_vm6 = vweird.f32 %v3515_v53 }
 0xa74   :  { %v1218_v59 = vadd.f32 1.0, %v3517_v57  ;;  %vm1186_vm8 = vmor %vm1184_vm7, %vm1185_vm6 }
 0xa75   :  { %v1181_v60 = vsub.f32 1.0, %v1180_v38 }
 0xa76   :  { %3518 = vrcp.f32 %v1218_v59  ;;  %v1230_v1 = vand.u32 2147483648, %v1218_v59  ;;  %vm1224_vm3 = vweird.f32 %v1218_v59  ;;  %v1228_v48 = vand.u32 2147483647, %v1218_v59 }
 0xa77   :  { %v1182_v44 = vmul.f32 %v3515_v53, %v1181_v60 }
 0xa78   :  { %v1231_v63 = vor.u32 1.1754944e-38, %v1230_v1  ;;  %vm1229_vm6 = vcmp.eq.f32.partialorder %v1228_v48, 8.507059e+37 }
 0xa79   :  { %v1183_v62 = vadd.f32 %v3515_v53, %v1182_v44 }
 0xa7b   :  { %v1187_v3 = vsel %vm1186_vm8, %v3515_v53, %v1183_v62 }
 0xa7c   :  { %v3519_v2 = vpop.eup %3518  ;;  %v1192_v9 = vsel %vm1189_vm9, %v1191_v4, %v1187_v3 }
 0xa7d   :  { %v1220_v7 = vmul.f32 %v3519_v2, %v1218_v59  ;;  %vm1225_vm2 = vweird.f32 %v3519_v2  ;;  %v1195_v36 = vmul.f32 %v1192_v9, %v4738_v15 }
 0xa7e   :  { %vm1226_vm1 = vmor %vm1224_vm3, %vm1225_vm2 }
 0xa7f   :  { %v1221_v14 = vsub.f32 1.0, %v1220_v7 }
 0xa81   :  { %v1222_v20 = vmul.f32 %v3519_v2, %v1221_v14 }
 0xa83   :  { %v1223_v56 = vadd.f32 %v3519_v2, %v1222_v20 }
 0xa85   :  { %v1227_v22 = vsel %vm1226_vm1, %v3519_v2, %v1223_v56 }
 0xa86   :  { %v1232_v17 = vsel %vm1229_vm6, %v1231_v63, %v1227_v22 }
 0xa87   :  { %v1235_v11 = vmul.f32 %v1232_v17, %v4728_v31 }
 0xaca   :  { %v1198_v8 = vpop.permute.xlu1 %1197 }
 0xacb   :  { %v1200_v13 = vmul.f32 %v1198_v8, %v1192_v9 }
 0xacd   :  { %1202 = vrot.lane.b32.xlu0 %v1200_v13, %s4188_s2 }
 0xadb   :  { %v1238_v58 = vpop.permute.xlu0 %1237 }
 0xadc   :  { %v1240_v41 = vmul.f32 %v1238_v58, %v1232_v17 }
 0xade   :  { %1242 = vrot.lane.b32.xlu2 %v1240_v41, %s4188_s2 }
 0xb38   :  { %v1243_v32 = vpop.permute.xlu2 %1242 }
 0xb39   :  { %v4731_v18 = vadd.f32 %v1243_v32, %v1235_v11 }
 0xb3b   :  { %3520 = vtanh.f32 %v4731_v18 }
 0xb3f   :  { %v1203_v39 = vpop.permute.xlu0 %1202 }
 0xb40   :  { %v4741_v26 = vadd.f32 %v1203_v39, %v1195_v36 }
 0xb41   :  { %v3521_v51 = vpop.eup %3520 }
 0xb42   :  { %3522 = vtanh.f32 %v4741_v26  ;;  %1248 = vrot.lane.b32.xlu1 %v3521_v51, %s4192_s26 }
 0xb48   :  { %v3523_v16 = vpop.eup %3522 }
 0xb49   :  { %1208 = vrot.lane.b32.xlu2 %v3523_v16, %s4192_s26 }
 0xba3   :  { %v1209_v45 = vpop.permute.xlu2 %1208 }
 0xba4   :  { %v4746_v46 = vmul.f32 %v1209_v45, %v1192_v9 }
 0xba6   :  { %v4752_v19 = vsel %vm1113_vm4, %v4746_v46, %v4713_v5 }
 0xba7   :  { %v1269_v21 = vpack.c.bf16 %v4752_v19, %v4752_v19 }
 0xba9   :  { %1271 = vrot.lane.b32.xlu1 %v1269_v21, %s4193_s6 }
 0xbb4   :  { %v1249_v47 = vpop.permute.xlu1 %1248 }
 0xbb5   :  { %v4757_v25 = vmul.f32 %v1249_v47, %v1232_v17 }
 0xbb7   :  { %v4763_v30 = vsel %vm1068_vm5, %v4757_v25, %v4699_v24  ;;  %v1291_v24 = vld [vmem:[#allocation7 + $0x8] sm:$0xf] }
 0xbb8   :  { %v1292_v27 = vpack.c.bf16 %v4763_v30, %v4763_v30 }
 0xbba   :  { %1294 = vrot.lane.b32.xlu0 %v1292_v27, %s4193_s6 }
 0xc1b   :  { %v1272_v5 = vpop.permute.xlu1 %1271 }
 0xc1c   :  { %3308 = vmatmul.msk.bf16.vlgmr.msra.gmra.mxu2 %vm383_vm0, %v1272_v5 }
 0xc2c   :  { %v1295_v49 = vpop.permute.xlu0 %1294 }
 0xc2d   :  { %3309 = vmatmul.msk.bf16.vlgmr.msra.gmra.mxu3 %vm383_vm0, %v1295_v49 }
 0xc9f   :  { %v1285_v53 = vpop.f32.mrf.mxu2 }
 0xca0   :  { %v1289_v38 = vadd.f32 %v1285_v53, %v1268_v52  ;;  %v4778_v52 = vsel %vm1113_vm4, %v4741_v26, %v4738_v15 }
 0xca2   :  { %3524 = vtanh.f32 %v1289_v38  ;;  %v3310_v42 = vmul.f32 -1.442695, %v1289_v38 }
 0xca7   :  { %v1287_v57 = vpop.f32.mrf.mxu2 }
 0xca8   :  { %v3525_v59 = vpop.eup %3524 }
 0xca9   :  { %1335 = vrot.lane.b32.xlu0 %v3525_v59, %s4189_s7 }
 0xcb0   :  { %v1308_v60 = vpop.f32.mrf.mxu3 }
 0xcb1   :  { %v1312_v44 = vadd.f32 %v1308_v60, %v1291_v24  ;;  %v4789_v24 = vsel %vm1068_vm5, %v4731_v18, %v4728_v31 }
 0xcb3   :  { %3526 = vtanh.f32 %v1312_v44  ;;  %v3311_v2 = vmul.f32 -1.442695, %v1312_v44 }
 0xcb5   :  { %3528 = vpow2.f32 %v3311_v2 }
 0xcb6   :  { %3530 = vpow2.f32 %v3310_v42 }
 0xcb8   :  { %v1310_v62 = vpop.f32.mrf.mxu3 }
 0xcb9   :  { %v3527_v0 = vpop.eup %3526 }
 0xcba   :  { %1375 = vrot.lane.b32.xlu2 %v3527_v0, %s4189_s7 }
 0xcbb   :  { %v3529_v3 = vpop.eup %3528 }
 0xcbc   :  { %v1356_v4 = vadd.f32 1.0, %v3529_v3  ;;  %v3531_v7 = vpop.eup %3530 }
 0xcbd   :  { %v1316_v8 = vadd.f32 1.0, %v3531_v7 }
 0xcbe   :  { %3532 = vrcp.f32 %v1356_v4  ;;  %v1368_v63 = vand.u32 2147483648, %v1356_v4  ;;  %vm1362_vm7 = vweird.f32 %v1356_v4  ;;  %v1366_v58 = vand.u32 2147483647, %v1356_v4 }
 0xcbf   :  { %3534 = vrcp.f32 %v1316_v8  ;;  %v1328_v16 = vand.u32 2147483648, %v1316_v8  ;;  %vm1322_vm3 = vweird.f32 %v1316_v8  ;;  %v1326_v45 = vand.u32 2147483647, %v1316_v8 }
 0xcc0   :  { %v1369_v11 = vor.u32 1.1754944e-38, %v1368_v63  ;;  %vm1367_vm9 = vcmp.eq.f32.partialorder %v1366_v58, 8.507059e+37 }
 0xcc1   :  { %v1329_v47 = vor.u32 1.1754944e-38, %v1328_v16  ;;  %vm1327_vm12 = vcmp.eq.f32.partialorder %v1326_v45, 8.507059e+37 }
 0xcc4   :  { %v3533_v9 = vpop.eup %3532 }
 0xcc5   :  { %v1358_v13 = vmul.f32 %v3533_v9, %v1356_v4  ;;  %v3535_v14 = vpop.eup %3534  ;;  %vm1363_vm1 = vweird.f32 %v3533_v9 }
 0xcc6   :  { %v1318_v56 = vmul.f32 %v3535_v14, %v1316_v8  ;;  %vm1364_vm8 = vmor %vm1362_vm7, %vm1363_vm1  ;;  %vm1323_vm2 = vweird.f32 %v3535_v14  ;;  %v1429_v8 = vld [vmem:[#allocation7 + $0x4] sm:$0xf] }
 0xcc7   :  { %v1359_v20 = vsub.f32 1.0, %v1358_v13  ;;  %vm1324_vm6 = vmor %vm1322_vm3, %vm1323_vm2 }
 0xcc8   :  { %v1319_v48 = vsub.f32 1.0, %v1318_v56 }
 0xcc9   :  { %v1360_v1 = vmul.f32 %v3533_v9, %v1359_v20 }
 0xcca   :  { %v1320_v17 = vmul.f32 %v3535_v14, %v1319_v48 }
 0xccb   :  { %v1361_v22 = vadd.f32 %v3533_v9, %v1360_v1 }
 0xccc   :  { %v1321_v39 = vadd.f32 %v3535_v14, %v1320_v17 }
 0xccd   :  { %v1365_v41 = vsel %vm1364_vm8, %v3533_v9, %v1361_v22 }
 0xcce   :  { %v1370_v36 = vsel %vm1367_vm9, %v1369_v11, %v1365_v41  ;;  %v1325_v21 = vsel %vm1324_vm6, %v3535_v14, %v1321_v39  ;;  %v1406_v14 = vld [vmem:[#allocation6 + $0x18] sm:$0xf] }
 0xccf   :  { %v1330_v5 = vsel %vm1327_vm12, %v1329_v47, %v1325_v21  ;;  %v1373_v60 = vmul.f32 %v1370_v36, %v4789_v24 }
 0xcd0   :  { %v1333_v53 = vmul.f32 %v1330_v5, %v4778_v52 }
 0xd14   :  { %v1376_v32 = vpop.permute.xlu2 %1375 }
 0xd15   :  { %v1378_v51 = vmul.f32 %v1376_v32, %v1370_v36 }
 0xd17   :  { %1380 = vrot.lane.b32.xlu1 %v1378_v51, %s4188_s2 }
 0xd1b   :  { %v1336_v27 = vpop.permute.xlu0 %1335 }
 0xd1c   :  { %v1338_v49 = vmul.f32 %v1336_v27, %v1330_v5 }
 0xd1e   :  { %1340 = vrot.lane.b32.xlu2 %v1338_v49, %s4188_s2 }
 0xd78   :  { %v1341_v38 = vpop.permute.xlu2 %1340 }
 0xd79   :  { %v4781_v57 = vadd.f32 %v1341_v38, %v1333_v53 }
 0xd7b   :  { %3536 = vtanh.f32 %v4781_v57 }
 0xd81   :  { %v3537_v59 = vpop.eup %3536 }
 0xd82   :  { %1346 = vrot.lane.b32.xlu1 %v3537_v59, %s4192_s26 }
 0xd89   :  { %v1381_v15 = vpop.permute.xlu1 %1380 }
 0xd8a   :  { %v4792_v26 = vadd.f32 %v1381_v15, %v1373_v60 }
 0xd8c   :  { %3538 = vtanh.f32 %v4792_v26 }
 0xd92   :  { %v3539_v44 = vpop.eup %3538 }
 0xd93   :  { %1386 = vrot.lane.b32.xlu0 %v3539_v44, %s4192_s26 }
 0xdf4   :  { %v1347_v62 = vpop.permute.xlu1 %1346 }
 0xdf5   :  { %v4796_v0 = vmul.f32 %v1347_v62, %v1330_v5 }
 0xdf7   :  { %v4802_v2 = vsel %vm963_vm14, %v4796_v0, %v4752_v19 }
 0xdf8   :  { %v1407_v31 = vpack.c.bf16 %v4802_v2, %v4802_v2 }
 0xdfa   :  { %1409 = vrot.lane.b32.xlu0 %v1407_v31, %s4193_s6 }
 0xe05   :  { %v1387_v18 = vpop.permute.xlu0 %1386 }
 0xe06   :  { %v4807_v42 = vmul.f32 %v1387_v18, %v1370_v36 }
 0xe08   :  { %v4813_v3 = vsel %vm918_vm15, %v4807_v42, %v4763_v30 }
 0xe09   :  { %v1430_v4 = vpack.c.bf16 %v4813_v3, %v4813_v3 }
 0xe0b   :  { %1432 = vrot.lane.b32.xlu2 %v1430_v4, %s4193_s6 }
 0xe65   :  { %v1433_v19 = vpop.permute.xlu2 %1432 }
 0xe66   :  { %3313 = vmatmul.msk.bf16.vlgmr.msrb.gmra.mxu1 %vm383_vm0, %v1433_v19 }
 0xe6c   :  { %v1410_v7 = vpop.permute.xlu0 %1409 }
 0xe6d   :  { %3312 = vmatmul.msk.bf16.vlgmr.msrb.gmra.mxu0 %vm383_vm0, %v1410_v7 }
 0xee3   :  { %v1446_v9 = vpop.f32.mrf.mxu1 }
 0xee4   :  { %v1450_v13 = vadd.f32 %v1446_v9, %v1429_v8 }
 0xee6   :  { %3540 = vtanh.f32 %v1450_v13  ;;  %v3315_v41 = vmul.f32 -1.442695, %v1450_v13  ;;  %v4828_v13 = vsel %vm963_vm14, %v4781_v57, %v4778_v52 }
 0xeea   :  { %v1423_v20 = vpop.f32.mrf.mxu0 }
 0xeeb   :  { %v1427_v56 = vadd.f32 %v1423_v20, %v1406_v14  ;;  %v1448_v30 = vpop.f32.mrf.mxu1 }
 0xeec   :  { %v3541_v1 = vpop.eup %3540 }
 0xeed   :  { %3542 = vtanh.f32 %v1427_v56  ;;  %1513 = vrot.lane.b32.xlu1 %v3541_v1, %s4189_s7  ;;  %v3314_v63 = vmul.f32 -1.442695, %v1427_v56  ;;  %v4839_v1 = vsel %vm918_vm15, %v4792_v26, %v4789_v24 }
 0xeef   :  { %3544 = vpow2.f32 %v3314_v63 }
 0xef2   :  { %v1425_v48 = vpop.f32.mrf.mxu0 }
 0xef3   :  { %v3543_v22 = vpop.eup %3542 }
 0xef4   :  { %1473 = vrot.lane.b32.xlu2 %v3543_v22, %s4189_s7 }
 0xef5   :  { %v3545_v58 = vpop.eup %3544 }
 0xef6   :  { %v1454_v17 = vadd.f32 1.0, %v3545_v58 }
 0xef8   :  { %3546 = vrcp.f32 %v1454_v17  ;;  %v1466_v21 = vand.u32 2147483648, %v1454_v17  ;;  %vm1460_vm1 = vweird.f32 %v1454_v17  ;;  %v1464_v27 = vand.u32 2147483647, %v1454_v17 }
 0xef9   :  { %3548 = vpow2.f32 %v3315_v41 }
 0xefa   :  { %v1467_v49 = vor.u32 1.1754944e-38, %v1466_v21  ;;  %vm1465_vm8 = vcmp.eq.f32.partialorder %v1464_v27, 8.507059e+37 }
 0xefe   :  { %v3547_v11 = vpop.eup %3546 }
 0xeff   :  { %v1456_v32 = vmul.f32 %v3547_v11, %v1454_v17  ;;  %v3549_v36 = vpop.eup %3548  ;;  %vm1461_vm12 = vweird.f32 %v3547_v11 }
 0xf00   :  { %v1494_v39 = vadd.f32 1.0, %v3549_v36  ;;  %vm1462_vm7 = vmor %vm1460_vm1, %vm1461_vm12 }
 0xf01   :  { %v1457_v51 = vsub.f32 1.0, %v1456_v32 }
 0xf02   :  { %3550 = vrcp.f32 %v1494_v39  ;;  %v1506_v31 = vand.u32 2147483648, %v1494_v39  ;;  %vm1500_vm2 = vweird.f32 %v1494_v39  ;;  %v1504_v18 = vand.u32 2147483647, %v1494_v39 }
 0xf03   :  { %v1458_v16 = vmul.f32 %v3547_v11, %v1457_v51 }
 0xf04   :  { %v1507_v19 = vor.u32 1.1754944e-38, %v1506_v31  ;;  %vm1505_vm6 = vcmp.eq.f32.partialorder %v1504_v18, 8.507059e+37 }
 0xf05   :  { %v1459_v45 = vadd.f32 %v3547_v11, %v1458_v16 }
 0xf07   :  { %v1463_v5 = vsel %vm1462_vm7, %v3547_v11, %v1459_v45 }
 0xf08   :  { %v3551_v47 = vpop.eup %3550  ;;  %v1468_v59 = vsel %vm1465_vm8, %v1467_v49, %v1463_v5 }
 0xf09   :  { %v1496_v53 = vmul.f32 %v3551_v47, %v1494_v39  ;;  %vm1501_vm9 = vweird.f32 %v3551_v47  ;;  %v1471_v14 = vmul.f32 %v1468_v59, %v4828_v13 }
 0xf0a   :  { %vm1502_vm3 = vmor %vm1500_vm2, %vm1501_vm9 }
 0xf0b   :  { %v1497_v15 = vsub.f32 1.0, %v1496_v53 }
 0xf0d   :  { %v1498_v44 = vmul.f32 %v3551_v47, %v1497_v15 }
 0xf0f   :  { %v1499_v62 = vadd.f32 %v3551_v47, %v1498_v44 }
 0xf11   :  { %v1503_v4 = vsel %vm1502_vm3, %v3551_v47, %v1499_v62  ;;  %v1566_v47 = vld [vmem:[#allocation7] sm:$0xf] }
 0xf12   :  { %v1508_v8 = vsel %vm1505_vm6, %v1507_v19, %v1503_v4 }
 0xf13   :  { %v1511_v48 = vmul.f32 %v1508_v8, %v4839_v1 }
 0xf4e   :  { %v1474_v38 = vpop.permute.xlu2 %1473 }
 0xf4f   :  { %v1476_v60 = vmul.f32 %v1474_v38, %v1468_v59 }
 0xf51   :  { %1478 = vrot.lane.b32.xlu1 %v1476_v60, %s4188_s2 }
 0xf5f   :  { %v1514_v7 = vpop.permute.xlu1 %1513 }
 0xf60   :  { %v1516_v9 = vmul.f32 %v1514_v7, %v1508_v8 }
 0xf62   :  { %1518 = vrot.lane.b32.xlu0 %v1516_v9, %s4188_s2 }
 0xfc3   :  { %v1479_v20 = vpop.permute.xlu1 %1478 }
 0xfc4   :  { %v4831_v56 = vadd.f32 %v1479_v20, %v1471_v14 }
 0xfc6   :  { %3552 = vtanh.f32 %v4831_v56 }
 0xfcc   :  { %v3553_v30 = vpop.eup %3552 }
 0xfcd   :  { %1484 = vrot.lane.b32.xlu0 %v3553_v30, %s4192_s26 }
 0xfd4   :  { %v1519_v52 = vpop.permute.xlu0 %1518 }
 0xfd5   :  { %v4842_v57 = vadd.f32 %v1519_v52, %v1511_v48 }
 0xfd7   :  { %3554 = vtanh.f32 %v4842_v57 }
 0xfdd   :  { %v3555_v22 = vpop.eup %3554 }
 0xfde   :  { %1524 = vrot.lane.b32.xlu2 %v3555_v22, %s4192_s26 }
0x1038   :  { %v1525_v63 = vpop.permute.xlu2 %1524 }
0x1039   :  { %v4846_v58 = vmul.f32 %v1525_v63, %v1508_v8 }
0x103b   :  { %v1528_v17 = vsel %vm768_vm11, %v4846_v58, %v4813_v3  ;;  %v1544_v3 = vld [vmem:[#allocation6 + $0x1c] sm:$0xf] }
0x103c   :  { %v1567_v24 = vpack.c.bf16 %v1528_v17, %v1528_v17 }
0x103e   :  { %1569 = vrot.lane.b32.xlu1 %v1567_v24, %s4193_s6  ;;  %v613_v24 = vsel %vm606_vm13, %v4513_v43, 0.0  ;;  %v1071_v43 = vsel %vm1068_vm5, %v4704_v28, 0.0 }
0x103f   :  { %v1485_v26 = vpop.permute.xlu0 %1484 }
0x1040   :  { %v4853_v41 = vmul.f32 %v1485_v26, %v1468_v59 }
0x1042   :  { %v1488_v11 = vsel %vm813_vm10, %v4853_v41, %v4802_v2 }
0x1043   :  { %v1545_v32 = vpack.c.bf16 %v1488_v11, %v1488_v11 }
0x1045   :  { %1547 = vrot.lane.b32.xlu2 %v1545_v32, %s4193_s6 }
0x109f   :  { %v1548_v36 = vpop.permute.xlu2 %1547 }
0x10a0   :  { %3316 = vmatmul.msk.bf16.vlgmr.msrb.gmra.mxu2 %vm383_vm0, %v1548_v36 }
0x10b0   :  { %v1570_v39 = vpop.permute.xlu1 %1569 }
0x10b1   :  { %3317 = vmatmul.msk.bf16.vlgmr.msrb.gmra.mxu3 %vm383_vm0, %v1570_v39 }
0x1123   :  { %v1561_v51 = vpop.f32.mrf.mxu2 }
0x1124   :  { %v1565_v16 = vadd.f32 %v1561_v51, %v1544_v3 }
0x1126   :  { %3556 = vtanh.f32 %v1565_v16  ;;  %v3318_v53 = vmul.f32 -1.442695, %v1565_v16 }
0x112b   :  { %v1563_v45 = vpop.f32.mrf.mxu2 }
0x112c   :  { %v3557_v21 = vpop.eup %3556  ;;  %v1530_v45 = vsel %vm768_vm11, %v4846_v58, 0.0  ;;  %v1529_v58 = vsel %vm768_vm11, %v4842_v57, %v4839_v1 }
0x112d   :  { %1610 = vrot.lane.b32.xlu1 %v3557_v21, %s4189_s7  ;;  %v1352_v21 = vsel %vm963_vm14, %v4796_v0, 0.0 }
0x1134   :  { %v1583_v27 = vpop.f32.mrf.mxu3 }
0x1135   :  { %v1587_v2 = vadd.f32 %v1583_v27, %v1566_v47  ;;  %v1116_v47 = vsel %vm1113_vm4, %v4692_v23, 0.0 }
0x1137   :  { %3558 = vtanh.f32 %v1587_v2  ;;  %v3319_v60 = vmul.f32 -1.442695, %v1587_v2 }
0x1138   :  { %3560 = vpow2.f32 %v3318_v53 }
0x113c   :  { %v1585_v5 = vpop.f32.mrf.mxu3 }
0x113d   :  { %v3559_v49 = vpop.eup %3558 }
0x113e   :  { %1648 = vrot.lane.b32.xlu0 %v3559_v49, %s4189_s7  ;;  %v3561_v38 = vpop.eup %3560 }
0x113f   :  { %v1591_v59 = vadd.f32 1.0, %v3561_v38  ;;  %v771_v38 = vsel %vm768_vm11, %v4574_v54, 0.0 }
0x1141   :  { %3562 = vrcp.f32 %v1591_v59  ;;  %v1603_v7 = vand.u32 2147483648, %v1591_v59  ;;  %vm1597_vm1 = vweird.f32 %v1591_v59  ;;  %v1601_v9 = vand.u32 2147483647, %v1591_v59 }
0x1142   :  { %3564 = vpow2.f32 %v3319_v60  ;;  %v1254_v60 = vsel %vm1068_vm5, %v4757_v25, 0.0  ;;  %v1214_v25 = vsel %vm1113_vm4, %v4746_v46, 0.0  ;;  %v3400_v46 = vld [vmem:[%s5516_s12] sm:$0xff] }
0x1143   :  { %v1604_v20 = vor.u32 1.1754944e-38, %v1603_v7  ;;  %vm1602_vm8 = vcmp.eq.f32.partialorder %v1601_v9, 8.507059e+37  ;;  %1811 = vmatpush.bf16.msra.mxu1 %v3400_v46  ;;  %v966_v9 = vsel %vm963_vm14, %v4630_v35, 0.0 }
0x1147   :  { %v3563_v15 = vpop.eup %3562 }
0x1148   :  { %v1593_v44 = vmul.f32 %v3563_v15, %v1591_v59  ;;  %v3565_v62 = vpop.eup %3564  ;;  %vm1598_vm12 = vweird.f32 %v3563_v15  ;;  %v921_v59 = vsel %vm918_vm15, %v4642_v10, 0.0 }
0x1149   :  { %v1629_v31 = vadd.f32 1.0, %v3565_v62  ;;  %vm1599_vm7 = vmor %vm1597_vm1, %vm1598_vm12  ;;  %vm5557_vm12 = vcmp.eq.s32.totalorder %v4498_v34, 1  ;;  %vm5534_vm1 = vcmask 125952  }
0x114a   :  { %v1594_v18 = vsub.f32 1.0, %v1593_v44  ;;  %v666_v28 = vsel %vm5557_vm12, %v4500_v37, 0.0  ;;  %v1489_v37 = vsel %vm813_vm10, %v4831_v56, %v4828_v13  ;;  %v1392_v44 = vsel %vm918_vm15, %v4807_v42, 0.0 }
0x114b   :  { %3566 = vrcp.f32 %v1629_v31  ;;  %v1641_v11 = vand.u32 2147483648, %v1629_v31  ;;  %vm1635_vm2 = vweird.f32 %v1629_v31  ;;  %v1639_v32 = vand.u32 2147483647, %v1629_v31 }
0x114c   :  { %v1595_v4 = vmul.f32 %v3563_v15, %v1594_v18 }
0x114d   :  { %v1642_v39 = vor.u32 1.1754944e-38, %v1641_v11  ;;  %vm1640_vm6 = vcmp.eq.f32.partialorder %v1639_v32, 8.507059e+37 }
0x114e   :  { %v1596_v19 = vadd.f32 %v3563_v15, %v1595_v4 }
0x1150   :  { %v1600_v14 = vsel %vm1599_vm7, %v3563_v15, %v1596_v19  ;;  %vm5558_vm7 = vmmov %vm5557_vm12 }
0x1151   :  { %v3567_v8 = vpop.eup %3566  ;;  %v4864_v52 = vsel %vm1602_vm8, %v1604_v20, %v1600_v14  ;;  %vm5559_vm8 = vcmask 519168  }
0x1152   :  { %v1631_v30 = vmul.f32 %v3567_v8, %v1629_v31  ;;  %vm1636_vm9 = vweird.f32 %v3567_v8  ;;  %v1608_v5 = vmul.f32 %v4864_v52, %v1489_v37 }
0x1153   :  { %vm1637_vm3 = vmor %vm1635_vm2, %vm1636_vm9 }
0x1154   :  { %v1632_v63 = vsub.f32 1.0, %v1631_v30  ;;  %vm5560_vm9 = vmmov %vm5559_vm8 }
0x1155   :  { %vm5561_vm2 = vmmov %vm5559_vm8 }
0x1156   :  { %v1633_v17 = vmul.f32 %v3567_v8, %v1632_v63  ;;  %vm5564_vm12 = vmmov %vm5561_vm2 }
0x1158   :  { %v1634_v26 = vadd.f32 %v3567_v8, %v1633_v17 }
0x115a   :  { %v1638_v36 = vsel %vm1637_vm3, %v3567_v8, %v1634_v26  ;;  %v3402_v8 = vld [vmem:[#allocation28] sm:$0xff]  ;;  %vm5562_vm3 = vmmov %vm5561_vm2 }
0x115b   :  { %v4872_v51 = vsel %vm1640_vm6, %v1642_v39, %v1638_v36  ;;  %1893 = vmatpush.bf16.msra.mxu3 %v3402_v8  ;;  %v816_v36 = vsel %vm813_vm10, %v4562_v50, 0.0  ;;  %vm5563_vm6 = vmmov %vm5561_vm2 }
0x115c   :  { %v1646_v0 = vmul.f32 %v4872_v51, %v1529_v58  ;;  %v3401_v58 = vld [vmem:[%s5516_s12 + $0x8] sm:$0xff] }
0x115d   :  { %1780 = vmatpush.bf16.msra.mxu0 %v3401_v58 }
0x119f   :  { %v1611_v48 = vpop.permute.xlu1 %1610 }
0x11a0   :  { %v1613_v22 = vmul.f32 %v1611_v48, %v4864_v52 }
0x11a2   :  { %1615 = vrot.lane.b32.xlu0 %v1613_v22, %s4188_s2 }
0x11aa   :  { %668 = vrot.lane.b32.xlu0 %v613_v24, %s4193_s6  ;;  %v1490_v24 = vsel %vm813_vm10, %v4853_v41, 0.0 }
0x11b0   :  { %v1649_v3 = vpop.permute.xlu0 %1648 }
0x11b1   :  { %v1651_v16 = vmul.f32 %v1649_v3, %v4872_v51 }
0x11b2   :  { %1118 = vrot.lane.b32.xlu0 %v1071_v43, %s4193_s6 }
0x11b3   :  { %1653 = vrot.lane.b32.xlu2 %v1651_v16, %s4188_s2 }
0x11ba   :  { %1538 = vrot.lane.b32.xlu0 %v1530_v45, %s4193_s6 }
0x11c2   :  { %1394 = vrot.lane.b32.xlu0 %v1352_v21, %s4193_s6 }
0x11ca   :  { %674 = vrot.lane.b32.xlu0 %v666_v28, %s4193_s6 }
0x11d2   :  { %1124 = vrot.lane.b32.xlu0 %v1116_v47, %s4193_s6  ;;  %v3403_v47 = vld [vmem:[#allocation28 + $0x8] sm:$0xff] }
0x11d3   :  { %1868 = vmatpush.bf16.msra.mxu2 %v3403_v47 }
0x120d   :  { %v1654_v27 = vpop.permute.xlu2 %1653 }
0x120e   :  { %v1656_v2 = vadd.f32 %v1654_v27, %v1646_v0  ;;  %v4969_v0 = vld [vmem:[#allocation30] sm:$0xff] }
0x120f   :  { %1984 = vmatpush.bf16.msrb.mxu1 %v4969_v0  ;;  %2135 = vmatpush.bf16.msrb.mxu3 %v4969_v0 }
0x1210   :  { %3568 = vtanh.f32 %v1656_v2 }
0x1214   :  { %v1616_v23 = vpop.permute.xlu0 %1615 }
0x1215   :  { %v1618_v49 = vadd.f32 %v1616_v23, %v1608_v5 }
0x1216   :  { %v3569_v53 = vpop.eup %3568 }
0x1217   :  { %3570 = vtanh.f32 %v1618_v49  ;;  %1659 = vrot.lane.b32.xlu1 %v3569_v53, %s4192_s26  ;;  %v4980_v53 = vld [vmem:[%s5517_s13] sm:$0xff] }
0x1218   :  { %1959 = vmatpush.bf16.msrb.mxu0 %v4980_v53  ;;  %2113 = vmatpush.bf16.msrb.mxu2 %v4980_v53 }
0x121c   :  { %v669_v1 = vpop.permute.xlu0 %668 }
0x121d   :  { %v3571_v57 = vpop.eup %3570  ;;  %672 = vst.msk [vmem:[#allocation2] sm:$0xf] %vm5534_vm1, %v669_v1 }
0x121e   :  { %1621 = vrot.lane.b32.xlu2 %v3571_v57, %s4192_s26 }
0x121f   :  { %818 = vrot.lane.b32.xlu1 %v771_v38, %s4193_s6  ;;  %v1940_v38 = vld [vmem:[#allocation34] sm:$0xf] }
0x1220   :  { %2060 = vrot.lane.b32.xlu0 %v1940_v38, %s4188_s2 }
0x1224   :  { %v1675_v13 = vld [vmem:[#allocation2] sm:$0xf]  ;;  %v1119_v56 = vpop.permute.xlu0 %1118 }
0x1225   :  { %1703 = vst [vmem:[#allocation1] ss:$2 sm:$0xff] %v1675_v13 }
0x1226   :  { %1122 = vst.msk [vmem:[#allocation2 + $0xc] sm:$0xf] %vm5534_vm1, %v1119_v56  ;;  %968 = vrot.lane.b32.xlu2 %v921_v59, %s4193_s6 }
0x1227   :  { %1262 = vrot.lane.b32.xlu1 %v1254_v60, %s4193_s6 }
0x122c   :  { %v1539_v54 = vpop.permute.xlu0 %1538 }
0x122d   :  { %v1678_v15 = vld [vmem:[#allocation2 + $0xc] sm:$0xf]  ;;  %1542 = vst.msk [vmem:[#allocation4 + $0x4] sm:$0xf] %vm5534_vm1, %v1539_v54 }
0x122e   :  { %1709 = vst [vmem:[#allocation1 + $0x11] ss:$2 sm:$0xff] %v1678_v15  ;;  %1400 = vrot.lane.b32.xlu2 %v1392_v44, %s4193_s6 }
0x1234   :  { %v1395_v10 = vpop.permute.xlu0 %1394  ;;  %v1684_v39 = vld [vmem:[#allocation4 + $0x4] sm:$0xf] }
0x1235   :  { %1398 = vst.msk [vmem:[#allocation2 + $0x14] sm:$0xf] %vm5534_vm1, %v1395_v10  ;;  %v4994_v10 = vld [vmem:[#allocation33] sm:$0xf] }
0x1236   :  { %1256 = vrot.lane.b32.xlu2 %v1214_v25, %s4193_s6  ;;  %v1967_v25 = vpack.c.bf16 %v4994_v10, %v4994_v10 }
0x123c   :  { %v1680_v62 = vld [vmem:[#allocation2 + $0x14] sm:$0xf]  ;;  %v675_v31 = vpop.permute.xlu0 %674 }
0x123d   :  { %1713 = vst [vmem:[#allocation1 + $0x21] ss:$2 sm:$0xff] %v1680_v62  ;;  %v5000_v62 = vld [vmem:[#allocation25] sm:$0xf] }
0x123e   :  { %678 = vst.msk [vmem:[#allocation4 + $0x1c] sm:$0xf] %vm5534_vm1, %v675_v31  ;;  %v1942_v31 = vpack.c.bf16 %v5000_v62, %v5000_v62 }
0x1244   :  { %v1125_v18 = vpop.permute.xlu0 %1124 }
0x1245   :  { %1128 = vst.msk [vmem:[#allocation4 + $0x10] sm:$0xf] %vm5534_vm1, %v1125_v18  ;;  %v1690_v59 = vld [vmem:[#allocation4 + $0x1c] sm:$0xf] }
0x124c   :  { %v1687_v3 = vld [vmem:[#allocation4 + $0x10] sm:$0xf] }
0x1278   :  { %v1622_v42 = vpop.permute.xlu2 %1621 }
0x1279   :  { %v1624_v4 = vmul.f32 %v1622_v42, %v4864_v52  ;;  %v3441_v42 = vld [vmem:[#allocation24] ss:$0 sm:$0xff] }
0x127b   :  { %v1625_v19 = vsel %vm5558_vm7, %v1624_v4, 0.0  ;;  %vm5565_vm7 = vmmov %vm5561_vm2 }
0x127c   :  { %1665 = vrot.lane.b32.xlu2 %v1625_v19, %s4193_s6 }
0x1280   :  { %v969_v7 = vpop.permute.xlu2 %968 }
0x1281   :  { %972 = vst.msk [vmem:[#allocation2 + $0x8] sm:$0xf] %vm5534_vm1, %v969_v7 }
0x1284   :  { %974 = vrot.lane.b32.xlu2 %v966_v9, %s4193_s6 }
0x1288   :  { %v1677_v14 = vld [vmem:[#allocation2 + $0x8] sm:$0xf]  ;;  %v1401_v20 = vpop.permute.xlu2 %1400 }
0x1289   :  { %1707 = vst [vmem:[#allocation1 + $0x10] ss:$2 sm:$0xff] %v1677_v14  ;;  %v1660_v30 = vpop.permute.xlu1 %1659  ;;  %v3442_v14 = vld [vmem:[#allocation31] ss:$0 sm:$0xff] }
0x128a   :  { %1404 = vst.msk [vmem:[#allocation4 + $0x8] sm:$0xf] %vm5534_vm1, %v1401_v20  ;;  %v1662_v48 = vmul.f32 %v1660_v30, %v4872_v51 }
0x128c   :  { %v1663_v52 = vsel %vm606_vm13, %v1662_v48, 0.0 }
0x128d   :  { %1671 = vrot.lane.b32.xlu1 %v1663_v52, %s4193_s6 }
0x1290   :  { %v1257_v22 = vpop.permute.xlu2 %1256  ;;  %v1719_v63 = vld.sshfl [vmem:[#allocation1 + $0x10] sm:$0xff pattern:$0x75316420] }
0x1291   :  { %v1685_v17 = vld [vmem:[#allocation4 + $0x8] sm:$0xf]  ;;  %1260 = vst.msk [vmem:[#allocation2 + $0x10] sm:$0xf] %vm5534_vm1, %v1257_v22  ;;  %v819_v35 = vpop.permute.xlu1 %818 }
0x1292   :  { %822 = vst.msk [vmem:[#allocation2 + $0x4] sm:$0xf] %vm5534_vm1, %v819_v35 }
0x1293   :  { %1740 = vst [vmem:[#allocation1 + $0x10] ss:$2 sm:$0xff] %v1685_v17 }
0x1295   :  { %1532 = vrot.lane.b32.xlu1 %v1490_v24, %s4193_s6 }
0x1298   :  { %v1679_v26 = vld [vmem:[#allocation2 + $0x10] sm:$0xf] }
0x1299   :  { %1711 = vst [vmem:[#allocation1 + $0x20] ss:$2 sm:$0xff] %v1679_v26  ;;  %v1676_v11 = vld [vmem:[#allocation2 + $0x4] sm:$0xf]  ;;  %v1263_v32 = vpop.permute.xlu1 %1262 }
0x129a   :  { %1705 = vst [vmem:[#allocation1 + $0x1] ss:$2 sm:$0xff] %v1676_v11 }
0x129b   :  { %1266 = vst.msk [vmem:[#allocation4 + $0xc] sm:$0xf] %vm5534_vm1, %v1263_v32 }
0x129d   :  { %824 = vrot.lane.b32.xlu1 %v816_v36, %s4193_s6 }
0x12a0   :  { %v1720_v51 = vld.sshfl [vmem:[#allocation1 + $0x20] sm:$0xff pattern:$0x75316420] }
0x12a1   :  { %v1718_v16 = vld.sshfl [vmem:[#allocation1] sm:$0xff pattern:$0x75316420]  ;;  %1744 = vst [vmem:[#allocation1 + $0x20] ss:$2 sm:$0xff] %v1687_v3 }
0x12a2   :  { %v1686_v41 = vld [vmem:[#allocation4 + $0xc] sm:$0xf]  ;;  %v1726_v43 = vpack.c.bf16 %v1719_v63, %v1718_v16  ;;  %1738 = vst [vmem:[#allocation1 + $0x1] ss:$2 sm:$0xff] %v1684_v39 }
0x12a3   :  { %1742 = vst [vmem:[#allocation1 + $0x11] ss:$2 sm:$0xff] %v1686_v41 }
0x12a4   :  { %3330 = vmatmul.msk.bf16.vlgmr.msra.gmra.mxu1 %vm383_vm0, %v1726_v43  ;;  %3342 = vmatmul.msk.bf16.vlgmr.msra.gmra.mxu3 %vm383_vm0, %v1726_v43 }
0x12a5   :  { %2271 = vmatpush.bf16.msra.mxu1 %v4969_v0  ;;  %2407 = vmatpush.bf16.msra.mxu3 %v4969_v0 }
0x12aa   :  { %v1752_v5 = vld.sshfl [vmem:[#allocation1 + $0x10] sm:$0xff pattern:$0x75316420] }
0x12d6   :  { %v1666_v45 = vpop.permute.xlu2 %1665 }
0x12d7   :  { %1669 = vst.msk [vmem:[#allocation2 + $0x1c] sm:$0xf] %vm5534_vm1, %v1666_v45 }
0x12de   :  { %v1682_v21 = vld [vmem:[#allocation2 + $0x1c] sm:$0xf]  ;;  %v975_v50 = vpop.permute.xlu2 %974 }
0x12df   :  { %1717 = vst [vmem:[#allocation1 + $0x31] ss:$2 sm:$0xff] %v1682_v21 }
0x12e0   :  { %978 = vst.msk [vmem:[#allocation4 + $0x14] sm:$0xf] %vm5534_vm1, %v975_v50 }
0x12e7   :  { %v1688_v28 = vld [vmem:[#allocation4 + $0x14] sm:$0xf] }
0x12e8   :  { %1746 = vst [vmem:[#allocation1 + $0x21] ss:$2 sm:$0xff] %v1688_v28 }
0x12ef   :  { %v1753_v54 = vld.sshfl [vmem:[#allocation1 + $0x20] sm:$0xff pattern:$0x75316420] }
0x12ff   :  { %v1672_v27 = vpop.permute.xlu1 %1671 }
0x1300   :  { %1674 = vst.msk [vmem:[#allocation4] sm:$0xf] %vm5534_vm1, %v1672_v27 }
0x1307   :  { %v1683_v2 = vld [vmem:[#allocation4] sm:$0xf]  ;;  %v1533_v37 = vpop.permute.xlu1 %1532 }
0x1308   :  { %1736 = vst [vmem:[#allocation1] ss:$2 sm:$0xff] %v1683_v2 }
0x1309   :  { %1536 = vst.msk [vmem:[#allocation2 + $0x18] sm:$0xf] %vm5534_vm1, %v1533_v37 }
0x130f   :  { %v825_v23 = vpop.permute.xlu1 %824  ;;  %v1751_v49 = vld.sshfl [vmem:[#allocation1] sm:$0xff pattern:$0x75316420] }
0x1310   :  { %v1681_v1 = vld [vmem:[#allocation2 + $0x18] sm:$0xf]  ;;  %828 = vst.msk [vmem:[#allocation4 + $0x18] sm:$0xf] %vm5534_vm1, %v825_v23  ;;  %v1759_v57 = vpack.c.bf16 %v1752_v5, %v1751_v49 }
0x1311   :  { %1715 = vst [vmem:[#allocation1 + $0x30] ss:$2 sm:$0xff] %v1681_v1 }
0x1312   :  { %3324 = vmatmul.msk.bf16.vlgmr.msra.gmra.mxu0 %vm383_vm0, %v1759_v57  ;;  %3336 = vmatmul.msk.bf16.vlgmr.msra.gmra.mxu2 %vm383_vm0, %v1759_v57 }
0x1313   :  { %2249 = vmatpush.bf16.msra.mxu0 %v4980_v53  ;;  %2385 = vmatpush.bf16.msra.mxu2 %v4980_v53 }
0x1317   :  { %v1689_v13 = vld [vmem:[#allocation4 + $0x18] sm:$0xf] }
0x1318   :  { %v1721_v56 = vld.sshfl [vmem:[#allocation1 + $0x30] sm:$0xff pattern:$0x75316420] }
0x1319   :  { %v1727_v60 = vpack.c.bf16 %v1721_v56, %v1720_v51  ;;  %1748 = vst [vmem:[#allocation1 + $0x30] ss:$2 sm:$0xff] %v1689_v13 }
0x131a   :  { %1750 = vst [vmem:[#allocation1 + $0x31] ss:$2 sm:$0xff] %v1690_v59 }
0x131b   :  { %3331 = vmatmul.msk.bf16.gmra.mxu1 %vm383_vm0, %v1727_v60  ;;  %3343 = vmatmul.msk.bf16.gmra.mxu3 %vm383_vm0, %v1727_v60 }
0x1321   :  { %v1754_v15 = vld.sshfl [vmem:[#allocation1 + $0x30] sm:$0xff pattern:$0x75316420]  ;;  %v1813_v18 = vpop.f32.mrf.mxu1 }
0x1322   :  { %v1760_v44 = vpack.c.bf16 %v1754_v15, %v1753_v54 }
0x1324   :  { %3325 = vmatmul.msk.bf16.gmra.mxu0 %vm383_vm0, %v1760_v44  ;;  %3337 = vmatmul.msk.bf16.gmra.mxu2 %vm383_vm0, %v1760_v44 }
0x1327   :  { %v1895_v8 = vpop.f32.mrf.mxu3 }
0x1329   :  { %v1815_v19 = vpop.f32.mrf.mxu1 }
0x132b   :  { %3353 = vmatmul.msk.bf16.vlgmr.msrb.gmra.mxu1 %vm383_vm0, %v1967_v25 }
0x132c   :  { %2543 = vmatpush.bf16.msrb.mxu1 %v4969_v0 }
0x132f   :  { %v1897_v26 = vpop.f32.mrf.mxu3 }
0x1334   :  { %3348 = vmatmul.msk.bf16.vlgmr.msrb.gmra.mxu0 %vm383_vm0, %v1942_v31  ;;  %v1938_v31 = vld [vmem:[#allocation27] sm:$0xf] }
0x1335   :  { %2521 = vmatpush.bf16.msrb.mxu0 %v4980_v53 }
0x138f   :  { %v1782_v4 = vpop.f32.mrf.mxu0 }
0x1390   :  { %v1814_v7 = vadd.f32 %v1813_v18, %v1782_v4 }
0x1392   :  { %v1827_v46 = vadd.f32 %v3441_v42, %v1814_v7 }
0x1394   :  { %v1835_v9 = vrot.slane %v1827_v46, 4  ;;  %1843 = vst.msk [vmem:[#allocation6] sm:$0xf] %vm5559_vm8, %v1827_v46  ;;  %vm5566_vm8 = vmmov %vm5561_vm2 }
0x1395   :  { %v1870_v20 = vpop.f32.mrf.mxu2 }
0x1396   :  { %1844 = vst.msk [vmem:[#allocation6 + $0x4] sm:$0xf] %vm5560_vm9, %v1835_v9  ;;  %v1896_v30 = vadd.f32 %v1895_v8, %v1870_v20  ;;  %vm5567_vm9 = vmmov %vm5561_vm2 }
0x1397   :  { %v1784_v48 = vpop.f32.mrf.mxu0 }
0x1398   :  { %v1909_v52 = vadd.f32 %v3442_v14, %v1896_v30  ;;  %v1816_v22 = vadd.f32 %v1815_v19, %v1784_v48  ;;  %v1818_v63 = vpop.f32.mrf.mxu1 }
0x139a   :  { %v1917_v17 = vrot.slane %v1909_v52, 4  ;;  %1925 = vst.msk [vmem:[#allocation7] sm:$0xf] %vm5561_vm2, %v1909_v52  ;;  %v1828_v35 = vadd.f32 %v3441_v42, %v1816_v22 }
0x139b   :  { %v1941_v38 = vld [vmem:[#allocation6] sm:$0xf] }
0x139c   :  { %1926 = vst.msk [vmem:[#allocation7 + $0x4] sm:$0xf] %vm5562_vm3, %v1917_v17  ;;  %v1836_v24 = vrot.slane %v1828_v35, 4  ;;  %vm5568_vm3 = vmmov %vm5561_vm2 }
0x139d   :  { %1845 = vst.msk [vmem:[#allocation6 + $0x8] sm:$0xf] %vm5563_vm6, %v1828_v35  ;;  %v1872_v11 = vpop.f32.mrf.mxu2  ;;  %vm5569_vm6 = vmmov %vm5561_vm2 }
0x139e   :  { %1846 = vst.msk [vmem:[#allocation6 + $0xc] sm:$0xf] %vm5564_vm12, %v1836_v24  ;;  %v1898_v32 = vadd.f32 %v1897_v26, %v1872_v11  ;;  %v1900_v43 = vpop.f32.mrf.mxu3  ;;  %vm5570_vm12 = vmmov %vm5561_vm2 }
0x13a0   :  { %v1910_v36 = vadd.f32 %v3442_v14, %v1898_v32  ;;  %v1820_v39 = vpop.f32.mrf.mxu1 }
0x13a1   :  { %v1787_v3 = vpop.f32.mrf.mxu0 }
0x13a2   :  { %v1918_v51 = vrot.slane %v1910_v36, 4  ;;  %1927 = vst.msk [vmem:[#allocation7 + $0x8] sm:$0xf] %vm5565_vm7, %v1910_v36  ;;  %v1819_v16 = vadd.f32 %v1818_v63, %v1787_v3  ;;  %vm5571_vm7 = vmmov %vm5561_vm2 }
0x13a4   :  { %1928 = vst.msk [vmem:[#allocation7 + $0xc] sm:$0xf] %vm5566_vm8, %v1918_v51  ;;  %v1829_v41 = vadd.f32 %v3441_v42, %v1819_v16  ;;  %vm5572_vm8 = vmmov %vm5561_vm2 }
0x13a6   :  { %v1837_v45 = vrot.slane %v1829_v41, 4  ;;  %1847 = vst.msk [vmem:[#allocation6 + $0x10] sm:$0xf] %vm5567_vm9, %v1829_v41  ;;  %v1902_v23 = vpop.f32.mrf.mxu3  ;;  %vm5573_vm9 = vmmov %vm5561_vm2 }
0x13a7   :  { %v1875_v21 = vpop.f32.mrf.mxu2 }
0x13a8   :  { %1848 = vst.msk [vmem:[#allocation6 + $0x14] sm:$0xf] %vm5561_vm2, %v1837_v45  ;;  %v1901_v50 = vadd.f32 %v1900_v43, %v1875_v21  ;;  %v1986_v28 = vpop.f32.mrf.mxu1 }
0x13a9   :  { %v1789_v47 = vpop.f32.mrf.mxu0 }
0x13aa   :  { %v1911_v58 = vadd.f32 %v3442_v14, %v1901_v50  ;;  %v1821_v27 = vadd.f32 %v1820_v39, %v1789_v47  ;;  %v5029_v50 = vpop.permute.xlu0 %2060 }
0x13ac   :  { %v1919_v2 = vrot.slane %v1911_v58, 4  ;;  %1929 = vst.msk [vmem:[#allocation7 + $0x10] sm:$0xf] %vm5568_vm3, %v1911_v58  ;;  %v1830_v37 = vadd.f32 %v3441_v42, %v1821_v27 }
0x13ae   :  { %1930 = vst.msk [vmem:[#allocation7 + $0x14] sm:$0xf] %vm5569_vm6, %v1919_v2  ;;  %v1838_v5 = vrot.slane %v1830_v37, 4 }
0x13af   :  { %1849 = vst.msk [vmem:[#allocation6 + $0x18] sm:$0xf] %vm5570_vm12, %v1830_v37  ;;  %v1877_v49 = vpop.f32.mrf.mxu2 }
0x13b0   :  { %1850 = vst.msk [vmem:[#allocation6 + $0x1c] sm:$0xf] %vm5571_vm7, %v1838_v5  ;;  %v1903_v1 = vadd.f32 %v1902_v23, %v1877_v49  ;;  %v1988_v57 = vpop.f32.mrf.mxu1 }
0x13b1   :  { %v1961_v13 = vpop.f32.mrf.mxu0 }
0x13b2   :  { %v1912_v56 = vadd.f32 %v3442_v14, %v1903_v1  ;;  %v1965_v59 = vadd.f32 %v1961_v13, %v1941_v38 }
0x13b4   :  { %v1920_v60 = vrot.slane %v1912_v56, 4  ;;  %1931 = vst.msk [vmem:[#allocation7 + $0x18] sm:$0xf] %vm5572_vm8, %v1912_v56  ;;  %3572 = vtanh.f32 %v1965_v59  ;;  %v3354_v42 = vmul.f32 -1.442695, %v1965_v59 }
0x13b6   :  { %1932 = vst.msk [vmem:[#allocation7 + $0x1c] sm:$0xf] %vm5573_vm9, %v1920_v60 }
0x13b9   :  { %v1963_v54 = vpop.f32.mrf.mxu0 }
0x13ba   :  { %v3573_v15 = vpop.eup %3572 }
0x13bb   :  { %2017 = vrot.lane.b32.xlu2 %v3573_v15, %s4189_s7 }
0x13bd   :  { %v1966_v44 = vld [vmem:[#allocation7 + $0x1c] sm:$0xf] }
0x13be   :  { %v1990_v25 = vadd.f32 %v1986_v28, %v1966_v44 }
0x13c0   :  { %3574 = vtanh.f32 %v1990_v25  ;;  %v3355_v14 = vmul.f32 -1.442695, %v1990_v25 }
0x13c1   :  { %3576 = vpow2.f32 %v3354_v42 }
0x13c3   :  { %2012 = vrot.lane.b32.xlu2 %v1938_v31, %s4188_s2  ;;  %v2120_v31 = vld [vmem:[#allocation7 + $0x18] sm:$0xf] }
0x13c6   :  { %v3575_v18 = vpop.eup %3574 }
0x13c7   :  { %2065 = vrot.lane.b32.xlu1 %v3575_v18, %s4189_s7  ;;  %v3577_v4 = vpop.eup %3576 }
0x13c8   :  { %v1994_v19 = vadd.f32 1.0, %v3577_v4 }
0x13ca   :  { %3578 = vrcp.f32 %v1994_v19  ;;  %v2006_v30 = vand.u32 2147483648, %v1994_v19  ;;  %vm2000_vm3 = vweird.f32 %v1994_v19  ;;  %v2004_v48 = vand.u32 2147483647, %v1994_v19 }
0x13cb   :  { %2081 = vrot.lane.b32.xlu2 %v4994_v10, %s4191_s18  ;;  %3580 = vpow2.f32 %v3355_v14 }
0x13cc   :  { %v2007_v22 = vor.u32 1.1754944e-38, %v2006_v30  ;;  %vm2005_vm12 = vcmp.eq.f32.partialorder %v2004_v48, 8.507059e+37 }
0x13d0   :  { %v3579_v7 = vpop.eup %3578 }
0x13d1   :  { %v1996_v46 = vmul.f32 %v3579_v7, %v1994_v19  ;;  %vm2001_vm2 = vweird.f32 %v3579_v7  ;;  %v3581_v17 = vpop.eup %3580 }
0x13d2   :  { %vm2002_vm6 = vmor %vm2000_vm3, %vm2001_vm2  ;;  %v2042_v24 = vadd.f32 1.0, %v3581_v17  ;;  %vm5574_vm3 = vcmp.eq.s32.totalorder %v4498_v34, 1 }
0x13d3   :  { %v1997_v8 = vsub.f32 1.0, %v1996_v46 }
0x13d4   :  { %3582 = vrcp.f32 %v2042_v24  ;;  %v2054_v3 = vand.u32 2147483648, %v2042_v24  ;;  %vm2048_vm8 = vweird.f32 %v2042_v24  ;;  %v2052_v51 = vand.u32 2147483647, %v2042_v24 }
0x13d5   :  { %v1998_v9 = vmul.f32 %v3579_v7, %v1997_v8 }
0x13d6   :  { %v2055_v41 = vor.u32 1.1754944e-38, %v2054_v3  ;;  %vm2053_vm2 = vcmp.eq.f32.partialorder %v2052_v51, 8.507059e+37 }
0x13d7   :  { %v1999_v20 = vadd.f32 %v3579_v7, %v1998_v9 }
0x13d9   :  { %v2003_v52 = vsel %vm2002_vm6, %v3579_v7, %v1999_v20  ;;  %v2098_v7 = vld [vmem:[#allocation6 + $0x4] sm:$0xf] }
0x13da   :  { %v2008_v63 = vsel %vm2005_vm12, %v2007_v22, %v2003_v52  ;;  %v3583_v26 = vpop.eup %3582 }
0x13db   :  { %v2044_v11 = vmul.f32 %v3583_v26, %v2042_v24  ;;  %vm2049_vm7 = vweird.f32 %v3583_v26 }
0x13dc   :  { %vm2050_vm9 = vmor %vm2048_vm8, %vm2049_vm7 }
0x13dd   :  { %v2045_v32 = vsub.f32 1.0, %v2044_v11 }
0x13df   :  { %v2046_v36 = vmul.f32 %v3583_v26, %v2045_v32 }
0x13e1   :  { %v2047_v39 = vadd.f32 %v3583_v26, %v2046_v36 }
0x13e3   :  { %v2051_v16 = vsel %vm2050_vm9, %v3583_v26, %v2047_v39 }
0x13e4   :  { %v2056_v43 = vsel %vm2053_vm2, %v2055_v41, %v2051_v16 }
0x13e5   :  { %v2063_v37 = vmul.f32 %v5029_v50, %v2056_v43 }
0x1415   :  { %v2018_v10 = vpop.permute.xlu2 %2017 }
0x1416   :  { %v2020_v35 = vmul.f32 %v2018_v10, %v2008_v63 }
0x1418   :  { %2022 = vrot.lane.b32.xlu0 %v2020_v35, %s4188_s2 }
0x141d   :  { %v5031_v28 = vpop.permute.xlu2 %2012 }
0x141e   :  { %v2015_v47 = vmul.f32 %v5031_v28, %v2008_v63 }
0x1425   :  { %v2082_v57 = vpop.permute.xlu2 %2081 }
0x1439   :  { %v2066_v45 = vpop.permute.xlu1 %2065 }
0x143a   :  { %v2068_v21 = vmul.f32 %v2066_v45, %v2056_v43 }
0x143c   :  { %2070 = vrot.lane.b32.xlu1 %v2068_v21, %s4188_s2 }
0x148a   :  { %v2023_v58 = vpop.permute.xlu0 %2022 }
0x148b   :  { %v5034_v27 = vadd.f32 %v2023_v58, %v2015_v47 }
0x148d   :  { %3584 = vtanh.f32 %v5034_v27 }
0x1493   :  { %v3585_v2 = vpop.eup %3584 }
0x1494   :  { %2028 = vrot.lane.b32.xlu0 %v3585_v2, %s4192_s26 }
0x14ae   :  { %v2071_v5 = vpop.permute.xlu1 %2070 }
0x14af   :  { %v5039_v23 = vadd.f32 %v2071_v5, %v2063_v37 }
0x14b1   :  { %3586 = vtanh.f32 %v5039_v23 }
0x14b7   :  { %v3587_v49 = vpop.eup %3586 }
0x14b8   :  { %2076 = vrot.lane.b32.xlu1 %v3587_v49, %s4192_s26 }
0x14c0   :  { %2033 = vrot.lane.b32.xlu1 %v5000_v62, %s4191_s18 }
0x1506   :  { %v2029_v56 = vpop.permute.xlu0 %2028 }
0x1507   :  { %v5055_v60 = vmul.f32 %v2029_v56, %v2008_v63 }
0x152a   :  { %v2077_v1 = vpop.permute.xlu1 %2076 }
0x152b   :  { %v5045_v38 = vmul.f32 %v2077_v1, %v2056_v43 }
0x152d   :  { %v5050_v13 = vsel %vm5574_vm3, %v5045_v38, %v2082_v57 }
0x152e   :  { %v2121_v59 = vpack.c.bf16 %v5050_v13, %v5050_v13 }
0x1530   :  { %2123 = vrot.lane.b32.xlu2 %v2121_v59, %s4193_s6 }
0x1532   :  { %v2034_v54 = vpop.permute.xlu1 %2033 }
0x1533   :  { %v5060_v62 = vsel %vm606_vm13, %v5055_v60, %v2034_v54 }
0x1534   :  { %v2099_v15 = vpack.c.bf16 %v5060_v62, %v5060_v62 }
0x1536   :  { %2101 = vrot.lane.b32.xlu0 %v2099_v15, %s4193_s6 }
0x158a   :  { %v2124_v44 = vpop.permute.xlu2 %2123 }
0x158b   :  { %3357 = vmatmul.msk.bf16.vlgmr.msrb.gmra.mxu3 %vm383_vm0, %v2124_v44  ;;  %v5087_v44 = vsel %vm606_vm13, %v5034_v27, %v5031_v28 }
0x158c   :  { %2679 = vmatpush.bf16.msrb.mxu3 %v4969_v0 }
0x15a8   :  { %v2102_v25 = vpop.permute.xlu0 %2101 }
0x15a9   :  { %3356 = vmatmul.msk.bf16.vlgmr.msrb.gmra.mxu2 %vm383_vm0, %v2102_v25 }
0x15aa   :  { %2657 = vmatpush.bf16.msrb.mxu2 %v4980_v53 }
0x160e   :  { %v2137_v18 = vpop.f32.mrf.mxu3 }
0x160f   :  { %v2141_v42 = vadd.f32 %v2137_v18, %v2120_v31 }
0x1611   :  { %3588 = vtanh.f32 %v2141_v42  ;;  %v3359_v20 = vmul.f32 -1.442695, %v2141_v42 }
0x1616   :  { %v2139_v4 = vpop.f32.mrf.mxu3 }
0x1617   :  { %v3589_v19 = vpop.eup %3588 }
0x1618   :  { %2204 = vrot.lane.b32.xlu1 %v3589_v19, %s4189_s7 }
0x162c   :  { %v2115_v46 = vpop.f32.mrf.mxu2 }
0x162d   :  { %v2119_v8 = vadd.f32 %v2115_v46, %v2098_v7 }
0x162f   :  { %3590 = vtanh.f32 %v2119_v8  ;;  %v3358_v30 = vmul.f32 -1.442695, %v2119_v8 }
0x1630   :  { %3592 = vpow2.f32 %v3359_v20 }
0x1631   :  { %3594 = vpow2.f32 %v3358_v30 }
0x1634   :  { %v2117_v9 = vpop.f32.mrf.mxu2 }
0x1635   :  { %v3591_v14 = vpop.eup %3590 }
0x1636   :  { %2164 = vrot.lane.b32.xlu2 %v3591_v14, %s4189_s7  ;;  %v3593_v48 = vpop.eup %3592  ;;  %v2256_v14 = vld [vmem:[#allocation7 + $0x14] sm:$0xf] }
0x1637   :  { %v2185_v52 = vadd.f32 1.0, %v3593_v48  ;;  %v3595_v22 = vpop.eup %3594 }
0x1638   :  { %v2145_v10 = vadd.f32 1.0, %v3595_v22 }
0x1639   :  { %3596 = vrcp.f32 %v2185_v52  ;;  %v2197_v39 = vand.u32 2147483648, %v2185_v52  ;;  %vm2191_vm12 = vweird.f32 %v2185_v52  ;;  %v2195_v3 = vand.u32 2147483647, %v2185_v52 }
0x163a   :  { %3598 = vrcp.f32 %v2145_v10  ;;  %v2157_v47 = vand.u32 2147483648, %v2145_v10  ;;  %vm2151_vm2 = vweird.f32 %v2145_v10  ;;  %v2155_v2 = vand.u32 2147483647, %v2145_v10 }
0x163b   :  { %v2198_v41 = vor.u32 1.1754944e-38, %v2197_v39  ;;  %vm2196_vm8 = vcmp.eq.f32.partialorder %v2195_v3, 8.507059e+37 }
0x163c   :  { %v2158_v5 = vor.u32 1.1754944e-38, %v2157_v47  ;;  %vm2156_vm1 = vcmp.eq.f32.partialorder %v2155_v2, 8.507059e+37 }
0x163f   :  { %v3597_v63 = vpop.eup %3596 }
0x1640   :  { %v2187_v17 = vmul.f32 %v3597_v63, %v2185_v52  ;;  %v3599_v35 = vpop.eup %3598  ;;  %vm2192_vm6 = vweird.f32 %v3597_v63 }
0x1641   :  { %v2147_v26 = vmul.f32 %v3599_v35, %v2145_v10  ;;  %vm2193_vm7 = vmor %vm2191_vm12, %vm2192_vm6  ;;  %vm2152_vm9 = vweird.f32 %v3599_v35  ;;  %vm5575_vm6 = vcmp.eq.s32.totalorder %v4498_v34, 1 }
0x1642   :  { %v2188_v24 = vsub.f32 1.0, %v2187_v17  ;;  %vm2153_vm3 = vmor %vm2151_vm2, %vm2152_vm9  ;;  %v5077_v56 = vsel %vm5575_vm6, %v5039_v23, %v5029_v50 }
0x1643   :  { %v2148_v32 = vsub.f32 1.0, %v2147_v26 }
0x1644   :  { %v2189_v11 = vmul.f32 %v3597_v63, %v2188_v24 }
0x1645   :  { %v2149_v51 = vmul.f32 %v3599_v35, %v2148_v32 }
0x1646   :  { %v2190_v36 = vadd.f32 %v3597_v63, %v2189_v11 }
0x1647   :  { %v2150_v43 = vadd.f32 %v3599_v35, %v2149_v51 }
0x1648   :  { %v2194_v16 = vsel %vm2193_vm7, %v3597_v63, %v2190_v36 }
0x1649   :  { %v2199_v21 = vsel %vm2196_vm8, %v2198_v41, %v2194_v16  ;;  %v2154_v37 = vsel %vm2153_vm3, %v3599_v35, %v2150_v43 }
0x164a   :  { %v2159_v1 = vsel %vm2156_vm1, %v2158_v5, %v2154_v37  ;;  %v2202_v59 = vmul.f32 %v2199_v21, %v5077_v56 }
0x164b   :  { %v2162_v25 = vmul.f32 %v2159_v1, %v5087_v44 }
0x168a   :  { %v2205_v45 = vpop.permute.xlu1 %2204 }
0x168b   :  { %v2207_v58 = vmul.f32 %v2205_v45, %v2199_v21 }
0x168d   :  { %2209 = vrot.lane.b32.xlu0 %v2207_v58, %s4188_s2 }
0x1690   :  { %v2165_v49 = vpop.permute.xlu2 %2164 }
0x1691   :  { %v2167_v57 = vmul.f32 %v2165_v49, %v2159_v1 }
0x1693   :  { %2169 = vrot.lane.b32.xlu1 %v2167_v57, %s4188_s2 }
0x16ff   :  { %v2210_v54 = vpop.permute.xlu0 %2209 }
0x1700   :  { %v5080_v15 = vadd.f32 %v2210_v54, %v2202_v59 }
0x1702   :  { %3600 = vtanh.f32 %v5080_v15 }
0x1705   :  { %v2170_v31 = vpop.permute.xlu1 %2169 }
0x1706   :  { %v5090_v18 = vadd.f32 %v2170_v31, %v2162_v25 }
0x1708   :  { %v3601_v50 = vpop.eup %3600  ;;  %3602 = vtanh.f32 %v5090_v18 }
0x1709   :  { %2215 = vrot.lane.b32.xlu2 %v3601_v50, %s4192_s26 }
0x170e   :  { %v3603_v23 = vpop.eup %3602 }
0x170f   :  { %2175 = vrot.lane.b32.xlu0 %v3603_v23, %s4192_s26 }
0x1763   :  { %v2216_v42 = vpop.permute.xlu2 %2215 }
0x1764   :  { %v5095_v4 = vmul.f32 %v2216_v42, %v2199_v21 }
0x1766   :  { %v5101_v28 = vsel %vm813_vm10, %v5095_v4, %v5050_v13  ;;  %v2221_v40 = vsel %vm813_vm10, %v5095_v4, 0.0 }
0x1767   :  { %v2257_v27 = vpack.c.bf16 %v5101_v28, %v5101_v28 }
0x1769   :  { %2259 = vrot.lane.b32.xlu1 %v2257_v27, %s4193_s6 }
0x1781   :  { %v2176_v19 = vpop.permute.xlu0 %2175 }
0x1782   :  { %v5106_v7 = vmul.f32 %v2176_v19, %v2159_v1  ;;  %v5129_v19 = vsel %vm813_vm10, %v5080_v15, %v5077_v56 }
0x1784   :  { %v5112_v46 = vsel %vm768_vm11, %v5106_v7, %v5060_v62  ;;  %v2234_v62 = vld [vmem:[#allocation6 + $0x8] sm:$0xf] }
0x1785   :  { %v2235_v8 = vpack.c.bf16 %v5112_v46, %v5112_v46 }
0x1787   :  { %2237 = vrot.lane.b32.xlu2 %v2235_v8, %s4193_s6 }
0x17db   :  { %v2260_v13 = vpop.permute.xlu1 %2259 }
0x17dc   :  { %3361 = vmatmul.msk.bf16.vlgmr.msra.gmra.mxu1 %vm383_vm0, %v2260_v13 }
0x17dd   :  { %2815 = vmatpush.bf16.msra.mxu1 %v4969_v0 }
0x17e1   :  { %v2238_v9 = vpop.permute.xlu2 %2237 }
0x17e2   :  { %3360 = vmatmul.msk.bf16.vlgmr.msra.gmra.mxu0 %vm383_vm0, %v2238_v9 }
0x17e3   :  { %2793 = vmatpush.bf16.msra.mxu0 %v4980_v53 }
0x1859   :  { %v2273_v20 = vpop.f32.mrf.mxu1 }
0x185a   :  { %v2277_v30 = vadd.f32 %v2273_v20, %v2256_v14  ;;  %v5140_v20 = vsel %vm768_vm11, %v5090_v18, %v5087_v44 }
0x185c   :  { %3604 = vtanh.f32 %v2277_v30  ;;  %v3363_v35 = vmul.f32 -1.442695, %v2277_v30 }
0x185f   :  { %v2251_v48 = vpop.f32.mrf.mxu0 }
0x1860   :  { %v2255_v52 = vadd.f32 %v2251_v48, %v2234_v62 }
0x1861   :  { %v2275_v22 = vpop.f32.mrf.mxu1 }
0x1862   :  { %v3605_v10 = vpop.eup %3604  ;;  %3606 = vtanh.f32 %v2255_v52  ;;  %v3362_v24 = vmul.f32 -1.442695, %v2255_v52 }
0x1863   :  { %2340 = vrot.lane.b32.xlu0 %v3605_v10, %s4189_s7  ;;  %3608 = vpow2.f32 %v3363_v35 }
0x1864   :  { %3610 = vpow2.f32 %v3362_v24  ;;  %v2392_v24 = vld [vmem:[#allocation7 + $0x10] sm:$0xf] }
0x1867   :  { %v2253_v63 = vpop.f32.mrf.mxu0 }
0x1868   :  { %v3607_v17 = vpop.eup %3606 }
0x1869   :  { %2300 = vrot.lane.b32.xlu1 %v3607_v17, %s4189_s7  ;;  %v3609_v26 = vpop.eup %3608 }
0x186a   :  { %v2321_v11 = vadd.f32 1.0, %v3609_v26  ;;  %v3611_v32 = vpop.eup %3610 }
0x186b   :  { %v2281_v36 = vadd.f32 1.0, %v3611_v32 }
0x186c   :  { %3612 = vrcp.f32 %v2321_v11  ;;  %v2333_v47 = vand.u32 2147483648, %v2321_v11  ;;  %vm2327_vm12 = vweird.f32 %v2321_v11  ;;  %v2331_v58 = vand.u32 2147483647, %v2321_v11 }
0x186d   :  { %3614 = vrcp.f32 %v2281_v36  ;;  %v2293_v59 = vand.u32 2147483648, %v2281_v36  ;;  %vm2287_vm2 = vweird.f32 %v2281_v36  ;;  %v2291_v25 = vand.u32 2147483647, %v2281_v36 }
0x186e   :  { %v2334_v5 = vor.u32 1.1754944e-38, %v2333_v47  ;;  %vm2332_vm8 = vcmp.eq.f32.partialorder %v2331_v58, 8.507059e+37 }
0x186f   :  { %v2294_v50 = vor.u32 1.1754944e-38, %v2293_v59  ;;  %vm2292_vm6 = vcmp.eq.f32.partialorder %v2291_v25, 8.507059e+37 }
0x1872   :  { %v3613_v39 = vpop.eup %3612 }
0x1873   :  { %v2323_v3 = vmul.f32 %v3613_v39, %v2321_v11  ;;  %v3615_v51 = vpop.eup %3614  ;;  %vm2328_vm1 = vweird.f32 %v3613_v39 }
0x1874   :  { %v2283_v41 = vmul.f32 %v3615_v51, %v2281_v36  ;;  %vm2329_vm7 = vmor %vm2327_vm12, %vm2328_vm1  ;;  %vm2288_vm9 = vweird.f32 %v3615_v51 }
0x1875   :  { %v2324_v16 = vsub.f32 1.0, %v2323_v3  ;;  %vm2289_vm3 = vmor %vm2287_vm2, %vm2288_vm9 }
0x1876   :  { %v2284_v45 = vsub.f32 1.0, %v2283_v41 }
0x1877   :  { %v2325_v43 = vmul.f32 %v3613_v39, %v2324_v16 }
0x1878   :  { %v2285_v2 = vmul.f32 %v3615_v51, %v2284_v45 }
0x1879   :  { %v2326_v21 = vadd.f32 %v3613_v39, %v2325_v43 }
0x187a   :  { %v2286_v49 = vadd.f32 %v3615_v51, %v2285_v2 }
0x187b   :  { %v2330_v37 = vsel %vm2329_vm7, %v3613_v39, %v2326_v21 }
0x187c   :  { %v2335_v1 = vsel %vm2332_vm8, %v2334_v5, %v2330_v37  ;;  %v2290_v31 = vsel %vm2289_vm3, %v3615_v51, %v2286_v49 }
0x187d   :  { %v2295_v42 = vsel %vm2292_vm6, %v2294_v50, %v2290_v31  ;;  %v2338_v8 = vmul.f32 %v2335_v1, %v5129_v19 }
0x187e   :  { %v2298_v30 = vmul.f32 %v2295_v42, %v5140_v20 }
0x18d5   :  { %v2341_v57 = vpop.permute.xlu0 %2340 }
0x18d6   :  { %v2343_v54 = vmul.f32 %v2341_v57, %v2335_v1 }
0x18d8   :  { %2345 = vrot.lane.b32.xlu2 %v2343_v54, %s4188_s2 }
0x18db   :  { %v2301_v23 = vpop.permute.xlu1 %2300 }
0x18dc   :  { %v2303_v27 = vmul.f32 %v2301_v23, %v2295_v42 }
0x18de   :  { %2305 = vrot.lane.b32.xlu0 %v2303_v27, %s4188_s2 }
0x1932   :  { %v2346_v13 = vpop.permute.xlu2 %2345 }
0x1933   :  { %v5132_v9 = vadd.f32 %v2346_v13, %v2338_v8 }
0x1935   :  { %3616 = vtanh.f32 %v5132_v9 }
0x193b   :  { %v3617_v14 = vpop.eup %3616 }
0x193c   :  { %2351 = vrot.lane.b32.xlu1 %v3617_v14, %s4192_s26 }
0x1950   :  { %v2306_v56 = vpop.permute.xlu0 %2305 }
0x1951   :  { %v5143_v15 = vadd.f32 %v2306_v56, %v2298_v30 }
0x1953   :  { %3618 = vtanh.f32 %v5143_v15 }
0x1959   :  { %v3619_v62 = vpop.eup %3618 }
0x195a   :  { %2311 = vrot.lane.b32.xlu2 %v3619_v62, %s4192_s26 }
0x19ae   :  { %v2352_v48 = vpop.permute.xlu1 %2351 }
0x19af   :  { %v5147_v52 = vmul.f32 %v2352_v48, %v2335_v1 }
0x19b1   :  { %v5153_v22 = vsel %vm963_vm14, %v5147_v52, %v5101_v28  ;;  %v2357_v33 = vsel %vm963_vm14, %v5147_v52, 0.0 }
0x19b2   :  { %v2393_v44 = vpack.c.bf16 %v5153_v22, %v5153_v22 }
0x19b4   :  { %2395 = vrot.lane.b32.xlu0 %v2393_v44, %s4193_s6  ;;  %v2312_v18 = vpop.permute.xlu2 %2311 }
0x19b5   :  { %v5158_v10 = vmul.f32 %v2312_v18, %v2295_v42  ;;  %v5181_v18 = vsel %vm963_vm14, %v5132_v9, %v5129_v19 }
0x19b7   :  { %v5164_v63 = vsel %vm918_vm15, %v5158_v10, %v5112_v46  ;;  %v2370_v46 = vld [vmem:[#allocation6 + $0xc] sm:$0xf] }
0x19b8   :  { %v2371_v17 = vpack.c.bf16 %v5164_v63, %v5164_v63 }
0x19ba   :  { %2373 = vrot.lane.b32.xlu1 %v2371_v17, %s4193_s6 }
0x1a26   :  { %v2396_v28 = vpop.permute.xlu0 %2395 }
0x1a27   :  { %3365 = vmatmul.msk.bf16.vlgmr.msra.gmra.mxu3 %vm383_vm0, %v2396_v28 }
0x1a28   :  { %2951 = vmatpush.bf16.msra.mxu3 %v4969_v0 }
0x1a2c   :  { %v2374_v35 = vpop.permute.xlu1 %2373 }
0x1a2d   :  { %3364 = vmatmul.msk.bf16.vlgmr.msra.gmra.mxu2 %vm383_vm0, %v2374_v35 }
0x1a2e   :  { %2929 = vmatpush.bf16.msra.mxu2 %v4980_v53 }
0x1aaa   :  { %v2409_v26 = vpop.f32.mrf.mxu3 }
0x1aab   :  { %v2413_v11 = vadd.f32 %v2409_v26, %v2392_v24  ;;  %v5191_v24 = vsel %vm918_vm15, %v5143_v15, %v5140_v20 }
0x1aad   :  { %3620 = vtanh.f32 %v2413_v11  ;;  %v3367_v0 = vmul.f32 -1.442695, %v2413_v11 }
0x1ab0   :  { %v2387_v32 = vpop.f32.mrf.mxu2 }
0x1ab1   :  { %v2391_v36 = vadd.f32 %v2387_v32, %v2370_v46 }
0x1ab2   :  { %v2411_v39 = vpop.f32.mrf.mxu3 }
0x1ab3   :  { %v3621_v3 = vpop.eup %3620  ;;  %3622 = vtanh.f32 %v2391_v36  ;;  %v3366_v21 = vmul.f32 -1.442695, %v2391_v36 }
0x1ab4   :  { %2476 = vrot.lane.b32.xlu2 %v3621_v3, %s4189_s7  ;;  %3624 = vpow2.f32 %v3367_v0 }
0x1ab8   :  { %v2389_v51 = vpop.f32.mrf.mxu2 }
0x1ab9   :  { %v3623_v16 = vpop.eup %3622 }
0x1aba   :  { %2436 = vrot.lane.b32.xlu0 %v3623_v16, %s4189_s7  ;;  %v3625_v41 = vpop.eup %3624 }
0x1abb   :  { %v2457_v53 = vadd.f32 1.0, %v3625_v41  ;;  %v2528_v41 = vld [vmem:[#allocation7 + $0xc] sm:$0xf] }
0x1abd   :  { %3626 = vrcp.f32 %v2457_v53  ;;  %v2469_v37 = vand.u32 2147483648, %v2457_v53  ;;  %vm2463_vm12 = vweird.f32 %v2457_v53  ;;  %v2467_v49 = vand.u32 2147483647, %v2457_v53 }
0x1abe   :  { %3628 = vpow2.f32 %v3366_v21 }
0x1abf   :  { %v2470_v59 = vor.u32 1.1754944e-38, %v2469_v37  ;;  %vm2468_vm8 = vcmp.eq.f32.partialorder %v2467_v49, 8.507059e+37 }
0x1ac3   :  { %v3627_v43 = vpop.eup %3626 }
0x1ac4   :  { %v2459_v45 = vmul.f32 %v3627_v43, %v2457_v53  ;;  %vm2464_vm1 = vweird.f32 %v3627_v43  ;;  %v3629_v5 = vpop.eup %3628 }
0x1ac5   :  { %vm2465_vm7 = vmor %vm2463_vm12, %vm2464_vm1  ;;  %v2417_v57 = vadd.f32 1.0, %v3629_v5 }
0x1ac6   :  { %v2460_v47 = vsub.f32 1.0, %v2459_v45 }
0x1ac7   :  { %3630 = vrcp.f32 %v2417_v57  ;;  %v2429_v13 = vand.u32 2147483648, %v2417_v57  ;;  %vm2423_vm2 = vweird.f32 %v2417_v57  ;;  %v2427_v14 = vand.u32 2147483647, %v2417_v57 }
0x1ac8   :  { %v2461_v58 = vmul.f32 %v3627_v43, %v2460_v47 }
0x1ac9   :  { %v2430_v56 = vor.u32 1.1754944e-38, %v2429_v13  ;;  %vm2428_vm6 = vcmp.eq.f32.partialorder %v2427_v14, 8.507059e+37 }
0x1aca   :  { %v2462_v2 = vadd.f32 %v3627_v43, %v2461_v58 }
0x1acc   :  { %v2466_v1 = vsel %vm2465_vm7, %v3627_v43, %v2462_v2 }
0x1acd   :  { %v2471_v25 = vsel %vm2468_vm8, %v2470_v59, %v2466_v1  ;;  %v3631_v50 = vpop.eup %3630 }
0x1ace   :  { %v2419_v23 = vmul.f32 %v3631_v50, %v2417_v57  ;;  %vm2424_vm9 = vweird.f32 %v3631_v50  ;;  %v2474_v17 = vmul.f32 %v2471_v25, %v5181_v18 }
0x1acf   :  { %vm2425_vm3 = vmor %vm2423_vm2, %vm2424_vm9 }
0x1ad0   :  { %v2420_v42 = vsub.f32 1.0, %v2419_v23 }
0x1ad2   :  { %v2421_v27 = vmul.f32 %v3631_v50, %v2420_v42 }
0x1ad4   :  { %v2422_v8 = vadd.f32 %v3631_v50, %v2421_v27 }
0x1ad6   :  { %v2426_v30 = vsel %vm2425_vm3, %v3631_v50, %v2422_v8 }
0x1ad7   :  { %v2431_v62 = vsel %vm2428_vm6, %v2430_v56, %v2426_v30 }
0x1ad8   :  { %v2434_v26 = vmul.f32 %v2431_v62, %v5191_v24 }
0x1b0e   :  { %v2477_v54 = vpop.permute.xlu2 %2476 }
0x1b0f   :  { %v2479_v31 = vmul.f32 %v2477_v54, %v2471_v25 }
0x1b11   :  { %2481 = vrot.lane.b32.xlu1 %v2479_v31, %s4188_s2 }
0x1b2c   :  { %v2437_v48 = vpop.permute.xlu0 %2436 }
0x1b2d   :  { %v2439_v44 = vmul.f32 %v2437_v48, %v2431_v62 }
0x1b2f   :  { %2441 = vrot.lane.b32.xlu2 %v2439_v44, %s4188_s2 }
0x1b83   :  { %v2482_v28 = vpop.permute.xlu1 %2481 }
0x1b84   :  { %v5184_v35 = vadd.f32 %v2482_v28, %v2474_v17 }
0x1b86   :  { %3632 = vtanh.f32 %v5184_v35 }
0x1b89   :  { %v2442_v11 = vpop.permute.xlu2 %2441 }
0x1b8a   :  { %v5194_v46 = vadd.f32 %v2442_v11, %v2434_v26 }
0x1b8c   :  { %v3633_v19 = vpop.eup %3632  ;;  %3634 = vtanh.f32 %v5194_v46 }
0x1b8d   :  { %2487 = vrot.lane.b32.xlu0 %v3633_v19, %s4192_s26 }
0x1b92   :  { %v3635_v9 = vpop.eup %3634 }
0x1b93   :  { %2447 = vrot.lane.b32.xlu1 %v3635_v9, %s4192_s26 }
0x1bff   :  { %v2488_v32 = vpop.permute.xlu0 %2487 }
0x1c00   :  { %v5199_v36 = vmul.f32 %v2488_v32, %v2471_v25 }
0x1c02   :  { %v5205_v20 = vsel %vm1113_vm4, %v5199_v36, %v5153_v22 }
0x1c03   :  { %v2529_v15 = vpack.c.bf16 %v5205_v20, %v5205_v20 }
0x1c05   :  { %v2448_v39 = vpop.permute.xlu1 %2447  ;;  %2531 = vrot.lane.b32.xlu2 %v2529_v15, %s4193_s6 }
0x1c06   :  { %v5210_v3 = vmul.f32 %v2448_v39, %v2431_v62 }
0x1c08   :  { %v5216_v51 = vsel %vm1068_vm5, %v5210_v3, %v5164_v63  ;;  %v2506_v63 = vld [vmem:[#allocation6 + $0x10] sm:$0xf] }
0x1c09   :  { %v2507_v16 = vpack.c.bf16 %v5216_v51, %v5216_v51 }
0x1c0b   :  { %2509 = vrot.lane.b32.xlu0 %v2507_v16, %s4193_s6 }
0x1c5f   :  { %v2532_v22 = vpop.permute.xlu2 %2531 }
0x1c60   :  { %3369 = vmatmul.msk.bf16.vlgmr.msrb.gmra.mxu1 %vm383_vm0, %v2532_v22  ;;  %v5231_v22 = vsel %vm1113_vm4, %v5184_v35, %v5181_v18 }
0x1c7d   :  { %v2510_v0 = vpop.permute.xlu0 %2509 }
0x1c7e   :  { %3368 = vmatmul.msk.bf16.vlgmr.msrb.gmra.mxu0 %vm383_vm0, %v2510_v0 }
0x1cdd   :  { %v2545_v53 = vpop.f32.mrf.mxu1 }
0x1cde   :  { %v2549_v43 = vadd.f32 %v2545_v53, %v2528_v41 }
0x1ce0   :  { %3636 = vtanh.f32 %v2549_v43  ;;  %v3371_v5 = vmul.f32 -1.442695, %v2549_v43  ;;  %v5241_v43 = vsel %vm1068_vm5, %v5194_v46, %v5191_v24 }
0x1ce5   :  { %v2547_v45 = vpop.f32.mrf.mxu1 }
0x1ce6   :  { %v3637_v21 = vpop.eup %3636 }
0x1ce7   :  { %2612 = vrot.lane.b32.xlu1 %v3637_v21, %s4189_s7 }
0x1cfb   :  { %v2523_v47 = vpop.f32.mrf.mxu0 }
0x1cfc   :  { %v2527_v58 = vadd.f32 %v2523_v47, %v2506_v63 }
0x1cfe   :  { %3638 = vtanh.f32 %v2527_v58  ;;  %v3370_v49 = vmul.f32 -1.442695, %v2527_v58 }
0x1cff   :  { %3640 = vpow2.f32 %v3371_v5 }
0x1d00   :  { %3642 = vpow2.f32 %v3370_v49 }
0x1d03   :  { %v2525_v2 = vpop.f32.mrf.mxu0 }
0x1d04   :  { %v3639_v37 = vpop.eup %3638 }
0x1d05   :  { %2572 = vrot.lane.b32.xlu2 %v3639_v37, %s4189_s7  ;;  %v3641_v1 = vpop.eup %3640 }
0x1d06   :  { %v2593_v57 = vadd.f32 1.0, %v3641_v1  ;;  %v3643_v59 = vpop.eup %3642 }
0x1d07   :  { %v2553_v54 = vadd.f32 1.0, %v3643_v59 }
0x1d08   :  { %3644 = vrcp.f32 %v2593_v57  ;;  %v2605_v14 = vand.u32 2147483648, %v2593_v57  ;;  %vm2599_vm12 = vweird.f32 %v2593_v57  ;;  %v2603_v30 = vand.u32 2147483647, %v2593_v57 }
0x1d09   :  { %3646 = vrcp.f32 %v2553_v54  ;;  %v2565_v26 = vand.u32 2147483648, %v2553_v54  ;;  %vm2559_vm2 = vweird.f32 %v2553_v54  ;;  %v2563_v19 = vand.u32 2147483647, %v2553_v54 }
0x1d0a   :  { %v2606_v48 = vor.u32 1.1754944e-38, %v2605_v14  ;;  %vm2604_vm8 = vcmp.eq.f32.partialorder %v2603_v30, 8.507059e+37 }
0x1d0b   :  { %v2566_v32 = vor.u32 1.1754944e-38, %v2565_v26  ;;  %vm2564_vm6 = vcmp.eq.f32.partialorder %v2563_v19, 8.507059e+37 }
0x1d0e   :  { %v3645_v25 = vpop.eup %3644 }
0x1d0f   :  { %v2595_v31 = vmul.f32 %v3645_v25, %v2593_v57  ;;  %v3647_v50 = vpop.eup %3646  ;;  %vm2600_vm1 = vweird.f32 %v3645_v25  ;;  %v2664_v57 = vld [vmem:[#allocation7 + $0x8] sm:$0xf] }
0x1d10   :  { %v2555_v42 = vmul.f32 %v3647_v50, %v2553_v54  ;;  %vm2601_vm7 = vmor %vm2599_vm12, %vm2600_vm1  ;;  %vm2560_vm9 = vweird.f32 %v3647_v50 }
0x1d11   :  { %v2596_v23 = vsub.f32 1.0, %v2595_v31  ;;  %vm2561_vm3 = vmor %vm2559_vm2, %vm2560_vm9 }
0x1d12   :  { %v2556_v8 = vsub.f32 1.0, %v2555_v42 }
0x1d13   :  { %v2597_v27 = vmul.f32 %v3645_v25, %v2596_v23 }
0x1d14   :  { %v2557_v56 = vmul.f32 %v3647_v50, %v2556_v8 }
0x1d15   :  { %v2598_v13 = vadd.f32 %v3645_v25, %v2597_v27 }
0x1d16   :  { %v2558_v44 = vadd.f32 %v3647_v50, %v2557_v56 }
0x1d17   :  { %v2602_v62 = vsel %vm2601_vm7, %v3645_v25, %v2598_v13  ;;  %v2642_v25 = vld [vmem:[#allocation6 + $0x14] sm:$0xf] }
0x1d18   :  { %v2607_v28 = vsel %vm2604_vm8, %v2606_v48, %v2602_v62  ;;  %v2562_v9 = vsel %vm2561_vm3, %v3647_v50, %v2558_v44 }
0x1d19   :  { %v2567_v39 = vsel %vm2564_vm6, %v2566_v32, %v2562_v9  ;;  %v2610_v0 = vmul.f32 %v2607_v28, %v5231_v22 }
0x1d1a   :  { %v2570_v45 = vmul.f32 %v2567_v39, %v5241_v43 }
0x1d59   :  { %v2613_v17 = vpop.permute.xlu1 %2612 }
0x1d5a   :  { %v2615_v11 = vmul.f32 %v2613_v17, %v2607_v28 }
0x1d5c   :  { %2617 = vrot.lane.b32.xlu0 %v2615_v11, %s4188_s2 }
0x1d5f   :  { %v2573_v15 = vpop.permute.xlu2 %2572 }
0x1d60   :  { %v2575_v16 = vmul.f32 %v2573_v15, %v2567_v39 }
0x1d62   :  { %2577 = vrot.lane.b32.xlu1 %v2575_v16, %s4188_s2 }
0x1dce   :  { %v2618_v41 = vpop.permute.xlu0 %2617 }
0x1dcf   :  { %v5234_v53 = vadd.f32 %v2618_v41, %v2610_v0 }
0x1dd1   :  { %3648 = vtanh.f32 %v5234_v53 }
0x1dd4   :  { %v2578_v21 = vpop.permute.xlu1 %2577 }
0x1dd5   :  { %v5244_v63 = vadd.f32 %v2578_v21, %v2570_v45 }
0x1dd7   :  { %v3649_v18 = vpop.eup %3648  ;;  %3650 = vtanh.f32 %v5244_v63 }
0x1dd8   :  { %2623 = vrot.lane.b32.xlu2 %v3649_v18, %s4192_s26 }
0x1ddd   :  { %v3651_v35 = vpop.eup %3650 }
0x1dde   :  { %2583 = vrot.lane.b32.xlu0 %v3651_v35, %s4192_s26 }
0x1e32   :  { %v2624_v47 = vpop.permute.xlu2 %2623 }
0x1e33   :  { %v5249_v58 = vmul.f32 %v2624_v47, %v2607_v28 }
0x1e35   :  { %v5255_v24 = vsel %vm1068_vm5, %v5249_v58, %v5205_v20 }
0x1e36   :  { %v2665_v46 = vpack.c.bf16 %v5255_v24, %v5255_v24 }
0x1e38   :  { %2667 = vrot.lane.b32.xlu1 %v2665_v46, %s4193_s6 }
0x1e50   :  { %v2584_v2 = vpop.permute.xlu0 %2583 }
0x1e51   :  { %v5260_v37 = vmul.f32 %v2584_v2, %v2567_v39 }
0x1e53   :  { %v5266_v5 = vsel %vm1113_vm4, %v5260_v37, %v5216_v51 }
0x1e54   :  { %v2643_v49 = vpack.c.bf16 %v5266_v5, %v5266_v5 }
0x1e56   :  { %2645 = vrot.lane.b32.xlu2 %v2643_v49, %s4193_s6 }
0x1eaa   :  { %v2668_v20 = vpop.permute.xlu1 %2667 }
0x1eab   :  { %3373 = vmatmul.msk.bf16.vlgmr.msrb.gmra.mxu3 %vm383_vm0, %v2668_v20 }
0x1eb0   :  { %v2646_v1 = vpop.permute.xlu2 %2645 }
0x1eb1   :  { %3372 = vmatmul.msk.bf16.vlgmr.msrb.gmra.mxu2 %vm383_vm0, %v2646_v1 }
0x1f2e   :  { %v2681_v59 = vpop.f32.mrf.mxu3 }
0x1f2f   :  { %v2685_v54 = vadd.f32 %v2681_v59, %v2664_v57  ;;  %v5281_v57 = vsel %vm1068_vm5, %v5234_v53, %v5231_v22 }
0x1f31   :  { %3652 = vtanh.f32 %v2685_v54  ;;  %v3375_v8 = vmul.f32 -1.442695, %v2685_v54 }
0x1f34   :  { %v2659_v31 = vpop.f32.mrf.mxu2 }
0x1f35   :  { %v2663_v50 = vadd.f32 %v2659_v31, %v2642_v25 }
0x1f36   :  { %v2683_v51 = vpop.f32.mrf.mxu3 }
0x1f37   :  { %v3653_v23 = vpop.eup %3652  ;;  %3654 = vtanh.f32 %v2663_v50  ;;  %v3374_v13 = vmul.f32 -1.442695, %v2663_v50  ;;  %v5292_v50 = vsel %vm1113_vm4, %v5244_v63, %v5241_v43 }
0x1f38   :  { %2748 = vrot.lane.b32.xlu0 %v3653_v23, %s4189_s7  ;;  %3656 = vpow2.f32 %v3375_v8 }
0x1f39   :  { %3658 = vpow2.f32 %v3374_v13 }
0x1f3c   :  { %v2661_v42 = vpop.f32.mrf.mxu2 }
0x1f3d   :  { %v3655_v27 = vpop.eup %3654 }
0x1f3e   :  { %2708 = vrot.lane.b32.xlu1 %v3655_v27, %s4189_s7  ;;  %v3657_v14 = vpop.eup %3656 }
0x1f3f   :  { %v2729_v30 = vadd.f32 1.0, %v3657_v14  ;;  %v3659_v56 = vpop.eup %3658 }
0x1f40   :  { %v2689_v62 = vadd.f32 1.0, %v3659_v56 }
0x1f41   :  { %3660 = vrcp.f32 %v2729_v30  ;;  %v2741_v32 = vand.u32 2147483648, %v2729_v30  ;;  %vm2735_vm12 = vweird.f32 %v2729_v30  ;;  %v2739_v15 = vand.u32 2147483647, %v2729_v30 }
0x1f42   :  { %3662 = vrcp.f32 %v2689_v62  ;;  %v2701_v18 = vand.u32 2147483648, %v2689_v62  ;;  %vm2695_vm2 = vweird.f32 %v2689_v62  ;;  %v2699_v47 = vand.u32 2147483647, %v2689_v62 }
0x1f43   :  { %v2742_v0 = vor.u32 1.1754944e-38, %v2741_v32  ;;  %vm2740_vm8 = vcmp.eq.f32.partialorder %v2739_v15, 8.507059e+37 }
0x1f44   :  { %v2702_v2 = vor.u32 1.1754944e-38, %v2701_v18  ;;  %vm2700_vm6 = vcmp.eq.f32.partialorder %v2699_v47, 8.507059e+37 }
0x1f47   :  { %v3661_v48 = vpop.eup %3660 }
0x1f48   :  { %v2731_v44 = vmul.f32 %v3661_v48, %v2729_v30  ;;  %v3663_v17 = vpop.eup %3662  ;;  %vm2736_vm1 = vweird.f32 %v3661_v48 }
0x1f49   :  { %v2691_v26 = vmul.f32 %v3663_v17, %v2689_v62  ;;  %vm2737_vm7 = vmor %vm2735_vm12, %vm2736_vm1  ;;  %vm2696_vm9 = vweird.f32 %v3663_v17  ;;  %v2800_v62 = vld [vmem:[#allocation7 + $0x4] sm:$0xf] }
0x1f4a   :  { %v2732_v28 = vsub.f32 1.0, %v2731_v44  ;;  %vm2697_vm3 = vmor %vm2695_vm2, %vm2696_vm9 }
0x1f4b   :  { %v2692_v19 = vsub.f32 1.0, %v2691_v26 }
0x1f4c   :  { %v2733_v11 = vmul.f32 %v3661_v48, %v2732_v28 }
0x1f4d   :  { %v2693_v39 = vmul.f32 %v3663_v17, %v2692_v19 }
0x1f4e   :  { %v2734_v9 = vadd.f32 %v3661_v48, %v2733_v11 }
0x1f4f   :  { %v2694_v41 = vadd.f32 %v3663_v17, %v2693_v39 }
0x1f50   :  { %v2738_v16 = vsel %vm2737_vm7, %v3661_v48, %v2734_v9 }
0x1f51   :  { %v2743_v45 = vsel %vm2740_vm8, %v2742_v0, %v2738_v16  ;;  %v2698_v46 = vsel %vm2697_vm3, %v3663_v17, %v2694_v41  ;;  %v2778_v17 = vld [vmem:[#allocation6 + $0x18] sm:$0xf] }
0x1f52   :  { %v2703_v20 = vsel %vm2700_vm6, %v2702_v2, %v2698_v46  ;;  %v2746_v59 = vmul.f32 %v2743_v45, %v5281_v57 }
0x1f53   :  { %v2706_v51 = vmul.f32 %v2703_v20, %v5292_v50 }
0x1faa   :  { %v2749_v21 = vpop.permute.xlu0 %2748 }
0x1fab   :  { %v2751_v35 = vmul.f32 %v2749_v21, %v2743_v45 }
0x1fad   :  { %2753 = vrot.lane.b32.xlu2 %v2751_v35, %s4188_s2 }
0x1fb0   :  { %v2709_v49 = vpop.permute.xlu1 %2708 }
0x1fb1   :  { %v2711_v1 = vmul.f32 %v2709_v49, %v2703_v20 }
0x1fb3   :  { %2713 = vrot.lane.b32.xlu0 %v2711_v1, %s4188_s2 }
0x2007   :  { %v2754_v54 = vpop.permute.xlu2 %2753 }
0x2008   :  { %v5284_v25 = vadd.f32 %v2754_v54, %v2746_v59 }
0x200a   :  { %3664 = vtanh.f32 %v5284_v25 }
0x2010   :  { %v3665_v31 = vpop.eup %3664 }
0x2011   :  { %2759 = vrot.lane.b32.xlu1 %v3665_v31, %s4192_s26 }
0x2025   :  { %v2714_v22 = vpop.permute.xlu0 %2713 }
0x2026   :  { %v5295_v53 = vadd.f32 %v2714_v22, %v2706_v51 }
0x2028   :  { %3666 = vtanh.f32 %v5295_v53 }
0x202e   :  { %v3667_v23 = vpop.eup %3666 }
0x202f   :  { %2719 = vrot.lane.b32.xlu2 %v3667_v23, %s4192_s26 }
0x2083   :  { %v2760_v42 = vpop.permute.xlu1 %2759 }
0x2084   :  { %v5299_v27 = vmul.f32 %v2760_v42, %v2743_v45 }
0x2086   :  { %v5305_v8 = vsel %vm918_vm15, %v5299_v27, %v5255_v24 }
0x2087   :  { %v2801_v43 = vpack.c.bf16 %v5305_v8, %v5305_v8 }
0x2089   :  { %2803 = vrot.lane.b32.xlu0 %v2801_v43, %s4193_s6  ;;  %v2720_v63 = vpop.permute.xlu2 %2719 }
0x208a   :  { %v5310_v13 = vmul.f32 %v2720_v63, %v2703_v20 }
0x208c   :  { %v5316_v14 = vsel %vm963_vm14, %v5310_v13, %v5266_v5 }
0x208d   :  { %v2779_v30 = vpack.c.bf16 %v5316_v14, %v5316_v14 }
0x208f   :  { %2781 = vrot.lane.b32.xlu1 %v2779_v30, %s4193_s6 }
0x20fb   :  { %v2804_v24 = vpop.permute.xlu0 %2803 }
0x20fc   :  { %3377 = vmatmul.msk.bf16.vlgmr.msra.gmra.mxu1 %vm383_vm0, %v2804_v24 }
0x2101   :  { %v2782_v56 = vpop.permute.xlu1 %2781 }
0x2102   :  { %3376 = vmatmul.msk.bf16.vlgmr.msra.gmra.mxu0 %vm383_vm0, %v2782_v56 }
0x2179   :  { %v2817_v48 = vpop.f32.mrf.mxu1 }
0x217a   :  { %v2821_v44 = vadd.f32 %v2817_v48, %v2800_v62 }
0x217c   :  { %3668 = vtanh.f32 %v2821_v44  ;;  %v3379_v32 = vmul.f32 -1.442695, %v2821_v44  ;;  %v5331_v44 = vsel %vm918_vm15, %v5284_v25, %v5281_v57 }
0x217f   :  { %v2795_v28 = vpop.f32.mrf.mxu0 }
0x2180   :  { %v2799_v26 = vadd.f32 %v2795_v28, %v2778_v17 }
0x2181   :  { %v2819_v5 = vpop.f32.mrf.mxu1 }
0x2182   :  { %v3669_v11 = vpop.eup %3668  ;;  %3670 = vtanh.f32 %v2799_v26  ;;  %v3378_v41 = vmul.f32 -1.442695, %v2799_v26  ;;  %v5341_v5 = vsel %vm963_vm14, %v5295_v53, %v5292_v50 }
0x2183   :  { %2884 = vrot.lane.b32.xlu2 %v3669_v11, %s4189_s7  ;;  %3672 = vpow2.f32 %v3379_v32 }
0x2187   :  { %v2797_v19 = vpop.f32.mrf.mxu0 }
0x2188   :  { %v3671_v9 = vpop.eup %3670 }
0x2189   :  { %2844 = vrot.lane.b32.xlu0 %v3671_v9, %s4189_s7  ;;  %v3673_v15 = vpop.eup %3672 }
0x218a   :  { %v2865_v39 = vadd.f32 1.0, %v3673_v15 }
0x218c   :  { %3674 = vrcp.f32 %v2865_v39  ;;  %v2877_v35 = vand.u32 2147483648, %v2865_v39  ;;  %vm2871_vm12 = vweird.f32 %v2865_v39  ;;  %v2875_v46 = vand.u32 2147483647, %v2865_v39 }
0x218d   :  { %3676 = vpow2.f32 %v3378_v41 }
0x218e   :  { %v2878_v20 = vor.u32 1.1754944e-38, %v2877_v35  ;;  %vm2876_vm8 = vcmp.eq.f32.partialorder %v2875_v46, 8.507059e+37 }
0x2192   :  { %v3675_v16 = vpop.eup %3674 }
0x2193   :  { %v2867_v0 = vmul.f32 %v3675_v16, %v2865_v39  ;;  %vm2872_vm1 = vweird.f32 %v3675_v16  ;;  %v3677_v47 = vpop.eup %3676 }
0x2194   :  { %vm2873_vm7 = vmor %vm2871_vm12, %vm2872_vm1  ;;  %v2825_v49 = vadd.f32 1.0, %v3677_v47 }
0x2195   :  { %v2868_v45 = vsub.f32 1.0, %v2867_v0 }
0x2196   :  { %3678 = vrcp.f32 %v2825_v49  ;;  %v2837_v43 = vand.u32 2147483648, %v2825_v49  ;;  %vm2831_vm2 = vweird.f32 %v2825_v49  ;;  %v2835_v63 = vand.u32 2147483647, %v2825_v49 }
0x2197   :  { %v2869_v21 = vmul.f32 %v3675_v16, %v2868_v45 }
0x2198   :  { %v2838_v24 = vor.u32 1.1754944e-38, %v2837_v43  ;;  %vm2836_vm6 = vcmp.eq.f32.partialorder %v2835_v63, 8.507059e+37 }
0x2199   :  { %v2870_v18 = vadd.f32 %v3675_v16, %v2869_v21 }
0x219b   :  { %v2874_v2 = vsel %vm2873_vm7, %v3675_v16, %v2870_v18 }
0x219c   :  { %v2879_v59 = vsel %vm2876_vm8, %v2878_v20, %v2874_v2  ;;  %v3679_v31 = vpop.eup %3678  ;;  %v2914_v2 = vld [vmem:[#allocation6 + $0x1c] sm:$0xf] }
0x219d   :  { %v2827_v51 = vmul.f32 %v3679_v31, %v2825_v49  ;;  %vm2832_vm9 = vweird.f32 %v3679_v31  ;;  %v2882_v17 = vmul.f32 %v2879_v59, %v5331_v44 }
0x219e   :  { %vm2833_vm3 = vmor %vm2831_vm2, %vm2832_vm9 }
0x219f   :  { %v2828_v22 = vsub.f32 1.0, %v2827_v51 }
0x21a1   :  { %v2829_v23 = vmul.f32 %v3679_v31, %v2828_v22 }
0x21a3   :  { %v2830_v42 = vadd.f32 %v3679_v31, %v2829_v23 }
0x21a5   :  { %v2834_v30 = vsel %vm2833_vm3, %v3679_v31, %v2830_v42 }
0x21a6   :  { %v2839_v56 = vsel %vm2836_vm6, %v2838_v24, %v2834_v30 }
0x21a7   :  { %v2842_v11 = vmul.f32 %v2839_v56, %v5341_v5 }
0x21dd   :  { %v2885_v1 = vpop.permute.xlu2 %2884 }
0x21de   :  { %v2887_v54 = vmul.f32 %v2885_v1, %v2879_v59 }
0x21e0   :  { %2889 = vrot.lane.b32.xlu1 %v2887_v54, %s4188_s2 }
0x21fb   :  { %v2845_v62 = vpop.permute.xlu0 %2844 }
0x21fc   :  { %v2847_v48 = vmul.f32 %v2845_v62, %v2839_v56 }
0x21fe   :  { %2849 = vrot.lane.b32.xlu2 %v2847_v48, %s4188_s2 }
0x2252   :  { %v2890_v28 = vpop.permute.xlu1 %2889 }
0x2253   :  { %v5334_v26 = vadd.f32 %v2890_v28, %v2882_v17 }
0x2255   :  { %3680 = vtanh.f32 %v5334_v26 }
0x2258   :  { %v2850_v19 = vpop.permute.xlu2 %2849 }
0x2259   :  { %v5344_v9 = vadd.f32 %v2850_v19, %v2842_v11 }
0x225b   :  { %v3681_v57 = vpop.eup %3680  ;;  %3682 = vtanh.f32 %v5344_v9 }
0x225c   :  { %2895 = vrot.lane.b32.xlu0 %v3681_v57, %s4192_s26 }
0x2261   :  { %v3683_v25 = vpop.eup %3682 }
0x2262   :  { %2855 = vrot.lane.b32.xlu1 %v3683_v25, %s4192_s26 }
0x22ce   :  { %v2896_v32 = vpop.permute.xlu0 %2895 }
0x22cf   :  { %v5349_v15 = vmul.f32 %v2896_v32, %v2879_v59 }
0x22d1   :  { %v2899_v50 = vsel %vm768_vm11, %v5349_v15, %v5305_v8  ;;  %v2936_v8 = vld [vmem:[#allocation7] sm:$0xf] }
0x22d2   :  { %v2937_v53 = vpack.c.bf16 %v2899_v50, %v2899_v50 }
0x22d4   :  { %v2856_v39 = vpop.permute.xlu1 %2855  ;;  %2939 = vrot.lane.b32.xlu2 %v2937_v53, %s4193_s6 }
0x22d5   :  { %v5356_v16 = vmul.f32 %v2856_v39, %v2839_v56 }
0x22d7   :  { %v2859_v0 = vsel %vm813_vm10, %v5356_v16, %v5316_v14 }
0x22d8   :  { %v2915_v41 = vpack.c.bf16 %v2859_v0, %v2859_v0 }
0x22da   :  { %2917 = vrot.lane.b32.xlu0 %v2915_v41, %s4193_s6 }
0x232e   :  { %v2940_v45 = vpop.permute.xlu2 %2939 }
0x232f   :  { %3381 = vmatmul.msk.bf16.vlgmr.msra.gmra.mxu3 %vm383_vm0, %v2940_v45 }
0x234c   :  { %v2918_v21 = vpop.permute.xlu0 %2917 }
0x234d   :  { %3380 = vmatmul.msk.bf16.vlgmr.msra.gmra.mxu2 %vm383_vm0, %v2918_v21 }
0x23b2   :  { %v2953_v18 = vpop.f32.mrf.mxu3 }
0x23b3   :  { %v2957_v35 = vadd.f32 %v2953_v18, %v2936_v8 }
0x23b5   :  { %3684 = vtanh.f32 %v2957_v35  ;;  %v3383_v59 = vmul.f32 -1.442695, %v2957_v35  ;;  %v2038_v35 = vsel %vm606_vm13, %v5055_v60, 0.0 }
0x23ba   :  { %v2955_v47 = vpop.f32.mrf.mxu3 }
0x23bb   :  { %v3685_v46 = vpop.eup %3684  ;;  %v2453_v47 = vsel %vm1068_vm5, %v5210_v3, 0.0  ;;  %v2493_v3 = vsel %vm1113_vm4, %v5199_v36, 0.0 }
0x23bc   :  { %3018 = vrot.lane.b32.xlu1 %v3685_v46, %s4189_s7  ;;  %v2901_v46 = vsel %vm768_vm11, %v5349_v15, 0.0  ;;  %v2900_v15 = vsel %vm768_vm11, %v5334_v26, %v5331_v44  ;;  %v2181_v26 = vsel %vm768_vm11, %v5106_v7, 0.0  ;;  %v2765_v7 = vsel %vm918_vm15, %v5299_v27, 0.0 }
0x23d0   :  { %v2931_v49 = vpop.f32.mrf.mxu2 }
0x23d1   :  { %v2935_v14 = vadd.f32 %v2931_v49, %v2914_v2  ;;  %v2725_v2 = vsel %vm963_vm14, %v5310_v13, 0.0 }
0x23d3   :  { %3686 = vtanh.f32 %v2935_v14  ;;  %v3382_v54 = vmul.f32 -1.442695, %v2935_v14 }
0x23d4   :  { %3688 = vpow2.f32 %v3383_v59 }
0x23d5   :  { %3690 = vpow2.f32 %v3382_v54 }
0x23d8   :  { %v2933_v20 = vpop.f32.mrf.mxu2 }
0x23d9   :  { %v3687_v1 = vpop.eup %3686 }
0x23da   :  { %2980 = vrot.lane.b32.xlu2 %v3687_v1, %s4189_s7  ;;  %v3689_v31 = vpop.eup %3688 }
0x23db   :  { %v2999_v51 = vadd.f32 1.0, %v3689_v31  ;;  %v3691_v22 = vpop.eup %3690  ;;  %v2317_v31 = vsel %vm918_vm15, %v5158_v10, 0.0 }
0x23dc   :  { %v2961_v23 = vadd.f32 1.0, %v3691_v22 }
0x23dd   :  { %3692 = vrcp.f32 %v2999_v51  ;;  %v3011_v17 = vand.u32 2147483648, %v2999_v51  ;;  %vm3005_vm12 = vweird.f32 %v2999_v51  ;;  %v3009_v28 = vand.u32 2147483647, %v2999_v51 }
0x23de   :  { %3694 = vrcp.f32 %v2961_v23  ;;  %v2973_v53 = vand.u32 2147483648, %v2961_v23  ;;  %vm2967_vm2 = vweird.f32 %v2961_v23  ;;  %v2971_v0 = vand.u32 2147483647, %v2961_v23 }
0x23df   :  { %v3012_v57 = vor.u32 1.1754944e-38, %v3011_v17  ;;  %vm3010_vm8 = vcmp.eq.f32.partialorder %v3009_v28, 8.507059e+37 }
0x23e0   :  { %v2974_v45 = vor.u32 1.1754944e-38, %v2973_v53  ;;  %vm2972_vm6 = vcmp.eq.f32.partialorder %v2971_v0, 8.507059e+37  ;;  %v3407_v53 = vld [vmem:[%s5527_s23] sm:$0xff] }
0x23e1   :  { %3150 = vmatpush.bf16.msrb.mxu0 %v3407_v53 }
0x23e3   :  { %v3693_v42 = vpop.eup %3692 }
0x23e4   :  { %v3001_v43 = vmul.f32 %v3693_v42, %v2999_v51  ;;  %v3695_v63 = vpop.eup %3694  ;;  %vm3006_vm1 = vweird.f32 %v3693_v42  ;;  %v2629_v51 = vsel %vm1068_vm5, %v5249_v58, 0.0 }
0x23e5   :  { %v2963_v24 = vmul.f32 %v3695_v63, %v2961_v23  ;;  %vm3007_vm7 = vmor %vm3005_vm12, %vm3006_vm1  ;;  %vm2968_vm9 = vweird.f32 %v3695_v63  ;;  %vm5576_vm1 = vcmp.eq.s32.totalorder %v4498_v34, 1  ;;  %vm5577_vm12 = vcmask 125952  }
0x23e6   :  { %v3002_v30 = vsub.f32 1.0, %v3001_v43  ;;  %vm2969_vm3 = vmor %vm2967_vm2, %vm2968_vm9  ;;  %v2086_v60 = vsel %vm5576_vm1, %v5045_v38, 0.0  ;;  %v2860_v38 = vsel %vm813_vm10, %v5344_v9, %v5341_v5  ;;  %v2589_v23 = vsel %vm1113_vm4, %v5260_v37, 0.0 }
0x23e7   :  { %v2964_v62 = vsub.f32 1.0, %v2963_v24  ;;  %v2861_v37 = vsel %vm813_vm10, %v5356_v16, 0.0  ;;  %v3406_v24 = vld [vmem:[%s5526_s22] sm:$0xff] }
0x23e8   :  { %v3003_v56 = vmul.f32 %v3693_v42, %v3002_v30  ;;  %3181 = vmatpush.bf16.msrb.mxu1 %v3406_v24 }
0x23e9   :  { %v2965_v11 = vmul.f32 %v3695_v63, %v2964_v62 }
0x23ea   :  { %v3004_v48 = vadd.f32 %v3693_v42, %v3003_v56 }
0x23eb   :  { %v2966_v25 = vadd.f32 %v3695_v63, %v2965_v11 }
0x23ec   :  { %v3008_v19 = vsel %vm3007_vm7, %v3693_v42, %v3004_v48  ;;  %vm5578_vm7 = vmmov %vm5577_vm12 }
0x23ed   :  { %v5367_v50 = vsel %vm3010_vm8, %v3012_v57, %v3008_v19  ;;  %v2970_v41 = vsel %vm2969_vm3, %v3695_v63, %v2966_v25  ;;  %vm5579_vm11 = vmmov %vm5578_vm7 }
0x23ee   :  { %v5371_v8 = vsel %vm2972_vm6, %v2974_v45, %v2970_v41  ;;  %v3016_v13 = vmul.f32 %v5367_v50, %v2900_v15  ;;  %vm5580_vm8 = vmmov %vm5578_vm7 }
0x23ef   :  { %v2978_v20 = vmul.f32 %v5371_v8, %v2860_v38  ;;  %vm5581_vm5 = vmmov %vm5578_vm7 }
0x23f0   :  { %vm5582_vm15 = vmmov %vm5581_vm5 }
0x23f1   :  { %vm5583_vm4 = vmmov %vm5581_vm5 }
0x23f2   :  { %vm5584_vm9 = vmmov %vm5583_vm4 }
0x23f3   :  { %vm5586_vm2 = vmmov %vm5583_vm4 }
0x23f4   :  { %vm5587_vm10 = vmmov %vm5586_vm2 }
0x23f5   :  { %vm5588_vm3 = vmmov %vm5586_vm2 }
0x23f6   :  { %vm5589_vm14 = vmmov %vm5586_vm2 }
0x23f7   :  { %vm5590_vm6 = vmmov %vm5586_vm2 }
0x242e   :  { %v3019_v32 = vpop.permute.xlu1 %3018 }
0x242f   :  { %v3021_v39 = vmul.f32 %v3019_v32, %v5367_v50 }
0x2431   :  { %3023 = vrot.lane.b32.xlu0 %v3021_v39, %s4188_s2 }
0x2434   :  { %v2981_v21 = vpop.permute.xlu2 %2980 }
0x2435   :  { %v2983_v18 = vmul.f32 %v2981_v21, %v5371_v8 }
0x2437   :  { %2985 = vrot.lane.b32.xlu1 %v2983_v18, %s4188_s2 }
0x243f   :  { %2088 = vrot.lane.b32.xlu1 %v2038_v35, %s4193_s6 }
0x2447   :  { %2495 = vrot.lane.b32.xlu1 %v2453_v47, %s4193_s6 }
0x244f   :  { %2909 = vrot.lane.b32.xlu1 %v2901_v46, %s4193_s6 }
0x2457   :  { %2767 = vrot.lane.b32.xlu1 %v2725_v2, %s4193_s6 }
0x245f   :  { %2093 = vrot.lane.b32.xlu1 %v2086_v60, %s4193_s6 }
0x2467   :  { %2501 = vrot.lane.b32.xlu1 %v2493_v3, %s4193_s6 }
0x24a3   :  { %v3024_v49 = vpop.permute.xlu0 %3023 }
0x24a4   :  { %v3026_v14 = vadd.f32 %v3024_v49, %v3016_v13 }
0x24a6   :  { %3696 = vtanh.f32 %v3026_v14 }
0x24a9   :  { %v2986_v36 = vpop.permute.xlu1 %2985 }
0x24aa   :  { %v2988_v1 = vadd.f32 %v2986_v36, %v2978_v20 }
0x24ac   :  { %v3697_v59 = vpop.eup %3696  ;;  %3698 = vtanh.f32 %v2988_v1  ;;  %v3443_v1 = vld [vmem:[%s5594_s9] ss:$0 sm:$0xff] }
0x24ad   :  { %3029 = vrot.lane.b32.xlu2 %v3697_v59, %s4192_s26 }
0x24b1   :  { %v2089_v54 = vpop.permute.xlu1 %2088 }
0x24b2   :  { %v3699_v44 = vpop.eup %3698  ;;  %2091 = vst.msk [vmem:[#allocation3] sm:$0xf] %vm5577_vm12, %v2089_v54 }
0x24b3   :  { %2991 = vrot.lane.b32.xlu0 %v3699_v44, %s4192_s26 }
0x24b5   :  { %2223 = vrot.lane.b32.xlu2 %v2181_v26, %s4193_s6 }
0x24b9   :  { %v3045_v5 = vld [vmem:[#allocation3] sm:$0xf]  ;;  %v2496_v9 = vpop.permute.xlu1 %2495 }
0x24ba   :  { %3069 = vst [vmem:[#allocation1] ss:$2 sm:$0xff] %v3045_v5 }
0x24bb   :  { %2499 = vst.msk [vmem:[#allocation3 + $0xc] sm:$0xf] %vm5578_vm7, %v2496_v9  ;;  %2359 = vrot.lane.b32.xlu0 %v2317_v31, %s4193_s6 }
0x24bd   :  { %2637 = vrot.lane.b32.xlu2 %v2629_v51, %s4193_s6 }
0x24c1   :  { %v2910_v55 = vpop.permute.xlu1 %2909 }
0x24c2   :  { %v3048_v22 = vld [vmem:[#allocation3 + $0xc] sm:$0xf]  ;;  %2913 = vst.msk [vmem:[#allocation5 + $0x4] sm:$0xf] %vm5579_vm11, %v2910_v55  ;;  %vm3201_vm11 = vcmask 39936  }
0x24c3   :  { %3075 = vst [vmem:[#allocation1 + $0x11] ss:$2 sm:$0xff] %v3048_v22  ;;  %2773 = vrot.lane.b32.xlu0 %v2765_v7, %s4193_s6 }
0x24c9   :  { %v2768_v10 = vpop.permute.xlu1 %2767  ;;  %v3054_v56 = vld [vmem:[#allocation5 + $0x4] sm:$0xf] }
0x24ca   :  { %2771 = vst.msk [vmem:[#allocation3 + $0x14] sm:$0xf] %vm5580_vm8, %v2768_v10 }
0x24cb   :  { %2631 = vrot.lane.b32.xlu0 %v2589_v23, %s4193_s6 }
0x24d1   :  { %v3050_v29 = vld [vmem:[#allocation3 + $0x14] sm:$0xf]  ;;  %v2094_v58 = vpop.permute.xlu1 %2093 }
0x24d2   :  { %3079 = vst [vmem:[#allocation1 + $0x21] ss:$2 sm:$0xff] %v3050_v29 }
0x24d3   :  { %2097 = vst.msk [vmem:[#allocation5 + $0x1c] sm:$0xf] %vm5581_vm5, %v2094_v58 }
0x24d9   :  { %v2502_v12 = vpop.permute.xlu1 %2501 }
0x24da   :  { %2505 = vst.msk [vmem:[#allocation5 + $0x10] sm:$0xf] %vm5582_vm15, %v2502_v12  ;;  %v3060_v13 = vld [vmem:[#allocation5 + $0x1c] sm:$0xf] }
0x24e1   :  { %v3057_v52 = vld [vmem:[#allocation5 + $0x10] sm:$0xf] }
0x2507   :  { %v3030_v27 = vpop.permute.xlu2 %3029 }
0x2508   :  { %v3032_v42 = vmul.f32 %v3030_v27, %v5367_v50 }
0x250a   :  { %v3033_v43 = vsel %vm606_vm13, %v3032_v42, 0.0  ;;  %vm5585_vm13 = vmmov %vm5576_vm1 }
0x250b   :  { %3041 = vrot.lane.b32.xlu2 %v3033_v43, %s4193_s6  ;;  %vm5591_vm1 = vmmov %vm5586_vm2 }
0x250c   :  { %vm5592_vm12 = vmmov %vm5591_vm1 }
0x250d   :  { %vm5593_vm7 = vmmov %vm5591_vm1 }
0x250f   :  { %v2224_v61 = vpop.permute.xlu2 %2223 }
0x2510   :  { %2227 = vst.msk [vmem:[#allocation3 + $0x4] sm:$0xf] %vm5583_vm4, %v2224_v61 }
0x2513   :  { %2903 = vrot.lane.b32.xlu2 %v2861_v37, %s4193_s6 }
0x2517   :  { %v3046_v63 = vld [vmem:[#allocation3 + $0x4] sm:$0xf]  ;;  %v2638_v30 = vpop.permute.xlu2 %2637 }
0x2518   :  { %3071 = vst [vmem:[#allocation1 + $0x1] ss:$2 sm:$0xff] %v3046_v63 }
0x2519   :  { %2641 = vst.msk [vmem:[#allocation5 + $0xc] sm:$0xf] %vm5584_vm9, %v2638_v30 }
0x251b   :  { %2229 = vrot.lane.b32.xlu2 %v2221_v40, %s4193_s6 }
0x251f   :  { %v3084_v16 = vld.sshfl [vmem:[#allocation1] sm:$0xff pattern:$0x75316420] }
0x2520   :  { %3106 = vst [vmem:[#allocation1 + $0x1] ss:$2 sm:$0xff] %v3054_v56  ;;  %v3056_v32 = vld [vmem:[#allocation5 + $0xc] sm:$0xf] }
0x2525   :  { %v2992_v62 = vpop.permute.xlu0 %2991 }
0x2526   :  { %v2994_v48 = vmul.f32 %v2992_v62, %v5371_v8 }
0x2528   :  { %v2995_v17 = vsel %vm5585_vm13, %v2994_v48, 0.0 }
0x2529   :  { %3035 = vrot.lane.b32.xlu0 %v2995_v17, %s4193_s6 }
0x252d   :  { %v2360_v28 = vpop.permute.xlu0 %2359 }
0x252e   :  { %2363 = vst.msk [vmem:[#allocation3 + $0x8] sm:$0xf] %vm5586_vm2, %v2360_v28 }
0x2531   :  { %2365 = vrot.lane.b32.xlu0 %v2357_v33, %s4193_s6 }
0x2535   :  { %v3047_v4 = vld [vmem:[#allocation3 + $0x8] sm:$0xf]  ;;  %v2774_v11 = vpop.permute.xlu0 %2773 }
0x2536   :  { %3073 = vst [vmem:[#allocation1 + $0x10] ss:$2 sm:$0xff] %v3047_v4 }
0x2537   :  { %2777 = vst.msk [vmem:[#allocation5 + $0x8] sm:$0xf] %vm5587_vm10, %v2774_v11 }
0x253d   :  { %v2632_v19 = vpop.permute.xlu0 %2631  ;;  %v3085_v57 = vld.sshfl [vmem:[#allocation1 + $0x10] sm:$0xff pattern:$0x75316420] }
0x253e   :  { %2635 = vst.msk [vmem:[#allocation3 + $0x10] sm:$0xf] %vm5588_vm3, %v2632_v19  ;;  %v3055_v34 = vld [vmem:[#allocation5 + $0x8] sm:$0xf]  ;;  %v3092_v25 = vpack.c.bf16 %v3085_v57, %v3084_v16 }
0x253f   :  { %3108 = vst [vmem:[#allocation1 + $0x10] ss:$2 sm:$0xff] %v3055_v34 }
0x2540   :  { %3110 = vst [vmem:[#allocation1 + $0x11] ss:$2 sm:$0xff] %v3056_v32  ;;  %3394 = vmatmul.msk.bf16.vlgmr.msrb.gmra.mxu1 %vm383_vm0, %v3092_v25 }
0x2545   :  { %v3049_v6 = vld [vmem:[#allocation3 + $0x10] sm:$0xf] }
0x2546   :  { %3077 = vst [vmem:[#allocation1 + $0x20] ss:$2 sm:$0xff] %v3049_v6 }
0x2547   :  { %v3120_v8 = vld.sshfl [vmem:[#allocation1 + $0x10] sm:$0xff pattern:$0x75316420] }
0x254d   :  { %v3086_v50 = vld.sshfl [vmem:[#allocation1 + $0x20] sm:$0xff pattern:$0x75316420] }
0x254e   :  { %3112 = vst [vmem:[#allocation1 + $0x20] ss:$2 sm:$0xff] %v3057_v52 }
0x2565   :  { %v3042_v39 = vpop.permute.xlu2 %3041 }
0x2566   :  { %3044 = vst.msk [vmem:[#allocation5] sm:$0xf] %vm5589_vm14, %v3042_v39 }
0x256d   :  { %v3053_v0 = vld [vmem:[#allocation5] sm:$0xf]  ;;  %v2904_v41 = vpop.permute.xlu2 %2903 }
0x256e   :  { %3104 = vst [vmem:[#allocation1] ss:$2 sm:$0xff] %v3053_v0 }
0x256f   :  { %2907 = vst.msk [vmem:[#allocation3 + $0x18] sm:$0xf] %vm5590_vm6, %v2904_v41 }
0x2575   :  { %v2230_v45 = vpop.permute.xlu2 %2229  ;;  %v3119_v21 = vld.sshfl [vmem:[#allocation1] sm:$0xff pattern:$0x75316420] }
0x2576   :  { %2233 = vst.msk [vmem:[#allocation5 + $0x18] sm:$0xf] %vm5591_vm1, %v2230_v45  ;;  %v3127_v18 = vpack.c.bf16 %v3120_v8, %v3119_v21  ;;  %v3051_v35 = vld [vmem:[#allocation3 + $0x18] sm:$0xf] }
0x2577   :  { %3081 = vst [vmem:[#allocation1 + $0x30] ss:$2 sm:$0xff] %v3051_v35 }
0x2578   :  { %3388 = vmatmul.msk.bf16.vlgmr.msrb.gmra.mxu0 %vm383_vm0, %v3127_v18 }
0x257d   :  { %v3059_v3 = vld [vmem:[#allocation5 + $0x18] sm:$0xf] }
0x259b   :  { %v3036_v47 = vpop.permute.xlu0 %3035 }
0x259c   :  { %3039 = vst.msk [vmem:[#allocation3 + $0x1c] sm:$0xf] %vm5592_vm12, %v3036_v47 }
0x25a3   :  { %v2366_v46 = vpop.permute.xlu0 %2365  ;;  %v3052_v2 = vld [vmem:[#allocation3 + $0x1c] sm:$0xf] }
0x25a4   :  { %2369 = vst.msk [vmem:[#allocation5 + $0x14] sm:$0xf] %vm5593_vm7, %v2366_v46 }
0x25a5   :  { %3083 = vst [vmem:[#allocation1 + $0x31] ss:$2 sm:$0xff] %v3052_v2 }
0x25ab   :  { %v3058_v60 = vld [vmem:[#allocation5 + $0x14] sm:$0xf] }
0x25ac   :  { %v3087_v15 = vld.sshfl [vmem:[#allocation1 + $0x30] sm:$0xff pattern:$0x75316420]  ;;  %3114 = vst [vmem:[#allocation1 + $0x21] ss:$2 sm:$0xff] %v3058_v60 }
0x25ad   :  { %v3093_v49 = vpack.c.bf16 %v3087_v15, %v3086_v50  ;;  %3116 = vst [vmem:[#allocation1 + $0x30] ss:$2 sm:$0xff] %v3059_v3 }
0x25ae   :  { %3118 = vst [vmem:[#allocation1 + $0x31] ss:$2 sm:$0xff] %v3060_v13 }
0x25af   :  { %3395 = vmatmul.msk.bf16.gmra.mxu1 %vm383_vm0, %v3093_v49 }
0x25b3   :  { %v3121_v14 = vld.sshfl [vmem:[#allocation1 + $0x20] sm:$0xff pattern:$0x75316420] }
0x25b5   :  { %v3122_v38 = vld.sshfl [vmem:[#allocation1 + $0x30] sm:$0xff pattern:$0x75316420] }
0x25b6   :  { %v3128_v20 = vpack.c.bf16 %v3122_v38, %v3121_v14 }
0x25b8   :  { %3389 = vmatmul.msk.bf16.gmra.mxu0 %vm383_vm0, %v3128_v20 }
0x25bd   :  { %v3183_v36 = vpop.f32.mrf.mxu1 }
0x25c5   :  { %v3185_v5 = vpop.f32.mrf.mxu1 }
0x25f5   :  { %v3152_v59 = vpop.f32.mrf.mxu0 }
0x25f6   :  { %v3184_v54 = vadd.f32 %v3183_v36, %v3152_v59 }
0x25f8   :  { %v3197_v44 = vadd.f32 %v3443_v1, %v3184_v54 }
0x25fa   :  { %v3202_v26 = vsel %vm3201_vm11, %v3197_v44, -inf }
0x25fb   :  { %3203 = vmax.xlane.f32.xlu2 %v3202_v26 }
0x25fd   :  { %v3154_v9 = vpop.f32.mrf.mxu0 }
0x25fe   :  { %v3186_v31 = vadd.f32 %v3185_v5, %v3154_v9 }
0x2600   :  { %v3198_v51 = vadd.f32 %v3443_v1, %v3186_v31 }
0x2602   :  { %v3205_v55 = vsel %vm3201_vm11, %v3198_v51, -inf }
0x2603   :  { %3206 = vmax.xlane.f32.xlu0 %v3205_v55 }
0x262c   :  { %v3188_v7 = vpop.f32.mrf.mxu1 }
0x2634   :  { %v3190_v58 = vpop.f32.mrf.mxu1 }
0x2635   :  { %v3157_v22 = vpop.f32.mrf.mxu0 }
0x2636   :  { %v3189_v10 = vadd.f32 %v3188_v7, %v3157_v22 }
0x2638   :  { %v3199_v23 = vadd.f32 %v3443_v1, %v3189_v10 }
0x263a   :  { %v3208_v29 = vsel %vm3201_vm11, %v3199_v23, -inf }
0x263b   :  { %3209 = vmax.xlane.f32.xlu1 %v3208_v29 }
0x263d   :  { %v3159_v12 = vpop.f32.mrf.mxu0 }
0x263e   :  { %v3191_v27 = vadd.f32 %v3190_v58, %v3159_v12 }
0x2640   :  { %v3200_v42 = vadd.f32 %v3443_v1, %v3191_v27 }
0x2642   :  { %v3211_v43 = vsel %vm3201_vm11, %v3200_v42, -inf }
0x2643   :  { %3212 = vmax.xlane.f32.xlu2 %v3211_v43 }
0x266e   :  { %v3204_v61 = vpop.xlane.xlu2 %3203 }
0x266f   :  { %v3214_v37 = vsub.f32 %v3197_v44, %v3204_v61 }
0x2671   :  { %v3218_v63 = vmul.f32 1.442695, %v3214_v37 }
0x2673   :  { %3700 = vpow2.f32 %v3218_v63 }
0x2676   :  { %v3207_v30 = vpop.xlane.xlu0 %3206 }
0x2677   :  { %v3215_v24 = vsub.f32 %v3198_v51, %v3207_v30 }
0x2679   :  { %v3701_v40 = vpop.eup %3700  ;;  %v3220_v56 = vmul.f32 1.442695, %v3215_v24 }
0x267a   :  { %v3226_v16 = vsel %vm3201_vm11, %v3701_v40, 0.0 }
0x267b   :  { %3702 = vpow2.f32 %v3220_v56  ;;  %3227 = vadd.xlane.f32.xlu2 %v3226_v16 }
0x2681   :  { %v3703_v62 = vpop.eup %3702 }
0x2682   :  { %v3229_v48 = vsel %vm3201_vm11, %v3703_v62, 0.0 }
0x2683   :  { %3230 = vadd.xlane.f32.xlu0 %v3229_v48 }
0x26ae   :  { %v3210_v17 = vpop.xlane.xlu1 %3209 }
0x26af   :  { %v3216_v28 = vsub.f32 %v3199_v23, %v3210_v17 }
0x26b1   :  { %v3222_v33 = vmul.f32 1.442695, %v3216_v28 }
0x26b3   :  { %3704 = vpow2.f32 %v3222_v33 }
0x26b6   :  { %v3213_v4 = vpop.xlane.xlu2 %3212 }
0x26b7   :  { %v3217_v11 = vsub.f32 %v3200_v42, %v3213_v4 }
0x26b9   :  { %v3705_v19 = vpop.eup %3704  ;;  %v3224_v57 = vmul.f32 1.442695, %v3217_v11 }
0x26ba   :  { %v3232_v34 = vsel %vm3201_vm11, %v3705_v19, 0.0 }
0x26bb   :  { %3706 = vpow2.f32 %v3224_v57  ;;  %3233 = vadd.xlane.f32.xlu1 %v3232_v34 }
0x26c1   :  { %v3707_v25 = vpop.eup %3706 }
0x26c2   :  { %v3235_v32 = vsel %vm3201_vm11, %v3707_v25, 0.0 }
0x26c3   :  { %3236 = vadd.xlane.f32.xlu2 %v3235_v32 }
0x26ee   :  { %v3228_v6 = vpop.xlane.xlu2 %3227 }
0x26ef   :  { %3708 = vlog2.f32 %v3228_v6 }
0x26f5   :  { %v3709_v52 = vpop.eup %3708 }
0x26f6   :  { %v3239_v50 = vmul.f32 0.6931472, %v3709_v52  ;;  %v3231_v53 = vpop.xlane.xlu0 %3230 }
0x26f7   :  { %3710 = vlog2.f32 %v3231_v53 }
0x26f8   :  { %v3246_v39 = vsub.f32 %v3214_v37, %v3239_v50 }
0x26fa   :  { %3250 = vst.msk [vmem:[%s5595_s10] sm:$0xff] %vm3201_vm11, %v3246_v39 }
0x26fd   :  { %v3711_v0 = vpop.eup %3710 }
0x26fe   :  { %v3241_v41 = vmul.f32 0.6931472, %v3711_v0 }
0x2700   :  { %v3247_v45 = vsub.f32 %v3215_v24, %v3241_v41 }
0x2702   :  { %3251 = vst.msk [vmem:[%s5595_s10 + $0x8] sm:$0xff] %vm3201_vm11, %v3247_v45 }
0x272e   :  { %v3234_v21 = vpop.xlane.xlu1 %3233 }
0x272f   :  { %3712 = vlog2.f32 %v3234_v21 }
0x2735   :  { %v3713_v8 = vpop.eup %3712 }
0x2736   :  { %v3243_v18 = vmul.f32 0.6931472, %v3713_v8  ;;  %v3237_v35 = vpop.xlane.xlu2 %3236 }
0x2737   :  { %3714 = vlog2.f32 %v3237_v35 }
0x2738   :  { %v3248_v47 = vsub.f32 %v3216_v28, %v3243_v18 }
0x273a   :  { %3252 = vst.msk [vmem:[%s5595_s10 + $0x10] sm:$0xff] %vm3201_vm11, %v3248_v47 }
0x273d   :  { %v3715_v46 = vpop.eup %3714 }
0x273e   :  { %v3245_v2 = vmul.f32 0.6931472, %v3715_v46 }
0x2740   :  { %v3249_v60 = vsub.f32 %v3217_v11, %v3245_v2 }
0x2742   :  { %3253 = vst.msk [vmem:[%s5595_s10 + $0x18] sm:$0xff] %vm3201_vm11, %v3249_v60 }
0x2743   :  { %3258 = vsyncpa [#allocation9], 1 }
0x2744   :  { %3259 = vsyncpa [#allocation11], 1 }
0x2745   :  { %3260 = vsyncpa [#allocation14], 1 }
0x2746   :  { %3261 = vsyncpa [#allocation17], 1 }
0x2747   :  { %3262 = vsyncpa [#allocation20], 1 }
0x2748   :  { %3263 = vsyncpa [#allocation23], 1 }
0x2749   :  { %3264 = vsyncpa [#allocation26], 1 }
0x274a   :  { %3265 = vsyncpa [#allocation29], 1 }
0x274b   :  { %3266 = vsyncpa [#allocation32], 1 }
0x274c   :  { %3267 = vsyncpa [#allocation35], 1 }

</bundles_post_ra>
